<compile_context>
chip_gen: v6e
topology: v6e:2x2x1
jax: 0.10.0
libtpu: 0.0.40
codegen_flags: <defaults>
</compile_context>

<pallas_src>
import jax
import jax.numpy as jnp
import numpy as np
from jax.experimental import pallas as pl
from jax.experimental.pallas import tpu as pltpu

INPUT_DIM = 12
SELF_STATE_DIM = 5
MLP1_DIMS = (64, 32)
MLP2_DIMS = (32, 32)
ATT_DIMS = (32, 32, 1)
MLP3_DIMS = (32, 32)
N_ACTIONS = 5

D1 = MLP1_DIMS[1]   # mlp1 feature / global-state width (32)
D2 = MLP2_DIMS[1]   # mlp2 feature width (32)
A1 = ATT_DIMS[0]    # 32
A2 = ATT_DIMS[1]    # 32
D3 = MLP3_DIMS[1]   # 32

# weight-pack slots: each is a zero-padded (64, 128) bf16 slab, (in, out) layout
(W_MLP1A, W_MLP1B, W_FUSED, W_MLP2B, W_ATT2,
 W_MLP3A_SELF, W_MLP3A_W, W_MLP3B, W_VAL) = range(9)
NW = 9
# bias-pack rows: each is a zero-padded (128,) f32 row
(B_MLP1A, B_MLP1B, B_FUSED, B_MLP2B, B_ATT2,
 B_ATT3_W, B_ATT3_B, B_MLP3A, B_MLP3B, B_VAL) = range(10)
NB = 10


def _sarl_kernel(state_ref, self_ref, w_ref, b_ref, out_ref):
    TB, H, D = state_ref.shape
    M = TB * H

    def w(i, din, dout):
        # load one packed weight slab, keep its valid (din, dout) corner (bf16)
        return w_ref[i][:din, :dout]

    def b(i, dout):
        return b_ref[i:i + 1, :dout]                       # (1, dout) f32

    def dot(x, i, din, dout):
        # bf16 operands -> MXU, fp32 accumulation
        return jnp.dot(x.astype(jnp.bfloat16), w(i, din, dout),
                       preferred_element_type=jnp.float32)

    x = state_ref[...].reshape(M, D)                       # (TB*H, 12) f32

    # ---- mlp1 (last_relu=True) ----
    h1 = jnp.maximum(dot(x, W_MLP1A, D, MLP1_DIMS[0]) + b(B_MLP1A, MLP1_DIMS[0]), 0.0)
    m1 = jnp.maximum(dot(h1, W_MLP1B, MLP1_DIMS[0], D1) + b(B_MLP1B, D1), 0.0)   # (M, 32)

    # ---- fused dot: [w2a | wa1_m1 | wa1_gs], one MXU push with N=96 ----
    # cols  0:32 -> mlp2 hidden pre-act (b2a folded into the fused bias)
    # cols 32:64 -> attention pre-act, m1 contribution (ba1 folded in)
    # cols 64:96 -> per-row global-state contribution (mean over H taken below;
    #               mean(m1) @ wa1_gs == mean(m1 @ wa1_gs) by linearity)
    z = dot(m1, W_FUSED, D1, 3 * D1) + b(B_FUSED, 3 * D1)  # (M, 96)
    z3 = z.reshape(TB, H, 3 * D1)

    h2 = jnp.maximum(z[:, :D1], 0.0)                                   # (M, 32)
    gs = jnp.mean(z3[..., 2 * D1:3 * D1], axis=1, keepdims=True)       # (TB, 1, 32)
    a1 = jnp.maximum(z3[..., D1:2 * D1] + gs, 0.0)                     # (TB, H, 32)

    # ---- mlp2 layer 2 (no final relu) ----
    m2 = (dot(h2, W_MLP2B, D1, D2) + b(B_MLP2B, D2)).reshape(TB, H, D2)

    # ---- attention layer 2 ----
    a2 = jnp.maximum(dot(a1.reshape(M, A1), W_ATT2, A1, A2) + b(B_ATT2, A2), 0.0)
    a2 = a2.reshape(TB, H, A2)

    # ---- attention score layer (out width 1): VPU multiply + XLU lane reduce ----
    wa3 = b_ref[B_ATT3_W:B_ATT3_W + 1, :A2]                # (1, 32) f32
    ba3 = b_ref[B_ATT3_B:B_ATT3_B + 1, :1]                 # (1, 1)  f32
    scores = jnp.sum(a2 * wa3, axis=-1, keepdims=True) + ba3           # (TB, H, 1)

    # ---- softmax over humans (axis=1 == one sublane group of 8) ----
    smax = jnp.max(scores, axis=1, keepdims=True)
    e = jnp.exp(scores - smax)
    wts = e * pl.reciprocal(jnp.sum(e, axis=1, keepdims=True), approx=True)

    # ---- weighted feature + joint state (concat replaced by split weights) ----
    weighted = jnp.sum(wts * m2, axis=1)                   # (TB, 32)
    joint = (dot(self_ref[...], W_MLP3A_SELF, SELF_STATE_DIM, MLP3_DIMS[0])
             + dot(weighted, W_MLP3A_W, D2, MLP3_DIMS[0])
             + b(B_MLP3A, MLP3_DIMS[0]))

    # ---- mlp3 (last_relu=True) + value head ----
    h3 = jnp.maximum(joint, 0.0)
    h3 = jnp.maximum(dot(h3, W_MLP3B, MLP3_DIMS[0], D3) + b(B_MLP3B, D3), 0.0)
    out_ref[...] = dot(h3, W_VAL, D3, N_ACTIONS) + b(B_VAL, N_ACTIONS)
    # TODO(synk): pfrl.action_value.DiscreteActionValue wrapper and the
    # `self.attention_weights = weights[0,:,0].cpu().numpy()` host side effect
    # have no Pallas equivalent; the kernel returns the raw Q-values.


def pack_params(params):
    """Pack per-layer weights into one bf16 slab and biases into one f32 slab."""
    wpack = np.zeros((NW, 64, 128), np.float32)
    bpack = np.zeros((NB, 128), np.float32)

    def setw(i, m):
        m = np.asarray(m, np.float32)
        wpack[i, :m.shape[0], :m.shape[1]] = m

    def setb(i, v):
        v = np.asarray(v, np.float32).reshape(-1)
        bpack[i, :v.shape[0]] = v

    setw(W_MLP1A, params["w1a"]); setb(B_MLP1A, params["b1a"])
    setw(W_MLP1B, params["w1b"]); setb(B_MLP1B, params["b1b"])

    wa1 = np.asarray(params["wa1"], np.float32)            # (2*D1, A1)
    setw(W_FUSED, np.concatenate(
        [np.asarray(params["w2a"], np.float32), wa1[:D1], wa1[D1:]], axis=1))
    setb(B_FUSED, np.concatenate(
        [np.asarray(params["b2a"], np.float32).reshape(-1),
         np.asarray(params["ba1"], np.float32).reshape(-1),
         np.zeros((D1,), np.float32)]))

    setw(W_MLP2B, params["w2b"]); setb(B_MLP2B, params["b2b"])
    setw(W_ATT2, params["wa2"]);  setb(B_ATT2, params["ba2"])
    setb(B_ATT3_W, params["wa3"])      # score weights kept f32 (used on the VPU)
    setb(B_ATT3_B, params["ba3"])

    w3a = np.asarray(params["w3a"], np.float32)            # (5 + D2, 32)
    setw(W_MLP3A_SELF, w3a[:SELF_STATE_DIM])
    setw(W_MLP3A_W, w3a[SELF_STATE_DIM:])
    setb(B_MLP3A, params["b3a"])
    setw(W_MLP3B, params["w3b"]); setb(B_MLP3B, params["b3b"])
    setw(W_VAL, params["wv"]);    setb(B_VAL, params["bv"])

    return jnp.asarray(wpack, jnp.bfloat16), jnp.asarray(bpack, jnp.float32)


def sarl_forward(state, params, *, tile_b=64):
    """state: (B, H, INPUT_DIM) float32 -> Q-values (B, N_ACTIONS) float32."""
    B, H, D = state.shape
    assert D == INPUT_DIM
    wpack, bpack = pack_params(params)

    # self_state = state[:, 0, :5] is sliced wrapper-side (pure layout
    # plumbing) so the kernel never needs a middle-axis squeeze.
    self_state = state[:, 0, :SELF_STATE_DIM]

    b_pad = pl.cdiv(B, tile_b) * tile_b
    if b_pad != B:
        state = jnp.pad(state, ((0, b_pad - B), (0, 0), (0, 0)))
        self_state = jnp.pad(self_state, ((0, b_pad - B), (0, 0)))

    out = pl.pallas_call(
        _sarl_kernel,
        out_shape=jax.ShapeDtypeStruct((b_pad, N_ACTIONS), jnp.float32),
        grid_spec=pltpu.PrefetchScalarGridSpec(
            num_scalar_prefetch=0,
            grid=(b_pad // tile_b,),
            in_specs=[
                pl.BlockSpec((tile_b, H, D), lambda b: (b, 0, 0)),
                pl.BlockSpec((tile_b, SELF_STATE_DIM), lambda b: (b, 0)),
                pl.BlockSpec((NW, 64, 128), lambda b: (0, 0, 0)),   # weight pack, resident
                pl.BlockSpec((NB, 128), lambda b: (0, 0)),          # bias pack, resident
            ],
            out_specs=pl.BlockSpec((tile_b, N_ACTIONS), lambda b: (b, 0)),
        ),
        compiler_params=pltpu.CompilerParams(
            dimension_semantics=("parallel",)),
    )(state, self_state, wpack, bpack)
    return out[:B]


def init_params(key):
    """Deterministic synthetic parameters. Weights stored as (in_dim, out_dim)."""
    dims = {
        "w1a": (INPUT_DIM, MLP1_DIMS[0]),
        "w1b": (MLP1_DIMS[0], MLP1_DIMS[1]),
        "w2a": (MLP1_DIMS[1], MLP2_DIMS[0]),
        "w2b": (MLP2_DIMS[0], MLP2_DIMS[1]),
        "wa1": (2 * MLP1_DIMS[1], ATT_DIMS[0]),
        "wa2": (ATT_DIMS[0], ATT_DIMS[1]),
        "wa3": (ATT_DIMS[1], ATT_DIMS[2]),
        "w3a": (MLP2_DIMS[1] + SELF_STATE_DIM, MLP3_DIMS[0]),
        "w3b": (MLP3_DIMS[0], MLP3_DIMS[1]),
        "wv": (MLP3_DIMS[1], N_ACTIONS),
    }
    params = {}
    keys = jax.random.split(key, len(dims))
    for (name, shape), k in zip(dims.items(), keys):
        params[name] = (0.1 * jax.random.normal(k, shape)).astype(jnp.float32)
        params["b" + name[1:]] = jnp.full((shape[1],), 0.01, dtype=jnp.float32)
    return params


def ref_forward(state, params):
    """Pure-JAX fp32 reference following the PyTorch forward exactly."""
    B, H, D = state.shape
    x = state.reshape(-1, D)
    relu = jax.nn.relu

    m1 = relu(relu(x @ params["w1a"] + params["b1a"]) @ params["w1b"] + params["b1b"])
    m2 = relu(m1 @ params["w2a"] + params["b2a"]) @ params["w2b"] + params["b2b"]

    gs = jnp.mean(m1.reshape(B, H, -1), axis=1, keepdims=True)
    gs = jnp.broadcast_to(gs, (B, H, gs.shape[-1])).reshape(-1, gs.shape[-1])
    att_in = jnp.concatenate([m1, gs], axis=1)

    a = relu(att_in @ params["wa1"] + params["ba1"])
    a = relu(a @ params["wa2"] + params["ba2"])
    scores = (a @ params["wa3"] + params["ba3"]).reshape(B, H)

    weights = jax.nn.softmax(scores, axis=1)[:, :, None]
    features = m2.reshape(B, H, -1)
    weighted = jnp.sum(weights * features, axis=1)

    self_state = state[:, 0, :SELF_STATE_DIM]
    joint = jnp.concatenate([self_state, weighted], axis=1)

    h3 = relu(joint @ params["w3a"] + params["b3a"])
    h3 = relu(h3 @ params["w3b"] + params["b3b"])
    return h3 @ params["wv"] + params["bv"]


if __name__ == "__main__":
    key = jax.random.PRNGKey(0)
    pkey, skey = jax.random.split(key)
    params = init_params(pkey)

    # Batch-tiled case: 2 grid steps of TILE_B=64 -> 512 MXU rows per step.
    B, H = 128, 8
    state = jax.random.normal(skey, (B, H, INPUT_DIM), dtype=jnp.float32)
    values = jax.block_until_ready(sarl_forward(state, params, tile_b=64))
    expected = ref_forward(state, params)
    # bf16-at-the-MXU numerics: loose but structure-revealing tolerance vs fp32 ref.
    np.testing.assert_allclose(np.asarray(values), np.asarray(expected),
                               rtol=5e-2, atol=1e-2)

    # Ragged batch exercises the pad-to-tile / slice path.
    state_small = state[:6]
    values_small = jax.block_until_ready(sarl_forward(state_small, params, tile_b=64))
    np.testing.assert_allclose(np.asarray(values_small),
                               np.asarray(ref_forward(state_small, params)),
                               rtol=5e-2, atol=1e-2)

    print("KERNEL_OK")
</pallas_src>

<mosaic_0001>
module attributes {stable_mosaic.version = 11 : i64} {
  func.func @_sarl_kernel(%arg0: i32, %arg1: memref<64x8x12xf32, #tpu.memory_space<vmem>>, %arg2: memref<64x5xf32, #tpu.memory_space<vmem>>, %arg3: memref<9x64x128xbf16, #tpu.memory_space<vmem>>, %arg4: memref<10x128xf32, #tpu.memory_space<vmem>>, %arg5: memref<64x5xf32, #tpu.memory_space<vmem>>) attributes {dimension_semantics = [#tpu.dimension_semantics<parallel>], iteration_bounds = array<i64: 2>, scalar_prefetch = 0 : i64, scratch_operands = 0 : i64, tpu.core_type = #tpu.core_type<tc>, window_params = [{transform_indices = @transform_0, window_bounds = array<i64: 64, 8, 12>}, {transform_indices = @transform_1, window_bounds = array<i64: 64, 5>}, {pipeline_mode = #tpu.pipeline_mode<synchronous>, transform_indices = @transform_2, window_bounds = array<i64: 9, 64, 128>}, {pipeline_mode = #tpu.pipeline_mode<synchronous>, transform_indices = @transform_3, window_bounds = array<i64: 10, 128>}, {transform_indices = @transform_4, window_bounds = array<i64: 64, 5>}]} {
    %c0 = arith.constant 0 : index
    %c0_0 = arith.constant 0 : index
    %c0_1 = arith.constant 0 : index
    %0 = vector.load %arg1[%c0, %c0_0, %c0_1] : memref<64x8x12xf32, #tpu.memory_space<vmem>>, vector<64x8x12xf32>
    %1 = vector.shape_cast %0 : vector<64x8x12xf32> to vector<512x12xf32>
    %2 = arith.truncf %1 : vector<512x12xf32> to vector<512x12xbf16>
    %c0_2 = arith.constant 0 : index
    %c0_3 = arith.constant 0 : index
    %c0_4 = arith.constant 0 : index
    %3 = vector.load %arg3[%c0_2, %c0_3, %c0_4] : memref<9x64x128xbf16, #tpu.memory_space<vmem>>, vector<1x64x128xbf16>
    %4 = vector.shape_cast %3 : vector<1x64x128xbf16> to vector<64x128xbf16>
    %5 = vector.extract_strided_slice %4 {offsets = [0, 0], sizes = [12, 64], strides = [1, 1]} : vector<64x128xbf16> to vector<12x64xbf16>
    %cst = arith.constant dense<0.000000e+00> : vector<512x64xf32>
    %6 = tpu.matmul %2, %5, %cst {dimension_numbers = #tpu.dot_dimension_numbers<[1], [0], [0], [1], [0, 0, 1, 1], [], []>} : vector<512x12xbf16>, vector<12x64xbf16>, vector<512x64xf32> -> vector<512x64xf32>
    %c0_5 = arith.constant 0 : index
    %c0_6 = arith.constant 0 : index
    %7 = vector.load %arg4[%c0_5, %c0_6] : memref<10x128xf32, #tpu.memory_space<vmem>>, vector<1x64xf32>
    %8 = vector.broadcast %7 : vector<1x64xf32> to vector<512x64xf32>
    %9 = arith.addf %6, %8 : vector<512x64xf32>
    %cst_7 = arith.constant 0.000000e+00 : f32
    %10 = vector.broadcast %cst_7 : f32 to vector<512x64xf32>
    %11 = arith.maximumf %9, %10 : vector<512x64xf32>
    %12 = arith.truncf %11 : vector<512x64xf32> to vector<512x64xbf16>
    %c1 = arith.constant 1 : index
    %c0_8 = arith.constant 0 : index
    %c0_9 = arith.constant 0 : index
    %13 = vector.load %arg3[%c1, %c0_8, %c0_9] : memref<9x64x128xbf16, #tpu.memory_space<vmem>>, vector<1x64x128xbf16>
    %14 = vector.shape_cast %13 : vector<1x64x128xbf16> to vector<64x128xbf16>
    %15 = vector.extract_strided_slice %14 {offsets = [0, 0], sizes = [64, 32], strides = [1, 1]} : vector<64x128xbf16> to vector<64x32xbf16>
    %cst_10 = arith.constant dense<0.000000e+00> : vector<512x32xf32>
    %16 = tpu.matmul %12, %15, %cst_10 {dimension_numbers = #tpu.dot_dimension_numbers<[1], [0], [0], [1], [0, 0, 1, 1], [], []>} : vector<512x64xbf16>, vector<64x32xbf16>, vector<512x32xf32> -> vector<512x32xf32>
    %c1_11 = arith.constant 1 : index
    %c0_12 = arith.constant 0 : index
    %17 = vector.load %arg4[%c1_11, %c0_12] : memref<10x128xf32, #tpu.memory_space<vmem>>, vector<1x32xf32>
    %18 = vector.broadcast %17 : vector<1x32xf32> to vector<512x32xf32>
    %19 = arith.addf %16, %18 : vector<512x32xf32>
    %cst_13 = arith.constant 0.000000e+00 : f32
    %20 = vector.broadcast %cst_13 : f32 to vector<512x32xf32>
    %21 = arith.maximumf %19, %20 : vector<512x32xf32>
    %22 = arith.truncf %21 : vector<512x32xf32> to vector<512x32xbf16>
    %c2 = arith.constant 2 : index
    %c0_14 = arith.constant 0 : index
    %c0_15 = arith.constant 0 : index
    %23 = vector.load %arg3[%c2, %c0_14, %c0_15] : memref<9x64x128xbf16, #tpu.memory_space<vmem>>, vector<1x64x128xbf16>
    %24 = vector.shape_cast %23 : vector<1x64x128xbf16> to vector<64x128xbf16>
    %25 = vector.extract_strided_slice %24 {offsets = [0, 0], sizes = [32, 96], strides = [1, 1]} : vector<64x128xbf16> to vector<32x96xbf16>
    %cst_16 = arith.constant dense<0.000000e+00> : vector<512x96xf32>
    %26 = tpu.matmul %22, %25, %cst_16 {dimension_numbers = #tpu.dot_dimension_numbers<[1], [0], [0], [1], [0, 0, 1, 1], [], []>} : vector<512x32xbf16>, vector<32x96xbf16>, vector<512x96xf32> -> vector<512x96xf32>
    %c2_17 = arith.constant 2 : index
    %c0_18 = arith.constant 0 : index
    %27 = vector.load %arg4[%c2_17, %c0_18] : memref<10x128xf32, #tpu.memory_space<vmem>>, vector<1x96xf32>
    %28 = vector.broadcast %27 : vector<1x96xf32> to vector<512x96xf32>
    %29 = arith.addf %26, %28 : vector<512x96xf32>
    %30 = vector.shape_cast %29 : vector<512x96xf32> to vector<64x8x96xf32>
    %31 = vector.extract_strided_slice %29 {offsets = [0, 0], sizes = [512, 32], strides = [1, 1]} : vector<512x96xf32> to vector<512x32xf32>
    %cst_19 = arith.constant 0.000000e+00 : f32
    %32 = vector.broadcast %cst_19 : f32 to vector<512x32xf32>
    %33 = arith.maximumf %31, %32 : vector<512x32xf32>
    %34 = vector.extract_strided_slice %30 {offsets = [0, 0, 64], sizes = [64, 8, 32], strides = [1, 1, 1]} : vector<64x8x96xf32> to vector<64x8x32xf32>
    %cst_20 = arith.constant dense<0.000000e+00> : vector<64x32xf32>
    %35 = vector.multi_reduction <add>, %34, %cst_20 [1] : vector<64x8x32xf32> to vector<64x32xf32>
    %36 = vector.shape_cast %35 : vector<64x32xf32> to vector<64x1x32xf32>
    %cst_21 = arith.constant 8.000000e+00 : f32
    %37 = vector.broadcast %cst_21 : f32 to vector<64x1x32xf32>
    %38 = arith.divf %36, %37 : vector<64x1x32xf32>
    %39 = vector.extract_strided_slice %30 {offsets = [0, 0, 32], sizes = [64, 8, 32], strides = [1, 1, 1]} : vector<64x8x96xf32> to vector<64x8x32xf32>
    %40 = vector.broadcast %38 : vector<64x1x32xf32> to vector<64x8x32xf32>
    %41 = arith.addf %39, %40 : vector<64x8x32xf32>
    %cst_22 = arith.constant 0.000000e+00 : f32
    %42 = vector.broadcast %cst_22 : f32 to vector<64x8x32xf32>
    %43 = arith.maximumf %41, %42 : vector<64x8x32xf32>
    %44 = arith.truncf %33 : vector<512x32xf32> to vector<512x32xbf16>
    %c3 = arith.constant 3 : index
    %c0_23 = arith.constant 0 : index
    %c0_24 = arith.constant 0 : index
    %45 = vector.load %arg3[%c3, %c0_23, %c0_24] : memref<9x64x128xbf16, #tpu.memory_space<vmem>>, vector<1x64x128xbf16>
    %46 = vector.shape_cast %45 : vector<1x64x128xbf16> to vector<64x128xbf16>
    %47 = vector.extract_strided_slice %46 {offsets = [0, 0], sizes = [32, 32], strides = [1, 1]} : vector<64x128xbf16> to vector<32x32xbf16>
    %cst_25 = arith.constant dense<0.000000e+00> : vector<512x32xf32>
    %48 = tpu.matmul %44, %47, %cst_25 {dimension_numbers = #tpu.dot_dimension_numbers<[1], [0], [0], [1], [0, 0, 1, 1], [], []>} : vector<512x32xbf16>, vector<32x32xbf16>, vector<512x32xf32> -> vector<512x32xf32>
    %c3_26 = arith.constant 3 : index
    %c0_27 = arith.constant 0 : index
    %49 = vector.load %arg4[%c3_26, %c0_27] : memref<10x128xf32, #tpu.memory_space<vmem>>, vector<1x32xf32>
    %50 = vector.broadcast %49 : vector<1x32xf32> to vector<512x32xf32>
    %51 = arith.addf %48, %50 : vector<512x32xf32>
    %52 = vector.shape_cast %51 : vector<512x32xf32> to vector<64x8x32xf32>
    %53 = vector.shape_cast %43 : vector<64x8x32xf32> to vector<512x32xf32>
    %54 = arith.truncf %53 : vector<512x32xf32> to vector<512x32xbf16>
    %c4 = arith.constant 4 : index
    %c0_28 = arith.constant 0 : index
    %c0_29 = arith.constant 0 : index
    %55 = vector.load %arg3[%c4, %c0_28, %c0_29] : memref<9x64x128xbf16, #tpu.memory_space<vmem>>, vector<1x64x128xbf16>
    %56 = vector.shape_cast %55 : vector<1x64x128xbf16> to vector<64x128xbf16>
    %57 = vector.extract_strided_slice %56 {offsets = [0, 0], sizes = [32, 32], strides = [1, 1]} : vector<64x128xbf16> to vector<32x32xbf16>
    %cst_30 = arith.constant dense<0.000000e+00> : vector<512x32xf32>
    %58 = tpu.matmul %54, %57, %cst_30 {dimension_numbers = #tpu.dot_dimension_numbers<[1], [0], [0], [1], [0, 0, 1, 1], [], []>} : vector<512x32xbf16>, vector<32x32xbf16>, vector<512x32xf32> -> vector<512x32xf32>
    %c4_31 = arith.constant 4 : index
    %c0_32 = arith.constant 0 : index
    %59 = vector.load %arg4[%c4_31, %c0_32] : memref<10x128xf32, #tpu.memory_space<vmem>>, vector<1x32xf32>
    %60 = vector.broadcast %59 : vector<1x32xf32> to vector<512x32xf32>
    %61 = arith.addf %58, %60 : vector<512x32xf32>
    %cst_33 = arith.constant 0.000000e+00 : f32
    %62 = vector.broadcast %cst_33 : f32 to vector<512x32xf32>
    %63 = arith.maximumf %61, %62 : vector<512x32xf32>
    %64 = vector.shape_cast %63 : vector<512x32xf32> to vector<64x8x32xf32>
    %c5 = arith.constant 5 : index
    %c0_34 = arith.constant 0 : index
    %65 = vector.load %arg4[%c5, %c0_34] : memref<10x128xf32, #tpu.memory_space<vmem>>, vector<1x32xf32>
    %c6 = arith.constant 6 : index
    %c0_35 = arith.constant 0 : index
    %66 = vector.load %arg4[%c6, %c0_35] : memref<10x128xf32, #tpu.memory_space<vmem>>, vector<1x1xf32>
    %67 = vector.shape_cast %65 : vector<1x32xf32> to vector<1x1x32xf32>
    %68 = vector.broadcast %67 : vector<1x1x32xf32> to vector<64x8x32xf32>
    %69 = arith.mulf %64, %68 : vector<64x8x32xf32>
    %cst_36 = arith.constant dense<0.000000e+00> : vector<64x8xf32>
    %70 = vector.multi_reduction <add>, %69, %cst_36 [2] : vector<64x8x32xf32> to vector<64x8xf32>
    %71 = vector.shape_cast %70 : vector<64x8xf32> to vector<64x8x1xf32>
    %72 = vector.shape_cast %66 : vector<1x1xf32> to vector<1x1x1xf32>
    %73 = vector.broadcast %72 : vector<1x1x1xf32> to vector<64x8x1xf32>
    %74 = arith.addf %71, %73 : vector<64x8x1xf32>
    %cst_37 = arith.constant dense<0xFF800000> : vector<64x1xf32>
    %75 = vector.multi_reduction <maximumf>, %74, %cst_37 [1] : vector<64x8x1xf32> to vector<64x1xf32>
    %76 = vector.shape_cast %75 : vector<64x1xf32> to vector<64x1x1xf32>
    %77 = vector.broadcast %76 : vector<64x1x1xf32> to vector<64x8x1xf32>
    %78 = arith.subf %74, %77 : vector<64x8x1xf32>
    %79 = math.exp %78 : vector<64x8x1xf32>
    %cst_38 = arith.constant dense<0.000000e+00> : vector<64x1xf32>
    %80 = vector.multi_reduction <add>, %79, %cst_38 [1] : vector<64x8x1xf32> to vector<64x1xf32>
    %81 = vector.shape_cast %80 : vector<64x1xf32> to vector<64x1x1xf32>
    %82 = tpu.reciprocal %81 {approx = true} : vector<64x1x1xf32> -> vector<64x1x1xf32>
    %83 = vector.broadcast %82 : vector<64x1x1xf32> to vector<64x8x1xf32>
    %84 = arith.mulf %79, %83 : vector<64x8x1xf32>
    %85 = vector.broadcast %84 : vector<64x8x1xf32> to vector<64x8x32xf32>
    %86 = arith.mulf %85, %52 : vector<64x8x32xf32>
    %cst_39 = arith.constant dense<0.000000e+00> : vector<64x32xf32>
    %87 = vector.multi_reduction <add>, %86, %cst_39 [1] : vector<64x8x32xf32> to vector<64x32xf32>
    %c0_40 = arith.constant 0 : index
    %c0_41 = arith.constant 0 : index
    %88 = vector.load %arg2[%c0_40, %c0_41] : memref<64x5xf32, #tpu.memory_space<vmem>>, vector<64x5xf32>
    %89 = arith.truncf %88 : vector<64x5xf32> to vector<64x5xbf16>
    %c5_42 = arith.constant 5 : index
    %c0_43 = arith.constant 0 : index
    %c0_44 = arith.constant 0 : index
    %90 = vector.load %arg3[%c5_42, %c0_43, %c0_44] : memref<9x64x128xbf16, #tpu.memory_space<vmem>>, vector<1x64x128xbf16>
    %91 = vector.shape_cast %90 : vector<1x64x128xbf16> to vector<64x128xbf16>
    %92 = vector.extract_strided_slice %91 {offsets = [0, 0], sizes = [5, 32], strides = [1, 1]} : vector<64x128xbf16> to vector<5x32xbf16>
    %cst_45 = arith.constant dense<0.000000e+00> : vector<64x32xf32>
    %93 = tpu.matmul %89, %92, %cst_45 {dimension_numbers = #tpu.dot_dimension_numbers<[1], [0], [0], [1], [0, 0, 1, 1], [], []>} : vector<64x5xbf16>, vector<5x32xbf16>, vector<64x32xf32> -> vector<64x32xf32>
    %94 = arith.truncf %87 : vector<64x32xf32> to vector<64x32xbf16>
    %c6_46 = arith.constant 6 : index
    %c0_47 = arith.constant 0 : index
    %c0_48 = arith.constant 0 : index
    %95 = vector.load %arg3[%c6_46, %c0_47, %c0_48] : memref<9x64x128xbf16, #tpu.memory_space<vmem>>, vector<1x64x128xbf16>
    %96 = vector.shape_cast %95 : vector<1x64x128xbf16> to vector<64x128xbf16>
    %97 = vector.extract_strided_slice %96 {offsets = [0, 0], sizes = [32, 32], strides = [1, 1]} : vector<64x128xbf16> to vector<32x32xbf16>
    %cst_49 = arith.constant dense<0.000000e+00> : vector<64x32xf32>
    %98 = tpu.matmul %94, %97, %cst_49 {dimension_numbers = #tpu.dot_dimension_numbers<[1], [0], [0], [1], [0, 0, 1, 1], [], []>} : vector<64x32xbf16>, vector<32x32xbf16>, vector<64x32xf32> -> vector<64x32xf32>
    %99 = arith.addf %93, %98 : vector<64x32xf32>
    %c7 = arith.constant 7 : index
    %c0_50 = arith.constant 0 : index
    %100 = vector.load %arg4[%c7, %c0_50] : memref<10x128xf32, #tpu.memory_space<vmem>>, vector<1x32xf32>
    %101 = vector.broadcast %100 : vector<1x32xf32> to vector<64x32xf32>
    %102 = arith.addf %99, %101 : vector<64x32xf32>
    %cst_51 = arith.constant 0.000000e+00 : f32
    %103 = vector.broadcast %cst_51 : f32 to vector<64x32xf32>
    %104 = arith.maximumf %102, %103 : vector<64x32xf32>
    %105 = arith.truncf %104 : vector<64x32xf32> to vector<64x32xbf16>
    %c7_52 = arith.constant 7 : index
    %c0_53 = arith.constant 0 : index
    %c0_54 = arith.constant 0 : index
    %106 = vector.load %arg3[%c7_52, %c0_53, %c0_54] : memref<9x64x128xbf16, #tpu.memory_space<vmem>>, vector<1x64x128xbf16>
    %107 = vector.shape_cast %106 : vector<1x64x128xbf16> to vector<64x128xbf16>
    %108 = vector.extract_strided_slice %107 {offsets = [0, 0], sizes = [32, 32], strides = [1, 1]} : vector<64x128xbf16> to vector<32x32xbf16>
    %cst_55 = arith.constant dense<0.000000e+00> : vector<64x32xf32>
    %109 = tpu.matmul %105, %108, %cst_55 {dimension_numbers = #tpu.dot_dimension_numbers<[1], [0], [0], [1], [0, 0, 1, 1], [], []>} : vector<64x32xbf16>, vector<32x32xbf16>, vector<64x32xf32> -> vector<64x32xf32>
    %c8 = arith.constant 8 : index
    %c0_56 = arith.constant 0 : index
    %110 = vector.load %arg4[%c8, %c0_56] : memref<10x128xf32, #tpu.memory_space<vmem>>, vector<1x32xf32>
    %111 = vector.broadcast %110 : vector<1x32xf32> to vector<64x32xf32>
    %112 = arith.addf %109, %111 : vector<64x32xf32>
    %cst_57 = arith.constant 0.000000e+00 : f32
    %113 = vector.broadcast %cst_57 : f32 to vector<64x32xf32>
    %114 = arith.maximumf %112, %113 : vector<64x32xf32>
    %115 = arith.truncf %114 : vector<64x32xf32> to vector<64x32xbf16>
    %c8_58 = arith.constant 8 : index
    %c0_59 = arith.constant 0 : index
    %c0_60 = arith.constant 0 : index
    %116 = vector.load %arg3[%c8_58, %c0_59, %c0_60] : memref<9x64x128xbf16, #tpu.memory_space<vmem>>, vector<1x64x128xbf16>
    %117 = vector.shape_cast %116 : vector<1x64x128xbf16> to vector<64x128xbf16>
    %118 = vector.extract_strided_slice %117 {offsets = [0, 0], sizes = [32, 5], strides = [1, 1]} : vector<64x128xbf16> to vector<32x5xbf16>
    %cst_61 = arith.constant dense<0.000000e+00> : vector<64x5xf32>
    %119 = tpu.matmul %115, %118, %cst_61 {dimension_numbers = #tpu.dot_dimension_numbers<[1], [0], [0], [1], [0, 0, 1, 1], [], []>} : vector<64x32xbf16>, vector<32x5xbf16>, vector<64x5xf32> -> vector<64x5xf32>
    %c9 = arith.constant 9 : index
    %c0_62 = arith.constant 0 : index
    %120 = vector.load %arg4[%c9, %c0_62] : memref<10x128xf32, #tpu.memory_space<vmem>>, vector<1x5xf32>
    %121 = vector.broadcast %120 : vector<1x5xf32> to vector<64x5xf32>
    %122 = arith.addf %119, %121 : vector<64x5xf32>
    %c0_63 = arith.constant 0 : index
    %c0_64 = arith.constant 0 : index
    %123 = vector.load %arg5[%c0_63, %c0_64] : memref<64x5xf32, #tpu.memory_space<vmem>>, vector<64x5xf32>
    tpu.vector_store %arg5[%c0_63, %c0_64], %122 {strides = array<i32>} : memref<64x5xf32, #tpu.memory_space<vmem>>, vector<64x5xf32>,
    return
  }
  func.func @transform_0(%arg0: i32) -> (i32, i32, i32) {
    %c0_i32 = arith.constant 0 : i32
    %c0_i32_0 = arith.constant 0 : i32
    %c0_i32_1 = arith.constant 0 : i32
    return %arg0, %c0_i32, %c0_i32_0 : i32, i32, i32
  }
  func.func @transform_1(%arg0: i32) -> (i32, i32) {
    %c0_i32 = arith.constant 0 : i32
    %c0_i32_0 = arith.constant 0 : i32
    return %arg0, %c0_i32 : i32, i32
  }
  func.func @transform_2(%arg0: i32) -> (i32, i32, i32) {
    %c0_i32 = arith.constant 0 : i32
    %c0_i32_0 = arith.constant 0 : i32
    %c0_i32_1 = arith.constant 0 : i32
    %c0_i32_2 = arith.constant 0 : i32
    return %c0_i32, %c0_i32_0, %c0_i32_1 : i32, i32, i32
  }
  func.func @transform_3(%arg0: i32) -> (i32, i32) {
    %c0_i32 = arith.constant 0 : i32
    %c0_i32_0 = arith.constant 0 : i32
    %c0_i32_1 = arith.constant 0 : i32
    return %c0_i32, %c0_i32_0 : i32, i32
  }
  func.func @transform_4(%arg0: i32) -> (i32, i32) {
    %c0_i32 = arith.constant 0 : i32
    %c0_i32_0 = arith.constant 0 : i32
    return %arg0, %c0_i32 : i32, i32
  }
}

</mosaic_0001>

<bundles_post_ra>
// kernel: tpu_custom_call.1
= control target key start
LH: loop header
LB: loop body
LE: loop exit
PB: predicated region body
PF: predicated region fallthrough
CT: control target
= control target key end

     0   :  { %s8052_s15 = smov 0   ;;  %s11339_s0 = inlined_call_operand.vmem [shape: f32[128,8,12], index: 0, kind: input, shape index: {}]   ;;  %s11340_s1 = inlined_call_operand.vmem [shape: f32[128,5], index: 1, kind: input, shape index: {}]   ;;  %s11341_s2 = inlined_call_operand.vmem [shape: bf16[9,64,128], index: 2, kind: input, shape index: {}]   ;;  %s11342_s3 = inlined_call_operand.vmem [shape: f32[10,128], index: 3, kind: input, shape index: {}]   ;;  %s11343_s4 = inlined_call_operand.vmem [shape: f32[128,5], index: 4, kind: output, shape index: {}]  }
   0x1 LB: > { %s6888_s16 = sadd.s32 4294967295, %s8022_s15   ;;  %p6892_p0 = scmp.ge.s32.totalorder %s8022_s15, 1  ;;  %s8022_s15 = sphi %s8052_s15, %s14_s15  }
   0x2   : > { %p174_p1 = scmp.lt.s32.totalorder %s8022_s15, 3 }
   0x4   : > { %p175_p2 = pnand %p6892_p0, %p174_p1 }
   0x6   : > { %178 = sbr.rel (%p175_p2) target bundleno = 2447 (0x98f), region = 36 }
   0xb   : > { %v7736_v0 = vld [vmem:[%s11341_s2] sm:$0xff]   ;;  %vm429_vm0 = vcmask 1045504   ;;  %s6893_s19 = sshll.u32 %s6888_s16, 6  ;;  %v7737_v2 = vld [vmem:[%s11341_s2 + $0x38] sm:$0xff]   ;;  %vm332_vm1 = vcmask 97280   ;;  %v7738_v35 = vld [vmem:[%s11341_s2 + $0x30] sm:$0xff]  }
   0xc   : > { %7721 = vmatprep.subr.msk.bf16.mxu0 %vm429_vm0, %v7736_v0  ;;  %v431_v1 = vsel %vm429_vm0, %v7736_v0, 0  ;;  %p206_p3 = scmp.lt.s32.totalorder %s6893_s19, 127  ;;  %7722 = vmatprep.subr.msk.bf16.mxu1 %vm429_vm0, %v7736_v0  ;;  %v7739_v42 = vld [vmem:[%s11341_s2 + $0x28] sm:$0xff]   ;;  %vm856_vm2 = vcmask 523264   ;;  %vm1360_vm3 = vcmask 261120   ;;  %vm1810_vm4 = vcmask 785920  }
   0xd   : > { %7332 = vmatpush3.bf16.msra.mxu0 %v431_v1  ;;  %7720 = vmatpush3.bf16.msra.mxu1 %v431_v1  ;;  %vm4076_vm5 = vcmask 7168   ;;  %vm6336_vm6 = vcmask 1041409   ;;  %vm6338_vm7 = vcmask 1042434   ;;  %vm6340_vm8 = vcmask 1043459   ;;  %s11249_s5 = sshll.u32 %s6888_s16, 3 }
   0xe   : > { %s11649_s19 = smov (!%p206_p3, %s6893_s19), 127  ;;  %7397 = vmatprep.subr.bf16.mxu1 %v7737_v2  ;;  %vm6342_vm9 = vcmask 1044484   ;;  %vm6344_vm10 = vcmask 1045509   ;;  %vm6346_vm11 = vcmask 1046534   ;;  %vm6348_vm12 = vcmask 1047559   ;;  %p212_p4 = scmp.lt.s32.totalorder %s11249_s5, 15 }
   0xf   : > { %s6894_s22 = sshll.u32 %s11649_s19, 3  ;;  %vm6505_vm13 = vcmask 1041408   ;;  %vm6506_vm14 = vcmask 1042432   ;;  %vm6492_vm15 = vcmask 39936  }
  0x10   : > { %s8071_s25 = scalar_lea.vmem %s11339_s0, %s6894_s22  ;;  %s8024_s22 = smov 96  }
  0x11   : > { %v224_v3 = vld [vmem:[%s8071_s25] sm:$0xff]  ;;  %v225_v4 = vld [vmem:[%s8071_s25 + $0x8] sm:$0xff]  ;;  %v226_v5 = vld [vmem:[%s8071_s25 + $0x10] sm:$0xff]  ;;  %s11651_s5 = smov (!%p212_p4, %s11249_s5), 15 }
  0x12   : > { %v288_v6 = vpack.c.bf16 %v225_v4, %v224_v3  ;;  %v227_v7 = vld [vmem:[%s8071_s25 + $0x18] sm:$0xff]  ;;  %v228_v8 = vld [vmem:[%s8071_s25 + $0x20] sm:$0xff]  ;;  %v229_v9 = vld [vmem:[%s8071_s25 + $0x28] sm:$0xff]  ;;  %s6896_s16 = sshll.u32 %s11651_s5, 3 }
  0x13   : > { %v289_v10 = vpack.c.bf16 %v227_v7, %v226_v5  ;;  %v290_v11 = vpack.c.bf16 %v229_v9, %v228_v8  ;;  %v230_v12 = vld [vmem:[%s8071_s25 + $0x30] sm:$0xff]  ;;  %v231_v13 = vld [vmem:[%s8071_s25 + $0x38] sm:$0xff]  ;;  %v232_v14 = vld [vmem:[%s8071_s25 + $0x40] sm:$0xff]  ;;  %s11270_s8 = scalar_lea.vmem %s11340_s1, %s6896_s16  ;;  %s221_s27 = scalar_lea.vmem %s11343_s4, %s6896_s16 }
  0x14   : > { %7333 = vmatprep.mubr.msk.bf16.mxu0 %vm332_vm1, %v288_v6  ;;  %v233_v15 = vld [vmem:[%s8071_s25 + $0x48] sm:$0xff]  ;;  %v291_v16 = vpack.c.bf16 %v231_v13, %v230_v12  ;;  %v234_v18 = vld [vmem:[%s8071_s25 + $0x50] sm:$0xff]  ;;  %v235_v19 = vld [vmem:[%s8071_s25 + $0x58] sm:$0xff] }
  0x15   : > { %7334 = vmatmul.mubr.msk.bf16.vlgmr.msra.gmra.mxu0 %vm332_vm1, %v289_v10  ;;  %v292_v17 = vpack.c.bf16 %v233_v15, %v232_v14  ;;  %v236_v20 = vld [vmem:[%s8071_s25 + $0x60] sm:$0xff]  ;;  %v237_v21 = vld [vmem:[%s8071_s25 + $0x68] sm:$0xff]  ;;  %v293_v22 = vpack.c.bf16 %v235_v19, %v234_v18  ;;  %v274_v25 = vld [vmem:[%s8071_s25 + $0x190] sm:$0xff] }
  0x16   : > { %7337 = vmatprep.mubr.msk.bf16.mxu0 %vm332_vm1, %v290_v11  ;;  %v272_v23 = vld [vmem:[%s8071_s25 + $0x180] sm:$0xff]  ;;  %v273_v24 = vld [vmem:[%s8071_s25 + $0x188] sm:$0xff]  ;;  %v294_v26 = vpack.c.bf16 %v237_v21, %v236_v20  ;;  %v275_v28 = vld [vmem:[%s8071_s25 + $0x198] sm:$0xff] }
  0x17   : > { %v312_v27 = vpack.c.bf16 %v273_v24, %v272_v23  ;;  %v276_v29 = vld [vmem:[%s8071_s25 + $0x1a0] sm:$0xff]  ;;  %v277_v30 = vld [vmem:[%s8071_s25 + $0x1a8] sm:$0xff]  ;;  %v313_v31 = vpack.c.bf16 %v275_v28, %v274_v25  ;;  %v238_v33 = vld [vmem:[%s8071_s25 + $0x70] sm:$0xff] }
  0x18   : > { %v314_v32 = vpack.c.bf16 %v277_v30, %v276_v29  ;;  %v239_v34 = vld [vmem:[%s8071_s25 + $0x78] sm:$0xff]  ;;  %v240_v36 = vld [vmem:[%s8071_s25 + $0x80] sm:$0xff]  ;;  %v241_v37 = vld [vmem:[%s8071_s25 + $0x88] sm:$0xff] }
  0x19   : > { %7381 = vmatprep.mubr.msk.bf16.mxu1 %vm332_vm1, %v312_v27  ;;  %v278_v38 = vld [vmem:[%s8071_s25 + $0x1b0] sm:$0xff]  ;;  %v279_v39 = vld [vmem:[%s8071_s25 + $0x1b8] sm:$0xff]  ;;  %v280_v40 = vld [vmem:[%s8071_s25 + $0x1c0] sm:$0xff]  ;;  %v295_v43 = vpack.c.bf16 %v239_v34, %v238_v33  ;;  %v296_v45 = vpack.c.bf16 %v241_v37, %v240_v36 }
  0x1a   : > { %7382 = vmatmul.mubr.msk.bf16.vlgmr.msra.gmra.mxu1 %vm332_vm1, %v313_v31  ;;  %v281_v41 = vld [vmem:[%s8071_s25 + $0x1c8] sm:$0xff]  ;;  %v315_v44 = vpack.c.bf16 %v279_v39, %v278_v38  ;;  %v242_v47 = vld [vmem:[%s8071_s25 + $0x90] sm:$0xff]  ;;  %v243_v48 = vld [vmem:[%s8071_s25 + $0x98] sm:$0xff] }
  0x1b   : > { %7385 = vmatprep.mubr.msk.bf16.mxu1 %vm332_vm1, %v314_v32  ;;  %7398 = vmatpush3.bf16.msra.mxu1 %v7737_v2  ;;  %v316_v46 = vpack.c.bf16 %v281_v41, %v280_v40  ;;  %v244_v49 = vld [vmem:[%s8071_s25 + $0xa0] sm:$0xff]  ;;  %v282_v50 = vld [vmem:[%s8071_s25 + $0x1d0] sm:$0xff]  ;;  %v283_v51 = vld [vmem:[%s8071_s25 + $0x1d8] sm:$0xff]  ;;  %v297_v55 = vpack.c.bf16 %v243_v48, %v242_v47 }
  0x1c   : > { %7399 = vmatprep.subr.bf16.mxu1 %v7738_v35  ;;  %v245_v52 = vld [vmem:[%s8071_s25 + $0xa8] sm:$0xff]  ;;  %v284_v53 = vld [vmem:[%s8071_s25 + $0x1e0] sm:$0xff]  ;;  %v317_v56 = vpack.c.bf16 %v283_v51, %v282_v50  ;;  %v246_v59 = vld [vmem:[%s8071_s25 + $0xb0] sm:$0xff] }
  0x1d   : > { %7338 = vmatmul.mubr.msk.bf16.gmra.mxu0 %vm332_vm1, %v291_v16  ;;  %v285_v54 = vld [vmem:[%s8071_s25 + $0x1e8] sm:$0xff]  ;;  %v298_v57 = vpack.c.bf16 %v245_v52, %v244_v49  ;;  %v247_v60 = vld [vmem:[%s8071_s25 + $0xb8] sm:$0xff]  ;;  %v286_v61 = vld [vmem:[%s8071_s25 + $0x1f0] sm:$0xff] }
  0x1e   : > { %7341 = vmatprep.mubr.msk.bf16.mxu0 %vm332_vm1, %v292_v17  ;;  %v318_v58 = vpack.c.bf16 %v285_v54, %v284_v53  ;;  %v287_v62 = vld [vmem:[%s8071_s25 + $0x1f8] sm:$0xff]  ;;  %v248_v63 = vld [vmem:[%s8071_s25 + $0xc0] sm:$0xff]  ;;  %v249_v0 = vld [vmem:[%s8071_s25 + $0xc8] sm:$0xff]  ;;  %v299_v1 = vpack.c.bf16 %v247_v60, %v246_v59 }
  0x1f   : > { %7400 = vmatpush3.bf16.msra.mxu1 %v7738_v35  ;;  %v319_v2 = vpack.c.bf16 %v287_v62, %v286_v61  ;;  %v300_v3 = vpack.c.bf16 %v249_v0, %v248_v63  ;;  %v250_v4 = vld [vmem:[%s8071_s25 + $0xd0] sm:$0xff]  ;;  %v251_v5 = vld [vmem:[%s8071_s25 + $0xd8] sm:$0xff]  ;;  %v252_v6 = vld [vmem:[%s8071_s25 + $0xe0] sm:$0xff] }
  0x20   : > { %7401 = vmatprep.subr.bf16.mxu1 %v7739_v42  ;;  %v253_v7 = vld [vmem:[%s8071_s25 + $0xe8] sm:$0xff]  ;;  %v301_v8 = vpack.c.bf16 %v251_v5, %v250_v4  ;;  %v254_v10 = vld [vmem:[%s8071_s25 + $0xf0] sm:$0xff]  ;;  %v255_v11 = vld [vmem:[%s8071_s25 + $0xf8] sm:$0xff] }
  0x21   : > { %v302_v9 = vpack.c.bf16 %v253_v7, %v252_v6  ;;  %v256_v12 = vld [vmem:[%s8071_s25 + $0x100] sm:$0xff]  ;;  %v257_v13 = vld [vmem:[%s8071_s25 + $0x108] sm:$0xff]  ;;  %v303_v14 = vpack.c.bf16 %v255_v11, %v254_v10  ;;  %v258_v16 = vld [vmem:[%s8071_s25 + $0x110] sm:$0xff] }
  0x22   : > { %7386 = vmatmul.mubr.msk.bf16.gmra.mxu1 %vm332_vm1, %v315_v44  ;;  %v304_v15 = vpack.c.bf16 %v257_v13, %v256_v12  ;;  %v259_v17 = vld [vmem:[%s8071_s25 + $0x118] sm:$0xff]  ;;  %v260_v18 = vld [vmem:[%s8071_s25 + $0x120] sm:$0xff]  ;;  %v261_v19 = vld [vmem:[%s8071_s25 + $0x128] sm:$0xff] }
  0x23   : > { %7389 = vmatprep.mubr.msk.bf16.mxu1 %vm332_vm1, %v316_v46  ;;  %7402 = vmatpush3.bf16.msra.mxu1 %v7739_v42  ;;  %v305_v20 = vpack.c.bf16 %v259_v17, %v258_v16  ;;  %v306_v21 = vpack.c.bf16 %v261_v19, %v260_v18  ;;  %v263_v23 = vld [vmem:[%s8071_s25 + $0x138] sm:$0xff]  ;;  %v264_v24 = vld [vmem:[%s8071_s25 + $0x140] sm:$0xff]  ;;  %v265_v25 = vld [vmem:[%s8071_s25 + $0x148] sm:$0xff] }
  0x24   : > { %v308_v27 = vpack.c.bf16 %v265_v25, %v264_v24  ;;  %v7740_v28 = vld [vmem:[%s11341_s2 + $0x20] sm:$0xff]   ;;  %v266_v29 = vld [vmem:[%s8071_s25 + $0x150] sm:$0xff]  ;;  %v267_v30 = vld [vmem:[%s8071_s25 + $0x158] sm:$0xff] }
  0x25   : > { %7342 = vmatmul.mubr.msk.bf16.gmra.mxu0 %vm332_vm1, %v293_v22  ;;  %v262_v22 = vld [vmem:[%s8071_s25 + $0x130] sm:$0xff]  ;;  %v268_v31 = vld [vmem:[%s8071_s25 + $0x160] sm:$0xff]  ;;  %v269_v32 = vld [vmem:[%s8071_s25 + $0x168] sm:$0xff]  ;;  %7403 = vmatprep.subr.bf16.mxu1 %v7740_v28  ;;  %v309_v33 = vpack.c.bf16 %v267_v30, %v266_v29 }
  0x26   : > { %7345 = vmatprep.mubr.msk.bf16.mxu0 %vm332_vm1, %v294_v26  ;;  %v307_v26 = vpack.c.bf16 %v263_v23, %v262_v22  ;;  %v310_v34 = vpack.c.bf16 %v269_v32, %v268_v31  ;;  %v270_v35 = vld [vmem:[%s8071_s25 + $0x170] sm:$0xff]  ;;  %v271_v36 = vld [vmem:[%s8071_s25 + $0x178] sm:$0xff]  ;;  %v7741_v38 = vld [vmem:[%s11341_s2 + $0x48] sm:$0xff]  }
  0x27   : > { %7404 = vmatpush3.bf16.msra.mxu1 %v7740_v28  ;;  %v311_v37 = vpack.c.bf16 %v271_v36, %v270_v35  ;;  %7469 = vmatprep.subr.bf16.mxu0 %v7741_v38  ;;  %v8184_v41 = vld [vmem:[%s11342_s3] ss:$0 sm:$0xff] }
  0x28   : > { %7470 = vmatpush3.bf16.msra.mxu0 %v7741_v38  ;;  %v7742_v47 = vld [vmem:[%s11341_s2 + $0x40] sm:$0xff]  }
  0x29   : > { %7471 = vmatprep.subr.bf16.mxu0 %v7742_v47 }
  0x2a   : > { %7390 = vmatmul.mubr.msk.bf16.gmra.mxu1 %vm332_vm1, %v317_v56 }
  0x2b   : > { %7393 = vmatprep.mubr.msk.bf16.mxu1 %vm332_vm1, %v318_v58 }
  0x2c   : > { %7472 = vmatpush3.bf16.msra.mxu0 %v7742_v47 }
  0x2d   : > { %7346 = vmatmul.mubr.msk.bf16.gmra.mxu0 %vm332_vm1, %v295_v43 }
  0x2e   : > { %7349 = vmatprep.mubr.msk.bf16.mxu0 %vm332_vm1, %v296_v45 }
  0x32   : > { %7394 = vmatmul.mubr.msk.bf16.gmra.mxu1 %vm332_vm1, %v319_v2 }
  0x35   : > { %7350 = vmatmul.mubr.msk.bf16.gmra.mxu0 %vm332_vm1, %v297_v55 }
  0x36   : > { %7353 = vmatprep.mubr.msk.bf16.mxu0 %vm332_vm1, %v298_v57 }
  0x3d   : > { %7354 = vmatmul.mubr.msk.bf16.gmra.mxu0 %vm332_vm1, %v299_v1 }
  0x3e   : > { %7357 = vmatprep.mubr.msk.bf16.mxu0 %vm332_vm1, %v300_v3 }
  0x45   : > { %7358 = vmatmul.mubr.msk.bf16.gmra.mxu0 %vm332_vm1, %v301_v8 }
  0x46   : > { %7361 = vmatprep.mubr.msk.bf16.mxu0 %vm332_vm1, %v302_v9 }
  0x4d   : > { %7362 = vmatmul.mubr.msk.bf16.gmra.mxu0 %vm332_vm1, %v303_v14 }
  0x4e   : > { %7365 = vmatprep.mubr.msk.bf16.mxu0 %vm332_vm1, %v304_v15 }
  0x55   : > { %7366 = vmatmul.mubr.msk.bf16.gmra.mxu0 %vm332_vm1, %v305_v20 }
  0x56   : > { %7369 = vmatprep.mubr.msk.bf16.mxu0 %vm332_vm1, %v306_v21 }
  0x5d   : > { %7370 = vmatmul.mubr.msk.bf16.gmra.mxu0 %vm332_vm1, %v307_v26 }
  0x5e   : > { %7373 = vmatprep.mubr.msk.bf16.mxu0 %vm332_vm1, %v308_v27 }
  0x65   : > { %7374 = vmatmul.mubr.msk.bf16.gmra.mxu0 %vm332_vm1, %v309_v33 }
  0x66   : > { %7377 = vmatprep.mubr.msk.bf16.mxu0 %vm332_vm1, %v310_v34 }
  0x6d   : > { %7378 = vmatmul.mubr.msk.bf16.gmra.mxu0 %vm332_vm1, %v311_v37 }
  0xd5   : > { %v7335_v39 = vpop.f32.mrf.mxu0 }
  0xd6   : > { %v476_v45 = vadd.f32 %v7335_v39, %v8184_v41 }
  0xd7   : > { %v467_v40 = vpop.f32.mrf.mxu0 }
  0xd8   : > { %v468_v43 = vadd.f32 %v8184_v41, %v467_v40  ;;  %v724_v53 = vmax.f32 %v476_v45, 0.0 }
  0xd9   : > { %v7336_v42 = vpop.f32.mrf.mxu0 }
  0xda   : > { %v479_v44 = vadd.f32 %v7336_v42, %v8184_v41  ;;  %v722_v51 = vmax.f32 %v468_v43, 0.0 }
  0xdb   : > { %v470_v46 = vpop.f32.mrf.mxu0 }
  0xdc   : > { %v471_v48 = vadd.f32 %v8184_v41, %v470_v46  ;;  %v725_v49 = vmax.f32 %v479_v44, 0.0 }
  0xdd   : > { %v7339_v50 = vpop.f32.mrf.mxu0 }
  0xde   : > { %v723_v52 = vmax.f32 %v471_v48, 0.0  ;;  %v787_v56 = vpack.c.bf16 %v725_v49, %v724_v53  ;;  %v492_v60 = vadd.f32 %v7339_v50, %v8184_v41 }
  0xdf   : > { %v483_v54 = vpop.f32.mrf.mxu0 }
  0xe0   : > { %v786_v55 = vpack.c.bf16 %v723_v52, %v722_v51  ;;  %v484_v58 = vadd.f32 %v8184_v41, %v483_v54  ;;  %v728_v3 = vmax.f32 %v492_v60, 0.0 }
  0xe1   : > { %v7340_v57 = vpop.f32.mrf.mxu0 }
  0xe2   : > { %v495_v59 = vadd.f32 %v7340_v57, %v8184_v41  ;;  %7405 = vmatprep.mubr.msk.bf16.mxu1 %vm856_vm2, %v786_v55  ;;  %v726_v1 = vmax.f32 %v484_v58, 0.0 }
  0xe3   : > { %v486_v61 = vpop.f32.mrf.mxu0  ;;  %7406 = vmatmul.mubr.msk.bf16.vlgmr.msra.gmra.mxu1 %vm856_vm2, %v787_v56 }
  0xe4   : > { %v487_v62 = vadd.f32 %v8184_v41, %v486_v61  ;;  %v729_v63 = vmax.f32 %v495_v59, 0.0 }
  0xe5   : > { %v7343_v0 = vpop.f32.mrf.mxu0 }
  0xe6   : > { %v727_v2 = vmax.f32 %v487_v62, 0.0  ;;  %v789_v6 = vpack.c.bf16 %v729_v63, %v728_v3  ;;  %v508_v10 = vadd.f32 %v7343_v0, %v8184_v41 }
  0xe7   : > { %v499_v4 = vpop.f32.mrf.mxu0 }
  0xe8   : > { %v788_v5 = vpack.c.bf16 %v727_v2, %v726_v1  ;;  %v500_v8 = vadd.f32 %v8184_v41, %v499_v4  ;;  %v732_v17 = vmax.f32 %v508_v10, 0.0 }
  0xe9   : > { %v7344_v7 = vpop.f32.mrf.mxu0 }
  0xea   : > { %v511_v9 = vadd.f32 %v7344_v7, %v8184_v41  ;;  %7409 = vmatprep.mubr.msk.bf16.mxu1 %vm856_vm2, %v788_v5  ;;  %v730_v15 = vmax.f32 %v500_v8, 0.0 }
  0xeb   : > { %v502_v11 = vpop.f32.mrf.mxu0  ;;  %7410 = vmatmul.mubr.msk.bf16.gmra.mxu1 %vm856_vm2, %v789_v6 }
  0xec   : > { %v503_v12 = vadd.f32 %v8184_v41, %v502_v11  ;;  %v733_v13 = vmax.f32 %v511_v9, 0.0 }
  0xed   : > { %v7347_v14 = vpop.f32.mrf.mxu0 }
  0xee   : > { %v731_v16 = vmax.f32 %v503_v12, 0.0  ;;  %v791_v20 = vpack.c.bf16 %v733_v13, %v732_v17  ;;  %v524_v24 = vadd.f32 %v7347_v14, %v8184_v41  ;;  %v8229_v12 = vpop.f32.mrf.mxu1 }
  0xef   : > { %v515_v18 = vpop.f32.mrf.mxu0 }
  0xf0   : > { %v790_v19 = vpack.c.bf16 %v731_v16, %v730_v15  ;;  %v516_v22 = vadd.f32 %v8184_v41, %v515_v18  ;;  %v736_v31 = vmax.f32 %v524_v24, 0.0 }
  0xf1   : > { %v7348_v21 = vpop.f32.mrf.mxu0 }
  0xf2   : > { %v527_v23 = vadd.f32 %v7348_v21, %v8184_v41  ;;  %7413 = vmatprep.mubr.msk.bf16.mxu1 %vm856_vm2, %v790_v19  ;;  %v734_v29 = vmax.f32 %v516_v22, 0.0 }
  0xf3   : > { %v518_v25 = vpop.f32.mrf.mxu0  ;;  %7414 = vmatmul.mubr.msk.bf16.gmra.mxu1 %vm856_vm2, %v791_v20  ;;  %v8236_v20 = vpop.f32.mrf.mxu1 }
  0xf4   : > { %v519_v26 = vadd.f32 %v8184_v41, %v518_v25  ;;  %v737_v27 = vmax.f32 %v527_v23, 0.0 }
  0xf5   : > { %v7351_v28 = vpop.f32.mrf.mxu0 }
  0xf6   : > { %v735_v30 = vmax.f32 %v519_v26, 0.0  ;;  %v793_v34 = vpack.c.bf16 %v737_v27, %v736_v31  ;;  %v540_v38 = vadd.f32 %v7351_v28, %v8184_v41 }
  0xf7   : > { %v531_v32 = vpop.f32.mrf.mxu0 }
  0xf8   : > { %v792_v33 = vpack.c.bf16 %v735_v30, %v734_v29  ;;  %v532_v36 = vadd.f32 %v8184_v41, %v531_v32  ;;  %v740_v46 = vmax.f32 %v540_v38, 0.0  ;;  %v8240_v29 = vpop.f32.mrf.mxu1 }
  0xf9   : > { %v7352_v35 = vpop.f32.mrf.mxu0 }
  0xfa   : > { %v543_v37 = vadd.f32 %v7352_v35, %v8184_v41  ;;  %7417 = vmatprep.mubr.msk.bf16.mxu1 %vm856_vm2, %v792_v33  ;;  %v738_v44 = vmax.f32 %v532_v36, 0.0 }
  0xfb   : > { %v534_v39 = vpop.f32.mrf.mxu0  ;;  %7418 = vmatmul.mubr.msk.bf16.gmra.mxu1 %vm856_vm2, %v793_v34 }
  0xfc   : > { %v535_v40 = vadd.f32 %v8184_v41, %v534_v39  ;;  %v741_v42 = vmax.f32 %v543_v37, 0.0  ;;  %v662_v37 = vpop.f32.mrf.mxu1 }
  0xfd   : > { %v7355_v43 = vpop.f32.mrf.mxu0 }
  0xfe   : > { %v739_v45 = vmax.f32 %v535_v40, 0.0  ;;  %v795_v49 = vpack.c.bf16 %v741_v42, %v740_v46  ;;  %v556_v53 = vadd.f32 %v7355_v43, %v8184_v41  ;;  %v8247_v43 = vpop.f32.mrf.mxu1 }
  0xff   : > { %v547_v47 = vpop.f32.mrf.mxu0 }
 0x100   : > { %v794_v48 = vpack.c.bf16 %v739_v45, %v738_v44  ;;  %v548_v51 = vadd.f32 %v8184_v41, %v547_v47  ;;  %v744_v60 = vmax.f32 %v556_v53, 0.0 }
 0x101   : > { %v7356_v50 = vpop.f32.mrf.mxu0 }
 0x102   : > { %v559_v52 = vadd.f32 %v7356_v50, %v8184_v41  ;;  %7421 = vmatprep.mubr.msk.bf16.mxu1 %vm856_vm2, %v794_v48  ;;  %v742_v58 = vmax.f32 %v548_v51, 0.0  ;;  %v675_v51 = vpop.f32.mrf.mxu1 }
 0x103   : > { %v550_v54 = vpop.f32.mrf.mxu0  ;;  %7422 = vmatmul.mubr.msk.bf16.gmra.mxu1 %vm856_vm2, %v795_v49 }
 0x104   : > { %v551_v55 = vadd.f32 %v8184_v41, %v550_v54  ;;  %v745_v56 = vmax.f32 %v559_v52, 0.0 }
 0x105   : > { %v7359_v57 = vpop.f32.mrf.mxu0 }
 0x106   : > { %v743_v59 = vmax.f32 %v551_v55, 0.0  ;;  %v797_v63 = vpack.c.bf16 %v745_v56, %v744_v60  ;;  %v572_v3 = vadd.f32 %v7359_v57, %v8184_v41 }
 0x107   : > { %v563_v61 = vpop.f32.mrf.mxu0 }
 0x108   : > { %v796_v62 = vpack.c.bf16 %v743_v59, %v742_v58  ;;  %v564_v1 = vadd.f32 %v8184_v41, %v563_v61  ;;  %v748_v10 = vmax.f32 %v572_v3, 0.0  ;;  %v7388_v59 = vpop.f32.mrf.mxu1 }
 0x109   : > { %v7360_v0 = vpop.f32.mrf.mxu0 }
 0x10a   : > { %v575_v2 = vadd.f32 %v7360_v0, %v8184_v41  ;;  %7425 = vmatprep.mubr.msk.bf16.mxu1 %vm856_vm2, %v796_v62  ;;  %v746_v8 = vmax.f32 %v564_v1, 0.0  ;;  %v678_v3 = vpop.f32.mrf.mxu1 }
 0x10b   : > { %v566_v4 = vpop.f32.mrf.mxu0  ;;  %7426 = vmatmul.mubr.msk.bf16.gmra.mxu1 %vm856_vm2, %v797_v63 }
 0x10c   : > { %v567_v5 = vadd.f32 %v8184_v41, %v566_v4  ;;  %v749_v6 = vmax.f32 %v575_v2, 0.0 }
 0x10d   : > { %v7363_v7 = vpop.f32.mrf.mxu0 }
 0x10e   : > { %v747_v9 = vmax.f32 %v567_v5, 0.0  ;;  %v799_v14 = vpack.c.bf16 %v749_v6, %v748_v10  ;;  %v588_v18 = vadd.f32 %v7363_v7, %v8184_v41  ;;  %v7391_v7 = vpop.f32.mrf.mxu1 }
 0x10f   : > { %v579_v11 = vpop.f32.mrf.mxu0 }
 0x110   : > { %v798_v13 = vpack.c.bf16 %v747_v9, %v746_v8  ;;  %v580_v16 = vadd.f32 %v8184_v41, %v579_v11  ;;  %v752_v26 = vmax.f32 %v588_v18, 0.0  ;;  %v691_v18 = vpop.f32.mrf.mxu1 }
 0x111   : > { %v7364_v15 = vpop.f32.mrf.mxu0 }
 0x112   : > { %v591_v17 = vadd.f32 %v7364_v15, %v8184_v41  ;;  %7429 = vmatprep.mubr.msk.bf16.mxu1 %vm856_vm2, %v798_v13  ;;  %v750_v24 = vmax.f32 %v580_v16, 0.0 }
 0x113   : > { %v582_v19 = vpop.f32.mrf.mxu0  ;;  %7430 = vmatmul.mubr.msk.bf16.gmra.mxu1 %vm856_vm2, %v799_v14 }
 0x114   : > { %v583_v21 = vadd.f32 %v8184_v41, %v582_v19  ;;  %v753_v22 = vmax.f32 %v591_v17, 0.0  ;;  %v660_v17 = vadd.f32 %v8184_v41, %v8236_v20 }
 0x115   : > { %v7367_v23 = vpop.f32.mrf.mxu0 }
 0x116   : > { %v751_v25 = vmax.f32 %v583_v21, 0.0  ;;  %v604_v27 = vadd.f32 %v7367_v23, %v8184_v41  ;;  %v801_v32 = vpack.c.bf16 %v753_v22, %v752_v26  ;;  %v663_v22 = vadd.f32 %v8184_v41, %v662_v37 }
 0x117   : > { %v595_v28 = vpop.f32.mrf.mxu0 }
 0x118   : > { %v800_v30 = vpack.c.bf16 %v751_v25, %v750_v24  ;;  %v596_v31 = vadd.f32 %v8184_v41, %v595_v28  ;;  %v756_v35 = vmax.f32 %v604_v27, 0.0  ;;  %v770_v27 = vmax.f32 %v660_v17, 0.0  ;;  %v7392_v28 = vpop.f32.mrf.mxu1 }
 0x119   : > { %v7368_v33 = vpop.f32.mrf.mxu0 }
 0x11a   : > { %v607_v34 = vadd.f32 %v7368_v33, %v8184_v41  ;;  %7433 = vmatprep.mubr.msk.bf16.mxu1 %vm856_vm2, %v800_v30  ;;  %v754_v38 = vmax.f32 %v596_v31, 0.0  ;;  %v694_v37 = vpop.f32.mrf.mxu1 }
 0x11b   : > { %v598_v36 = vpop.f32.mrf.mxu0  ;;  %7434 = vmatmul.mubr.msk.bf16.gmra.mxu1 %vm856_vm2, %v801_v32  ;;  %v771_v32 = vmax.f32 %v663_v22, 0.0 }
 0x11c   : > { %v757_v39 = vmax.f32 %v607_v34, 0.0  ;;  %v599_v40 = vadd.f32 %v8184_v41, %v598_v36  ;;  %v671_v36 = vadd.f32 %v8240_v29, %v8184_v41 }
 0x11d   : > { %v7371_v42 = vpop.f32.mrf.mxu0 }
 0x11e   : > { %v755_v44 = vmax.f32 %v599_v40, 0.0  ;;  %v803_v45 = vpack.c.bf16 %v757_v39, %v756_v35  ;;  %v620_v46 = vadd.f32 %v7371_v42, %v8184_v41  ;;  %v668_v35 = vadd.f32 %v8229_v12, %v8184_v41 }
 0x11f   : > { %v611_v47 = vpop.f32.mrf.mxu0  ;;  %v810_v39 = vpack.c.bf16 %v771_v32, %v770_v27  ;;  %v676_v40 = vadd.f32 %v8184_v41, %v675_v51  ;;  %v679_v42 = vadd.f32 %v8184_v41, %v678_v3 }
 0x120   : > { %v802_v48 = vpack.c.bf16 %v755_v44, %v754_v38  ;;  %v612_v49 = vadd.f32 %v8184_v41, %v611_v47  ;;  %v760_v53 = vmax.f32 %v620_v46, 0.0  ;;  %v7395_v44 = vpop.f32.mrf.mxu1  ;;  %v773_v46 = vmax.f32 %v671_v36, 0.0 }
 0x121   : > { %v7372_v50 = vpop.f32.mrf.mxu0  ;;  %v774_v12 = vmax.f32 %v676_v40, 0.0  ;;  %v775_v47 = vmax.f32 %v679_v42, 0.0 }
 0x122   : > { %v623_v52 = vadd.f32 %v7372_v50, %v8184_v41  ;;  %7437 = vmatprep.mubr.msk.bf16.mxu1 %vm856_vm2, %v802_v48  ;;  %v758_v55 = vmax.f32 %v612_v49, 0.0  ;;  %v707_v48 = vpop.f32.mrf.mxu1  ;;  %v684_v49 = vadd.f32 %v8247_v43, %v8184_v41  ;;  %v687_v50 = vadd.f32 %v7388_v59, %v8184_v41 }
 0x123   : > { %v614_v54 = vpop.f32.mrf.mxu0  ;;  %7438 = vmatmul.mubr.msk.bf16.gmra.mxu1 %vm856_vm2, %v803_v45  ;;  %v772_v45 = vmax.f32 %v668_v35, 0.0  ;;  %v812_v51 = vpack.c.bf16 %v775_v47, %v774_v12  ;;  %v700_v43 = vadd.f32 %v7391_v7, %v8184_v41  ;;  %v703_v59 = vadd.f32 %v7392_v28, %v8184_v41 }
 0x124   : > { %v761_v56 = vmax.f32 %v623_v52, 0.0  ;;  %v615_v57 = vadd.f32 %v8184_v41, %v614_v54  ;;  %v692_v52 = vadd.f32 %v8184_v41, %v691_v18  ;;  %v7396_v54 = vpop.f32.mrf.mxu1 }
 0x125   : > { %v7375_v58 = vpop.f32.mrf.mxu0  ;;  %v811_v29 = vpack.c.bf16 %v773_v46, %v772_v45  ;;  %v719_v7 = vadd.f32 %v7396_v54, %v8184_v41 }
 0x126   : > { %v759_v60 = vmax.f32 %v615_v57, 0.0  ;;  %v805_v61 = vpack.c.bf16 %v761_v56, %v760_v53  ;;  %v636_v62 = vadd.f32 %v7375_v58, %v8184_v41  ;;  %v695_v53 = vadd.f32 %v8184_v41, %v694_v37 }
 0x127   : > { %v627_v63 = vpop.f32.mrf.mxu0  ;;  %v777_v56 = vmax.f32 %v687_v50, 0.0  ;;  %v778_v57 = vmax.f32 %v692_v52, 0.0 }
 0x128   : > { %v804_v0 = vpack.c.bf16 %v759_v60, %v758_v55  ;;  %v628_v1 = vadd.f32 %v8184_v41, %v627_v63  ;;  %v764_v5 = vmax.f32 %v636_v62, 0.0  ;;  %v776_v55 = vmax.f32 %v684_v49, 0.0  ;;  %v710_v60 = vpop.f32.mrf.mxu1 }
 0x129   : > { %v7376_v2 = vpop.f32.mrf.mxu0  ;;  %v779_v58 = vmax.f32 %v695_v53, 0.0  ;;  %v708_v63 = vadd.f32 %v8184_v41, %v707_v48 }
 0x12a   : > { %v639_v4 = vadd.f32 %v7376_v2, %v8184_v41  ;;  %7441 = vmatprep.mubr.msk.bf16.mxu1 %vm856_vm2, %v804_v0  ;;  %v762_v8 = vmax.f32 %v628_v1, 0.0  ;;  %v711_v0 = vadd.f32 %v8184_v41, %v710_v60  ;;  %v780_v1 = vmax.f32 %v700_v43, 0.0 }
 0x12b   : > { %v630_v6 = vpop.f32.mrf.mxu0  ;;  %7442 = vmatmul.mubr.msk.bf16.gmra.mxu1 %vm856_vm2, %v805_v61  ;;  %v813_v61 = vpack.c.bf16 %v777_v56, %v776_v55  ;;  %v814_v62 = vpack.c.bf16 %v779_v58, %v778_v57  ;;  %v781_v2 = vmax.f32 %v703_v59, 0.0  ;;  %v782_v3 = vmax.f32 %v708_v63, 0.0 }
 0x12c   : > { %v765_v9 = vmax.f32 %v639_v4, 0.0  ;;  %v631_v10 = vadd.f32 %v8184_v41, %v630_v6  ;;  %v783_v4 = vmax.f32 %v711_v0, 0.0  ;;  %v716_v6 = vadd.f32 %v7395_v44, %v8184_v41 }
 0x12d   : > { %v7379_v11 = vpop.f32.mrf.mxu0 }
 0x12e   : > { %v763_v13 = vmax.f32 %v631_v10, 0.0  ;;  %v807_v14 = vpack.c.bf16 %v765_v9, %v764_v5  ;;  %v652_v15 = vadd.f32 %v7379_v11, %v8184_v41  ;;  %v815_v5 = vpack.c.bf16 %v781_v2, %v780_v1 }
 0x12f   : > { %v643_v16 = vpop.f32.mrf.mxu0  ;;  %v784_v9 = vmax.f32 %v716_v6, 0.0  ;;  %v785_v10 = vmax.f32 %v719_v7, 0.0 }
 0x130   : > { %v806_v19 = vpack.c.bf16 %v763_v13, %v762_v8  ;;  %v644_v21 = vadd.f32 %v8184_v41, %v643_v16  ;;  %v768_v25 = vmax.f32 %v652_v15, 0.0  ;;  %v816_v8 = vpack.c.bf16 %v783_v4, %v782_v3  ;;  %v8300_v15 = vld [vmem:[%s11342_s3 + $0x1] ss:$0 sm:$0xff] }
 0x131   : > { %v7380_v23 = vpop.f32.mrf.mxu0  ;;  %v817_v11 = vpack.c.bf16 %v785_v10, %v784_v9 }
 0x132   : > { %v655_v24 = vadd.f32 %v7380_v23, %v8184_v41  ;;  %7445 = vmatprep.mubr.msk.bf16.mxu1 %vm856_vm2, %v806_v19  ;;  %v766_v30 = vmax.f32 %v644_v21, 0.0 }
 0x133   : > { %v646_v26 = vpop.f32.mrf.mxu0  ;;  %7446 = vmatmul.mubr.msk.bf16.gmra.mxu1 %vm856_vm2, %v807_v14 }
 0x134   : > { %v769_v31 = vmax.f32 %v655_v24, 0.0  ;;  %v647_v20 = vadd.f32 %v8184_v41, %v646_v26 }
 0x136   : > { %v767_v33 = vmax.f32 %v647_v20, 0.0  ;;  %v809_v34 = vpack.c.bf16 %v769_v31, %v768_v25 }
 0x138   : > { %v808_v38 = vpack.c.bf16 %v767_v33, %v766_v30 }
 0x13a   : > { %7449 = vmatprep.mubr.msk.bf16.mxu1 %vm856_vm2, %v808_v38 }
 0x13b   : > { %7450 = vmatmul.mubr.msk.bf16.gmra.mxu1 %vm856_vm2, %v809_v34 }
 0x13c   : > { %7453 = vmatprep.mubr.msk.bf16.mxu1 %vm856_vm2, %v810_v39 }
 0x143   : > { %7454 = vmatmul.mubr.msk.bf16.gmra.mxu1 %vm856_vm2, %v811_v29 }
 0x144   : > { %7457 = vmatprep.mubr.msk.bf16.mxu1 %vm856_vm2, %v812_v51 }
 0x14b   : > { %7458 = vmatmul.mubr.msk.bf16.gmra.mxu1 %vm856_vm2, %v813_v61 }
 0x14c   : > { %7461 = vmatprep.mubr.msk.bf16.mxu1 %vm856_vm2, %v814_v62 }
 0x153   : > { %7462 = vmatmul.mubr.msk.bf16.gmra.mxu1 %vm856_vm2, %v815_v5 }
 0x154   : > { %7465 = vmatprep.mubr.msk.bf16.mxu1 %vm856_vm2, %v816_v8 }
 0x15b   : > { %7466 = vmatmul.mubr.msk.bf16.gmra.mxu1 %vm856_vm2, %v817_v11 }
 0x1a3   : > { %v7407_v13 = vpop.f32.mrf.mxu1 }
 0x1a4   : > { %v996_v18 = vadd.f32 %v7407_v13, %v8300_v15 }
 0x1a5   : > { %v987_v14 = vpop.f32.mrf.mxu1 }
 0x1a6   : > { %v988_v41 = vadd.f32 %v8300_v15, %v987_v14  ;;  %v1244_v26 = vmax.f32 %v996_v18, 0.0 }
 0x1a7   : > { %v7408_v16 = vpop.f32.mrf.mxu1 }
 0x1a8   : > { %v999_v17 = vadd.f32 %v7408_v16, %v8300_v15  ;;  %v1242_v24 = vmax.f32 %v988_v41, 0.0 }
 0x1a9   : > { %v990_v19 = vpop.f32.mrf.mxu1 }
 0x1aa   : > { %v991_v21 = vadd.f32 %v8300_v15, %v990_v19  ;;  %v1245_v22 = vmax.f32 %v999_v17, 0.0 }
 0x1ab   : > { %v7411_v23 = vpop.f32.mrf.mxu1 }
 0x1ac   : > { %v1243_v25 = vmax.f32 %v991_v21, 0.0  ;;  %v1307_v30 = vpack.c.bf16 %v1245_v22, %v1244_v26  ;;  %v1012_v33 = vadd.f32 %v7411_v23, %v8300_v15 }
 0x1ad   : > { %v1003_v27 = vpop.f32.mrf.mxu1 }
 0x1ae   : > { %v1306_v28 = vpack.c.bf16 %v1243_v25, %v1242_v24  ;;  %v1004_v20 = vadd.f32 %v8300_v15, %v1003_v27  ;;  %v1248_v40 = vmax.f32 %v1012_v33, 0.0 }
 0x1af   : > { %v7412_v31 = vpop.f32.mrf.mxu1 }
 0x1b0   : > { %v1015_v32 = vadd.f32 %v7412_v31, %v8300_v15  ;;  %7473 = vmatprep.mubr.msk.bf16.mxu0 %vm1360_vm3, %v1306_v28  ;;  %v1246_v38 = vmax.f32 %v1004_v20, 0.0 }
 0x1b1   : > { %v1006_v34 = vpop.f32.mrf.mxu1  ;;  %7474 = vmatmul.mubr.msk.bf16.vlgmr.msra.gmra.mxu0 %vm1360_vm3, %v1307_v30 }
 0x1b2   : > { %v1007_v35 = vadd.f32 %v8300_v15, %v1006_v34  ;;  %v1249_v36 = vmax.f32 %v1015_v32, 0.0 }
 0x1b3   : > { %v7415_v37 = vpop.f32.mrf.mxu1 }
 0x1b4   : > { %v1247_v39 = vmax.f32 %v1007_v35, 0.0  ;;  %v1309_v45 = vpack.c.bf16 %v1249_v36, %v1248_v40  ;;  %v1028_v48 = vadd.f32 %v7415_v37, %v8300_v15 }
 0x1b5   : > { %v1019_v42 = vpop.f32.mrf.mxu1 }
 0x1b6   : > { %v1308_v44 = vpack.c.bf16 %v1247_v39, %v1246_v38  ;;  %v1020_v12 = vadd.f32 %v8300_v15, %v1019_v42  ;;  %v1252_v54 = vmax.f32 %v1028_v48, 0.0 }
 0x1b7   : > { %v7416_v46 = vpop.f32.mrf.mxu1 }
 0x1b8   : > { %v1031_v47 = vadd.f32 %v7416_v46, %v8300_v15  ;;  %7477 = vmatprep.mubr.msk.bf16.mxu0 %vm1360_vm3, %v1308_v44  ;;  %v1250_v52 = vmax.f32 %v1020_v12, 0.0 }
 0x1b9   : > { %v1022_v29 = vpop.f32.mrf.mxu1  ;;  %7478 = vmatmul.mubr.msk.bf16.gmra.mxu0 %vm1360_vm3, %v1309_v45 }
 0x1ba   : > { %v1023_v49 = vadd.f32 %v8300_v15, %v1022_v29  ;;  %v1253_v50 = vmax.f32 %v1031_v47, 0.0 }
 0x1bb   : > { %v7419_v51 = vpop.f32.mrf.mxu1 }
 0x1bc   : > { %v1251_v53 = vmax.f32 %v1023_v49, 0.0  ;;  %v1311_v57 = vpack.c.bf16 %v1253_v50, %v1252_v54  ;;  %v1044_v43 = vadd.f32 %v7419_v51, %v8300_v15 }
 0x1bd   : > { %v1035_v55 = vpop.f32.mrf.mxu1 }
 0x1be   : > { %v1310_v56 = vpack.c.bf16 %v1251_v53, %v1250_v52  ;;  %v1036_v60 = vadd.f32 %v8300_v15, %v1035_v55  ;;  %v1256_v3 = vmax.f32 %v1044_v43, 0.0 }
 0x1bf   : > { %v7420_v58 = vpop.f32.mrf.mxu1 }
 0x1c0   : > { %v1047_v61 = vadd.f32 %v7420_v58, %v8300_v15  ;;  %7481 = vmatprep.mubr.msk.bf16.mxu0 %vm1360_vm3, %v1310_v56  ;;  %v1254_v1 = vmax.f32 %v1036_v60, 0.0 }
 0x1c1   : > { %v1038_v59 = vpop.f32.mrf.mxu1  ;;  %7482 = vmatmul.mubr.msk.bf16.gmra.mxu0 %vm1360_vm3, %v1311_v57 }
 0x1c2   : > { %v1039_v62 = vadd.f32 %v8300_v15, %v1038_v59  ;;  %v1257_v63 = vmax.f32 %v1047_v61, 0.0 }
 0x1c3   : > { %v7423_v0 = vpop.f32.mrf.mxu1 }
 0x1c4   : > { %v1255_v2 = vmax.f32 %v1039_v62, 0.0  ;;  %v1313_v6 = vpack.c.bf16 %v1257_v63, %v1256_v3  ;;  %v1060_v10 = vadd.f32 %v7423_v0, %v8300_v15 }
 0x1c5   : > { %v1051_v4 = vpop.f32.mrf.mxu1 }
 0x1c6   : > { %v1312_v5 = vpack.c.bf16 %v1255_v2, %v1254_v1  ;;  %v1052_v8 = vadd.f32 %v8300_v15, %v1051_v4  ;;  %v1260_v18 = vmax.f32 %v1060_v10, 0.0 }
 0x1c7   : > { %v7424_v7 = vpop.f32.mrf.mxu1 }
 0x1c8   : > { %v1063_v9 = vadd.f32 %v7424_v7, %v8300_v15  ;;  %7485 = vmatprep.mubr.msk.bf16.mxu0 %vm1360_vm3, %v1312_v5  ;;  %v1258_v41 = vmax.f32 %v1052_v8, 0.0 }
 0x1c9   : > { %v1054_v11 = vpop.f32.mrf.mxu1  ;;  %7486 = vmatmul.mubr.msk.bf16.gmra.mxu0 %vm1360_vm3, %v1313_v6 }
 0x1ca   : > { %v1055_v13 = vadd.f32 %v8300_v15, %v1054_v11  ;;  %v1261_v14 = vmax.f32 %v1063_v9, 0.0 }
 0x1cb   : > { %v7427_v16 = vpop.f32.mrf.mxu1 }
 0x1cc   : > { %v1259_v17 = vmax.f32 %v1055_v13, 0.0  ;;  %v1315_v22 = vpack.c.bf16 %v1261_v14, %v1260_v18  ;;  %v1076_v26 = vadd.f32 %v7427_v16, %v8300_v15 }
 0x1cd   : > { %v1067_v19 = vpop.f32.mrf.mxu1 }
 0x1ce   : > { %v1314_v21 = vpack.c.bf16 %v1259_v17, %v1258_v41  ;;  %v1068_v24 = vadd.f32 %v8300_v15, %v1067_v19  ;;  %v1264_v33 = vmax.f32 %v1076_v26, 0.0 }
 0x1cf   : > { %v7428_v23 = vpop.f32.mrf.mxu1 }
 0x1d0   : > { %v1079_v25 = vadd.f32 %v7428_v23, %v8300_v15  ;;  %7489 = vmatprep.mubr.msk.bf16.mxu0 %vm1360_vm3, %v1314_v21  ;;  %v1262_v20 = vmax.f32 %v1068_v24, 0.0 }
 0x1d1   : > { %v1070_v27 = vpop.f32.mrf.mxu1  ;;  %7490 = vmatmul.mubr.msk.bf16.gmra.mxu0 %vm1360_vm3, %v1315_v22 }
 0x1d2   : > { %v1071_v28 = vadd.f32 %v8300_v15, %v1070_v27  ;;  %v1265_v30 = vmax.f32 %v1079_v25, 0.0 }
 0x1d3   : > { %v7431_v31 = vpop.f32.mrf.mxu1 }
 0x1d4   : > { %v1263_v32 = vmax.f32 %v1071_v28, 0.0  ;;  %v1317_v36 = vpack.c.bf16 %v1265_v30, %v1264_v33  ;;  %v1092_v40 = vadd.f32 %v7431_v31, %v8300_v15  ;;  %v7743_v31 = vld [vmem:[%s11341_s2 + $0x68] sm:$0xff]  }
 0x1d5   : > { %v1083_v34 = vpop.f32.mrf.mxu1  ;;  %7537 = vmatprep.subr.bf16.mxu1 %v7743_v31 }
 0x1d6   : > { %v1316_v35 = vpack.c.bf16 %v1263_v32, %v1262_v20  ;;  %v1084_v38 = vadd.f32 %v8300_v15, %v1083_v34  ;;  %v1268_v48 = vmax.f32 %v1092_v40, 0.0  ;;  %7538 = vmatpush3.bf16.msra.mxu1 %v7743_v31 }
 0x1d7   : > { %v7432_v37 = vpop.f32.mrf.mxu1 }
 0x1d8   : > { %v1095_v39 = vadd.f32 %v7432_v37, %v8300_v15  ;;  %7493 = vmatprep.mubr.msk.bf16.mxu0 %vm1360_vm3, %v1316_v35  ;;  %v1266_v12 = vmax.f32 %v1084_v38, 0.0  ;;  %v7744_v37 = vld [vmem:[%s11341_s2 + $0x60] sm:$0xff]  }
 0x1d9   : > { %v1086_v42 = vpop.f32.mrf.mxu1  ;;  %7494 = vmatmul.mubr.msk.bf16.gmra.mxu0 %vm1360_vm3, %v1317_v36  ;;  %7539 = vmatprep.subr.bf16.mxu1 %v7744_v37 }
 0x1da   : > { %v1087_v44 = vadd.f32 %v8300_v15, %v1086_v42  ;;  %v1269_v45 = vmax.f32 %v1095_v39, 0.0  ;;  %7540 = vmatpush3.bf16.msra.mxu1 %v7744_v37 }
 0x1db   : > { %v7435_v46 = vpop.f32.mrf.mxu1 }
 0x1dc   : > { %v1267_v47 = vmax.f32 %v1087_v44, 0.0  ;;  %v1319_v50 = vpack.c.bf16 %v1269_v45, %v1268_v48  ;;  %v1108_v54 = vadd.f32 %v7435_v46, %v8300_v15 }
 0x1dd   : > { %v1099_v29 = vpop.f32.mrf.mxu1 }
 0x1de   : > { %v1318_v49 = vpack.c.bf16 %v1267_v47, %v1266_v12  ;;  %v1100_v52 = vadd.f32 %v8300_v15, %v1099_v29  ;;  %v1272_v43 = vmax.f32 %v1108_v54, 0.0 }
 0x1df   : > { %v7436_v51 = vpop.f32.mrf.mxu1 }
 0x1e0   : > { %v1111_v53 = vadd.f32 %v7436_v51, %v8300_v15  ;;  %7497 = vmatprep.mubr.msk.bf16.mxu0 %vm1360_vm3, %v1318_v49  ;;  %v1270_v60 = vmax.f32 %v1100_v52, 0.0 }
 0x1e1   : > { %v1102_v55 = vpop.f32.mrf.mxu1  ;;  %7498 = vmatmul.mubr.msk.bf16.gmra.mxu0 %vm1360_vm3, %v1319_v50 }
 0x1e2   : > { %v1103_v56 = vadd.f32 %v8300_v15, %v1102_v55  ;;  %v1273_v57 = vmax.f32 %v1111_v53, 0.0 }
 0x1e3   : > { %v7439_v58 = vpop.f32.mrf.mxu1 }
 0x1e4   : > { %v1271_v61 = vmax.f32 %v1103_v56, 0.0  ;;  %v1124_v59 = vadd.f32 %v7439_v58, %v8300_v15  ;;  %v1321_v1 = vpack.c.bf16 %v1273_v57, %v1272_v43 }
 0x1e5   : > { %v1115_v62 = vpop.f32.mrf.mxu1 }
 0x1e6   : > { %v1320_v63 = vpack.c.bf16 %v1271_v61, %v1270_v60  ;;  %v1116_v0 = vadd.f32 %v8300_v15, %v1115_v62  ;;  %v1276_v4 = vmax.f32 %v1124_v59, 0.0 }
 0x1e7   : > { %v7440_v2 = vpop.f32.mrf.mxu1 }
 0x1e8   : > { %v1127_v3 = vadd.f32 %v7440_v2, %v8300_v15  ;;  %7501 = vmatprep.mubr.msk.bf16.mxu0 %vm1360_vm3, %v1320_v63  ;;  %v1274_v6 = vmax.f32 %v1116_v0, 0.0 }
 0x1e9   : > { %v1118_v5 = vpop.f32.mrf.mxu1  ;;  %7502 = vmatmul.mubr.msk.bf16.gmra.mxu0 %vm1360_vm3, %v1321_v1 }
 0x1ea   : > { %v1277_v7 = vmax.f32 %v1127_v3, 0.0  ;;  %v1119_v8 = vadd.f32 %v8300_v15, %v1118_v5 }
 0x1eb   : > { %v7443_v9 = vpop.f32.mrf.mxu1 }
 0x1ec   : > { %v1275_v10 = vmax.f32 %v1119_v8, 0.0  ;;  %v1323_v11 = vpack.c.bf16 %v1277_v7, %v1276_v4  ;;  %v1140_v13 = vadd.f32 %v7443_v9, %v8300_v15 }
 0x1ed   : > { %v1131_v14 = vpop.f32.mrf.mxu1 }
 0x1ee   : > { %v1322_v16 = vpack.c.bf16 %v1275_v10, %v1274_v6  ;;  %v1132_v41 = vadd.f32 %v8300_v15, %v1131_v14  ;;  %v1280_v19 = vmax.f32 %v1140_v13, 0.0 }
 0x1ef   : > { %v7444_v17 = vpop.f32.mrf.mxu1 }
 0x1f0   : > { %v1143_v18 = vadd.f32 %v7444_v17, %v8300_v15  ;;  %7505 = vmatprep.mubr.msk.bf16.mxu0 %vm1360_vm3, %v1322_v16  ;;  %v1278_v22 = vmax.f32 %v1132_v41, 0.0 }
 0x1f1   : > { %v1134_v21 = vpop.f32.mrf.mxu1  ;;  %7506 = vmatmul.mubr.msk.bf16.gmra.mxu0 %vm1360_vm3, %v1323_v11 }
 0x1f2   : > { %v1281_v23 = vmax.f32 %v1143_v18, 0.0  ;;  %v1135_v24 = vadd.f32 %v8300_v15, %v1134_v21 }
 0x1f3   : > { %v7447_v25 = vpop.f32.mrf.mxu1 }
 0x1f4   : > { %v1279_v26 = vmax.f32 %v1135_v24, 0.0  ;;  %v1325_v27 = vpack.c.bf16 %v1281_v23, %v1280_v19  ;;  %v1156_v28 = vadd.f32 %v7447_v25, %v8300_v15 }
 0x1f5   : > { %v1147_v30 = vpop.f32.mrf.mxu1 }
 0x1f6   : > { %v1324_v20 = vpack.c.bf16 %v1279_v26, %v1278_v22  ;;  %v1148_v32 = vadd.f32 %v8300_v15, %v1147_v30  ;;  %v1284_v35 = vmax.f32 %v1156_v28, 0.0 }
 0x1f7   : > { %v7448_v33 = vpop.f32.mrf.mxu1 }
 0x1f8   : > { %v1159_v34 = vadd.f32 %v7448_v33, %v8300_v15  ;;  %7509 = vmatprep.mubr.msk.bf16.mxu0 %vm1360_vm3, %v1324_v20  ;;  %v1282_v38 = vmax.f32 %v1148_v32, 0.0 }
 0x1f9   : > { %v1150_v36 = vpop.f32.mrf.mxu1  ;;  %7510 = vmatmul.mubr.msk.bf16.gmra.mxu0 %vm1360_vm3, %v1325_v27 }
 0x1fa   : > { %v1285_v39 = vmax.f32 %v1159_v34, 0.0  ;;  %v1151_v40 = vadd.f32 %v8300_v15, %v1150_v36 }
 0x1fb   : > { %v7451_v42 = vpop.f32.mrf.mxu1 }
 0x1fc   : > { %v1283_v44 = vmax.f32 %v1151_v40, 0.0  ;;  %v1327_v45 = vpack.c.bf16 %v1285_v39, %v1284_v35  ;;  %v1172_v46 = vadd.f32 %v7451_v42, %v8300_v15 }
 0x1fd   : > { %v1163_v12 = vpop.f32.mrf.mxu1 }
 0x1fe   : > { %v1326_v47 = vpack.c.bf16 %v1283_v44, %v1282_v38  ;;  %v1164_v48 = vadd.f32 %v8300_v15, %v1163_v12  ;;  %v1288_v50 = vmax.f32 %v1172_v46, 0.0 }
 0x1ff   : > { %v7452_v29 = vpop.f32.mrf.mxu1 }
 0x200   : > { %v1175_v49 = vadd.f32 %v7452_v29, %v8300_v15  ;;  %7513 = vmatprep.mubr.msk.bf16.mxu0 %vm1360_vm3, %v1326_v47  ;;  %v1286_v52 = vmax.f32 %v1164_v48, 0.0 }
 0x201   : > { %v1166_v51 = vpop.f32.mrf.mxu1  ;;  %7514 = vmatmul.mubr.msk.bf16.gmra.mxu0 %vm1360_vm3, %v1327_v45 }
 0x202   : > { %v1289_v53 = vmax.f32 %v1175_v49, 0.0  ;;  %v1167_v54 = vadd.f32 %v8300_v15, %v1166_v51  ;;  %v8407_v51 = vld [vmem:[%s11342_s3 + $0x2] ss:$0 sm:$0xff] }
 0x203   : > { %v7455_v55 = vpop.f32.mrf.mxu1 }
 0x204   : > { %v1287_v56 = vmax.f32 %v1167_v54, 0.0  ;;  %v1329_v57 = vpack.c.bf16 %v1289_v53, %v1288_v50  ;;  %v1188_v58 = vadd.f32 %v7455_v55, %v8300_v15 }
 0x205   : > { %v1179_v60 = vpop.f32.mrf.mxu1 }
 0x206   : > { %v1328_v61 = vpack.c.bf16 %v1287_v56, %v1286_v52  ;;  %v1180_v43 = vadd.f32 %v8300_v15, %v1179_v60  ;;  %v1292_v63 = vmax.f32 %v1188_v58, 0.0 }
 0x207   : > { %v7456_v59 = vpop.f32.mrf.mxu1 }
 0x208   : > { %7517 = vmatprep.mubr.msk.bf16.mxu0 %vm1360_vm3, %v1328_v61  ;;  %v1191_v62 = vadd.f32 %v7456_v59, %v8300_v15  ;;  %v1290_v1 = vmax.f32 %v1180_v43, 0.0 }
 0x209   : > { %7518 = vmatmul.mubr.msk.bf16.gmra.mxu0 %vm1360_vm3, %v1329_v57  ;;  %v1182_v0 = vpop.f32.mrf.mxu1 }
 0x20a   : > { %v1293_v2 = vmax.f32 %v1191_v62, 0.0  ;;  %v1183_v3 = vadd.f32 %v8300_v15, %v1182_v0 }
 0x20b   : > { %v7459_v4 = vpop.f32.mrf.mxu1 }
 0x20c   : > { %v1291_v5 = vmax.f32 %v1183_v3, 0.0  ;;  %v1331_v6 = vpack.c.bf16 %v1293_v2, %v1292_v63  ;;  %v1204_v7 = vadd.f32 %v7459_v4, %v8300_v15 }
 0x20d   : > { %v1195_v8 = vpop.f32.mrf.mxu1 }
 0x20e   : > { %v1330_v9 = vpack.c.bf16 %v1291_v5, %v1290_v1  ;;  %v1196_v10 = vadd.f32 %v8300_v15, %v1195_v8  ;;  %v1296_v14 = vmax.f32 %v1204_v7, 0.0 }
 0x20f   : > { %v7460_v11 = vpop.f32.mrf.mxu1 }
 0x210   : > { %7521 = vmatprep.mubr.msk.bf16.mxu0 %vm1360_vm3, %v1330_v9  ;;  %v1207_v13 = vadd.f32 %v7460_v11, %v8300_v15  ;;  %v1294_v41 = vmax.f32 %v1196_v10, 0.0 }
 0x211   : > { %7522 = vmatmul.mubr.msk.bf16.gmra.mxu0 %vm1360_vm3, %v1331_v6  ;;  %v1198_v16 = vpop.f32.mrf.mxu1 }
 0x212   : > { %v1297_v17 = vmax.f32 %v1207_v13, 0.0  ;;  %v1199_v18 = vadd.f32 %v8300_v15, %v1198_v16 }
 0x213   : > { %v7463_v19 = vpop.f32.mrf.mxu1 }
 0x214   : > { %v1295_v21 = vmax.f32 %v1199_v18, 0.0  ;;  %v1333_v22 = vpack.c.bf16 %v1297_v17, %v1296_v14  ;;  %v1220_v23 = vadd.f32 %v7463_v19, %v8300_v15 }
 0x215   : > { %v1211_v24 = vpop.f32.mrf.mxu1 }
 0x216   : > { %v1332_v25 = vpack.c.bf16 %v1295_v21, %v1294_v41  ;;  %v1212_v26 = vadd.f32 %v8300_v15, %v1211_v24  ;;  %v1300_v30 = vmax.f32 %v1220_v23, 0.0 }
 0x217   : > { %v7464_v27 = vpop.f32.mrf.mxu1 }
 0x218   : > { %7525 = vmatprep.mubr.msk.bf16.mxu0 %vm1360_vm3, %v1332_v25  ;;  %v1223_v28 = vadd.f32 %v7464_v27, %v8300_v15  ;;  %v1298_v20 = vmax.f32 %v1212_v26, 0.0 }
 0x219   : > { %7526 = vmatmul.mubr.msk.bf16.gmra.mxu0 %vm1360_vm3, %v1333_v22  ;;  %v1214_v31 = vpop.f32.mrf.mxu1 }
 0x21a   : > { %v1301_v32 = vmax.f32 %v1223_v28, 0.0  ;;  %v1215_v33 = vadd.f32 %v8300_v15, %v1214_v31 }
 0x21b   : > { %v7467_v34 = vpop.f32.mrf.mxu1 }
 0x21c   : > { %v1299_v35 = vmax.f32 %v1215_v33, 0.0  ;;  %v1335_v36 = vpack.c.bf16 %v1301_v32, %v1300_v30  ;;  %v1236_v37 = vadd.f32 %v7467_v34, %v8300_v15 }
 0x21d   : > { %v1227_v38 = vpop.f32.mrf.mxu1 }
 0x21e   : > { %v1334_v39 = vpack.c.bf16 %v1299_v35, %v1298_v20  ;;  %v1228_v40 = vadd.f32 %v8300_v15, %v1227_v38  ;;  %v1304_v45 = vmax.f32 %v1236_v37, 0.0 }
 0x21f   : > { %v7468_v42 = vpop.f32.mrf.mxu1 }
 0x220   : > { %7529 = vmatprep.mubr.msk.bf16.mxu0 %vm1360_vm3, %v1334_v39  ;;  %v1239_v44 = vadd.f32 %v7468_v42, %v8300_v15  ;;  %v1302_v12 = vmax.f32 %v1228_v40, 0.0 }
 0x221   : > { %7530 = vmatmul.mubr.msk.bf16.gmra.mxu0 %vm1360_vm3, %v1335_v36  ;;  %v1230_v46 = vpop.f32.mrf.mxu1 }
 0x222   : > { %v1305_v47 = vmax.f32 %v1239_v44, 0.0  ;;  %v1231_v48 = vadd.f32 %v8300_v15, %v1230_v46 }
 0x224   : > { %v1303_v29 = vmax.f32 %v1231_v48, 0.0  ;;  %v1337_v49 = vpack.c.bf16 %v1305_v47, %v1304_v45 }
 0x226   : > { %v1336_v50 = vpack.c.bf16 %v1303_v29, %v1302_v12 }
 0x228   : > { %7533 = vmatprep.mubr.msk.bf16.mxu0 %vm1360_vm3, %v1336_v50 }
 0x229   : > { %7534 = vmatmul.mubr.msk.bf16.gmra.mxu0 %vm1360_vm3, %v1337_v49 }
 0x271   : > { %v7475_v52 = vpop.f32.mrf.mxu0 }
 0x272   : > { %v8410_v53 = vadd.f32 %v7475_v52, %v8407_v51 }
 0x273   : > { %v1491_v54 = vpop.f32.mrf.mxu0 }
 0x274   : > { %v1825_v15 = vsel %vm1810_vm4, %v8410_v53, 0.0  ;;  %v8415_v55 = vadd.f32 %v8407_v51, %v1491_v54  ;;  %v1748_v8 = vmax.f32 %v8410_v53, 0.0 }
 0x275   : > { %v1826_v56 = vrot.slane %v1825_v15, 4  ;;  %v7476_v57 = vpop.f32.mrf.mxu0 }
 0x276   : > { %v1811_v58 = vsel %vm1810_vm4, %v8415_v55, 0.0  ;;  %v8420_v60 = vadd.f32 %v7476_v57, %v8407_v51  ;;  %v1746_v5 = vmax.f32 %v8415_v55, 0.0 }
 0x277   : > { %v1812_v61 = vrot.slane %v1811_v58, 4  ;;  %v1494_v43 = vpop.f32.mrf.mxu0  ;;  %v1827_v59 = vadd.f32 %v1826_v56, %v1825_v15 }
 0x278   : > { %v1832_v62 = vsel %vm1810_vm4, %v8420_v60, 0.0  ;;  %v8425_v63 = vadd.f32 %v8407_v51, %v1494_v43  ;;  %v1749_v0 = vmax.f32 %v8420_v60, 0.0 }
 0x279   : > { %v1833_v1 = vrot.slane %v1832_v62, 4  ;;  %v7479_v2 = vpop.f32.mrf.mxu0  ;;  %v1828_v3 = vrot.slane %v1827_v59, 2  ;;  %v1813_v4 = vadd.f32 %v1812_v61, %v1811_v58 }
 0x27a   : > { %v1747_v6 = vmax.f32 %v8425_v63, 0.0  ;;  %v8431_v7 = vadd.f32 %v7479_v2, %v8407_v51  ;;  %v1818_v14 = vsel %vm1810_vm4, %v8425_v63, 0.0  ;;  %v2709_v18 = vpack.c.bf16 %v1749_v0, %v1748_v8 }
 0x27b   : > { %v1834_v9 = vadd.f32 %v1833_v1, %v1832_v62  ;;  %v1507_v10 = vpop.f32.mrf.mxu0  ;;  %v1829_v11 = vadd.f32 %v1828_v3, %v1827_v59  ;;  %v1814_v13 = vrot.slane %v1813_v4, 2  ;;  %v1819_v27 = vrot.slane %v1818_v14, 4 }
 0x27c   : > { %v1853_v16 = vsel %vm1810_vm4, %v8431_v7, 0.0  ;;  %v8439_v41 = vadd.f32 %v8407_v51, %v1507_v10  ;;  %v2708_v17 = vpack.c.bf16 %v1747_v6, %v1746_v5  ;;  %v1752_v12 = vmax.f32 %v8431_v7, 0.0 }
 0x27d   : > { %v1854_v19 = vrot.slane %v1853_v16, 4  ;;  %v7480_v21 = vpop.f32.mrf.mxu0  ;;  %v1830_v22 = vrot.slane %v1829_v11, 1  ;;  %v1835_v23 = vrot.slane %v1834_v9, 2  ;;  %v1815_v26 = vadd.f32 %v1814_v13, %v1813_v4 }
 0x27e   : > { %v1839_v24 = vsel %vm1810_vm4, %v8439_v41, 0.0  ;;  %v8444_v25 = vadd.f32 %v7480_v21, %v8407_v51  ;;  %7541 = vmatprep.mubr.msk.bf16.mxu1 %vm1360_vm3, %v2708_v17  ;;  %v1750_v35 = vmax.f32 %v8439_v41, 0.0  ;;  %v1820_v46 = vadd.f32 %v1819_v27, %v1818_v14 }
 0x27f   : > { %v1855_v28 = vadd.f32 %v1854_v19, %v1853_v16  ;;  %v1840_v30 = vrot.slane %v1839_v24, 4  ;;  %v1510_v31 = vpop.f32.mrf.mxu0  ;;  %7542 = vmatmul.mubr.msk.bf16.vlgmr.msra.gmra.mxu1 %vm1360_vm3, %v2709_v18  ;;  %v1831_v20 = vadd.f32 %v1830_v22, %v1829_v11  ;;  %v1816_v34 = vrot.slane %v1815_v26, 1 }
 0x280   : > { %v1860_v32 = vsel %vm1810_vm4, %v8444_v25, 0.0  ;;  %v8451_v33 = vadd.f32 %v8407_v51, %v1510_v31  ;;  %v1753_v37 = vmax.f32 %v8444_v25, 0.0  ;;  %v1836_v45 = vadd.f32 %v1835_v23, %v1834_v9 }
 0x281   : > { %v8454_v36 = vadd.f32 %v1840_v30, %v1839_v24  ;;  %v7483_v38 = vpop.f32.mrf.mxu0  ;;  %v2262_v39 = vmul.f32 0.125, %v1831_v20  ;;  %v1861_v40 = vrot.slane %v1860_v32, 4  ;;  %v1856_v47 = vrot.slane %v1855_v28, 2 }
 0x282   : > { %v1751_v42 = vmax.f32 %v8451_v33, 0.0  ;;  %v8459_v44 = vadd.f32 %v7483_v38, %v8407_v51  ;;  %v1817_v29 = vadd.f32 %v1816_v34, %v1815_v26  ;;  %v1846_v49 = vsel %vm1810_vm4, %v8451_v33, 0.0 }
 0x283   : > { %2392 = vrot.lane.b32.xlu1 %v2262_v39, %s8024_s22  ;;  %v1523_v48 = vpop.f32.mrf.mxu0  ;;  %v1842_v15 = vrot.slane %v8454_v36, 2  ;;  %v2711_v56 = vpack.c.bf16 %v1753_v37, %v1752_v12  ;;  %v1862_v61 = vadd.f32 %v1861_v40, %v1860_v32  ;;  %v1837_v62 = vrot.slane %v1836_v45, 1 }
 0x284   : > { %v1881_v50 = vsel %vm1810_vm4, %v8459_v44, 0.0  ;;  %v8468_v52 = vadd.f32 %v8407_v51, %v1523_v48  ;;  %v2710_v54 = vpack.c.bf16 %v1751_v42, %v1750_v35  ;;  %v2260_v58 = vmul.f32 0.125, %v1817_v29 }
 0x285   : > { %v7484_v57 = vpop.f32.mrf.mxu0  ;;  %v1847_v0 = vrot.slane %v1846_v49, 4  ;;  %v1882_v1 = vrot.slane %v1881_v50, 4  ;;  %v1821_v4 = vrot.slane %v1820_v46, 2  ;;  %v1838_v6 = vadd.f32 %v1837_v62, %v1836_v45 }
 0x286   : > { %v1867_v43 = vsel %vm1810_vm4, %v8468_v52, 0.0  ;;  %v8474_v59 = vadd.f32 %v7484_v57, %v8407_v51  ;;  %7545 = vmatprep.mubr.msk.bf16.mxu1 %vm1360_vm3, %v2710_v54  ;;  %2388 = vrot.lane.b32.xlu0 %v2260_v58, %s8024_s22  ;;  %v1857_v9 = vadd.f32 %v1856_v47, %v1855_v28  ;;  %v1756_v10 = vmax.f32 %v8459_v44, 0.0 }
 0x287   : > { %v1868_v2 = vrot.slane %v1867_v43, 4  ;;  %v1526_v3 = vpop.f32.mrf.mxu0  ;;  %7546 = vmatmul.mubr.msk.bf16.gmra.mxu1 %vm1360_vm3, %v2711_v56  ;;  %v1822_v16 = vadd.f32 %v1821_v4, %v1820_v46  ;;  %v1754_v17 = vmax.f32 %v8468_v52, 0.0  ;;  %v2263_v18 = vmul.f32 0.125, %v1838_v6 }
 0x288   : > { %v1888_v5 = vsel %vm1810_vm4, %v8474_v59, 0.0  ;;  %v8482_v8 = vadd.f32 %v8407_v51, %v1526_v3  ;;  %v1757_v11 = vmax.f32 %v8474_v59, 0.0  ;;  %v1863_v22 = vrot.slane %v1862_v61, 2 }
 0x289   : > { %v1889_v13 = vrot.slane %v1888_v5, 4  ;;  %v7487_v14 = vpop.f32.mrf.mxu0  ;;  %v8490_v23 = vadd.f32 %v1882_v1, %v1881_v50  ;;  %v8492_v24 = vadd.f32 %v1868_v2, %v1867_v43  ;;  %2394 = vrot.lane.b32.xlu1 %v2263_v18, %s8024_s22  ;;  %v1823_v28 = vrot.slane %v1822_v16, 1 }
 0x28a   : > { %v1755_v19 = vmax.f32 %v8482_v8, 0.0  ;;  %v1874_v21 = vsel %vm1810_vm4, %v8482_v8, 0.0  ;;  %v8495_v26 = vadd.f32 %v7487_v14, %v8407_v51  ;;  %v1858_v31 = vrot.slane %v1857_v9, 1 }
 0x28b   : > { %v1539_v27 = vpop.f32.mrf.mxu0  ;;  %v8501_v32 = vadd.f32 %v1889_v13, %v1888_v5  ;;  %v2713_v34 = vpack.c.bf16 %v1757_v11, %v1756_v10  ;;  %v1875_v35 = vrot.slane %v1874_v21, 4  ;;  %v1848_v39 = vadd.f32 %v1847_v0, %v1846_v49 }
 0x28c   : > { %v8499_v30 = vadd.f32 %v8407_v51, %v1539_v27  ;;  %v2712_v20 = vpack.c.bf16 %v1755_v19, %v1754_v17  ;;  %v1909_v37 = vsel %vm1810_vm4, %v8495_v26, 0.0  ;;  %v1824_v42 = vadd.f32 %v1823_v28, %v1822_v16 }
 0x28d   : > { %v7488_v38 = vpop.f32.mrf.mxu0  ;;  %v1910_v40 = vrot.slane %v1909_v37, 4  ;;  %v1884_v46 = vrot.slane %v8490_v23, 2  ;;  %v1864_v48 = vadd.f32 %v1863_v22, %v1862_v61  ;;  %v1859_v54 = vadd.f32 %v1858_v31, %v1857_v9 }
 0x28e   : > { %v1895_v45 = vsel %vm1810_vm4, %v8499_v30, 0.0  ;;  %7549 = vmatprep.mubr.msk.bf16.mxu1 %vm1360_vm3, %v2712_v20  ;;  %v8510_v47 = vadd.f32 %v7488_v38, %v8407_v51  ;;  %v2261_v50 = vmul.f32 0.125, %v1824_v42  ;;  %v1843_v56 = vadd.f32 %v1842_v15, %v8454_v36 }
 0x28f   : > { %v1896_v12 = vrot.slane %v1895_v45, 4  ;;  %v1542_v29 = vpop.f32.mrf.mxu0  ;;  %7550 = vmatmul.mubr.msk.bf16.gmra.mxu1 %vm1360_vm3, %v2713_v34  ;;  %v1870_v57 = vrot.slane %v8492_v24, 2  ;;  %v1891_v58 = vrot.slane %v8501_v32, 2  ;;  %v8519_v43 = vadd.f32 %v1875_v35, %v1874_v21 }
 0x290   : > { %v8514_v49 = vadd.f32 %v8407_v51, %v1542_v29  ;;  %v1916_v62 = vsel %vm1810_vm4, %v8510_v47, 0.0  ;;  %v8523_v0 = vadd.f32 %v1910_v40, %v1909_v37  ;;  %2390 = vrot.lane.b32.xlu0 %v2261_v50, %s8024_s22  ;;  %v1865_v3 = vrot.slane %v1864_v48, 1 }
 0x291   : > { %v7491_v61 = vpop.f32.mrf.mxu0  ;;  %v8526_v1 = vadd.f32 %v1896_v12, %v1895_v45  ;;  %v1917_v2 = vrot.slane %v1916_v62, 4  ;;  %v1760_v36 = vmax.f32 %v8495_v26, 0.0  ;;  %v1758_v15 = vmax.f32 %v8499_v30, 0.0 }
 0x292   : > { %v1761_v4 = vmax.f32 %v8510_v47, 0.0  ;;  %v8532_v5 = vadd.f32 %v7491_v61, %v8407_v51  ;;  %v2266_v9 = vmul.f32 0.125, %v1859_v54  ;;  %v1866_v10 = vadd.f32 %v1865_v3, %v1864_v48 }
 0x293   : > { %v1555_v6 = vpop.f32.mrf.mxu0  ;;  %v1759_v11 = vmax.f32 %v8514_v49, 0.0  ;;  %v1844_v13 = vrot.slane %v1843_v56, 1  ;;  %v1902_v14 = vsel %vm1810_vm4, %v8514_v49, 0.0  ;;  %v1849_v18 = vrot.slane %v1848_v39, 2 }
 0x294   : > { %v1937_v16 = vsel %vm1810_vm4, %v8532_v5, 0.0  ;;  %v8540_v17 = vadd.f32 %v8407_v51, %v1555_v6  ;;  %v1912_v21 = vrot.slane %v8523_v0, 2  ;;  %v1898_v22 = vrot.slane %v8526_v1, 2  ;;  %2400 = vrot.lane.b32.xlu0 %v2266_v9, %s8024_s22 }
 0x295   : > { %v7492_v19 = vpop.f32.mrf.mxu0  ;;  %v8544_v27 = vadd.f32 %v1917_v2, %v1916_v62  ;;  %v2267_v28 = vmul.f32 0.125, %v1866_v10  ;;  %v2715_v31 = vpack.c.bf16 %v1761_v4, %v1760_v36  ;;  %v1938_v20 = vrot.slane %v1937_v16, 4 }
 0x296   : > { %v1845_v34 = vadd.f32 %v1844_v13, %v1843_v56  ;;  %v1850_v35 = vadd.f32 %v1849_v18, %v1848_v39  ;;  %v1903_v38 = vrot.slane %v1902_v14, 4  ;;  %v1923_v40 = vsel %vm1810_vm4, %v8540_v17, 0.0 }
 0x297   : > { %v1558_v37 = vpop.f32.mrf.mxu0  ;;  %2402 = vrot.lane.b32.xlu1 %v2267_v28, %s8024_s22  ;;  %v8551_v42 = vadd.f32 %v7492_v19, %v8407_v51  ;;  %v1885_v45 = vadd.f32 %v1884_v46, %v8490_v23  ;;  %v2714_v29 = vpack.c.bf16 %v1759_v11, %v1758_v15  ;;  %v1919_v39 = vrot.slane %v8544_v27, 2 }
 0x298   : > { %v2264_v12 = vmul.f32 0.125, %v1845_v34  ;;  %v1851_v48 = vrot.slane %v1850_v35, 1  ;;  %v8555_v50 = vadd.f32 %v8407_v51, %v1558_v37  ;;  %v1764_v56 = vmax.f32 %v8532_v5, 0.0 }
 0x299   : > { %v7495_v54 = vpop.f32.mrf.mxu0  ;;  %v1762_v62 = vmax.f32 %v8540_v17, 0.0  ;;  %v1944_v61 = vsel %vm1810_vm4, %v8551_v42, 0.0  ;;  %v8562_v2 = vadd.f32 %v1938_v20, %v1937_v16  ;;  %v1886_v46 = vrot.slane %v1885_v45, 1  ;;  %7553 = vmatprep.mubr.msk.bf16.mxu1 %vm1360_vm3, %v2714_v29 }
 0x29a   : > { %2396 = vrot.lane.b32.xlu0 %v2264_v12, %s8024_s22  ;;  %v1852_v23 = vadd.f32 %v1851_v48, %v1850_v35  ;;  %v1763_v3 = vmax.f32 %v8555_v50, 0.0  ;;  %v1924_v15 = vrot.slane %v1923_v40, 4  ;;  %v1765_v4 = vmax.f32 %v8551_v42, 0.0  ;;  %7554 = vmatmul.mubr.msk.bf16.gmra.mxu1 %vm1360_vm3, %v2715_v31 }
 0x29b   : > { %v1571_v36 = vpop.f32.mrf.mxu0  ;;  %v1930_v6 = vsel %vm1810_vm4, %v8555_v50, 0.0  ;;  %v1892_v9 = vadd.f32 %v1891_v58, %v8501_v32  ;;  %v1945_v11 = vrot.slane %v1944_v61, 4  ;;  %v1887_v13 = vadd.f32 %v1886_v46, %v1885_v45 }
 0x29c   : > { %v2265_v10 = vmul.f32 0.125, %v1852_v23  ;;  %v1931_v16 = vrot.slane %v1930_v6, 4  ;;  %v2716_v19 = vpack.c.bf16 %v1763_v3, %v1762_v62  ;;  %v8573_v20 = vadd.f32 %v7495_v54, %v8407_v51 }
 0x29d   : > { %v7496_v18 = vpop.f32.mrf.mxu0  ;;  %v1893_v28 = vrot.slane %v1892_v9, 1  ;;  %v1871_v34 = vadd.f32 %v1870_v57, %v8492_v24  ;;  %v8578_v35 = vadd.f32 %v1903_v38, %v1902_v14  ;;  %v1940_v32 = vrot.slane %v8562_v2, 2 }
 0x29e   : > { %11399 = vst [vmem:[#allocation2_spill] sm:$0xff] %v8573_v20  ;;  %2398 = vrot.lane.b32.xlu1 %v2265_v10, %s8024_s22  ;;  %v2270_v58 = vmul.f32 0.125, %v1887_v13  ;;  %v8583_v31 = vadd.f32 %v8407_v51, %v1571_v36  ;;  %v8585_v45 = vadd.f32 %v1924_v15, %v1923_v40  ;;  %v1965_v48 = vsel %vm1810_vm4, %v8573_v20, 0.0  ;;  %7557 = vmatprep.mubr.msk.bf16.mxu1 %vm1360_vm3, %v2716_v19 }
 0x29f   : > { %v1574_v37 = vpop.f32.mrf.mxu0  ;;  %v1894_v12 = vadd.f32 %v1893_v28, %v1892_v9  ;;  %v1872_v29 = vrot.slane %v1871_v34, 1  ;;  %v8590_v24 = vadd.f32 %v1945_v11, %v1944_v61  ;;  %v2717_v57 = vpack.c.bf16 %v1765_v4, %v1764_v56 }
 0x2a0   : > { %11400 = vst [vmem:[#allocation3_spill] sm:$0xff] %v8583_v31  ;;  %2408 = vrot.lane.b32.xlu0 %v2270_v58, %s8024_s22  ;;  %v1966_v14 = vrot.slane %v1965_v48, 4  ;;  %v1951_v38 = vsel %vm1810_vm4, %v8583_v31, 0.0  ;;  %v8595_v62 = vadd.f32 %v1931_v16, %v1930_v6  ;;  %v1877_v46 = vrot.slane %v8519_v43, 2 }
 0x2a1   : > { %v7499_v54 = vpop.f32.mrf.mxu0  ;;  %v2271_v40 = vmul.f32 0.125, %v1894_v12  ;;  %v1873_v23 = vadd.f32 %v1872_v29, %v1871_v34  ;;  %v1952_v3 = vrot.slane %v1951_v38, 4  ;;  %v8599_v36 = vadd.f32 %v7496_v18, %v8407_v51 }
 0x2a2   : > { %v1913_v56 = vadd.f32 %v1912_v21, %v8523_v0  ;;  %v8605_v61 = vadd.f32 %v8407_v51, %v1574_v37  ;;  %v1768_v4 = vmax.f32 %v8573_v20, 0.0  ;;  %v1878_v9 = vadd.f32 %v1877_v46, %v8519_v43  ;;  %7558 = vmatmul.mubr.msk.bf16.gmra.mxu1 %vm1360_vm3, %v2717_v57 }
 0x2a3   : > { %v1587_v15 = vpop.f32.mrf.mxu0  ;;  %2410 = vrot.lane.b32.xlu1 %v2271_v40, %s8024_s22  ;;  %v2268_v6 = vmul.f32 0.125, %v1873_v23  ;;  %v1920_v10 = vadd.f32 %v1919_v39, %v8544_v27  ;;  %v8612_v11 = vadd.f32 %v1966_v14, %v1965_v48  ;;  %v1766_v13 = vmax.f32 %v8583_v31, 0.0 }
 0x2a4   : > { %11401 = vst [vmem:[#allocation4_spill] sm:$0xff] %v8605_v61  ;;  %v1972_v0 = vsel %vm1810_vm4, %v8599_v36, 0.0  ;;  %v1914_v21 = vrot.slane %v1913_v56, 1  ;;  %v1879_v18 = vrot.slane %v1878_v9, 1  ;;  %v1769_v19 = vmax.f32 %v8599_v36, 0.0 }
 0x2a5   : > { %v7500_v16 = vpop.f32.mrf.mxu0  ;;  %2404 = vrot.lane.b32.xlu0 %v2268_v6, %s8024_s22  ;;  %v1973_v28 = vrot.slane %v1972_v0, 4  ;;  %v1767_v43 = vmax.f32 %v8605_v61, 0.0  ;;  %v8620_v27 = vadd.f32 %v1952_v3, %v1951_v38  ;;  %v1958_v34 = vsel %vm1810_vm4, %v8605_v61, 0.0 }
 0x2a6   : > { %v1915_v39 = vadd.f32 %v1914_v21, %v1913_v56  ;;  %v1921_v58 = vrot.slane %v1920_v10, 1  ;;  %v1880_v12 = vadd.f32 %v1879_v18, %v1878_v9  ;;  %v1959_v29 = vrot.slane %v1958_v34, 4 }
 0x2a7   : > { %v1590_v37 = vpop.f32.mrf.mxu0  ;;  %v8624_v48 = vadd.f32 %v1973_v28, %v1972_v0  ;;  %v2718_v57 = vpack.c.bf16 %v1767_v43, %v1766_v13  ;;  %v8627_v23 = vadd.f32 %v7499_v54, %v8407_v51  ;;  %v1899_v38 = vadd.f32 %v1898_v22, %v8526_v1 }
 0x2a8   : > { %v2274_v14 = vmul.f32 0.125, %v1915_v39  ;;  %v1922_v40 = vadd.f32 %v1921_v58, %v1920_v10  ;;  %v1947_v3 = vrot.slane %v8590_v24, 2  ;;  %v2269_v56 = vmul.f32 0.125, %v1880_v12 }
 0x2a9   : > { %11402 = vst [vmem:[#allocation5_spill] sm:$0xff] %v8627_v23  ;;  %v7503_v46 = vpop.f32.mrf.mxu0  ;;  %v2719_v6 = vpack.c.bf16 %v1769_v19, %v1768_v4  ;;  %v8634_v9 = vadd.f32 %v8407_v51, %v1587_v15  ;;  %7561 = vmatprep.mubr.msk.bf16.mxu1 %vm1360_vm3, %v2718_v57  ;;  %v1926_v13 = vrot.slane %v8585_v45, 2  ;;  %v1900_v0 = vrot.slane %v1899_v38, 1 }
 0x2aa   : > { %2416 = vrot.lane.b32.xlu0 %v2274_v14, %s8024_s22  ;;  %2406 = vrot.lane.b32.xlu1 %v2269_v56, %s8024_s22  ;;  %v8644_v15 = vadd.f32 %v1959_v29, %v1958_v34  ;;  %v2275_v21 = vmul.f32 0.125, %v1922_v40  ;;  %v1993_v18 = vsel %vm1810_vm4, %v8627_v23, 0.0  ;;  %v1905_v28 = vrot.slane %v8578_v35, 2 }
 0x2ab   : > { %11403 = vst [vmem:[#allocation6_spill] sm:$0xff] %v8634_v9  ;;  %v1603_v1 = vpop.f32.mrf.mxu0  ;;  %7562 = vmatmul.mubr.msk.bf16.gmra.mxu1 %vm1360_vm3, %v2719_v6  ;;  %v1901_v19 = vadd.f32 %v1900_v0, %v1899_v38  ;;  %v8651_v43 = vadd.f32 %v7500_v16, %v8407_v51  ;;  %v1979_v58 = vsel %vm1810_vm4, %v8634_v9, 0.0  ;;  %v1941_v34 = vadd.f32 %v1940_v32, %v8562_v2 }
 0x2ac   : > { %v8659_v12 = vadd.f32 %v8407_v51, %v1590_v37  ;;  %v1948_v29 = vadd.f32 %v1947_v3, %v8590_v24  ;;  %v1772_v57 = vmax.f32 %v8627_v23, 0.0  ;;  %v1906_v40 = vadd.f32 %v1905_v28, %v8578_v35 }
 0x2ad   : > { %11404 = vst [vmem:[#allocation7_spill] sm:$0xff] %v8651_v43  ;;  %v7504_v39 = vpop.f32.mrf.mxu0  ;;  %v2272_v14 = vmul.f32 0.125, %v1901_v19  ;;  %v1773_v16 = vmax.f32 %v8651_v43, 0.0  ;;  %v1770_v56 = vmax.f32 %v8634_v9, 0.0  ;;  %v2000_v2 = vsel %vm1810_vm4, %v8651_v43, 0.0 }
 0x2ae   : > { %11405 = vst [vmem:[#allocation8_spill] sm:$0xff] %v8659_v12  ;;  %2418 = vrot.lane.b32.xlu1 %v2275_v21, %s8024_s22  ;;  %v1942_v32 = vrot.slane %v1941_v34, 1  ;;  %v1771_v37 = vmax.f32 %v8659_v12, 0.0  ;;  %v1994_v6 = vrot.slane %v1993_v18, 4  ;;  %v1980_v24 = vrot.slane %v1979_v58, 4 }
 0x2af   : > { %v1606_v38 = vpop.f32.mrf.mxu0  ;;  %2412 = vrot.lane.b32.xlu0 %v2272_v14, %s8024_s22  ;;  %v1907_v3 = vrot.slane %v1906_v40, 1  ;;  %v2001_v0 = vrot.slane %v2000_v2, 4  ;;  %v1986_v21 = vsel %vm1810_vm4, %v8659_v12, 0.0  ;;  %v1949_v22 = vrot.slane %v1948_v29, 1 }
 0x2b0   : > { %v1943_v19 = vadd.f32 %v1942_v32, %v1941_v34  ;;  %v2720_v28 = vpack.c.bf16 %v1771_v37, %v1770_v56  ;;  %v2721_v54 = vpack.c.bf16 %v1773_v16, %v1772_v57  ;;  %v1987_v10 = vrot.slane %v1986_v21, 4 }
 0x2b1   : > { %v8671_v35 = vpop.f32.mrf.mxu0  ;;  %v1908_v4 = vadd.f32 %v1907_v3, %v1906_v40  ;;  %v8676_v9 = vadd.f32 %v7503_v46, %v8407_v51  ;;  %v1950_v14 = vadd.f32 %v1949_v22, %v1948_v29  ;;  %v1927_v61 = vadd.f32 %v1926_v13, %v8585_v45 }
 0x2b2   : > { %v2278_v23 = vmul.f32 0.125, %v1943_v19  ;;  %v8680_v31 = vadd.f32 %v8407_v51, %v1603_v1  ;;  %7565 = vmatprep.mubr.msk.bf16.mxu1 %vm1360_vm3, %v2720_v28  ;;  %v8684_v56 = vadd.f32 %v1994_v6, %v1993_v18  ;;  %v8686_v40 = vadd.f32 %v1980_v24, %v1979_v58 }
 0x2b3   : > { %11406 = vst [vmem:[#allocation9_spill] sm:$0xff] %v8676_v9  ;;  %v1619_v43 = vpop.f32.mrf.mxu0  ;;  %v2273_v57 = vmul.f32 0.125, %v1908_v4  ;;  %7566 = vmatmul.mubr.msk.bf16.gmra.mxu1 %vm1360_vm3, %v2721_v54  ;;  %v8691_v16 = vadd.f32 %v2001_v0, %v2000_v2  ;;  %v8694_v45 = vadd.f32 %v1987_v10, %v1986_v21  ;;  %v2021_v13 = vsel %vm1810_vm4, %v8676_v9, 0.0 }
 0x2b4   : > { %11407 = vst [vmem:[#allocation10_spill] sm:$0xff] %v8680_v31  ;;  %2424 = vrot.lane.b32.xlu0 %v2278_v23, %s8024_s22  ;;  %v1928_v1 = vrot.slane %v1927_v61, 1  ;;  %v2279_v22 = vmul.f32 0.125, %v1950_v14  ;;  %v2022_v18 = vrot.slane %v2021_v13, 4  ;;  %v2007_v4 = vsel %vm1810_vm4, %v8680_v31, 0.0 }
 0x2b5   : > { %v8689_v46 = vpop.f32.mrf.mxu0  ;;  %2414 = vrot.lane.b32.xlu1 %v2273_v57, %s8024_s22  ;;  %v11408_v54 = vrot.slane %v8595_v62, 2  ;;  %v2008_v10 = vrot.slane %v2007_v4, 4  ;;  %v8707_v2 = vadd.f32 %v7504_v39, %v8407_v51  ;;  %v11410_v32 = vrot.slane %v8612_v11, 2 }
 0x2b6   : > { %v1929_v23 = vadd.f32 %v1928_v1, %v1927_v61  ;;  %v1996_v6 = vrot.slane %v8684_v56, 2  ;;  %v8715_v0 = vadd.f32 %v8407_v51, %v1606_v38  ;;  %v2003_v61 = vrot.slane %v8691_v16, 2 }
 0x2b7   : > { %v1934_v58 = vadd.f32 %v11408_v54, %v8595_v62  ;;  %v8704_v29 = vpop.f32.mrf.mxu0  ;;  %11409 = vst [vmem:[#allocation11_spill] sm:$0xff] %v8707_v2  ;;  %v1969_v37 = vadd.f32 %v11410_v32, %v8612_v11  ;;  %v1776_v19 = vmax.f32 %v8676_v9, 0.0  ;;  %v11412_v21 = vrot.slane %v8624_v48, 2 }
 0x2b8   : > { %11411 = vst [vmem:[#allocation12_spill] sm:$0xff] %v8715_v0  ;;  %v2276_v39 = vmul.f32 0.125, %v1929_v23  ;;  %v8725_v11 = vadd.f32 %v2022_v18, %v2021_v13  ;;  %v1777_v57 = vmax.f32 %v8707_v2, 0.0  ;;  %v1774_v23 = vmax.f32 %v8680_v31, 0.0 }
 0x2b9   : > { %v1935_v3 = vrot.slane %v1934_v58, 1  ;;  %v8717_v62 = vpop.f32.mrf.mxu0  ;;  %v1976_v28 = vadd.f32 %v11412_v21, %v8624_v48  ;;  %2426 = vrot.lane.b32.xlu1 %v2279_v22, %s8024_s22  ;;  %v1970_v38 = vrot.slane %v1969_v37, 1  ;;  %v8733_v32 = vadd.f32 %v2008_v10, %v2007_v4 }
 0x2ba   : > { %2420 = vrot.lane.b32.xlu0 %v2276_v39, %s8024_s22  ;;  %v1775_v48 = vmax.f32 %v8715_v0, 0.0  ;;  %v2028_v13 = vsel %vm1810_vm4, %v8707_v2, 0.0  ;;  %v2014_v18 = vsel %vm1810_vm4, %v8715_v0, 0.0  ;;  %v8744_v39 = vadd.f32 %v8671_v35, %v8407_v51  ;;  %v7745_v35 = vld [vmem:[%s11341_s2 + $0x88] sm:$0xff]  }
 0x2bb   : > { %v1936_v14 = vadd.f32 %v1935_v3, %v1934_v58  ;;  %v8728_v1 = vpop.f32.mrf.mxu0  ;;  %v1971_v22 = vadd.f32 %v1970_v38, %v1969_v37  ;;  %v1977_v54 = vrot.slane %v1976_v28, 1  ;;  %v11414_v4 = vrot.slane %v8620_v27, 2  ;;  %7605 = vmatprep.subr.bf16.mxu0 %v7745_v35 }
 0x2bc   : > { %v2722_v3 = vpack.c.bf16 %v1775_v48, %v1774_v23  ;;  %11413 = vst [vmem:[#allocation13_spill] sm:$0xff] %v8744_v39  ;;  %v2723_v37 = vpack.c.bf16 %v1777_v57, %v1776_v19  ;;  %v8752_v24 = vadd.f32 %v8407_v51, %v1619_v43  ;;  %v2029_v23 = vrot.slane %v2028_v13, 4  ;;  %7606 = vmatpush3.bf16.msra.mxu0 %v7745_v35 }
 0x2bd   : > { %v2277_v21 = vmul.f32 0.125, %v1936_v14  ;;  %v8740_v58 = vpop.f32.mrf.mxu0  ;;  %v1955_v10 = vadd.f32 %v11414_v4, %v8620_v27  ;;  %v2282_v38 = vmul.f32 0.125, %v1971_v22  ;;  %v1978_v48 = vadd.f32 %v1977_v54, %v1976_v28 }
 0x2be   : > { %11415 = vst [vmem:[#allocation14_spill] sm:$0xff] %v8752_v24  ;;  %v2049_v27 = vsel %vm1810_vm4, %v8744_v39, 0.0  ;;  %7569 = vmatprep.mubr.msk.bf16.mxu1 %vm1360_vm3, %v2722_v3  ;;  %v2015_v43 = vrot.slane %v2014_v18, 4  ;;  %v1780_v57 = vmax.f32 %v8744_v39, 0.0  ;;  %v11416_v3 = vrot.slane %v8644_v15, 2 }
 0x2bf   : > { %2422 = vrot.lane.b32.xlu1 %v2277_v21, %s8024_s22  ;;  %v8754_v34 = vpop.f32.mrf.mxu0  ;;  %v1956_v4 = vrot.slane %v1955_v10, 1  ;;  %2432 = vrot.lane.b32.xlu0 %v2282_v38, %s8024_s22  ;;  %v2035_v21 = vsel %vm1810_vm4, %v8752_v24, 0.0  ;;  %v2283_v28 = vmul.f32 0.125, %v1978_v48  ;;  %v2050_v54 = vrot.slane %v2049_v27, 4 }
 0x2c0   : > { %7570 = vmatmul.mubr.msk.bf16.gmra.mxu1 %vm1360_vm3, %v2723_v37  ;;  %v1962_v0 = vadd.f32 %v11416_v3, %v8644_v15  ;;  %v1778_v38 = vmax.f32 %v8752_v24, 0.0  ;;  %v2036_v19 = vrot.slane %v2035_v21, 4  ;;  %v8776_v39 = vadd.f32 %v8689_v46, %v8407_v51 }
 0x2c1   : > { %v8768_v22 = vpop.f32.mrf.mxu0  ;;  %v1957_v14 = vadd.f32 %v1956_v4, %v1955_v10  ;;  %v1997_v31 = vadd.f32 %v1996_v6, %v8684_v56  ;;  %v8784_v15 = vadd.f32 %v8407_v51, %v8704_v29  ;;  %v2004_v4 = vadd.f32 %v2003_v61, %v8691_v16 }
 0x2c2   : > { %11417 = vst [vmem:[#allocation15_spill] sm:$0xff] %v8776_v39  ;;  %v1963_v48 = vrot.slane %v1962_v0, 1  ;;  %v2030_v3 = vadd.f32 %v2029_v23, %v2028_v13  ;;  %v1781_v24 = vmax.f32 %v8776_v39, 0.0  ;;  %v2056_v46 = vsel %vm1810_vm4, %v8776_v39, 0.0 }
 0x2c3   : > { %v8779_v37 = vpop.f32.mrf.mxu0  ;;  %2434 = vrot.lane.b32.xlu1 %v2283_v28, %s8024_s22  ;;  %v2280_v10 = vmul.f32 0.125, %v1957_v14  ;;  %11418 = vst [vmem:[#allocation16_spill] sm:$0xff] %v8784_v15  ;;  %v1998_v56 = vrot.slane %v1997_v31, 1  ;;  %v8792_v35 = vadd.f32 %v2015_v43, %v2014_v18  ;;  %v8794_v28 = vadd.f32 %v2050_v54, %v2049_v27 }
 0x2c4   : > { %v1964_v14 = vadd.f32 %v1963_v48, %v1962_v0  ;;  %v1779_v29 = vmax.f32 %v8784_v15, 0.0  ;;  %v8798_v2 = vadd.f32 %v2036_v19, %v2035_v21  ;;  %v2725_v16 = vpack.c.bf16 %v1781_v24, %v1780_v57 }
 0x2c5   : > { %v8790_v6 = vpop.f32.mrf.mxu0  ;;  %2428 = vrot.lane.b32.xlu0 %v2280_v10, %s8024_s22  ;;  %v1999_v61 = vadd.f32 %v1998_v56, %v1997_v31  ;;  %v2005_v13 = vrot.slane %v2004_v4, 1  ;;  %v2057_v9 = vrot.slane %v2056_v46, 4  ;;  %v2042_v18 = vsel %vm1810_vm4, %v8784_v15, 0.0 }
 0x2c6   : > { %v2281_v39 = vmul.f32 0.125, %v1964_v14  ;;  %v2724_v43 = vpack.c.bf16 %v1779_v29, %v1778_v38  ;;  %v8806_v0 = vadd.f32 %v8717_v62, %v8407_v51  ;;  %v11420_v19 = vrot.slane %v8686_v40, 2 }
 0x2c7   : > { %v8800_v23 = vpop.f32.mrf.mxu0  ;;  %v2286_v27 = vmul.f32 0.125, %v1999_v61  ;;  %v2006_v54 = vadd.f32 %v2005_v13, %v2004_v4  ;;  %v2031_v31 = vrot.slane %v2030_v3, 2  ;;  %v2017_v57 = vrot.slane %v8792_v35, 2 }
 0x2c8   : > { %11419 = vst [vmem:[#allocation17_spill] sm:$0xff] %v8806_v0  ;;  %v1983_v24 = vadd.f32 %v11420_v19, %v8686_v40  ;;  %2430 = vrot.lane.b32.xlu1 %v2281_v39, %s8024_s22  ;;  %v8815_v21 = vadd.f32 %v8407_v51, %v8728_v1  ;;  %v11422_v38 = vrot.slane %v8694_v45, 2  ;;  %7573 = vmatprep.mubr.msk.bf16.mxu1 %vm1360_vm3, %v2724_v43  ;;  %v2043_v40 = vrot.slane %v2042_v18, 4 }
 0x2c9   : > { %2440 = vrot.lane.b32.xlu0 %v2286_v27, %s8024_s22  ;;  %v2287_v48 = vmul.f32 0.125, %v2006_v54  ;;  %7574 = vmatmul.mubr.msk.bf16.gmra.mxu1 %vm1360_vm3, %v2725_v16  ;;  %v8824_v39 = vpop.f32.mrf.mxu0  ;;  %v2038_v1 = vrot.slane %v8798_v2, 2  ;;  %v8827_v56 = vadd.f32 %v2057_v9, %v2056_v46  ;;  %v1784_v14 = vmax.f32 %v8806_v0, 0.0 }
 0x2ca   : > { %11421 = vst [vmem:[#allocation18_spill] sm:$0xff] %v8815_v21  ;;  %v1990_v10 = vadd.f32 %v11422_v38, %v8694_v45  ;;  %v1984_v4 = vrot.slane %v1983_v24, 1  ;;  %v2077_v45 = vsel %vm1810_vm4, %v8806_v0, 0.0  ;;  %v1782_v61 = vmax.f32 %v8815_v21, 0.0 }
 0x2cb   : > { %v8835_v43 = vadd.f32 %v8740_v58, %v8407_v51  ;;  %v2063_v16 = vsel %vm1810_vm4, %v8815_v21, 0.0  ;;  %v11424_v9 = vrot.slane %v8725_v11, 2  ;;  %v8845_v27 = vadd.f32 %v8407_v51, %v8754_v34 }
 0x2cc   : > { %v1985_v29 = vadd.f32 %v1984_v4, %v1983_v24  ;;  %v1991_v13 = vrot.slane %v1990_v10, 1  ;;  %2442 = vrot.lane.b32.xlu1 %v2287_v48, %s8024_s22  ;;  %v2032_v54 = vadd.f32 %v2031_v31, %v2030_v3  ;;  %v8847_v19 = vadd.f32 %v2043_v40, %v2042_v18  ;;  %v8850_v4 = vpop.f32.mrf.mxu0 }
 0x2cd   : > { %11423 = vst [vmem:[#allocation19_spill] sm:$0xff] %v8835_v43  ;;  %v2025_v46 = vadd.f32 %v11424_v9, %v8725_v11  ;;  %11425 = vst [vmem:[#allocation20_spill] sm:$0xff] %v8845_v27  ;;  %v1785_v58 = vmax.f32 %v8835_v43, 0.0  ;;  %v2078_v48 = vrot.slane %v2077_v45, 4  ;;  %v2084_v62 = vsel %vm1810_vm4, %v8835_v43, 0.0 }
 0x2ce   : > { %v2284_v24 = vmul.f32 0.125, %v1985_v29  ;;  %v1992_v38 = vadd.f32 %v1991_v13, %v1990_v10  ;;  %v1783_v11 = vmax.f32 %v8845_v27, 0.0  ;;  %v2064_v34 = vrot.slane %v2063_v16, 4  ;;  %v8856_v31 = vpop.f32.mrf.mxu0 }
 0x2cf   : > { %v2026_v0 = vrot.slane %v2025_v46, 1  ;;  %v2085_v3 = vrot.slane %v2084_v62, 4  ;;  %v2727_v18 = vpack.c.bf16 %v1785_v58, %v1784_v14  ;;  %v2059_v10 = vrot.slane %v8827_v56, 2 }
 0x2d0   : > { %2436 = vrot.lane.b32.xlu0 %v2284_v24, %s8024_s22  ;;  %v2285_v9 = vmul.f32 0.125, %v1992_v38  ;;  %v2726_v29 = vpack.c.bf16 %v1783_v11, %v1782_v61  ;;  %v2033_v13 = vrot.slane %v2032_v54, 1  ;;  %v2070_v43 = vsel %vm1810_vm4, %v8845_v27, 0.0 }
 0x2d1   : > { %v2027_v40 = vadd.f32 %v2026_v0, %v2025_v46  ;;  %v8865_v24 = vadd.f32 %v8768_v22, %v8407_v51  ;;  %v11427_v14 = vrot.slane %v8733_v32, 2  ;;  %v8872_v0 = vadd.f32 %v8407_v51, %v8779_v37 }
 0x2d2   : > { %2438 = vrot.lane.b32.xlu1 %v2285_v9, %s8024_s22  ;;  %v2034_v15 = vadd.f32 %v2033_v13, %v2032_v54  ;;  %v2018_v61 = vadd.f32 %v2017_v57, %v8792_v35  ;;  %7577 = vmatprep.mubr.msk.bf16.mxu1 %vm1360_vm3, %v2726_v29  ;;  %v8876_v46 = vadd.f32 %v2078_v48, %v2077_v45  ;;  %v2071_v37 = vrot.slane %v2070_v43, 4 }
 0x2d3   : > { %11426 = vst [vmem:[#allocation21_spill] sm:$0xff] %v8865_v24  ;;  %v2011_v38 = vadd.f32 %v11427_v14, %v8733_v32  ;;  %v2290_v58 = vmul.f32 0.125, %v2027_v40  ;;  %11428 = vst [vmem:[#allocation22_spill] sm:$0xff] %v8872_v0  ;;  %v8878_v11 = vadd.f32 %v2064_v34, %v2063_v16  ;;  %v8880_v22 = vadd.f32 %v2085_v3, %v2084_v62  ;;  %v8885_v32 = vpop.f32.mrf.mxu0 }
 0x2d4   : > { %v2105_v9 = vsel %vm1810_vm4, %v8865_v24, 0.0  ;;  %7578 = vmatmul.mubr.msk.bf16.gmra.mxu1 %vm1360_vm3, %v2727_v18  ;;  %v2291_v54 = vmul.f32 0.125, %v2034_v15  ;;  %v1788_v35 = vmax.f32 %v8865_v24, 0.0  ;;  %v2091_v16 = vsel %vm1810_vm4, %v8872_v0, 0.0 }
 0x2d5   : > { %2448 = vrot.lane.b32.xlu0 %v2290_v58, %s8024_s22  ;;  %v2012_v57 = vrot.slane %v2011_v38, 1  ;;  %v2106_v45 = vrot.slane %v2105_v9, 4  ;;  %v2019_v62 = vrot.slane %v2018_v61, 1  ;;  %v8893_v48 = vadd.f32 %v8790_v6, %v8407_v51  ;;  %v8895_v34 = vpop.f32.mrf.mxu0 }
 0x2d6   : > { %2450 = vrot.lane.b32.xlu1 %v2291_v54, %s8024_s22  ;;  %v1786_v18 = vmax.f32 %v8872_v0, 0.0  ;;  %v2092_v15 = vrot.slane %v2091_v16, 4  ;;  %v2039_v40 = vadd.f32 %v2038_v1, %v8798_v2  ;;  %v8905_v6 = vadd.f32 %v8407_v51, %v8800_v23 }
 0x2d7   : > { %11429 = vst [vmem:[#allocation23_spill] sm:$0xff] %v8893_v48  ;;  %v2013_v3 = vadd.f32 %v2012_v57, %v2011_v38  ;;  %v2020_v29 = vadd.f32 %v2019_v62, %v2018_v61  ;;  %v1789_v13 = vmax.f32 %v8893_v48, 0.0  ;;  %v2112_v14 = vsel %vm1810_vm4, %v8893_v48, 0.0  ;;  %v8914_v62 = vpop.f32.mrf.mxu0 }
 0x2d8   : > { %11430 = vst [vmem:[#allocation24_spill] sm:$0xff] %v8905_v6  ;;  %v2080_v58 = vrot.slane %v8876_v46, 2  ;;  %v2066_v54 = vrot.slane %v8878_v11, 2  ;;  %v8909_v38 = vadd.f32 %v2071_v37, %v2070_v43  ;;  %v8911_v21 = vadd.f32 %v2106_v45, %v2105_v9 }
 0x2d9   : > { %v2288_v57 = vmul.f32 0.125, %v2013_v3  ;;  %v2289_v2 = vmul.f32 0.125, %v2020_v29  ;;  %v2040_v1 = vrot.slane %v2039_v40, 1  ;;  %v1787_v61 = vmax.f32 %v8905_v6, 0.0  ;;  %v8927_v3 = vld [vmem:[%s11342_s3 + $0x2] ss:$0 sm:$0xff] }
 0x2da   : > { %v8917_v48 = vadd.f32 %v2092_v15, %v2091_v16  ;;  %v2113_v51 = vrot.slane %v2112_v14, 4  ;;  %v2729_v23 = vpack.c.bf16 %v1789_v13, %v1788_v35  ;;  %v11431_v24 = vrot.slane %v8794_v28, 2 }
 0x2db   : > { %2444 = vrot.lane.b32.xlu0 %v2288_v57, %s8024_s22  ;;  %v2087_v37 = vrot.slane %v8880_v22, 2  ;;  %2446 = vrot.lane.b32.xlu1 %v2289_v2, %s8024_s22  ;;  %v2041_v9 = vadd.f32 %v2040_v1, %v2039_v40  ;;  %v2728_v45 = vpack.c.bf16 %v1787_v61, %v1786_v18  ;;  %v8931_v16 = vadd.f32 %v8927_v3, %v8824_v39  ;;  %v8945_v39 = vpop.f32.mrf.mxu0 }
 0x2dc   : > { %v2053_v43 = vadd.f32 %v11431_v24, %v8794_v28  ;;  %v2098_v35 = vsel %vm1810_vm4, %v8905_v6, 0.0  ;;  %v2060_v28 = vadd.f32 %v2059_v10, %v8827_v56  ;;  %v8938_v24 = vadd.f32 %v8927_v3, %v8850_v4 }
 0x2dd   : > { %11432 = vst [vmem:[#allocation25_spill] sm:$0xff] %v8931_v16  ;;  %v2073_v18 = vrot.slane %v8909_v38, 2  ;;  %v2108_v40 = vrot.slane %v8911_v21, 2  ;;  %v2292_v29 = vmul.f32 0.125, %v2041_v9  ;;  %v2133_v13 = vsel %vm1810_vm4, %v8931_v16, 0.0  ;;  %7581 = vmatprep.mubr.msk.bf16.mxu1 %vm1360_vm3, %v2728_v45  ;;  %v8962_v27 = vpop.f32.mrf.mxu0 }
 0x2de   : > { %v2054_v15 = vrot.slane %v2053_v43, 1  ;;  %11433 = vst [vmem:[#allocation26_spill] sm:$0xff] %v8938_v24  ;;  %v2094_v57 = vrot.slane %v8917_v48, 2  ;;  %v2114_v2 = vadd.f32 %v2113_v51, %v2112_v14  ;;  %v2061_v10 = vrot.slane %v2060_v28, 1  ;;  %7582 = vmatmul.mubr.msk.bf16.gmra.mxu1 %vm1360_vm3, %v2729_v23 }
 0x2df   : > { %2452 = vrot.lane.b32.xlu0 %v2292_v29, %s8024_s22  ;;  %v2099_v4 = vrot.slane %v2098_v35, 4  ;;  %v2119_v1 = vsel %vm1810_vm4, %v8938_v24, 0.0  ;;  %v11434_v61 = vrot.slane %v8847_v19, 2  ;;  %v2067_v45 = vadd.f32 %v2066_v54, %v8878_v11 }
 0x2e0   : > { %v2055_v56 = vadd.f32 %v2054_v15, %v2053_v43  ;;  %v1792_v0 = vmax.f32 %v8931_v16, 0.0  ;;  %v2134_v14 = vrot.slane %v2133_v13, 4  ;;  %v2062_v51 = vadd.f32 %v2061_v10, %v2060_v28  ;;  %v8971_v16 = vpop.f32.mrf.mxu0 }
 0x2e1   : > { %v2046_v9 = vadd.f32 %v11434_v61, %v8847_v19  ;;  %v2068_v15 = vrot.slane %v2067_v45, 1  ;;  %v8959_v23 = vadd.f32 %v8927_v3, %v8856_v31  ;;  %v2081_v29 = vadd.f32 %v2080_v58, %v8876_v46 }
 0x2e2   : > { %v2294_v6 = vmul.f32 0.125, %v2055_v56  ;;  %v2295_v19 = vmul.f32 0.125, %v2062_v51  ;;  %v1790_v11 = vmax.f32 %v8938_v24, 0.0  ;;  %v2120_v54 = vrot.slane %v2119_v1, 4 }
 0x2e3   : > { %v2047_v43 = vrot.slane %v2046_v9, 1  ;;  %11435 = vst [vmem:[#allocation27_spill] sm:$0xff] %v8959_v23  ;;  %v8968_v56 = vadd.f32 %v8927_v3, %v8885_v32  ;;  %v2115_v28 = vrot.slane %v2114_v2, 2  ;;  %v2069_v61 = vadd.f32 %v2068_v15, %v2067_v45 }
 0x2e4   : > { %2456 = vrot.lane.b32.xlu1 %v2294_v6, %s8024_s22  ;;  %v1793_v31 = vmax.f32 %v8959_v23, 0.0  ;;  %v2100_v46 = vadd.f32 %v2099_v4, %v2098_v35  ;;  %2458 = vrot.lane.b32.xlu0 %v2295_v19, %s8024_s22  ;;  %v2140_v6 = vsel %vm1810_vm4, %v8959_v23, 0.0  ;;  %v2082_v58 = vrot.slane %v2081_v29, 1 }
 0x2e5   : > { %v2048_v10 = vadd.f32 %v2047_v43, %v2046_v9  ;;  %v1791_v51 = vmax.f32 %v8968_v56, 0.0  ;;  %v2296_v12 = vmul.f32 0.125, %v2069_v61  ;;  %v2126_v9 = vsel %vm1810_vm4, %v8968_v56, 0.0 }
 0x2e6   : > { %v2731_v32 = vpack.c.bf16 %v1793_v31, %v1792_v0  ;;  %v2135_v45 = vadd.f32 %v2134_v14, %v2133_v13  ;;  %v2121_v43 = vadd.f32 %v2120_v54, %v2119_v1  ;;  %v2083_v15 = vadd.f32 %v2082_v58, %v2081_v29 }
 0x2e7   : > { %v2293_v24 = vmul.f32 0.125, %v2048_v10  ;;  %v2730_v20 = vpack.c.bf16 %v1791_v51, %v1790_v11  ;;  %v2088_v35 = vadd.f32 %v2087_v37, %v8880_v22  ;;  %v2074_v4 = vadd.f32 %v2073_v18, %v8909_v38  ;;  %v8984_v10 = vpop.f32.mrf.mxu0 }
 0x2e8   : > { %v2095_v19 = vadd.f32 %v2094_v57, %v8917_v48  ;;  %v2109_v23 = vadd.f32 %v2108_v40, %v8911_v21  ;;  %v2101_v0 = vrot.slane %v2100_v46, 2  ;;  %2460 = vrot.lane.b32.xlu0 %v2296_v12, %s8024_s22  ;;  %v2141_v61 = vrot.slane %v2140_v6, 4 }
 0x2e9   : > { %2454 = vrot.lane.b32.xlu1 %v2293_v24, %s8024_s22  ;;  %v2298_v13 = vmul.f32 0.125, %v2083_v15  ;;  %v2127_v1 = vrot.slane %v2126_v9, 4  ;;  %7585 = vmatprep.mubr.msk.bf16.mxu1 %vm1360_vm3, %v2730_v20  ;;  %v2089_v14 = vrot.slane %v2088_v35, 1  ;;  %v2075_v24 = vrot.slane %v2074_v4, 1  ;;  %v8990_v57 = vpop.f32.mrf.mxu0 }
 0x2ea   : > { %v2096_v29 = vrot.slane %v2095_v19, 1  ;;  %v2110_v22 = vrot.slane %v2109_v23, 1  ;;  %7586 = vmatmul.mubr.msk.bf16.gmra.mxu1 %vm1360_vm3, %v2731_v32  ;;  %v2136_v38 = vrot.slane %v2135_v45, 2  ;;  %v2122_v48 = vrot.slane %v2121_v43, 2 }
 0x2eb   : > { %v2116_v37 = vadd.f32 %v2115_v28, %v2114_v2  ;;  %v2090_v21 = vadd.f32 %v2089_v14, %v2088_v35  ;;  %v2076_v18 = vadd.f32 %v2075_v24, %v2074_v4  ;;  %v8994_v20 = vadd.f32 %v8927_v3, %v8895_v34 }
 0x2ec   : > { %v2097_v40 = vadd.f32 %v2096_v29, %v2095_v19  ;;  %v2111_v12 = vadd.f32 %v2110_v22, %v2109_v23  ;;  %v8998_v54 = vadd.f32 %v8927_v3, %v8914_v62  ;;  %v2102_v31 = vadd.f32 %v2101_v0, %v2100_v46  ;;  %v1702_v62 = vpop.f32.mrf.mxu0 }
 0x2ed   : > { %2464 = vrot.lane.b32.xlu1 %v2298_v13, %s8024_s22  ;;  %v2117_v11 = vrot.slane %v2116_v37, 1  ;;  %v2142_v58 = vadd.f32 %v2141_v61, %v2140_v6  ;;  %v2128_v2 = vadd.f32 %v2127_v1, %v2126_v9  ;;  %v2299_v28 = vmul.f32 0.125, %v2090_v21 }
 0x2ee   : > { %v2297_v51 = vmul.f32 0.125, %v2076_v18  ;;  %v2300_v32 = vmul.f32 0.125, %v2097_v40  ;;  %v2302_v15 = vmul.f32 0.125, %v2111_v12  ;;  %v2103_v35 = vrot.slane %v2102_v31, 1  ;;  %v7531_v14 = vpop.f32.mrf.mxu0 }
 0x2ef   : > { %2466 = vrot.lane.b32.xlu0 %v2299_v28, %s8024_s22  ;;  %v2118_v23 = vadd.f32 %v2117_v11, %v2116_v37  ;;  %v9004_v34 = vadd.f32 %v8927_v3, %v8945_v39  ;;  %v2123_v4 = vadd.f32 %v2122_v48, %v2121_v43  ;;  %v1796_v46 = vmax.f32 %v8994_v20, 0.0 }
 0x2f0   : > { %v1794_v6 = vmax.f32 %v8998_v54, 0.0  ;;  %v9010_v9 = vadd.f32 %v8927_v3, %v8962_v27  ;;  %v2137_v19 = vadd.f32 %v2136_v38, %v2135_v45  ;;  %v2143_v0 = vrot.slane %v2142_v58, 2  ;;  %v1715_v40 = vpop.f32.mrf.mxu0 }
 0x2f1   : > { %2462 = vrot.lane.b32.xlu1 %v2297_v51, %s8024_s22  ;;  %v2129_v61 = vrot.slane %v2128_v2, 2  ;;  %v2104_v13 = vadd.f32 %v2103_v35, %v2102_v31  ;;  %v1797_v1 = vmax.f32 %v9004_v34, 0.0  ;;  %v2124_v24 = vrot.slane %v2123_v4, 1 }
 0x2f2   : > { %v1795_v39 = vmax.f32 %v9010_v9, 0.0  ;;  %v2154_v43 = vsel %vm1810_vm4, %v9010_v9, 0.0  ;;  %v2303_v29 = vmul.f32 0.125, %v2118_v23  ;;  %v2138_v48 = vrot.slane %v2137_v19, 1 }
 0x2f3   : > { %2468 = vrot.lane.b32.xlu0 %v2300_v32, %s8024_s22  ;;  %v2301_v27 = vmul.f32 0.125, %v2104_v13  ;;  %v2733_v22 = vpack.c.bf16 %v1797_v1, %v1796_v46  ;;  %v2125_v45 = vadd.f32 %v2124_v24, %v2123_v4  ;;  %v2155_v37 = vrot.slane %v2154_v43, 4  ;;  %v7532_v46 = vpop.f32.mrf.mxu0 }
 0x2f4   : > { %v2732_v38 = vpack.c.bf16 %v1795_v39, %v1794_v6  ;;  %v2144_v21 = vadd.f32 %v2143_v0, %v2142_v58  ;;  %v2130_v18 = vadd.f32 %v2129_v61, %v2128_v2  ;;  %v2139_v12 = vadd.f32 %v2138_v48, %v2137_v19 }
 0x2f5   : > { %2472 = vrot.lane.b32.xlu1 %v2302_v15, %s8024_s22  ;;  %v9021_v11 = vadd.f32 %v8927_v3, %v8971_v16  ;;  %v9025_v31 = vadd.f32 %v8927_v3, %v8984_v10  ;;  %v2393_v28 = vpop.permute.xlu1 %2392  ;;  %v2304_v51 = vmul.f32 0.125, %v2125_v45  ;;  %v2147_v32 = vsel %vm1810_vm4, %v8998_v54, 0.0  ;;  %v7746_v16 = vld [vmem:[%s11341_s2 + $0x80] sm:$0xff]  }
 0x2f6   : > { %7589 = vmatprep.mubr.msk.bf16.mxu1 %vm1360_vm3, %v2732_v38  ;;  %v2145_v58 = vrot.slane %v2144_v21, 1  ;;  %v2131_v2 = vrot.slane %v2130_v18, 1  ;;  %v2306_v15 = vmul.f32 0.125, %v2139_v12  ;;  %v2161_v10 = vsel %vm1810_vm4, %v8994_v20, 0.0  ;;  %7607 = vmatprep.subr.bf16.mxu0 %v7746_v16 }
 0x2f7   : > { %2474 = vrot.lane.b32.xlu0 %v2303_v29, %s8024_s22  ;;  %7590 = vmatmul.mubr.msk.bf16.gmra.mxu1 %vm1360_vm3, %v2733_v22  ;;  %v2156_v23 = vadd.f32 %v2155_v37, %v2154_v43  ;;  %v1800_v6 = vmax.f32 %v9021_v11, 0.0  ;;  %v1798_v19 = vmax.f32 %v9025_v31, 0.0  ;;  %v9041_v0 = vadd.f32 %v8927_v3, %v8990_v57  ;;  %v1718_v22 = vpop.f32.mrf.mxu0 }
 0x2f8   : > { %v2146_v35 = vadd.f32 %v2145_v58, %v2144_v21  ;;  %v2132_v4 = vadd.f32 %v2131_v2, %v2130_v18  ;;  %v9044_v61 = vadd.f32 %v8927_v3, %v1702_v62  ;;  %v2148_v13 = vrot.slane %v2147_v32, 4  ;;  %v2389_v29 = vpop.permute.xlu0 %2388  ;;  %7608 = vmatpush3.bf16.msra.mxu0 %v7746_v16 }
 0x2f9   : > { %2470 = vrot.lane.b32.xlu1 %v2301_v27, %s8024_s22  ;;  %v1801_v39 = vmax.f32 %v9041_v0, 0.0  ;;  %v2162_v57 = vrot.slane %v2161_v10, 4  ;;  %v2157_v45 = vrot.slane %v2156_v23, 2  ;;  %v2582_v48 = vadd.f32 %v2393_v28, %v8410_v53 }
 0x2fa   : > { %v2307_v1 = vmul.f32 0.125, %v2146_v35  ;;  %v2305_v24 = vmul.f32 0.125, %v2132_v4  ;;  %v1799_v43 = vmax.f32 %v9044_v61, 0.0  ;;  %v2149_v37 = vadd.f32 %v2148_v13, %v2147_v32 }
 0x2fb   : > { %2476 = vrot.lane.b32.xlu0 %v2304_v51, %s8024_s22  ;;  %v2395_v27 = vpop.permute.xlu1 %2394  ;;  %v2735_v62 = vpack.c.bf16 %v1801_v39, %v1800_v6  ;;  %v2168_v21 = vsel %vm1810_vm4, %v9004_v34, 0.0  ;;  %v9058_v12 = vadd.f32 %v8927_v3, %v7531_v14  ;;  %v9061_v51 = vadd.f32 %v8927_v3, %v1715_v40  ;;  %v7535_v14 = vpop.f32.mrf.mxu0 }
 0x2fc   : > { %v2734_v38 = vpack.c.bf16 %v1799_v43, %v1798_v19  ;;  %v2583_v18 = vadd.f32 %v2395_v27, %v8420_v60  ;;  %v9064_v53 = vadd.f32 %v8927_v3, %v7532_v46  ;;  %v9067_v28 = vadd.f32 %v8927_v3, %v1718_v22 }
 0x2fd   : > { %2480 = vrot.lane.b32.xlu1 %v2306_v15, %s8024_s22  ;;  %v2163_v58 = vadd.f32 %v2162_v57, %v2161_v10  ;;  %v2182_v2 = vsel %vm1810_vm4, %v9044_v61, 0.0  ;;  %v2580_v60 = vadd.f32 %v2389_v29, %v8415_v55  ;;  %v2646_v15 = vmax.f32 %v2582_v48, 0.0  ;;  %v1731_v43 = vpop.f32.mrf.mxu0 }
 0x2fe   : > { %7593 = vmatprep.mubr.msk.bf16.mxu1 %vm1360_vm3, %v2734_v38  ;;  %v2647_v32 = vmax.f32 %v2583_v18, 0.0  ;;  %v1804_v40 = vmax.f32 %v9058_v12, 0.0  ;;  %v1802_v16 = vmax.f32 %v9061_v51, 0.0  ;;  %v2158_v4 = vadd.f32 %v2157_v45, %v2156_v23 }
 0x2ff   : > { %2482 = vrot.lane.b32.xlu0 %v2307_v1, %s8024_s22  ;;  %7594 = vmatmul.mubr.msk.bf16.gmra.mxu1 %vm1360_vm3, %v2735_v62  ;;  %v2169_v46 = vrot.slane %v2168_v21, 4  ;;  %v1805_v10 = vmax.f32 %v9064_v53, 0.0  ;;  %v2150_v19 = vrot.slane %v2149_v37, 2  ;;  %v1803_v13 = vmax.f32 %v9067_v28, 0.0 }
 0x300   : > { %v3148_v55 = vpack.c.bf16 %v2647_v32, %v2646_v15  ;;  %v2164_v1 = vrot.slane %v2163_v58, 2  ;;  %v2644_v29 = vmax.f32 %v2580_v60, 0.0  ;;  %v2159_v23 = vrot.slane %v2158_v4, 1 }
 0x301   : > { %2478 = vrot.lane.b32.xlu1 %v2305_v24, %s8024_s22  ;;  %v2183_v24 = vrot.slane %v2182_v2, 4  ;;  %v2737_v27 = vpack.c.bf16 %v1805_v10, %v1804_v40  ;;  %v2736_v57 = vpack.c.bf16 %v1803_v13, %v1802_v16  ;;  %v2170_v45 = vadd.f32 %v2169_v46, %v2168_v21  ;;  %v7536_v40 = vpop.f32.mrf.mxu0 }
 0x302   : > { %v2391_v35 = vpop.permute.xlu0 %2390  ;;  %v2175_v62 = vsel %vm1810_vm4, %v9025_v31, 0.0  ;;  %v2160_v18 = vadd.f32 %v2159_v23, %v2158_v4  ;;  %v2151_v32 = vadd.f32 %v2150_v19, %v2149_v37  ;;  %v2165_v15 = vadd.f32 %v2164_v1, %v2163_v58 }
 0x303   : > { %v2581_v6 = vadd.f32 %v2391_v35, %v8425_v63  ;;  %v2189_v63 = vsel %vm1810_vm4, %v9021_v11, 0.0  ;;  %7597 = vmatprep.mubr.msk.bf16.mxu1 %vm1360_vm3, %v2736_v57  ;;  %v2184_v60 = vadd.f32 %v2183_v24, %v2182_v2  ;;  %v2176_v46 = vrot.slane %v2175_v62, 4 }
 0x304   : > { %v2190_v16 = vrot.slane %v2189_v63, 4  ;;  %v2309_v21 = vmul.f32 0.125, %v2160_v18  ;;  %v2152_v35 = vrot.slane %v2151_v32, 1  ;;  %v2166_v13 = vrot.slane %v2165_v15, 1 }
 0x305   : > { %v2645_v39 = vmax.f32 %v2581_v6, 0.0  ;;  %3223 = vrot.lane.b32.xlu1 %v3148_v55, %s8024_s22  ;;  %v2171_v55 = vrot.slane %v2170_v45, 2  ;;  %v9089_v2 = vadd.f32 %v8927_v3, %v7535_v14  ;;  %v9092_v58 = vadd.f32 %v8927_v3, %v7536_v40 }
 0x306   : > { %v2401_v22 = vpop.permute.xlu0 %2400  ;;  %v2153_v37 = vadd.f32 %v2152_v35, %v2151_v32  ;;  %v2185_v4 = vrot.slane %v2184_v60, 2  ;;  %v2167_v1 = vadd.f32 %v2166_v13, %v2165_v15  ;;  %v9096_v24 = vadd.f32 %v8927_v3, %v1731_v43 }
 0x307   : > { %v3147_v48 = vpack.c.bf16 %v2645_v39, %v2644_v29  ;;  %7598 = vmatmul.mubr.msk.bf16.gmra.mxu1 %vm1360_vm3, %v2737_v27  ;;  %v2586_v19 = vadd.f32 %v2401_v22, %v8431_v7  ;;  %v2191_v39 = vadd.f32 %v2190_v16, %v2189_v63  ;;  %v2177_v57 = vadd.f32 %v2176_v46, %v2175_v62 }
 0x308   : > { %v2308_v27 = vmul.f32 0.125, %v2153_v37  ;;  %v2310_v14 = vmul.f32 0.125, %v2167_v1  ;;  %v1808_v18 = vmax.f32 %v9089_v2, 0.0  ;;  %v1809_v7 = vmax.f32 %v9092_v58, 0.0 }
 0x309   : > { %v2403_v38 = vpop.permute.xlu1 %2402  ;;  %3221 = vrot.lane.b32.xlu0 %v3147_v48, %s8024_s22  ;;  %2486 = vrot.lane.b32.xlu1 %v2309_v21, %s8024_s22  ;;  %v2650_v22 = vmax.f32 %v2586_v19, 0.0  ;;  %v2172_v62 = vadd.f32 %v2171_v55, %v2170_v45  ;;  %v2186_v32 = vadd.f32 %v2185_v4, %v2184_v60  ;;  %v2192_v15 = vrot.slane %v2191_v39, 2 }
 0x30a   : > { %v2587_v6 = vadd.f32 %v2403_v38, %v8444_v25  ;;  %v1734_v25 = vpop.f32.mrf.mxu0  ;;  %v2739_v37 = vpack.c.bf16 %v1809_v7, %v1808_v18 }
 0x30b   : > { %v9104_v43 = vadd.f32 %v8927_v3, %v1734_v25  ;;  %v2173_v46 = vrot.slane %v2172_v62, 1  ;;  %v2187_v55 = vrot.slane %v2186_v32, 1 }
 0x30c   : > { %v2397_v10 = vpop.permute.xlu0 %2396  ;;  %v2651_v23 = vmax.f32 %v2587_v6, 0.0  ;;  %v2178_v6 = vrot.slane %v2177_v57, 2 }
 0x30d   : > { %v2584_v29 = vadd.f32 %v2397_v10, %v8439_v41  ;;  %2484 = vrot.lane.b32.xlu0 %v2308_v27, %s8024_s22  ;;  %2488 = vrot.lane.b32.xlu1 %v2310_v14, %s8024_s22  ;;  %v1806_v41 = vmax.f32 %v9096_v24, 0.0  ;;  %v1807_v3 = vmax.f32 %v9104_v43, 0.0  ;;  %v2174_v60 = vadd.f32 %v2173_v46, %v2172_v62 }
 0x30e   : > { %v3150_v35 = vpack.c.bf16 %v2651_v23, %v2650_v22  ;;  %v2210_v27 = vsel %vm1810_vm4, %v9067_v28, 0.0  ;;  %v2217_v22 = vsel %vm1810_vm4, %v9058_v12, 0.0 }
 0x30f   : > { %v2648_v40 = vmax.f32 %v2584_v29, 0.0  ;;  %v2738_v45 = vpack.c.bf16 %v1807_v3, %v1806_v41  ;;  %v2311_v23 = vmul.f32 0.125, %v2174_v60  ;;  %v2211_v41 = vrot.slane %v2210_v27, 4 }
 0x310   : > { %v2399_v38 = vpop.permute.xlu1 %2398 }
 0x311   : > { %v2585_v48 = vadd.f32 %v2399_v38, %v8451_v33  ;;  %v2196_v33 = vsel %vm1810_vm4, %v9041_v0, 0.0  ;;  %3227 = vrot.lane.b32.xlu1 %v3150_v35, %s8024_s22  ;;  %7601 = vmatprep.mubr.msk.bf16.mxu1 %vm1360_vm3, %v2738_v45  ;;  %v2188_v38 = vadd.f32 %v2187_v55, %v2186_v32  ;;  %v2212_v46 = vadd.f32 %v2211_v41, %v2210_v27 }
 0x312   : > { %v2409_v63 = vpop.permute.xlu0 %2408  ;;  %v2197_v4 = vrot.slane %v2196_v33, 4  ;;  %7602 = vmatmul.mubr.msk.bf16.gmra.mxu1 %vm1360_vm3, %v2739_v37 }
 0x313   : > { %v2649_v16 = vmax.f32 %v2585_v48, 0.0  ;;  %v2590_v21 = vadd.f32 %v2409_v63, %v8459_v44  ;;  %v2193_v44 = vadd.f32 %v2192_v15, %v2191_v39  ;;  %v2179_v48 = vadd.f32 %v2178_v6, %v2177_v57 }
 0x314   : > { %v2198_v18 = vadd.f32 %v2197_v4, %v2196_v33  ;;  %v2203_v63 = vsel %vm1810_vm4, %v9061_v51, 0.0  ;;  %v2313_v15 = vmul.f32 0.125, %v2188_v38 }
 0x315   : > { %v2411_v10 = vpop.permute.xlu1 %2410  ;;  %v3149_v13 = vpack.c.bf16 %v2649_v16, %v2648_v40  ;;  %v2654_v25 = vmax.f32 %v2590_v21, 0.0  ;;  %v2194_v14 = vrot.slane %v2193_v44, 1  ;;  %v2180_v33 = vrot.slane %v2179_v48, 1 }
 0x316   : > { %v2591_v19 = vadd.f32 %v2411_v10, %v8474_v59  ;;  %v2199_v40 = vrot.slane %v2198_v18, 2  ;;  %v2218_v16 = vrot.slane %v2217_v22, 4  ;;  %v2204_v3 = vrot.slane %v2203_v63, 4 }
 0x317   : > { %v2405_v1 = vpop.permute.xlu0 %2404  ;;  %3225 = vrot.lane.b32.xlu0 %v3149_v13, %s8024_s22  ;;  %v2195_v57 = vadd.f32 %v2194_v14, %v2193_v44 }
 0x318   : > { %v2655_v29 = vmax.f32 %v2591_v19, 0.0  ;;  %v2588_v7 = vadd.f32 %v2405_v1, %v8468_v52  ;;  %v2219_v45 = vadd.f32 %v2218_v16, %v2217_v22  ;;  %v2200_v4 = vadd.f32 %v2199_v40, %v2198_v18 }
 0x319   : > { %v2314_v19 = vmul.f32 0.125, %v2195_v57  ;;  %v2213_v1 = vrot.slane %v2212_v46, 2 }
 0x31a   : > { %v3152_v59 = vpack.c.bf16 %v2655_v29, %v2654_v25  ;;  %v2652_v21 = vmax.f32 %v2588_v7, 0.0  ;;  %v2224_v29 = vsel %vm1810_vm4, %v9064_v53, 0.0  ;;  %v2201_v38 = vrot.slane %v2200_v4, 1 }
 0x31b   : > { %2490 = vrot.lane.b32.xlu0 %v2311_v23, %s8024_s22  ;;  %v2220_v23 = vrot.slane %v2219_v45, 2  ;;  %v2214_v18 = vadd.f32 %v2213_v1, %v2212_v46  ;;  %v2225_v7 = vrot.slane %v2224_v29, 4  ;;  %v2231_v46 = vsel %vm1810_vm4, %v9096_v24, 0.0 }
 0x31c   : > { %v2417_v39 = vpop.permute.xlu0 %2416  ;;  %3231 = vrot.lane.b32.xlu1 %v3152_v59, %s8024_s22  ;;  %v2407_v62 = vpop.permute.xlu1 %2406  ;;  %v2232_v1 = vrot.slane %v2231_v46, 4 }
 0x31d   : > { %v2589_v32 = vadd.f32 %v2407_v62, %v8482_v8  ;;  %v2594_v35 = vadd.f32 %v2417_v39, %v8495_v26  ;;  %v2181_v8 = vadd.f32 %v2180_v33, %v2179_v48  ;;  %v2205_v26 = vadd.f32 %v2204_v3, %v2203_v63 }
 0x31e   : > { %v2202_v62 = vadd.f32 %v2201_v38, %v2200_v4  ;;  %v2215_v40 = vrot.slane %v2214_v18, 1 }
 0x31f   : > { %v2653_v52 = vmax.f32 %v2589_v32, 0.0  ;;  %v2658_v60 = vmax.f32 %v2594_v35, 0.0  ;;  %v2312_v44 = vmul.f32 0.125, %v2181_v8  ;;  %v2206_v14 = vrot.slane %v2205_v26, 2 }
 0x320   : > { %2494 = vrot.lane.b32.xlu1 %v2313_v15, %s8024_s22  ;;  %v2419_v6 = vpop.permute.xlu1 %2418  ;;  %v2221_v32 = vadd.f32 %v2220_v23, %v2219_v45 }
 0x321   : > { %v2595_v10 = vadd.f32 %v2419_v6, %v8510_v47  ;;  %v2413_v13 = vpop.permute.xlu0 %2412  ;;  %v3151_v37 = vpack.c.bf16 %v2653_v52, %v2652_v21  ;;  %v2207_v16 = vadd.f32 %v2206_v14, %v2205_v26  ;;  %v2226_v21 = vadd.f32 %v2225_v7, %v2224_v29 }
 0x322   : > { %v2592_v47 = vadd.f32 %v2413_v13, %v8499_v30  ;;  %v2238_v30 = vsel %vm1810_vm4, %v9104_v43, 0.0  ;;  %v2233_v7 = vadd.f32 %v2232_v1, %v2231_v46  ;;  %v11441_v1 = vld [vmem:[#allocation6_spill] sm:$0xff] }
 0x323   : > { %v2659_v55 = vmax.f32 %v2595_v10, 0.0  ;;  %3229 = vrot.lane.b32.xlu0 %v3151_v37, %s8024_s22  ;;  %v2222_v10 = vrot.slane %v2221_v32, 1  ;;  %v2208_v8 = vrot.slane %v2207_v16, 1  ;;  %v2227_v4 = vrot.slane %v2226_v21, 2 }
 0x324   : > { %2496 = vrot.lane.b32.xlu1 %v2314_v19, %s8024_s22  ;;  %v2656_v39 = vmax.f32 %v2592_v47, 0.0  ;;  %v2216_v19 = vadd.f32 %v2215_v40, %v2214_v18 }
 0x325   : > { %v3154_v25 = vpack.c.bf16 %v2659_v55, %v2658_v60  ;;  %v2223_v47 = vadd.f32 %v2222_v10, %v2221_v32  ;;  %v2228_v18 = vadd.f32 %v2227_v4, %v2226_v21 }
 0x326   : > { %v2425_v27 = vpop.permute.xlu0 %2424 }
 0x327   : > { %v2415_v59 = vpop.permute.xlu1 %2414  ;;  %2492 = vrot.lane.b32.xlu0 %v2312_v44, %s8024_s22  ;;  %v2598_v63 = vadd.f32 %v2425_v27, %v8532_v5  ;;  %v2245_v5 = vsel %vm1810_vm4, %v9089_v2, 0.0  ;;  %v2209_v27 = vadd.f32 %v2208_v8, %v2207_v16  ;;  %v2229_v21 = vrot.slane %v2228_v18, 1 }
 0x328   : > { %3235 = vrot.lane.b32.xlu1 %v3154_v25, %s8024_s22  ;;  %v2593_v48 = vadd.f32 %v2415_v59, %v8514_v49  ;;  %v2239_v49 = vrot.slane %v2238_v30, 4  ;;  %v2246_v26 = vrot.slane %v2245_v5, 4  ;;  %v2317_v25 = vmul.f32 0.125, %v2216_v19  ;;  %v11436_v59 = vld [vmem:[#allocation2_spill] sm:$0xff] }
 0x329   : > { %v2662_v52 = vmax.f32 %v2598_v63, 0.0  ;;  %v2316_v63 = vmul.f32 0.125, %v2209_v27  ;;  %v2230_v8 = vadd.f32 %v2229_v21, %v2228_v18 }
 0x32a   : > { %v2657_v22 = vmax.f32 %v2593_v48, 0.0  ;;  %v2240_v60 = vadd.f32 %v2239_v49, %v2238_v30  ;;  %v2247_v48 = vadd.f32 %v2246_v26, %v2245_v5  ;;  %v11437_v30 = vld [vmem:[#allocation3_spill] sm:$0xff]  ;;  %v2234_v49 = vrot.slane %v2233_v7, 2  ;;  %v11439_v5 = vld [vmem:[#allocation5_spill] sm:$0xff] }
 0x32b   : > { %v2427_v41 = vpop.permute.xlu1 %2426 }
 0x32c   : > { %v2599_v15 = vadd.f32 %v2427_v41, %v8551_v42  ;;  %v2421_v57 = vpop.permute.xlu0 %2420  ;;  %v3153_v33 = vpack.c.bf16 %v2657_v22, %v2656_v39  ;;  %v2315_v42 = vmul.f32 0.125, %v2202_v62  ;;  %v2241_v23 = vrot.slane %v2240_v60, 2 }
 0x32d   : > { %v2596_v3 = vadd.f32 %v2421_v57, %v8540_v17  ;;  %v2318_v22 = vmul.f32 0.125, %v2223_v47  ;;  %v2252_v57 = vsel %vm1810_vm4, %v9092_v58, 0.0 }
 0x32e   : > { %v2663_v35 = vmax.f32 %v2599_v15, 0.0  ;;  %3233 = vrot.lane.b32.xlu0 %v3153_v33, %s8024_s22  ;;  %v2248_v15 = vrot.slane %v2247_v48, 2  ;;  %v11438_v33 = vld [vmem:[#allocation4_spill] sm:$0xff] }
 0x32f   : > { %v2660_v55 = vmax.f32 %v2596_v3, 0.0 }
 0x330   : > { %v3156_v37 = vpack.c.bf16 %v2663_v35, %v2662_v52 }
 0x331   : > { %v2423_v6 = vpop.permute.xlu1 %2422  ;;  %v2433_v45 = vpop.permute.xlu0 %2432 }
 0x332   : > { %v2597_v13 = vadd.f32 %v2423_v6, %v8555_v50  ;;  %2498 = vrot.lane.b32.xlu0 %v2315_v42, %s8024_s22  ;;  %3239 = vrot.lane.b32.xlu1 %v3156_v37, %s8024_s22  ;;  %v2602_v38 = vadd.f32 %v2433_v45, %v11436_v59  ;;  %v2253_v6 = vrot.slane %v2252_v57, 4  ;;  %v2249_v45 = vadd.f32 %v2248_v15, %v2247_v48 }
 0x334   : > { %v2661_v17 = vmax.f32 %v2597_v13, 0.0  ;;  %v2666_v62 = vmax.f32 %v2602_v38, 0.0  ;;  %v11440_v13 = vld [vmem:[#allocation7_spill] sm:$0xff]  ;;  %v2254_v26 = vadd.f32 %v2253_v6, %v2252_v57 }
 0x335   : > { %v2435_v44 = vpop.permute.xlu1 %2434 }
 0x336   : > { %v3155_v29 = vpack.c.bf16 %v2661_v17, %v2660_v55  ;;  %v2603_v50 = vadd.f32 %v2435_v44, %v8599_v36  ;;  %2502 = vrot.lane.b32.xlu1 %v2317_v25, %s8024_s22  ;;  %v2242_v36 = vadd.f32 %v2241_v23, %v2240_v60  ;;  %v2235_v60 = vadd.f32 %v2234_v49, %v2233_v7  ;;  %v11442_v23 = vld [vmem:[#allocation8_spill] sm:$0xff] }
 0x337   : > { %v2429_v14 = vpop.permute.xlu0 %2428 }
 0x338   : > { %3237 = vrot.lane.b32.xlu0 %v3155_v29, %s8024_s22  ;;  %v2667_v39 = vmax.f32 %v2603_v50, 0.0  ;;  %v2600_v41 = vadd.f32 %v2429_v14, %v11437_v30  ;;  %v2243_v10 = vrot.slane %v2242_v36, 1  ;;  %v2319_v29 = vmul.f32 0.125, %v2230_v8 }
 0x339   : > { %v2250_v50 = vrot.slane %v2249_v45, 1  ;;  %v2236_v38 = vrot.slane %v2235_v60, 1  ;;  %v2255_v14 = vrot.slane %v2254_v26, 2 }
 0x33a   : > { %v2431_v32 = vpop.permute.xlu1 %2430  ;;  %2504 = vrot.lane.b32.xlu1 %v2318_v22, %s8024_s22  ;;  %v3158_v52 = vpack.c.bf16 %v2667_v39, %v2666_v62  ;;  %v2664_v35 = vmax.f32 %v2600_v41, 0.0  ;;  %v2244_v27 = vadd.f32 %v2243_v10, %v2242_v36  ;;  %v11443_v62 = vld [vmem:[#allocation9_spill] sm:$0xff]  ;;  %v11444_v36 = vld [vmem:[#allocation11_spill] sm:$0xff] }
 0x33b   : > { %v2601_v40 = vadd.f32 %v2431_v32, %v11438_v33  ;;  %v2441_v16 = vpop.permute.xlu0 %2440  ;;  %v2251_v22 = vadd.f32 %v2250_v50, %v2249_v45  ;;  %v2237_v41 = vadd.f32 %v2236_v38, %v2235_v60  ;;  %v2256_v57 = vadd.f32 %v2255_v14, %v2254_v26  ;;  %v11447_v60 = vld [vmem:[#allocation13_spill] sm:$0xff]  ;;  %v11448_v26 = vld [vmem:[#allocation15_spill] sm:$0xff]  ;;  %v11450_v50 = vld [vmem:[#allocation16_spill] sm:$0xff] }
 0x33c   : > { %2500 = vrot.lane.b32.xlu0 %v2316_v63, %s8024_s22  ;;  %v2606_v46 = vadd.f32 %v2441_v16, %v11439_v5  ;;  %v2321_v39 = vmul.f32 0.125, %v2244_v27  ;;  %v11446_v5 = vld [vmem:[#allocation12_spill] sm:$0xff] }
 0x33d   : > { %v2665_v3 = vmax.f32 %v2601_v40, 0.0  ;;  %v2322_v40 = vmul.f32 0.125, %v2251_v22  ;;  %v2320_v21 = vmul.f32 0.125, %v2237_v41  ;;  %v2257_v6 = vrot.slane %v2256_v57, 1 }
 0x33e   : > { %v2443_v42 = vpop.permute.xlu1 %2442  ;;  %3243 = vrot.lane.b32.xlu1 %v3158_v52, %s8024_s22  ;;  %v2670_v55 = vmax.f32 %v2606_v46, 0.0  ;;  %v11445_v52 = vld [vmem:[#allocation10_spill] sm:$0xff] }
 0x33f   : > { %v2607_v37 = vadd.f32 %v2443_v42, %v11440_v13  ;;  %v3157_v19 = vpack.c.bf16 %v2665_v3, %v2664_v35  ;;  %v2258_v8 = vadd.f32 %v2257_v6, %v2256_v57  ;;  %v11456_v6 = vld [vmem:[#allocation21_spill] sm:$0xff] }
 0x341   : > { %v2671_v17 = vmax.f32 %v2607_v37, 0.0  ;;  %3241 = vrot.lane.b32.xlu0 %v3157_v19, %s8024_s22 }
 0x342   : > { %v2437_v4 = vpop.permute.xlu0 %2436 }
 0x343   : > { %v2604_v44 = vadd.f32 %v2437_v4, %v11441_v1  ;;  %v3160_v47 = vpack.c.bf16 %v2671_v17, %v2670_v55  ;;  %v2323_v4 = vmul.f32 0.125, %v2258_v8  ;;  %v11458_v8 = vld [vmem:[#allocation24_spill] sm:$0xff] }
 0x344   : > { %v2439_v25 = vpop.permute.xlu1 %2438 }
 0x345   : > { %v2605_v59 = vadd.f32 %v2439_v25, %v11442_v23  ;;  %2506 = vrot.lane.b32.xlu0 %v2319_v29, %s8024_s22  ;;  %3247 = vrot.lane.b32.xlu1 %v3160_v47, %s8024_s22  ;;  %v2668_v48 = vmax.f32 %v2604_v44, 0.0  ;;  %v11449_v44 = vld [vmem:[#allocation14_spill] sm:$0xff] }
 0x347   : > { %v2669_v18 = vmax.f32 %v2605_v59, 0.0  ;;  %v2449_v7 = vpop.permute.xlu0 %2448 }
 0x348   : > { %v2451_v63 = vpop.permute.xlu1 %2450  ;;  %v2610_v32 = vadd.f32 %v2449_v7, %v11443_v62 }
 0x349   : > { %v3159_v30 = vpack.c.bf16 %v2669_v18, %v2668_v48  ;;  %v2611_v15 = vadd.f32 %v2451_v63, %v11444_v36  ;;  %2510 = vrot.lane.b32.xlu1 %v2321_v39, %s8024_s22  ;;  %v11451_v39 = vld [vmem:[#allocation18_spill] sm:$0xff]  ;;  %v11452_v63 = vld [vmem:[#allocation17_spill] sm:$0xff] }
 0x34a   : > { %v2674_v49 = vmax.f32 %v2610_v32, 0.0  ;;  %v11453_v32 = vld [vmem:[#allocation19_spill] sm:$0xff] }
 0x34b   : > { %3245 = vrot.lane.b32.xlu0 %v3159_v30, %s8024_s22  ;;  %v2675_v33 = vmax.f32 %v2611_v15, 0.0  ;;  %v11454_v15 = vld [vmem:[#allocation20_spill] sm:$0xff] }
 0x34d   : > { %v2445_v16 = vpop.permute.xlu0 %2444  ;;  %v2447_v3 = vpop.permute.xlu1 %2446  ;;  %2512 = vrot.lane.b32.xlu1 %v2322_v40, %s8024_s22  ;;  %v3162_v42 = vpack.c.bf16 %v2675_v33, %v2674_v49 }
 0x34e   : > { %v2608_v35 = vadd.f32 %v2445_v16, %v11445_v52  ;;  %v2609_v46 = vadd.f32 %v2447_v3, %v11446_v5  ;;  %v11455_v5 = vld [vmem:[#allocation22_spill] sm:$0xff] }
 0x34f   : > { %2508 = vrot.lane.b32.xlu0 %v2320_v21, %s8024_s22 }
 0x350   : > { %v2672_v10 = vmax.f32 %v2608_v35, 0.0  ;;  %v2673_v13 = vmax.f32 %v2609_v46, 0.0 }
 0x351   : > { %v2453_v37 = vpop.permute.xlu0 %2452  ;;  %3251 = vrot.lane.b32.xlu1 %v3162_v42, %s8024_s22 }
 0x352   : > { %v3161_v19 = vpack.c.bf16 %v2673_v13, %v2672_v10  ;;  %v2612_v25 = vadd.f32 %v2453_v37, %v11449_v44  ;;  %v11457_v37 = vld [vmem:[#allocation23_spill] sm:$0xff] }
 0x354   : > { %3249 = vrot.lane.b32.xlu0 %v3161_v19, %s8024_s22  ;;  %v2676_v14 = vmax.f32 %v2612_v25, 0.0 }
 0x356   : > { %v2457_v45 = vpop.permute.xlu1 %2456  ;;  %v2459_v17 = vpop.permute.xlu0 %2458 }
 0x357   : > { %v2614_v55 = vadd.f32 %v2457_v45, %v11447_v60  ;;  %v2615_v1 = vadd.f32 %v2459_v17, %v11448_v26 }
 0x358   : > { %2514 = vrot.lane.b32.xlu0 %v2323_v4, %s8024_s22 }
 0x359   : > { %v2678_v29 = vmax.f32 %v2614_v55, 0.0  ;;  %v2679_v47 = vmax.f32 %v2615_v1, 0.0 }
 0x35a   : > { %v2461_v59 = vpop.permute.xlu0 %2460 }
 0x35b   : > { %v2455_v27 = vpop.permute.xlu1 %2454  ;;  %v3164_v38 = vpack.c.bf16 %v2679_v47, %v2678_v29  ;;  %v2616_v22 = vadd.f32 %v2461_v59, %v11451_v39  ;;  %v11459_v29 = vld [vmem:[#allocation26_spill] sm:$0xff] }
 0x35c   : > { %v2613_v23 = vadd.f32 %v2455_v27, %v11450_v50  ;;  %v11460_v27 = vld [vmem:[#allocation25_spill] sm:$0xff] }
 0x35d   : > { %3255 = vrot.lane.b32.xlu1 %v3164_v38, %s8024_s22  ;;  %v2680_v33 = vmax.f32 %v2616_v22, 0.0  ;;  %v11461_v38 = vld [vmem:[#allocation27_spill] sm:$0xff] }
 0x35e   : > { %v2677_v48 = vmax.f32 %v2613_v23, 0.0 }
 0x35f   : > { %v2465_v18 = vpop.permute.xlu1 %2464 }
 0x360   : > { %v3163_v7 = vpack.c.bf16 %v2677_v48, %v2676_v14  ;;  %v2618_v30 = vadd.f32 %v2465_v18, %v11452_v63 }
 0x361   : > { %v2467_v41 = vpop.permute.xlu0 %2466 }
 0x362   : > { %3253 = vrot.lane.b32.xlu0 %v3163_v7, %s8024_s22  ;;  %v2619_v36 = vadd.f32 %v2467_v41, %v11453_v32  ;;  %v2682_v40 = vmax.f32 %v2618_v30, 0.0 }
 0x363   : > { %v2463_v62 = vpop.permute.xlu1 %2462 }
 0x364   : > { %v2617_v57 = vadd.f32 %v2463_v62, %v11454_v15  ;;  %v2683_v16 = vmax.f32 %v2619_v36, 0.0 }
 0x365   : > { %v2469_v49 = vpop.permute.xlu0 %2468 }
 0x366   : > { %v2681_v21 = vmax.f32 %v2617_v57, 0.0  ;;  %v3166_v35 = vpack.c.bf16 %v2683_v16, %v2682_v40  ;;  %v2620_v46 = vadd.f32 %v2469_v49, %v11455_v5 }
 0x367   : > { %v2473_v52 = vpop.permute.xlu1 %2472 }
 0x368   : > { %v3165_v3 = vpack.c.bf16 %v2681_v21, %v2680_v33  ;;  %v2622_v42 = vadd.f32 %v2473_v52, %v11456_v6  ;;  %3259 = vrot.lane.b32.xlu1 %v3166_v35, %s8024_s22  ;;  %v2684_v60 = vmax.f32 %v2620_v46, 0.0 }
 0x369   : > { %v2475_v10 = vpop.permute.xlu0 %2474 }
 0x36a   : > { %3257 = vrot.lane.b32.xlu0 %v3165_v3, %s8024_s22  ;;  %v2623_v19 = vadd.f32 %v2475_v10, %v11457_v37  ;;  %v2686_v55 = vmax.f32 %v2622_v42, 0.0 }
 0x36b   : > { %v2471_v13 = vpop.permute.xlu1 %2470 }
 0x36c   : > { %v2621_v45 = vadd.f32 %v2471_v13, %v11458_v8  ;;  %v2687_v17 = vmax.f32 %v2623_v19, 0.0 }
 0x36d   : > { %v2477_v26 = vpop.permute.xlu0 %2476 }
 0x36e   : > { %v2685_v4 = vmax.f32 %v2621_v45, 0.0  ;;  %v3168_v44 = vpack.c.bf16 %v2687_v17, %v2686_v55  ;;  %v2624_v47 = vadd.f32 %v2477_v26, %v11459_v29 }
 0x36f   : > { %v2481_v1 = vpop.permute.xlu1 %2480 }
 0x370   : > { %v3167_v25 = vpack.c.bf16 %v2685_v4, %v2684_v60  ;;  %v2626_v50 = vadd.f32 %v2481_v1, %v11460_v27  ;;  %3263 = vrot.lane.b32.xlu1 %v3168_v44, %s8024_s22  ;;  %v2688_v18 = vmax.f32 %v2624_v47, 0.0 }
 0x371   : > { %v2483_v23 = vpop.permute.xlu0 %2482 }
 0x372   : > { %3261 = vrot.lane.b32.xlu0 %v3167_v25, %s8024_s22  ;;  %v2627_v14 = vadd.f32 %v2483_v23, %v11461_v38  ;;  %v2690_v7 = vmax.f32 %v2626_v50, 0.0 }
 0x373   : > { %v2479_v59 = vpop.permute.xlu1 %2478 }
 0x374   : > { %v2625_v48 = vadd.f32 %v2479_v59, %v8968_v56  ;;  %v2691_v39 = vmax.f32 %v2627_v14, 0.0 }
 0x376   : > { %v2689_v22 = vmax.f32 %v2625_v48, 0.0  ;;  %v3170_v63 = vpack.c.bf16 %v2691_v39, %v2690_v7 }
 0x377   : > { %v3224_v41 = vpop.permute.xlu1 %3223 }
 0x378   : > { %v3169_v30 = vpack.c.bf16 %v2689_v22, %v2688_v18  ;;  %3267 = vrot.lane.b32.xlu1 %v3170_v63, %s8024_s22 }
 0x37a   : > { %3265 = vrot.lane.b32.xlu0 %v3169_v30, %s8024_s22 }
 0x37b   : > { %v3222_v62 = vpop.permute.xlu0 %3221  ;;  %v2487_v32 = vpop.permute.xlu1 %2486 }
 0x37c   : > { %7609 = vmatprep.mubr.msk.bf16.mxu0 %vm1360_vm3, %v3222_v62  ;;  %v2629_v36 = vadd.f32 %v2487_v32, %v9010_v9 }
 0x37d   : > { %7610 = vmatmul.mubr.msk.bf16.vlgmr.msra.gmra.mxu0 %vm1360_vm3, %v3224_v41 }
 0x37e   : > { %v2693_v33 = vmax.f32 %v2629_v36, 0.0 }
 0x37f   : > { %v2485_v56 = vpop.permute.xlu0 %2484  ;;  %v2489_v57 = vpop.permute.xlu1 %2488 }
 0x380   : > { %v2628_v15 = vadd.f32 %v2485_v56, %v8998_v54  ;;  %v2630_v52 = vadd.f32 %v2489_v57, %v8994_v20 }
 0x382   : > { %v2692_v40 = vmax.f32 %v2628_v15, 0.0  ;;  %v2694_v5 = vmax.f32 %v2630_v52, 0.0 }
 0x383   : > { %v3228_v16 = vpop.permute.xlu1 %3227 }
 0x384   : > { %v3171_v21 = vpack.c.bf16 %v2693_v33, %v2692_v40 }
 0x386   : > { %3269 = vrot.lane.b32.xlu0 %v3171_v21, %s8024_s22 }
 0x389   : > { %v3226_v49 = vpop.permute.xlu0 %3225 }
 0x38a   : > { %7613 = vmatprep.mubr.msk.bf16.mxu0 %vm1360_vm3, %v3226_v49 }
 0x38b   : > { %7614 = vmatmul.mubr.msk.bf16.gmra.mxu0 %vm1360_vm3, %v3228_v16 }
 0x38d   : > { %v2491_v35 = vpop.permute.xlu0 %2490 }
 0x38e   : > { %v3232_v3 = vpop.permute.xlu1 %3231  ;;  %v2631_v9 = vadd.f32 %v2491_v35, %v9004_v34 }
 0x390   : > { %v2695_v54 = vmax.f32 %v2631_v9, 0.0 }
 0x392   : > { %v3172_v46 = vpack.c.bf16 %v2695_v54, %v2694_v5  ;;  %v2495_v6 = vpop.permute.xlu1 %2494 }
 0x393   : > { %v2633_v10 = vadd.f32 %v2495_v6, %v9044_v61 }
 0x394   : > { %3271 = vrot.lane.b32.xlu1 %v3172_v46, %s8024_s22 }
 0x395   : > { %v3230_v42 = vpop.permute.xlu0 %3229  ;;  %v2697_v19 = vmax.f32 %v2633_v10, 0.0 }
 0x396   : > { %7617 = vmatprep.mubr.msk.bf16.mxu0 %vm1360_vm3, %v3230_v42  ;;  %v2497_v13 = vpop.permute.xlu1 %2496 }
 0x397   : > { %7618 = vmatmul.mubr.msk.bf16.gmra.mxu0 %vm1360_vm3, %v3232_v3  ;;  %v2634_v55 = vadd.f32 %v2497_v13, %v9021_v11 }
 0x399   : > { %v2493_v37 = vpop.permute.xlu0 %2492  ;;  %v2698_v26 = vmax.f32 %v2634_v55, 0.0 }
 0x39a   : > { %v2632_v20 = vadd.f32 %v2493_v37, %v9025_v31  ;;  %v3236_v34 = vpop.permute.xlu1 %3235  ;;  %v9262_v37 = vld [vmem:[%s11342_s3 + $0x4] ss:$0 sm:$0xff] }
 0x39c   : > { %v2696_v8 = vmax.f32 %v2632_v20, 0.0 }
 0x39e   : > { %v3173_v45 = vpack.c.bf16 %v2697_v19, %v2696_v8 }
 0x3a0   : > { %v3234_v60 = vpop.permute.xlu0 %3233  ;;  %3273 = vrot.lane.b32.xlu0 %v3173_v45, %s8024_s22 }
 0x3a1   : > { %7621 = vmatprep.mubr.msk.bf16.mxu0 %vm1360_vm3, %v3234_v60 }
 0x3a2   : > { %7622 = vmatmul.mubr.msk.bf16.gmra.mxu0 %vm1360_vm3, %v3236_v34  ;;  %v9268_v34 = vld [vmem:[%s11342_s3 + $0x5] ss:$0 sm:$0xff] }
 0x3a4   : > { %v3240_v17 = vpop.permute.xlu1 %3239  ;;  %v2499_v4 = vpop.permute.xlu0 %2498 }
 0x3a5   : > { %v2635_v61 = vadd.f32 %v2499_v4, %v9041_v0 }
 0x3a7   : > { %v2699_v1 = vmax.f32 %v2635_v61, 0.0 }
 0x3a8   : > { %v2503_v31 = vpop.permute.xlu1 %2502 }
 0x3a9   : > { %v3174_v25 = vpack.c.bf16 %v2699_v1, %v2698_v26  ;;  %v2637_v29 = vadd.f32 %v2503_v31, %v9067_v28 }
 0x3aa   : > { %v3238_v44 = vpop.permute.xlu0 %3237 }
 0x3ab   : > { %7625 = vmatprep.mubr.msk.bf16.mxu0 %vm1360_vm3, %v3238_v44  ;;  %3275 = vrot.lane.b32.xlu1 %v3174_v25, %s8024_s22  ;;  %v2701_v50 = vmax.f32 %v2637_v29, 0.0 }
 0x3ac   : > { %7626 = vmatmul.mubr.msk.bf16.gmra.mxu0 %vm1360_vm3, %v3240_v17  ;;  %v2505_v47 = vpop.permute.xlu1 %2504 }
 0x3ad   : > { %v2638_v14 = vadd.f32 %v2505_v47, %v9058_v12 }
 0x3ae   : > { %v2501_v27 = vpop.permute.xlu0 %2500 }
 0x3af   : > { %v2636_v11 = vadd.f32 %v2501_v27, %v9061_v51  ;;  %v2702_v7 = vmax.f32 %v2638_v14, 0.0 }
 0x3b0   : > { %v3244_v0 = vpop.permute.xlu1 %3243 }
 0x3b1   : > { %v2700_v23 = vmax.f32 %v2636_v11, 0.0 }
 0x3b3   : > { %v3175_v59 = vpack.c.bf16 %v2701_v50, %v2700_v23  ;;  %v3242_v38 = vpop.permute.xlu0 %3241 }
 0x3b4   : > { %7629 = vmatprep.mubr.msk.bf16.mxu0 %vm1360_vm3, %v3242_v38 }
 0x3b5   : > { %3277 = vrot.lane.b32.xlu0 %v3175_v59, %s8024_s22  ;;  %7630 = vmatmul.mubr.msk.bf16.gmra.mxu0 %vm1360_vm3, %v3244_v0 }
 0x3b7   : > { %v3248_v28 = vpop.permute.xlu1 %3247  ;;  %v2507_v48 = vpop.permute.xlu0 %2506 }
 0x3b8   : > { %v2639_v18 = vadd.f32 %v2507_v48, %v9064_v53 }
 0x3ba   : > { %v2703_v39 = vmax.f32 %v2639_v18, 0.0 }
 0x3bb   : > { %v2511_v51 = vpop.permute.xlu1 %2510 }
 0x3bc   : > { %v3176_v63 = vpack.c.bf16 %v2703_v39, %v2702_v7  ;;  %v2641_v30 = vadd.f32 %v2511_v51, %v9104_v43 }
 0x3bd   : > { %v3246_v22 = vpop.permute.xlu0 %3245 }
 0x3be   : > { %7633 = vmatprep.mubr.msk.bf16.mxu0 %vm1360_vm3, %v3246_v22  ;;  %3279 = vrot.lane.b32.xlu1 %v3176_v63, %s8024_s22  ;;  %v2705_v32 = vmax.f32 %v2641_v30, 0.0 }
 0x3bf   : > { %7634 = vmatmul.mubr.msk.bf16.gmra.mxu0 %vm1360_vm3, %v3248_v28  ;;  %v2513_v41 = vpop.permute.xlu1 %2512 }
 0x3c0   : > { %v2642_v57 = vadd.f32 %v2513_v41, %v9089_v2 }
 0x3c1   : > { %v2509_v62 = vpop.permute.xlu0 %2508 }
 0x3c2   : > { %v2640_v12 = vadd.f32 %v2509_v62, %v9096_v24  ;;  %v2706_v40 = vmax.f32 %v2642_v57, 0.0 }
 0x3c3   : > { %v3252_v53 = vpop.permute.xlu1 %3251 }
 0x3c4   : > { %v2704_v36 = vmax.f32 %v2640_v12, 0.0 }
 0x3c6   : > { %v3177_v56 = vpack.c.bf16 %v2705_v32, %v2704_v36  ;;  %v3250_v15 = vpop.permute.xlu0 %3249 }
 0x3c7   : > { %7637 = vmatprep.mubr.msk.bf16.mxu0 %vm1360_vm3, %v3250_v15 }
 0x3c8   : > { %3281 = vrot.lane.b32.xlu0 %v3177_v56, %s8024_s22  ;;  %7638 = vmatmul.mubr.msk.bf16.gmra.mxu0 %vm1360_vm3, %v3252_v53 }
 0x3ca   : > { %v2515_v33 = vpop.permute.xlu0 %2514 }
 0x3cb   : > { %v2643_v43 = vadd.f32 %v2515_v33, %v9092_v58 }
 0x3cd   : > { %v2707_v16 = vmax.f32 %v2643_v43, 0.0 }
 0x3cf   : > { %v3178_v21 = vpack.c.bf16 %v2707_v16, %v2706_v40  ;;  %v3256_v49 = vpop.permute.xlu1 %3255 }
 0x3d1   : > { %3283 = vrot.lane.b32.xlu1 %v3178_v21, %s8024_s22 }
 0x3d4   : > { %v3254_v24 = vpop.permute.xlu0 %3253 }
 0x3d5   : > { %7641 = vmatprep.mubr.msk.bf16.mxu0 %vm1360_vm3, %v3254_v24 }
 0x3d6   : > { %7642 = vmatmul.mubr.msk.bf16.gmra.mxu0 %vm1360_vm3, %v3256_v49 }
 0x3da   : > { %v3260_v35 = vpop.permute.xlu1 %3259 }
 0x3dc   : > { %v3258_v52 = vpop.permute.xlu0 %3257 }
 0x3dd   : > { %7645 = vmatprep.mubr.msk.bf16.mxu0 %vm1360_vm3, %v3258_v52 }
 0x3de   : > { %7646 = vmatmul.mubr.msk.bf16.gmra.mxu0 %vm1360_vm3, %v3260_v35 }
 0x3e2   : > { %v3264_v3 = vpop.permute.xlu1 %3263 }
 0x3e4   : > { %v3262_v2 = vpop.permute.xlu0 %3261 }
 0x3e5   : > { %7649 = vmatprep.mubr.msk.bf16.mxu0 %vm1360_vm3, %v3262_v2 }
 0x3e6   : > { %7650 = vmatmul.mubr.msk.bf16.gmra.mxu0 %vm1360_vm3, %v3264_v3 }
 0x3ea   : > { %v3268_v9 = vpop.permute.xlu1 %3267 }
 0x3ec   : > { %v3266_v58 = vpop.permute.xlu0 %3265 }
 0x3ed   : > { %7653 = vmatprep.mubr.msk.bf16.mxu0 %vm1360_vm3, %v3266_v58 }
 0x3ee   : > { %7654 = vmatmul.mubr.msk.bf16.gmra.mxu0 %vm1360_vm3, %v3268_v9 }
 0x3f8   : > { %v3270_v5 = vpop.permute.xlu0 %3269 }
 0x3f9   : > { %7657 = vmatprep.mubr.msk.bf16.mxu0 %vm1360_vm3, %v3270_v5  ;;  %v9301_v5 = vpop.f32.mrf.mxu1 }
 0x406   : > { %v3272_v54 = vpop.permute.xlu1 %3271 }
 0x407   : > { %7658 = vmatmul.mubr.msk.bf16.gmra.mxu0 %vm1360_vm3, %v3272_v54 }
 0x412   : > { %v3274_v46 = vpop.permute.xlu0 %3273 }
 0x413   : > { %7661 = vmatprep.mubr.msk.bf16.mxu0 %vm1360_vm3, %v3274_v46 }
 0x41d   : > { %v3276_v6 = vpop.permute.xlu1 %3275 }
 0x41e   : > { %7662 = vmatmul.mubr.msk.bf16.gmra.mxu0 %vm1360_vm3, %v3276_v6 }
 0x427   : > { %v3278_v42 = vpop.permute.xlu0 %3277 }
 0x428   : > { %7665 = vmatprep.mubr.msk.bf16.mxu0 %vm1360_vm3, %v3278_v42 }
 0x430   : > { %v3280_v10 = vpop.permute.xlu1 %3279 }
 0x431   : > { %7666 = vmatmul.mubr.msk.bf16.gmra.mxu0 %vm1360_vm3, %v3280_v10 }
 0x43a   : > { %v3282_v13 = vpop.permute.xlu0 %3281 }
 0x43b   : > { %7669 = vmatprep.mubr.msk.bf16.mxu0 %vm1360_vm3, %v3282_v13 }
 0x43d   : > { %v7611_v20 = vpop.f32.mrf.mxu0 }
 0x43e   : > { %v3436_v19 = vadd.f32 %v7611_v20, %v9262_v37  ;;  %v9306_v20 = vpop.f32.mrf.mxu1 }
 0x43f   : > { %v3427_v8 = vpop.f32.mrf.mxu0 }
 0x440   : > { %v3684_v45 = vmax.f32 %v3436_v19, 0.0  ;;  %v3428_v60 = vadd.f32 %v9262_v37, %v3427_v8 }
 0x441   : > { %v7612_v55 = vpop.f32.mrf.mxu0 }
 0x442   : > { %v3682_v4 = vmax.f32 %v3428_v60, 0.0  ;;  %v3439_v61 = vadd.f32 %v7612_v55, %v9262_v37  ;;  %v3754_v26 = vmul.f32 %v9268_v34, %v3684_v45 }
 0x443   : > { %v3284_v17 = vpop.permute.xlu1 %3283  ;;  %v3430_v1 = vpop.f32.mrf.mxu0 }
 0x444   : > { %7670 = vmatmul.mubr.msk.bf16.gmra.mxu0 %vm1360_vm3, %v3284_v17  ;;  %v3685_v31 = vmax.f32 %v3439_v61, 0.0  ;;  %v3431_v44 = vadd.f32 %v9262_v37, %v3430_v1  ;;  %v3822_v25 = vsel %vm1360_vm3, %v3754_v26, 0.0  ;;  %v3752_v29 = vmul.f32 %v9268_v34, %v3682_v4  ;;  %v9311_v4 = vpop.f32.mrf.mxu1 }
 0x445   : > { %3823 = vadd.xlane.f32.xlu1 %v3822_v25 }
 0x446   : > { %v3755_v47 = vmul.f32 %v9268_v34, %v3685_v31  ;;  %v3683_v27 = vmax.f32 %v3431_v44, 0.0  ;;  %v3816_v11 = vsel %vm1360_vm3, %v3752_v29, 0.0 }
 0x447   : > { %3817 = vadd.xlane.f32.xlu0 %v3816_v11 }
 0x448   : > { %v3753_v50 = vmul.f32 %v9268_v34, %v3683_v27  ;;  %v3825_v23 = vsel %vm1360_vm3, %v3755_v47, 0.0  ;;  %v9317_v47 = vpop.f32.mrf.mxu1 }
 0x449   : > { %3826 = vadd.xlane.f32.xlu1 %v3825_v23 }
 0x44a   : > { %v3819_v48 = vsel %vm1360_vm3, %v3753_v50, 0.0 }
 0x44b   : > { %v7615_v0 = vpop.f32.mrf.mxu0 }
 0x44c   : > { %v3452_v59 = vadd.f32 %v7615_v0, %v9262_v37 }
 0x44d   : > { %v3443_v38 = vpop.f32.mrf.mxu0  ;;  %3820 = vadd.xlane.f32.xlu1 %v3819_v48 }
 0x44e   : > { %v3688_v14 = vmax.f32 %v3452_v59, 0.0  ;;  %v3444_v28 = vadd.f32 %v9262_v37, %v3443_v38 }
 0x44f   : > { %v7616_v18 = vpop.f32.mrf.mxu0 }
 0x450   : > { %v3758_v7 = vmul.f32 %v9268_v34, %v3688_v14  ;;  %v3686_v39 = vmax.f32 %v3444_v28, 0.0  ;;  %v3455_v51 = vadd.f32 %v7616_v18, %v9262_v37 }
 0x451   : > { %v3446_v22 = vpop.f32.mrf.mxu0 }
 0x452   : > { %v3756_v63 = vmul.f32 %v9268_v34, %v3686_v39  ;;  %v3689_v30 = vmax.f32 %v3455_v51, 0.0  ;;  %v3447_v41 = vadd.f32 %v9262_v37, %v3446_v22  ;;  %v3834_v62 = vsel %vm1360_vm3, %v3758_v7, 0.0  ;;  %v9325_v7 = vpop.f32.mrf.mxu1 }
 0x453   : > { %3835 = vadd.xlane.f32.xlu1 %v3834_v62 }
 0x454   : > { %v3759_v12 = vmul.f32 %v9268_v34, %v3689_v30  ;;  %v3687_v32 = vmax.f32 %v3447_v41, 0.0  ;;  %v3828_v36 = vsel %vm1360_vm3, %v3756_v63, 0.0 }
 0x456   : > { %v3757_v15 = vmul.f32 %v9268_v34, %v3687_v32  ;;  %v3837_v33 = vsel %vm1360_vm3, %v3759_v12, 0.0  ;;  %v9332_v12 = vpop.f32.mrf.mxu1 }
 0x457   : > { %3829 = vadd.xlane.f32.xlu1 %v3828_v36  ;;  %v7619_v53 = vpop.f32.mrf.mxu0 }
 0x458   : > { %v3468_v56 = vadd.f32 %v7619_v53, %v9262_v37  ;;  %v3831_v35 = vsel %vm1360_vm3, %v3757_v15, 0.0 }
 0x459   : > { %v3459_v57 = vpop.f32.mrf.mxu0 }
 0x45a   : > { %v3692_v43 = vmax.f32 %v3468_v56, 0.0  ;;  %v3460_v40 = vadd.f32 %v9262_v37, %v3459_v57 }
 0x45b   : > { %3838 = vadd.xlane.f32.xlu1 %v3837_v33  ;;  %v7620_v16 = vpop.f32.mrf.mxu0 }
 0x45c   : > { %v3762_v21 = vmul.f32 %v9268_v34, %v3692_v43  ;;  %v3690_v24 = vmax.f32 %v3460_v40, 0.0  ;;  %v3471_v49 = vadd.f32 %v7620_v16, %v9262_v37 }
 0x45d   : > { %v3462_v52 = vpop.f32.mrf.mxu0 }
 0x45e   : > { %v3760_v2 = vmul.f32 %v9268_v34, %v3690_v24  ;;  %v3693_v3 = vmax.f32 %v3471_v49, 0.0  ;;  %v3463_v58 = vadd.f32 %v9262_v37, %v3462_v52  ;;  %v3846_v9 = vsel %vm1360_vm3, %v3762_v21, 0.0  ;;  %v9340_v21 = vpop.f32.mrf.mxu1 }
 0x45f   : > { %3832 = vadd.xlane.f32.xlu1 %v3831_v35  ;;  %3847 = vadd.xlane.f32.xlu0 %v3846_v9 }
 0x460   : > { %v3763_v54 = vmul.f32 %v9268_v34, %v3693_v3  ;;  %v3691_v46 = vmax.f32 %v3463_v58, 0.0  ;;  %v3840_v42 = vsel %vm1360_vm3, %v3760_v2, 0.0 }
 0x462   : > { %v7623_v6 = vpop.f32.mrf.mxu0  ;;  %v3761_v19 = vmul.f32 %v9268_v34, %v3691_v46  ;;  %v3849_v55 = vsel %vm1360_vm3, %v3763_v54, 0.0  ;;  %v9348_v46 = vpop.f32.mrf.mxu1 }
 0x463   : > { %v3484_v10 = vadd.f32 %v7623_v6, %v9262_v37  ;;  %3841 = vadd.xlane.f32.xlu0 %v3840_v42 }
 0x464   : > { %v3475_v13 = vpop.f32.mrf.mxu0  ;;  %v3843_v44 = vsel %vm1360_vm3, %v3761_v19, 0.0 }
 0x465   : > { %v3696_v8 = vmax.f32 %v3484_v10, 0.0  ;;  %v3476_v45 = vadd.f32 %v9262_v37, %v3475_v13 }
 0x466   : > { %v7624_v60 = vpop.f32.mrf.mxu0 }
 0x467   : > { %3850 = vadd.xlane.f32.xlu0 %v3849_v55  ;;  %v3766_v61 = vmul.f32 %v9268_v34, %v3696_v8  ;;  %v3694_v26 = vmax.f32 %v3476_v45, 0.0  ;;  %v3487_v1 = vadd.f32 %v7624_v60, %v9262_v37  ;;  %v9354_v55 = vpop.f32.mrf.mxu1 }
 0x468   : > { %v3478_v17 = vpop.f32.mrf.mxu0 }
 0x469   : > { %v3479_v27 = vadd.f32 %v9262_v37, %v3478_v17  ;;  %v3764_v23 = vmul.f32 %v9268_v34, %v3694_v26  ;;  %v3697_v0 = vmax.f32 %v3487_v1, 0.0  ;;  %v3858_v38 = vsel %vm1360_vm3, %v3766_v61, 0.0 }
 0x46b   : > { %3844 = vadd.xlane.f32.xlu0 %v3843_v44  ;;  %v3695_v39 = vmax.f32 %v3479_v27, 0.0  ;;  %v3767_v30 = vmul.f32 %v9268_v34, %v3697_v0  ;;  %v3852_v62 = vsel %vm1360_vm3, %v3764_v23, 0.0 }
 0x46c   : > { %v7627_v31 = vpop.f32.mrf.mxu0 }
 0x46d   : > { %v3500_v25 = vadd.f32 %v7627_v31, %v9262_v37  ;;  %v3765_v32 = vmul.f32 %v9268_v34, %v3695_v39  ;;  %v3861_v33 = vsel %vm1360_vm3, %v3767_v30, 0.0 }
 0x46e   : > { %v3491_v29 = vpop.f32.mrf.mxu0 }
 0x46f   : > { %v3700_v11 = vmax.f32 %v3500_v25, 0.0  ;;  %v3492_v50 = vadd.f32 %v9262_v37, %v3491_v29  ;;  %3859 = vadd.xlane.f32.xlu0 %v3858_v38  ;;  %v3855_v52 = vsel %vm1360_vm3, %v3765_v32, 0.0 }
 0x470   : > { %v7628_v59 = vpop.f32.mrf.mxu0 }
 0x471   : > { %v3770_v14 = vmul.f32 %v9268_v34, %v3700_v11  ;;  %v3698_v28 = vmax.f32 %v3492_v50, 0.0  ;;  %v3503_v48 = vadd.f32 %v7628_v59, %v9262_v37  ;;  %v9362_v50 = vpop.f32.mrf.mxu1 }
 0x472   : > { %v3494_v18 = vpop.f32.mrf.mxu0 }
 0x473   : > { %v3768_v51 = vmul.f32 %v9268_v34, %v3698_v28  ;;  %v3701_v22 = vmax.f32 %v3503_v48, 0.0  ;;  %v3870_v63 = vsel %vm1360_vm3, %v3770_v14, 0.0  ;;  %v3495_v41 = vadd.f32 %v9262_v37, %v3494_v18  ;;  %3853 = vadd.xlane.f32.xlu0 %v3852_v62  ;;  %v9369_v39 = vpop.f32.mrf.mxu1 }
 0x474   : > { %3871 = vadd.xlane.f32.xlu1 %v3870_v63 }
 0x475   : > { %v3771_v36 = vmul.f32 %v9268_v34, %v3701_v22  ;;  %v7631_v53 = vpop.f32.mrf.mxu0  ;;  %v3864_v56 = vsel %vm1360_vm3, %v3768_v51, 0.0  ;;  %v3699_v15 = vmax.f32 %v3495_v41, 0.0 }
 0x476   : > { %v3516_v57 = vadd.f32 %v7631_v53, %v9262_v37 }
 0x477   : > { %v3507_v43 = vpop.f32.mrf.mxu0  ;;  %3862 = vadd.xlane.f32.xlu0 %v3861_v33  ;;  %v3873_v49 = vsel %vm1360_vm3, %v3771_v36, 0.0  ;;  %v3769_v35 = vmul.f32 %v9268_v34, %v3699_v15 }
 0x478   : > { %3865 = vadd.xlane.f32.xlu1 %v3864_v56  ;;  %v3704_v40 = vmax.f32 %v3516_v57, 0.0  ;;  %v3508_v16 = vadd.f32 %v9262_v37, %v3507_v43  ;;  %v9377_v56 = vpop.f32.mrf.mxu1 }
 0x479   : > { %v7632_v24 = vpop.f32.mrf.mxu0  ;;  %v3867_v19 = vsel %vm1360_vm3, %v3769_v35, 0.0 }
 0x47a   : > { %v3774_v2 = vmul.f32 %v9268_v34, %v3704_v40  ;;  %v3702_v3 = vmax.f32 %v3508_v16, 0.0  ;;  %v3519_v58 = vadd.f32 %v7632_v24, %v9262_v37  ;;  %v9383_v24 = vpop.f32.mrf.mxu1 }
 0x47b   : > { %v3510_v9 = vpop.f32.mrf.mxu0  ;;  %3856 = vadd.xlane.f32.xlu0 %v3855_v52 }
 0x47c   : > { %3874 = vadd.xlane.f32.xlu1 %v3873_v49  ;;  %v3511_v54 = vadd.f32 %v9262_v37, %v3510_v9  ;;  %v3772_v6 = vmul.f32 %v9268_v34, %v3702_v3  ;;  %v3705_v42 = vmax.f32 %v3519_v58, 0.0  ;;  %v3882_v10 = vsel %vm1360_vm3, %v3774_v2, 0.0  ;;  %v9387_v58 = vpop.f32.mrf.mxu1 }
 0x47e   : > { %v3703_v45 = vmax.f32 %v3511_v54, 0.0  ;;  %v3775_v17 = vmul.f32 %v9268_v34, %v3705_v42  ;;  %v3876_v1 = vsel %vm1360_vm3, %v3772_v6, 0.0 }
 0x47f   : > { %v7635_v13 = vpop.f32.mrf.mxu0  ;;  %3868 = vadd.xlane.f32.xlu0 %v3867_v19 }
 0x480   : > { %3883 = vadd.xlane.f32.xlu1 %v3882_v10  ;;  %v3532_v8 = vadd.f32 %v7635_v13, %v9262_v37  ;;  %v3773_v29 = vmul.f32 %v9268_v34, %v3703_v45  ;;  %v3885_v38 = vsel %vm1360_vm3, %v3775_v17, 0.0  ;;  %v9394_v45 = vpop.f32.mrf.mxu1 }
 0x481   : > { %v3523_v60 = vpop.f32.mrf.mxu0 }
 0x482   : > { %v3708_v61 = vmax.f32 %v3532_v8, 0.0  ;;  %v3524_v26 = vadd.f32 %v9262_v37, %v3523_v60  ;;  %v3879_v30 = vsel %vm1360_vm3, %v3773_v29, 0.0 }
 0x483   : > { %v7636_v31 = vpop.f32.mrf.mxu0 }
 0x484   : > { %3877 = vadd.xlane.f32.xlu1 %v3876_v1  ;;  %v3778_v44 = vmul.f32 %v9268_v34, %v3708_v61  ;;  %v3535_v25 = vadd.f32 %v7636_v31, %v9262_v37  ;;  %v3706_v27 = vmax.f32 %v3524_v26, 0.0 }
 0x485   : > { %v3526_v11 = vpop.f32.mrf.mxu0 }
 0x486   : > { %v3709_v23 = vmax.f32 %v3535_v25, 0.0  ;;  %v3527_v0 = vadd.f32 %v9262_v37, %v3526_v11  ;;  %v3894_v59 = vsel %vm1360_vm3, %v3778_v44, 0.0  ;;  %v3776_v48 = vmul.f32 %v9268_v34, %v3706_v27  ;;  %v9402_v11 = vpop.f32.mrf.mxu1 }
 0x487   : > { %3895 = vadd.xlane.f32.xlu0 %v3894_v59 }
 0x488   : > { %3886 = vadd.xlane.f32.xlu1 %v3885_v38  ;;  %v3779_v14 = vmul.f32 %v9268_v34, %v3709_v23  ;;  %v3707_v28 = vmax.f32 %v3527_v0, 0.0  ;;  %v7639_v18 = vpop.f32.mrf.mxu0  ;;  %v3888_v53 = vsel %vm1360_vm3, %v3776_v48, 0.0 }
 0x489   : > { %v3548_v22 = vadd.f32 %v7639_v18, %v9262_v37 }
 0x48a   : > { %v3777_v51 = vmul.f32 %v9268_v34, %v3707_v28  ;;  %v3897_v63 = vsel %vm1360_vm3, %v3779_v14, 0.0  ;;  %v3539_v41 = vpop.f32.mrf.mxu0 }
 0x48b   : > { %3898 = vadd.xlane.f32.xlu0 %v3897_v63  ;;  %v3712_v62 = vmax.f32 %v3548_v22, 0.0  ;;  %v3540_v32 = vadd.f32 %v9262_v37, %v3539_v41  ;;  %v9410_v63 = vpop.f32.mrf.mxu1 }
 0x48c   : > { %3880 = vadd.xlane.f32.xlu1 %v3879_v30  ;;  %v7640_v36 = vpop.f32.mrf.mxu0  ;;  %v3891_v43 = vsel %vm1360_vm3, %v3777_v51, 0.0 }
 0x48d   : > { %v3782_v15 = vmul.f32 %v9268_v34, %v3712_v62  ;;  %v3710_v57 = vmax.f32 %v3540_v32, 0.0  ;;  %v3551_v33 = vadd.f32 %v7640_v36, %v9262_v37 }
 0x48e   : > { %v3542_v40 = vpop.f32.mrf.mxu0 }
 0x48f   : > { %3892 = vadd.xlane.f32.xlu0 %v3891_v43  ;;  %v3543_v16 = vadd.f32 %v9262_v37, %v3542_v40  ;;  %v3780_v49 = vmul.f32 %v9268_v34, %v3710_v57  ;;  %v3713_v52 = vmax.f32 %v3551_v33, 0.0  ;;  %v3906_v35 = vsel %vm1360_vm3, %v3782_v15, 0.0  ;;  %v9416_v57 = vpop.f32.mrf.mxu1 }
 0x490   : > { %3889 = vadd.xlane.f32.xlu1 %v3888_v53 }
 0x491   : > { %v3711_v2 = vmax.f32 %v3543_v16, 0.0  ;;  %v3783_v9 = vmul.f32 %v9268_v34, %v3713_v52  ;;  %v3900_v6 = vsel %vm1360_vm3, %v3780_v49, 0.0 }
 0x493   : > { %3907 = vadd.xlane.f32.xlu0 %v3906_v35  ;;  %v3781_v19 = vmul.f32 %v9268_v34, %v3711_v2  ;;  %v3909_v26 = vsel %vm1360_vm3, %v3783_v9, 0.0 }
 0x495   : > { %v3903_v59 = vsel %vm1360_vm3, %v3781_v19, 0.0 }
 0x496   : > { %v7643_v3 = vpop.f32.mrf.mxu0 }
 0x497   : > { %v3564_v54 = vadd.f32 %v7643_v3, %v9262_v37  ;;  %3901 = vadd.xlane.f32.xlu0 %v3900_v6  ;;  %v9422_v3 = vpop.f32.mrf.mxu1 }
 0x498   : > { %v3555_v42 = vpop.f32.mrf.mxu0 }
 0x499   : > { %v3716_v10 = vmax.f32 %v3564_v54, 0.0  ;;  %v3556_v13 = vadd.f32 %v9262_v37, %v3555_v42 }
 0x49a   : > { %v7644_v8 = vpop.f32.mrf.mxu0 }
 0x49b   : > { %v3786_v60 = vmul.f32 %v9268_v34, %v3716_v10  ;;  %v3714_v17 = vmax.f32 %v3556_v13, 0.0  ;;  %v3567_v61 = vadd.f32 %v7644_v8, %v9262_v37  ;;  %3910 = vadd.xlane.f32.xlu0 %v3909_v26  ;;  %v9431_v26 = vpop.f32.mrf.mxu1 }
 0x49c   : > { %v3558_v1 = vpop.f32.mrf.mxu0 }
 0x49d   : > { %v3784_v31 = vmul.f32 %v9268_v34, %v3714_v17  ;;  %v3717_v44 = vmax.f32 %v3567_v61, 0.0  ;;  %v3559_v25 = vadd.f32 %v9262_v37, %v3558_v1  ;;  %v3918_v29 = vsel %vm1360_vm3, %v3786_v60, 0.0 }
 0x49e   : > { %3919 = vadd.xlane.f32.xlu1 %v3918_v29  ;;  %v7647_v27 = vpop.f32.mrf.mxu0 }
 0x49f   : > { %v3715_v23 = vmax.f32 %v3559_v25, 0.0  ;;  %v3580_v0 = vadd.f32 %v7647_v27, %v9262_v37  ;;  %v3787_v38 = vmul.f32 %v9268_v34, %v3717_v44  ;;  %3904 = vadd.xlane.f32.xlu0 %v3903_v59  ;;  %v3912_v51 = vsel %vm1360_vm3, %v3784_v31, 0.0 }
 0x4a0   : > { %v3571_v14 = vpop.f32.mrf.mxu0 }
 0x4a1   : > { %v3785_v28 = vmul.f32 %v9268_v34, %v3715_v23  ;;  %v3720_v48 = vmax.f32 %v3580_v0, 0.0  ;;  %v3572_v18 = vadd.f32 %v9262_v37, %v3571_v14  ;;  %v3921_v53 = vsel %vm1360_vm3, %v3787_v38, 0.0 }
 0x4a2   : > { %3913 = vadd.xlane.f32.xlu1 %v3912_v51  ;;  %v7648_v22 = vpop.f32.mrf.mxu0 }
 0x4a3   : > { %v3915_v30 = vsel %vm1360_vm3, %v3785_v28, 0.0  ;;  %v3583_v41 = vadd.f32 %v7648_v22, %v9262_v37  ;;  %v3790_v32 = vmul.f32 %v9268_v34, %v3720_v48  ;;  %v3718_v36 = vmax.f32 %v3572_v18, 0.0  ;;  %v9440_v48 = vpop.f32.mrf.mxu1 }
 0x4a4   : > { %v3574_v62 = vpop.f32.mrf.mxu0  ;;  %3916 = vadd.xlane.f32.xlu0 %v3915_v30 }
 0x4a5   : > { %v3721_v43 = vmax.f32 %v3583_v41, 0.0  ;;  %v3575_v40 = vadd.f32 %v9262_v37, %v3574_v62  ;;  %v3788_v49 = vmul.f32 %v9268_v34, %v3718_v36  ;;  %v3930_v35 = vsel %vm1360_vm3, %v3790_v32, 0.0  ;;  %v9447_v36 = vpop.f32.mrf.mxu1 }
 0x4a6   : > { %3922 = vadd.xlane.f32.xlu1 %v3921_v53  ;;  %v7651_v15 = vpop.f32.mrf.mxu0 }
 0x4a7   : > { %v3596_v33 = vadd.f32 %v7651_v15, %v9262_v37  ;;  %v3791_v6 = vmul.f32 %v9268_v34, %v3721_v43  ;;  %v3719_v42 = vmax.f32 %v3575_v40, 0.0  ;;  %v3924_v60 = vsel %vm1360_vm3, %v3788_v49, 0.0 }
 0x4a8   : > { %v3587_v16 = vpop.f32.mrf.mxu0 }
 0x4a9   : > { %v3724_v52 = vmax.f32 %v3596_v33, 0.0  ;;  %v3588_v10 = vadd.f32 %v9262_v37, %v3587_v16  ;;  %v3789_v25 = vmul.f32 %v9268_v34, %v3719_v42  ;;  %v3933_v23 = vsel %vm1360_vm3, %v3791_v6, 0.0  ;;  %v9453_v16 = vpop.f32.mrf.mxu1 }
 0x4aa   : > { %3931 = vadd.xlane.f32.xlu1 %v3930_v35  ;;  %v7652_v2 = vpop.f32.mrf.mxu0  ;;  %v8025_v42 = vmov 0  }
 0x4ab   : > { %v3794_v9 = vmul.f32 %v9268_v34, %v3724_v52  ;;  %v3599_v54 = vadd.f32 %v7652_v2, %v9262_v37  ;;  %v3722_v29 = vmax.f32 %v3588_v10, 0.0  ;;  %v3927_v51 = vsel %vm1360_vm3, %v3789_v25, 0.0  ;;  %v9457_v2 = vpop.f32.mrf.mxu1  ;;  %7734 = vset.pattern.permute.xlu1 %v8025_v42  ;;  %7735 = vset.pattern.permute.xlu0 %v8025_v42 }
 0x4ac   : > { %v3590_v13 = vpop.f32.mrf.mxu0 }
 0x4ad   : > { %v3725_v19 = vmax.f32 %v3599_v54, 0.0  ;;  %v3591_v8 = vadd.f32 %v9262_v37, %v3590_v13  ;;  %v3942_v17 = vsel %vm1360_vm3, %v3794_v9, 0.0  ;;  %v3792_v18 = vmul.f32 %v9268_v34, %v3722_v29  ;;  %v9461_v6 = vpop.f32.mrf.mxu1 }
 0x4ae   : > { %3925 = vadd.xlane.f32.xlu1 %v3924_v60  ;;  %v7655_v61 = vpop.f32.mrf.mxu0  ;;  %3943 = vadd.xlane.f32.xlu0 %v3942_v17 }
 0x4af   : > { %v3795_v1 = vmul.f32 %v9268_v34, %v3725_v19  ;;  %v3723_v31 = vmax.f32 %v3591_v8, 0.0  ;;  %v3612_v44 = vadd.f32 %v7655_v61, %v9262_v37  ;;  %v3936_v53 = vsel %vm1360_vm3, %v3792_v18, 0.0  ;;  %v9464_v13 = vpop.f32.mrf.mxu1 }
 0x4b0   : > { %v3603_v27 = vpop.f32.mrf.mxu0 }
 0x4b1   : > { %v3793_v0 = vmul.f32 %v9268_v34, %v3723_v31  ;;  %v3728_v59 = vmax.f32 %v3612_v44, 0.0  ;;  %v3604_v38 = vadd.f32 %v9262_v37, %v3603_v27  ;;  %v3945_v14 = vsel %vm1360_vm3, %v3795_v1, 0.0  ;;  %v9467_v17 = vpop.f32.mrf.mxu1 }
 0x4b2   : > { %3934 = vadd.xlane.f32.xlu1 %v3933_v23  ;;  %v7656_v28 = vpop.f32.mrf.mxu0  ;;  %3946 = vadd.xlane.f32.xlu0 %v3945_v14 }
 0x4b3   : > { %v3798_v22 = vmul.f32 %v9268_v34, %v3728_v59  ;;  %v3726_v30 = vmax.f32 %v3604_v38, 0.0  ;;  %v3615_v41 = vadd.f32 %v7656_v28, %v9262_v37  ;;  %v3939_v62 = vsel %vm1360_vm3, %v3793_v0, 0.0  ;;  %v9472_v23 = vpop.f32.mrf.mxu1  ;;  %v9480_v28 = vld [vmem:[%s11342_s3 + $0x6] ss:$0 sm:$0xff] }
 0x4b4   : > { %v3606_v32 = vpop.f32.mrf.mxu0 }
 0x4b5   : > { %v3796_v15 = vmul.f32 %v9268_v34, %v3726_v30  ;;  %v3729_v33 = vmax.f32 %v3615_v41, 0.0  ;;  %v3607_v43 = vadd.f32 %v9262_v37, %v3606_v32  ;;  %v3954_v40 = vsel %vm1360_vm3, %v3798_v22, 0.0  ;;  %v9485_v30 = vpop.f32.mrf.mxu1 }
 0x4b6   : > { %3928 = vadd.xlane.f32.xlu1 %v3927_v51  ;;  %3940 = vadd.xlane.f32.xlu0 %v3939_v62 }
 0x4b7   : > { %v3799_v49 = vmul.f32 %v9268_v34, %v3729_v33  ;;  %v3727_v52 = vmax.f32 %v3607_v43, 0.0  ;;  %v3948_v35 = vsel %vm1360_vm3, %v3796_v15, 0.0  ;;  %v9498_v43 = vld [vmem:[%s11342_s3 + $0x3] ss:$0 sm:$0xff] }
 0x4b9   : > { %v3797_v9 = vmul.f32 %v9268_v34, %v3727_v52  ;;  %v3957_v54 = vsel %vm1360_vm3, %v3799_v49, 0.0 }
 0x4ba   : > { %3937 = vadd.xlane.f32.xlu1 %v3936_v53  ;;  %3955 = vadd.xlane.f32.xlu0 %v3954_v40 }
 0x4bb   : > { %v3951_v10 = vsel %vm1360_vm3, %v3797_v9, 0.0 }
 0x4be   : > { %3949 = vadd.xlane.f32.xlu0 %v3948_v35 }
 0x4c2   : > { %3958 = vadd.xlane.f32.xlu0 %v3957_v54  ;;  %v9506_v54 = vpop.f32.mrf.mxu1 }
 0x4c6   : > { %3952 = vadd.xlane.f32.xlu0 %v3951_v10 }
 0x4c7   : > { %v7659_v19 = vpop.f32.mrf.mxu0 }
 0x4c8   : > { %v3628_v8 = vadd.f32 %v7659_v19, %v9262_v37 }
 0x4c9   : > { %v3619_v60 = vpop.f32.mrf.mxu0 }
 0x4ca   : > { %v3732_v61 = vmax.f32 %v3628_v8, 0.0  ;;  %v3620_v1 = vadd.f32 %v9262_v37, %v3619_v60  ;;  %v9511_v8 = vadd.f32 %v9301_v5, %v9498_v43  ;;  %v9525_v5 = vadd.f32 %v9498_v43, %v9317_v47 }
 0x4cb   : > { %v7660_v31 = vpop.f32.mrf.mxu0  ;;  %v9542_v47 = vadd.f32 %v9340_v21, %v9498_v43  ;;  %v9556_v21 = vadd.f32 %v9498_v43, %v9362_v50  ;;  %v9573_v50 = vadd.f32 %v9383_v24, %v9498_v43 }
 0x4cc   : > { %v3802_v44 = vmul.f32 %v9268_v34, %v3732_v61  ;;  %v3730_v25 = vmax.f32 %v3620_v1, 0.0  ;;  %v3631_v29 = vadd.f32 %v7660_v31, %v9262_v37  ;;  %11462 = vst [vmem:[#allocation2_spill] sm:$0xff] %v9511_v8  ;;  %v9517_v61 = vadd.f32 %v9498_v43, %v9306_v20  ;;  %11465 = vst [vmem:[#allocation5_spill] sm:$0xff] %v9525_v5 }
 0x4cd   : > { %v3622_v27 = vpop.f32.mrf.mxu0  ;;  %v9536_v20 = vadd.f32 %v9498_v43, %v9332_v12  ;;  %11468 = vst [vmem:[#allocation8_spill] sm:$0xff] %v9542_v47  ;;  %11471 = vst [vmem:[#allocation10_spill] sm:$0xff] %v9556_v21 }
 0x4ce   : > { %v3800_v0 = vmul.f32 %v9268_v34, %v3730_v25  ;;  %v3733_v59 = vmax.f32 %v3631_v29, 0.0  ;;  %v3623_v38 = vadd.f32 %v9262_v37, %v3622_v27  ;;  %v3966_v14 = vsel %vm1360_vm3, %v3802_v44, 0.0  ;;  %v3824_v51 = vpop.xlane.xlu1 %3823  ;;  %11463 = vst [vmem:[#allocation3_spill] sm:$0xff] %v9517_v61  ;;  %11474 = vst [vmem:[#allocation15_spill] sm:$0xff] %v9573_v50 }
 0x4cf   : > { %3967 = vadd.xlane.f32.xlu1 %v3966_v14  ;;  %v9483_v22 = vadd.f32 %v9480_v28, %v3824_v51  ;;  %v9521_v29 = vadd.f32 %v9311_v4, %v9498_v43  ;;  %v9529_v27 = vadd.f32 %v9325_v7, %v9498_v43  ;;  %11467 = vst [vmem:[#allocation6_spill] sm:$0xff] %v9536_v20 }
 0x4d0   : > { %v3731_v18 = vmax.f32 %v3623_v38, 0.0  ;;  %v3803_v41 = vmul.f32 %v9268_v34, %v3733_v59  ;;  %v3960_v32 = vsel %vm1360_vm3, %v3800_v0, 0.0  ;;  %v3818_v53 = vpop.xlane.xlu0 %3817  ;;  %v9538_v59 = vpop.f32.mrf.mxu1  ;;  %v9546_v7 = vadd.f32 %v9498_v43, %v9348_v46 }
 0x4d1   : > { %v4091_v15 = vsel %vm4076_vm5, %v9483_v22, -inf  ;;  %v9493_v33 = vadd.f32 %v9480_v28, %v3818_v53  ;;  %11464 = vst [vmem:[#allocation4_spill] sm:$0xff] %v9521_v29  ;;  %11466 = vst [vmem:[#allocation7_spill] sm:$0xff] %v9529_v27  ;;  %v9560_v46 = vadd.f32 %v9369_v39, %v9498_v43  ;;  %v9577_v39 = vadd.f32 %v9498_v43, %v9387_v58 }
 0x4d2   : > { %v3801_v62 = vmul.f32 %v9268_v34, %v3731_v18  ;;  %v4092_v40 = vrot.slane %v4091_v15, 4  ;;  %v3827_v52 = vpop.xlane.xlu1 %3826  ;;  %v3969_v19 = vsel %vm1360_vm3, %v3803_v41, 0.0  ;;  %11469 = vst [vmem:[#allocation9_spill] sm:$0xff] %v9546_v7  ;;  %v9550_v18 = vadd.f32 %v9354_v55, %v9498_v43 }
 0x4d3   : > { %3961 = vadd.xlane.f32.xlu1 %v3960_v32  ;;  %v4077_v35 = vsel %vm4076_vm5, %v9493_v33, -inf  ;;  %v9504_v9 = vadd.f32 %v9480_v28, %v3827_v52  ;;  %11472 = vst [vmem:[#allocation12_spill] sm:$0xff] %v9560_v46  ;;  %v9564_v55 = vadd.f32 %v9498_v43, %v9377_v56  ;;  %11475 = vst [vmem:[#allocation14_spill] sm:$0xff] %v9577_v39 }
 0x4d4   : > { %v3963_v49 = vsel %vm1360_vm3, %v3801_v62, 0.0  ;;  %v4093_v42 = vmax.f32 %v4091_v15, %v4092_v40  ;;  %v4078_v10 = vrot.slane %v4077_v35, 4  ;;  %11470 = vst [vmem:[#allocation11_spill] sm:$0xff] %v9550_v18  ;;  %v9569_v40 = vpop.f32.mrf.mxu1  ;;  %v9581_v56 = vadd.f32 %v9394_v45, %v9498_v43 }
 0x4d5   : > { %3964 = vadd.xlane.f32.xlu0 %v3963_v49  ;;  %v4098_v60 = vsel %vm4076_vm5, %v9504_v9, -inf  ;;  %11473 = vst [vmem:[#allocation13_spill] sm:$0xff] %v9564_v55 }
 0x4d6   : > { %v4094_v1 = vrot.slane %v4093_v42, 2  ;;  %v4079_v31 = vmax.f32 %v4077_v35, %v4078_v10  ;;  %v4099_v44 = vrot.slane %v4098_v60, 4  ;;  %v3821_v25 = vpop.xlane.xlu1 %3820  ;;  %11476 = vst [vmem:[#allocation16_spill] sm:$0xff] %v9581_v56 }
 0x4d7   : > { %3970 = vadd.xlane.f32.xlu1 %v3969_v19  ;;  %v9532_v0 = vadd.f32 %v9480_v28, %v3821_v25  ;;  %v9594_v25 = vadd.f32 %v9410_v63, %v9498_v43 }
 0x4d8   : > { %v4095_v38 = vmax.f32 %v4093_v42, %v4094_v1  ;;  %v4080_v4 = vrot.slane %v4079_v31, 2  ;;  %v4100_v14 = vmax.f32 %v4098_v60, %v4099_v44  ;;  %v9587_v60 = vadd.f32 %v9498_v43, %v9402_v11  ;;  %v9589_v1 = vpop.f32.mrf.mxu1 }
 0x4d9   : > { %v4084_v12 = vsel %vm4076_vm5, %v9532_v0, -inf  ;;  %11478 = vst [vmem:[#allocation17_spill] sm:$0xff] %v9594_v25  ;;  %v9601_v11 = vadd.f32 %v9498_v43, %v9416_v57 }
 0x4da   : > { %v4096_v51 = vrot.slane %v4095_v38, 1  ;;  %v4081_v41 = vmax.f32 %v4079_v31, %v4080_v4  ;;  %v4101_v62 = vrot.slane %v4100_v14, 2  ;;  %v4085_v32 = vrot.slane %v4084_v12, 4  ;;  %11477 = vst [vmem:[#allocation18_spill] sm:$0xff] %v9587_v60 }
 0x4db   : > { %11479 = vst [vmem:[#allocation19_spill] sm:$0xff] %v9601_v11 }
 0x4dc   : > { %v3836_v53 = vpop.xlane.xlu1 %3835  ;;  %v4097_v49 = vmax.f32 %v4095_v38, %v4096_v51  ;;  %v4082_v52 = vrot.slane %v4081_v41, 1  ;;  %v4102_v35 = vmax.f32 %v4100_v14, %v4101_v62  ;;  %v4086_v42 = vmax.f32 %v4084_v12, %v4085_v32 }
 0x4dd   : > { %v9567_v15 = vadd.f32 %v9480_v28, %v3836_v53  ;;  %v9606_v62 = vadd.f32 %v9422_v3, %v9498_v43 }
 0x4de   : > { %v7663_v10 = vpop.f32.mrf.mxu0  ;;  %v4083_v24 = vmax.f32 %v4081_v41, %v4082_v52  ;;  %v4103_v31 = vrot.slane %v4102_v35, 1  ;;  %v4087_v38 = vrot.slane %v4086_v42, 2  ;;  %v4527_v12 = vsub.f32 %v9483_v22, %v4097_v49 }
 0x4df   : > { %v4119_v19 = vsel %vm4076_vm5, %v9567_v15, -inf  ;;  %v3644_v44 = vadd.f32 %v7663_v10, %v9262_v37  ;;  %11480 = vst [vmem:[#allocation20_spill] sm:$0xff] %v9606_v62  ;;  %v9611_v10 = vadd.f32 %v9498_v43, %v9431_v26 }
 0x4e0   : > { %v3830_v58 = vpop.xlane.xlu1 %3829  ;;  %v3635_v45 = vpop.f32.mrf.mxu0  ;;  %v4120_v4 = vrot.slane %v4119_v19, 4  ;;  %v4104_v51 = vmax.f32 %v4102_v35, %v4103_v31  ;;  %v4088_v32 = vmax.f32 %v4086_v42, %v4087_v38  ;;  %v4525_v57 = vsub.f32 %v9493_v33, %v4083_v24 }
 0x4e1   : > { %v9597_v14 = vadd.f32 %v9480_v28, %v3830_v58  ;;  %v3736_v41 = vmax.f32 %v3644_v44, 0.0  ;;  %v3636_v63 = vadd.f32 %v9262_v37, %v3635_v45  ;;  %11481 = vst [vmem:[#allocation22_spill] sm:$0xff] %v9611_v10  ;;  %v9613_v58 = vpop.f32.mrf.mxu1  ;;  %v4593_v45 = vmul.f32 1.442695, %v4527_v12 }
 0x4e2   : > { %v7664_v53 = vpop.f32.mrf.mxu0  ;;  %v4121_v52 = vmax.f32 %v4119_v19, %v4120_v4  ;;  %v4089_v31 = vrot.slane %v4088_v32, 1  ;;  %v4528_v26 = vsub.f32 %v9504_v9, %v4104_v51  ;;  %v4589_v11 = vmul.f32 1.442695, %v4525_v57 }
 0x4e3   : > { %v3806_v22 = vmul.f32 %v9268_v34, %v3736_v41  ;;  %v4105_v49 = vsel %vm4076_vm5, %v9597_v14, -inf  ;;  %v3734_v35 = vmax.f32 %v3636_v63, 0.0  ;;  %v3647_v42 = vadd.f32 %v7664_v53, %v9262_v37  ;;  %v9628_v53 = vpop.f32.mrf.mxu1 }
 0x4e4   : > { %v3839_v3 = vpop.xlane.xlu1 %3838  ;;  %v3638_v44 = vpop.f32.mrf.mxu0  ;;  %v4122_v19 = vrot.slane %v4121_v52, 2  ;;  %v4090_v24 = vmax.f32 %v4088_v32, %v4089_v31  ;;  %v9626_v63 = vadd.f32 %v9440_v48, %v9498_v43  ;;  %v4106_v12 = vrot.slane %v4105_v49, 4 }
 0x4e5   : > { %v3639_v38 = vadd.f32 %v9262_v37, %v3638_v44  ;;  %v3978_v4 = vsel %vm1360_vm3, %v3806_v22, 0.0  ;;  %v3804_v33 = vmul.f32 %v9268_v34, %v3734_v35  ;;  %v3737_v41 = vmax.f32 %v3647_v42, 0.0 }
 0x4e6   : > { %v4123_v10 = vmax.f32 %v4121_v52, %v4122_v19  ;;  %3979 = vadd.xlane.f32.xlu1 %v3978_v4  ;;  %11482 = vst [vmem:[#allocation21_spill] sm:$0xff] %v9626_v63  ;;  %v9631_v9 = vadd.f32 %v9480_v28, %v3839_v3  ;;  %v4526_v51 = vsub.f32 %v9532_v0, %v4090_v24  ;;  %7753 = vpow2.f32 %v4593_v45  ;;  %v9641_v4 = vpop.f32.mrf.mxu1 }
 0x4e7   : > { %v3807_v22 = vmul.f32 %v9268_v34, %v3737_v41  ;;  %v3735_v35 = vmax.f32 %v3639_v38, 0.0  ;;  %v4107_v42 = vmax.f32 %v4105_v49, %v4106_v12  ;;  %v3972_v44 = vsel %vm1360_vm3, %v3804_v33, 0.0 }
 0x4e8   : > { %v4124_v32 = vrot.slane %v4123_v10, 1  ;;  %v3848_v31 = vpop.xlane.xlu0 %3847  ;;  %v3833_v52 = vpop.xlane.xlu1 %3832  ;;  %v4126_v57 = vsel %vm4076_vm5, %v9631_v9, -inf  ;;  %v4595_v3 = vmul.f32 1.442695, %v4528_v26  ;;  %v4591_v38 = vmul.f32 1.442695, %v4526_v51 }
 0x4e9   : > { %v9637_v48 = vadd.f32 %v9480_v28, %v3848_v31  ;;  %v4127_v0 = vrot.slane %v4126_v57, 4  ;;  %v4108_v24 = vrot.slane %v4107_v42, 2  ;;  %v9646_v33 = vadd.f32 %v9480_v28, %v3833_v52 }
 0x4ea   : > { %v4125_v19 = vmax.f32 %v4123_v10, %v4124_v32  ;;  %3973 = vadd.xlane.f32.xlu1 %v3972_v44  ;;  %7755 = vpow2.f32 %v4589_v11  ;;  %v3805_v41 = vmul.f32 %v9268_v34, %v3735_v35  ;;  %v3981_v10 = vsel %vm1360_vm3, %v3807_v22, 0.0  ;;  %v7579_v11 = vpop.f32.mrf.mxu1 }
 0x4eb   : > { %v4147_v49 = vsel %vm4076_vm5, %v9637_v48, -inf  ;;  %v4128_v31 = vmax.f32 %v4126_v57, %v4127_v0  ;;  %v4109_v26 = vmax.f32 %v4107_v42, %v4108_v24  ;;  %v4112_v51 = vsel %vm4076_vm5, %v9646_v33, -inf }
 0x4ec   : > { %v4148_v12 = vrot.slane %v4147_v49, 4  ;;  %v3842_v45 = vpop.xlane.xlu0 %3841  ;;  %7757 = vpow2.f32 %v4595_v3  ;;  %v4531_v44 = vsub.f32 %v9567_v15, %v4125_v19  ;;  %v4113_v42 = vrot.slane %v4112_v51, 4 }
 0x4ed   : > { %v9651_v32 = vadd.f32 %v9480_v28, %v3842_v45  ;;  %v4129_v63 = vrot.slane %v4128_v31, 2  ;;  %7759 = vpow2.f32 %v4591_v38  ;;  %v4110_v34 = vrot.slane %v4109_v26, 1 }
 0x4ee   : > { %v4149_v52 = vmax.f32 %v4147_v49, %v4148_v12  ;;  %3982 = vadd.xlane.f32.xlu1 %v3981_v10  ;;  %v9660_v22 = vadd.f32 %v9498_v43, %v9447_v36  ;;  %v9664_v15 = vadd.f32 %v9453_v16, %v9498_v43  ;;  %v9668_v3 = vadd.f32 %v9498_v43, %v9457_v2 }
 0x4ef   : > { %v4133_v35 = vsel %vm4076_vm5, %v9651_v32, -inf  ;;  %v4130_v0 = vmax.f32 %v4128_v31, %v4129_v63  ;;  %v4111_v19 = vmax.f32 %v4109_v26, %v4110_v34  ;;  %v3975_v49 = vsel %vm1360_vm3, %v3805_v41, 0.0  ;;  %v3036_v31 = vpop.f32.mrf.mxu1 }
 0x4f0   : > { %11483 = vst [vmem:[#allocation23_spill] sm:$0xff] %v9660_v22  ;;  %v4150_v57 = vrot.slane %v4149_v52, 2  ;;  %v4134_v24 = vrot.slane %v4133_v35, 4  ;;  %11484 = vst [vmem:[#allocation24_spill] sm:$0xff] %v9664_v15  ;;  %v9673_v12 = vadd.f32 %v9461_v6, %v9498_v43  ;;  %v4601_v36 = vmul.f32 1.442695, %v4531_v44 }
 0x4f1   : > { %11485 = vst [vmem:[#allocation26_spill] sm:$0xff] %v9668_v3  ;;  %v7667_v38 = vpop.f32.mrf.mxu0  ;;  %v4131_v63 = vrot.slane %v4130_v0, 1  ;;  %v9677_v16 = vadd.f32 %v9498_v43, %v9464_v13  ;;  %v4529_v2 = vsub.f32 %v9597_v14, %v4111_v19  ;;  %v4114_v26 = vmax.f32 %v4112_v51, %v4113_v42  ;;  %v3851_v19 = vpop.xlane.xlu0 %3850 }
 0x4f2   : > { %11486 = vst [vmem:[#allocation25_spill] sm:$0xff] %v9673_v12  ;;  %v4151_v45 = vmax.f32 %v4149_v52, %v4150_v57  ;;  %3976 = vadd.xlane.f32.xlu1 %v3975_v49  ;;  %v4135_v10 = vmax.f32 %v4133_v35, %v4134_v24  ;;  %v9682_v41 = vadd.f32 %v9467_v17, %v9498_v43  ;;  %7761 = vpow2.f32 %v4601_v36 }
 0x4f3   : > { %11487 = vst [vmem:[#allocation27_spill] sm:$0xff] %v9677_v16  ;;  %v4132_v6 = vmax.f32 %v4130_v0, %v4131_v63  ;;  %v3660_v44 = vadd.f32 %v7667_v38, %v9262_v37  ;;  %v9687_v52 = vadd.f32 %v9498_v43, %v9472_v23  ;;  %v9691_v13 = vadd.f32 %v9485_v30, %v9498_v43  ;;  %v3651_v35 = vpop.f32.mrf.mxu0  ;;  %v9705_v42 = vpop.eup %7753 }
 0x4f4   : > { %11488 = vst [vmem:[#allocation28_spill] sm:$0xff] %v9682_v41  ;;  %v4152_v34 = vrot.slane %v4151_v45, 1  ;;  %v9695_v14 = vadd.f32 %v9498_v43, %v9506_v54  ;;  %v4136_v51 = vrot.slane %v4135_v10, 2  ;;  %v9699_v17 = vadd.f32 %v9538_v59, %v9498_v43  ;;  %v7580_v30 = vpop.f32.mrf.mxu1 }
 0x4f5   : > { %11489 = vst [vmem:[#allocation29_spill] sm:$0xff] %v9687_v52  ;;  %11490 = vst [vmem:[#allocation30_spill] sm:$0xff] %v9691_v13  ;;  %v9703_v37 = vadd.f32 %v9498_v43, %v9569_v40  ;;  %v4597_v57 = vmul.f32 1.442695, %v4529_v2  ;;  %v4532_v0 = vsub.f32 %v9631_v9, %v4132_v6  ;;  %v4115_v24 = vrot.slane %v4114_v26, 2 }
 0x4f6   : > { %11491 = vst [vmem:[#allocation31_spill] sm:$0xff] %v9695_v14  ;;  %11492 = vst [vmem:[#allocation32_spill] sm:$0xff] %v9699_v17  ;;  %v4153_v23 = vmax.f32 %v4151_v45, %v4152_v34  ;;  %v4137_v54 = vmax.f32 %v4135_v10, %v4136_v51  ;;  %v9710_v38 = vadd.f32 %v9589_v1, %v9498_v43  ;;  %v3740_v49 = vmax.f32 %v3660_v44, 0.0  ;;  %v9726_v1 = vld [vmem:[%s11342_s3 + $0x4] ss:$0 sm:$0xff]  ;;  %v3039_v44 = vpop.f32.mrf.mxu1 }
 0x4f7   : > { %11493 = vst [vmem:[#allocation33_spill] sm:$0xff] %v9703_v37  ;;  %v9714_v59 = vadd.f32 %v9498_v43, %v9613_v58  ;;  %v9717_v36 = vpop.eup %7755  ;;  %v9721_v45 = vadd.f32 %v9628_v53, %v9498_v43  ;;  %v4603_v9 = vmul.f32 1.442695, %v4532_v0  ;;  %v3652_v2 = vadd.f32 %v9726_v1, %v3651_v35  ;;  %v7668_v58 = vpop.f32.mrf.mxu0 }
 0x4f8   : > { %11494 = vst [vmem:[#allocation34_spill] sm:$0xff] %v9710_v38  ;;  %v4535_v40 = vsub.f32 %v9637_v48, %v4153_v23  ;;  %v4138_v63 = vrot.slane %v4137_v54, 1  ;;  %v9731_v48 = vadd.f32 %v9498_v43, %v9641_v4  ;;  %v9734_v10 = vadd.f32 %v7579_v11, %v9498_v43  ;;  %v9748_v4 = vld [vmem:[%s11342_s3 + $0x5] ss:$0 sm:$0xff]  ;;  %v7583_v17 = vpop.f32.mrf.mxu1 }
 0x4f9   : > { %11495 = vst [vmem:[#allocation35_spill] sm:$0xff] %v9714_v59  ;;  %11496 = vst [vmem:[#allocation36_spill] sm:$0xff] %v9721_v45  ;;  %v9737_v53 = vadd.f32 %v9498_v43, %v3036_v31  ;;  %v4731_v34 = vsel %vm4076_vm5, %v9705_v42, 0.0  ;;  %v9741_v6 = vpop.eup %7757  ;;  %7763 = vpow2.f32 %v4597_v57  ;;  %v4116_v23 = vmax.f32 %v4114_v26, %v4115_v24  ;;  %v3654_v24 = vpop.f32.mrf.mxu0 }
 0x4fa   : > { %11497 = vst [vmem:[#allocation37_spill] sm:$0xff] %v9731_v48  ;;  %11498 = vst [vmem:[#allocation38_spill] sm:$0xff] %v9734_v10  ;;  %v4609_v51 = vmul.f32 1.442695, %v4535_v40  ;;  %v4139_v35 = vmax.f32 %v4137_v54, %v4138_v63  ;;  %v9743_v0 = vpop.eup %7759  ;;  %7765 = vpow2.f32 %v4603_v9  ;;  %v3810_v11 = vmul.f32 %v9748_v4, %v3740_v49  ;;  %v3845_v40 = vpop.xlane.xlu0 %3844 }
 0x4fb   : > { %11499 = vst [vmem:[#allocation39_spill] sm:$0xff] %v9737_v53  ;;  %v3738_v31 = vmax.f32 %v3652_v2, 0.0  ;;  %v9752_v48 = vadd.f32 %v9480_v28, %v3851_v19  ;;  %v9755_v53 = vadd.f32 %v7580_v30, %v9498_v43  ;;  %v4732_v57 = vrot.slane %v4731_v34, 4 }
 0x4fc   : > { %v4533_v26 = vsub.f32 %v9651_v32, %v4139_v35  ;;  %v3663_v54 = vadd.f32 %v9726_v1, %v7668_v58  ;;  %v9760_v9 = vadd.f32 %v9498_v43, %v3039_v44  ;;  %v4717_v49 = vsel %vm4076_vm5, %v9717_v36, 0.0 }
 0x4fd   : > { %11500 = vst [vmem:[#allocation40_spill] sm:$0xff] %v9755_v53  ;;  %v4738_v19 = vsel %vm4076_vm5, %v9741_v6, 0.0  ;;  %7767 = vpow2.f32 %v4609_v51  ;;  %v4724_v30 = vsel %vm4076_vm5, %v9743_v0, 0.0  ;;  %v3808_v63 = vmul.f32 %v9748_v4, %v3738_v31 }
 0x4fe   : > { %11501 = vst [vmem:[#allocation41_spill] sm:$0xff] %v9760_v9  ;;  %v4117_v32 = vrot.slane %v4116_v23, 1  ;;  %v3741_v2 = vmax.f32 %v3663_v54, 0.0  ;;  %v4605_v58 = vmul.f32 1.442695, %v4533_v26  ;;  %v4154_v35 = vsel %vm4076_vm5, %v9752_v48, -inf  ;;  %v3872_v26 = vpop.xlane.xlu1 %3871 }
 0x4ff   : > { %v3655_v44 = vadd.f32 %v9726_v1, %v3654_v24  ;;  %v3990_v53 = vsel %vm1360_vm3, %v3810_v11, 0.0  ;;  %v4733_v9 = vadd.f32 %v4732_v57, %v4731_v34  ;;  %v4718_v37 = vrot.slane %v4717_v49, 4  ;;  %v9777_v13 = vpop.eup %7761 }
 0x500   : > { %v4739_v10 = vrot.slane %v4738_v19, 4  ;;  %v3811_v51 = vmul.f32 %v9748_v4, %v3741_v2  ;;  %3991 = vadd.xlane.f32.xlu0 %v3990_v53  ;;  %v4725_v14 = vrot.slane %v4724_v30, 4  ;;  %v4155_v45 = vrot.slane %v4154_v35, 4  ;;  %v3860_v2 = vpop.xlane.xlu0 %3859 }
 0x501   : > { %v3739_v31 = vmax.f32 %v3655_v44, 0.0  ;;  %v9775_v54 = vadd.f32 %v9480_v28, %v3845_v40  ;;  %v9780_v24 = vadd.f32 %v7583_v17, %v9498_v43  ;;  %v4118_v11 = vmax.f32 %v4116_v23, %v4117_v32 }
 0x502   : > { %v3984_v34 = vsel %vm1360_vm3, %v3808_v63, 0.0  ;;  %v3993_v57 = vsel %vm1360_vm3, %v3811_v51, 0.0  ;;  %7769 = vpow2.f32 %v4605_v58  ;;  %v4156_v53 = vmax.f32 %v4154_v35, %v4155_v45 }
 0x503   : > { %11502 = vst [vmem:[#allocation42_spill] sm:$0xff] %v9780_v24  ;;  %v3809_v59 = vmul.f32 %v9748_v4, %v3739_v31  ;;  %v4140_v40 = vsel %vm4076_vm5, %v9775_v54, -inf  ;;  %3985 = vadd.xlane.f32.xlu1 %v3984_v34  ;;  %v4734_v44 = vrot.slane %v4733_v9, 2  ;;  %v4719_v52 = vadd.f32 %v4718_v37, %v4717_v49  ;;  %v3052_v31 = vpop.f32.mrf.mxu1 }
 0x504   : > { %v4141_v38 = vrot.slane %v4140_v40, 4  ;;  %3994 = vadd.xlane.f32.xlu0 %v3993_v57  ;;  %v9788_v17 = vadd.f32 %v9480_v28, %v3872_v26  ;;  %v4740_v23 = vadd.f32 %v4739_v10, %v4738_v19  ;;  %v4726_v63 = vadd.f32 %v4725_v14, %v4724_v30 }
 0x505   : > { %v4157_v32 = vrot.slane %v4156_v53, 2  ;;  %v9791_v51 = vadd.f32 %v9480_v28, %v3860_v2  ;;  %v4759_v45 = vsel %vm4076_vm5, %v9777_v13, 0.0  ;;  %v4530_v58 = vsub.f32 %v9646_v33, %v4118_v11 }
 0x506   : > { %v4142_v35 = vmax.f32 %v4140_v40, %v4141_v38  ;;  %v4203_v37 = vsel %vm4076_vm5, %v9788_v17, -inf  ;;  %v9798_v49 = vpop.eup %7763  ;;  %v3987_v10 = vsel %vm1360_vm3, %v3809_v59, 0.0  ;;  %v9806_v30 = vadd.f32 %v9498_v43, %v3052_v31 }
 0x507   : > { %v4158_v26 = vmax.f32 %v4156_v53, %v4157_v32  ;;  %v4204_v34 = vrot.slane %v4203_v37, 4  ;;  %v4175_v14 = vsel %vm4076_vm5, %v9791_v51, -inf  ;;  %v9803_v19 = vpop.eup %7765  ;;  %v4720_v33 = vrot.slane %v4719_v52, 2  ;;  %v3866_v53 = vpop.xlane.xlu1 %3865 }
 0x508   : > { %11503 = vst [vmem:[#allocation43_spill] sm:$0xff] %v9806_v30  ;;  %v4143_v38 = vrot.slane %v4142_v35, 2  ;;  %v4176_v11 = vrot.slane %v4175_v14, 4  ;;  %3988 = vadd.xlane.f32.xlu0 %v3987_v10  ;;  %v4741_v57 = vrot.slane %v4740_v23, 2  ;;  %v4760_v2 = vrot.slane %v4759_v45, 4 }
 0x509   : > { %v4159_v40 = vrot.slane %v4158_v26, 1  ;;  %v4205_v24 = vmax.f32 %v4203_v37, %v4204_v34  ;;  %v9810_v41 = vadd.f32 %v4734_v44, %v4733_v9  ;;  %v4727_v16 = vrot.slane %v4726_v63, 2  ;;  %v7671_v37 = vpop.f32.mrf.mxu0 }
 0x50a   : > { %v9808_v32 = vpop.eup %7767  ;;  %v4144_v59 = vmax.f32 %v4142_v35, %v4143_v38  ;;  %v4177_v3 = vmax.f32 %v4175_v14, %v4176_v11  ;;  %v4745_v43 = vsel %vm4076_vm5, %v9798_v49, 0.0  ;;  %v4766_v31 = vsel %vm4076_vm5, %v9803_v19, 0.0 }
 0x50b   : > { %v4599_v30 = vmul.f32 1.442695, %v4530_v58  ;;  %v4160_v10 = vmax.f32 %v4158_v26, %v4159_v40  ;;  %v4206_v15 = vrot.slane %v4205_v24, 2  ;;  %v9817_v34 = vadd.f32 %v9480_v28, %v3866_v53  ;;  %v3854_v53 = vpop.xlane.xlu0 %3853 }
 0x50c   : > { %v4145_v12 = vrot.slane %v4144_v59, 1  ;;  %v4178_v22 = vrot.slane %v4177_v3, 2  ;;  %v9819_v9 = vadd.f32 %v4720_v33, %v4719_v52  ;;  %v9821_v44 = vadd.f32 %v4741_v57, %v4740_v23  ;;  %v3667_v57 = vpop.f32.mrf.mxu0 }
 0x50d   : > { %v4761_v35 = vadd.f32 %v4760_v2, %v4759_v45  ;;  %v4787_v14 = vsel %vm4076_vm5, %v9808_v32, 0.0  ;;  %v9825_v38 = vadd.f32 %v4727_v16, %v4726_v63  ;;  %v4207_v58 = vmax.f32 %v4205_v24, %v4206_v15 }
 0x50e   : > { %v4146_v11 = vmax.f32 %v4144_v59, %v4145_v12  ;;  %v4179_v26 = vmax.f32 %v4177_v3, %v4178_v22  ;;  %v4746_v40 = vrot.slane %v4745_v43, 4  ;;  %v4767_v60 = vrot.slane %v4766_v31, 4 }
 0x50f   : > { %7771 = vpow2.f32 %v4599_v30  ;;  %v3676_v62 = vadd.f32 %v9726_v1, %v7671_v37  ;;  %v9828_v56 = vpop.eup %7769  ;;  %v4788_v52 = vrot.slane %v4787_v14, 4  ;;  %v4536_v23 = vsub.f32 %v9752_v48, %v4160_v10  ;;  %v3875_v37 = vpop.xlane.xlu1 %3874 }
 0x510   : > { %v4208_v45 = vrot.slane %v4207_v58, 1  ;;  %v4189_v33 = vsel %vm4076_vm5, %v9817_v34, -inf  ;;  %v4762_v22 = vrot.slane %v4761_v35, 2  ;;  %v4180_v3 = vrot.slane %v4179_v26, 1 }
 0x511   : > { %v4534_v63 = vsub.f32 %v9775_v54, %v4146_v11  ;;  %v9838_v2 = vadd.f32 %v4746_v40, %v4745_v43  ;;  %v4773_v48 = vsel %vm4076_vm5, %v9828_v56, 0.0  ;;  %v3744_v59 = vmax.f32 %v3676_v62, 0.0 }
 0x512   : > { %v4209_v30 = vmax.f32 %v4207_v58, %v4208_v45  ;;  %v4190_v10 = vrot.slane %v4189_v33, 4  ;;  %v9842_v16 = vadd.f32 %v4788_v52, %v4787_v14  ;;  %v9844_v15 = vadd.f32 %v4767_v60, %v4766_v31  ;;  %v3863_v58 = vpop.xlane.xlu0 %3862 }
 0x513   : > { %v4611_v25 = vmul.f32 1.442695, %v4536_v23  ;;  %v9847_v12 = vadd.f32 %v9480_v28, %v3854_v53  ;;  %v9849_v24 = vadd.f32 %v4762_v22, %v4761_v35  ;;  %v4181_v54 = vmax.f32 %v4179_v26, %v4180_v3 }
 0x514   : > { %v4191_v11 = vmax.f32 %v4189_v33, %v4190_v10  ;;  %v3668_v43 = vadd.f32 %v9726_v1, %v3667_v57  ;;  %v4774_v40 = vrot.slane %v4773_v48, 4  ;;  %v4607_v45 = vmul.f32 1.442695, %v4534_v63  ;;  %v3884_v63 = vpop.xlane.xlu1 %3883 }
 0x515   : > { %v4543_v62 = vsub.f32 %v9788_v17, %v4209_v30  ;;  %v4161_v14 = vsel %vm4076_vm5, %v9847_v12, -inf  ;;  %v4748_v60 = vrot.slane %v9838_v2, 2  ;;  %v3814_v31 = vmul.f32 %v9748_v4, %v3744_v59 }
 0x516   : > { %v4192_v53 = vrot.slane %v4191_v11, 2  ;;  %v4162_v52 = vrot.slane %v4161_v14, 4  ;;  %v4790_v35 = vrot.slane %v9842_v16, 2  ;;  %v4769_v26 = vrot.slane %v9844_v15, 2 }
 0x517   : > { %7773 = vpow2.f32 %v4611_v25  ;;  %v3742_v23 = vmax.f32 %v3668_v43, 0.0  ;;  %v4539_v33 = vsub.f32 %v9791_v51, %v4181_v54  ;;  %v9861_v17 = vadd.f32 %v9480_v28, %v3875_v37  ;;  %v3857_v54 = vpop.xlane.xlu0 %3856  ;;  %v7672_v37 = vpop.f32.mrf.mxu0 }
 0x518   : > { %v4193_v22 = vmax.f32 %v4191_v11, %v4192_v53  ;;  %v4163_v3 = vmax.f32 %v4161_v14, %v4162_v52  ;;  %v9863_v30 = vadd.f32 %v4774_v40, %v4773_v48  ;;  %7775 = vpow2.f32 %v4607_v45  ;;  %v3878_v20 = vpop.xlane.xlu1 %3877 }
 0x519   : > { %v4625_v57 = vmul.f32 1.442695, %v4543_v62  ;;  %v9866_v59 = vadd.f32 %v9480_v28, %v3863_v58  ;;  %v3812_v25 = vmul.f32 %v9748_v4, %v3742_v23  ;;  %v4210_v51 = vsel %vm4076_vm5, %v9861_v17, -inf }
 0x51a   : > { %v4194_v10 = vrot.slane %v4193_v22, 1  ;;  %v4164_v39 = vrot.slane %v4163_v3, 2  ;;  %v4211_v43 = vrot.slane %v4210_v51, 4  ;;  %v4002_v40 = vsel %vm1360_vm3, %v3814_v31, 0.0 }
 0x51b   : > { %v4182_v48 = vsel %vm4076_vm5, %v9866_v59, -inf  ;;  %v9877_v58 = vadd.f32 %v9480_v28, %v3884_v63  ;;  %v4617_v45 = vmul.f32 1.442695, %v4539_v33  ;;  %4003 = vadd.xlane.f32.xlu0 %v4002_v40  ;;  %7777 = vpow2.f32 %v4625_v57 }
 0x51c   : > { %v9871_v11 = vpop.eup %7771  ;;  %v4195_v62 = vmax.f32 %v4193_v22, %v4194_v10  ;;  %v4165_v14 = vmax.f32 %v4163_v3, %v4164_v39  ;;  %v4183_v53 = vrot.slane %v4182_v48, 4  ;;  %v4212_v52 = vmax.f32 %v4210_v51, %v4211_v43  ;;  %v3670_v22 = vpop.f32.mrf.mxu0 }
 0x51d   : > { %11504 = vst [vmem:[#allocation44_spill] sm:$0xff] %v9871_v11  ;;  %v4231_v23 = vsel %vm4076_vm5, %v9877_v58, -inf  ;;  %v9882_v7 = vadd.f32 %v9480_v28, %v3857_v54  ;;  %v4752_v50 = vsel %vm4076_vm5, %v9871_v11, 0.0  ;;  %v3996_v63 = vsel %vm1360_vm3, %v3812_v25, 0.0 }
 0x51e   : > { %v4166_v31 = vrot.slane %v4165_v14, 1  ;;  %v4184_v47 = vmax.f32 %v4182_v48, %v4183_v53  ;;  %v4541_v33 = vsub.f32 %v9817_v34, %v4195_v62  ;;  %v4213_v39 = vrot.slane %v4212_v52, 2 }
 0x51f   : > { %v4232_v3 = vrot.slane %v4231_v23, 4  ;;  %v4168_v57 = vsel %vm4076_vm5, %v9882_v7, -inf  ;;  %7779 = vpow2.f32 %v4617_v45  ;;  %v3679_v51 = vadd.f32 %v9726_v1, %v7672_v37  ;;  %3997 = vadd.xlane.f32.xlu0 %v3996_v63 }
 0x520   : > { %v4167_v10 = vmax.f32 %v4165_v14, %v4166_v31  ;;  %v4185_v54 = vrot.slane %v4184_v47, 2  ;;  %v4214_v40 = vmax.f32 %v4212_v52, %v4213_v39  ;;  %v4169_v53 = vrot.slane %v4168_v57, 4 }
 0x521   : > { %v4233_v48 = vmax.f32 %v4231_v23, %v4232_v3  ;;  %v9893_v25 = vadd.f32 %v4748_v60, %v9838_v2  ;;  %v9896_v34 = vadd.f32 %v4769_v26, %v9844_v15  ;;  %v4753_v62 = vrot.slane %v4752_v50, 4 }
 0x522   : > { %v3671_v55 = vadd.f32 %v9726_v1, %v3670_v22  ;;  %v4621_v45 = vmul.f32 1.442695, %v4541_v33  ;;  %v4215_v14 = vrot.slane %v4214_v40, 1  ;;  %v4186_v31 = vmax.f32 %v4184_v47, %v4185_v54 }
 0x523   : > { %v4234_v37 = vrot.slane %v4233_v48, 2  ;;  %v9902_v52 = vadd.f32 %v4790_v35, %v9842_v16  ;;  %v4776_v23 = vrot.slane %v9863_v30, 2  ;;  %v4537_v2 = vsub.f32 %v9847_v12, %v4167_v10  ;;  %v3869_v10 = vpop.xlane.xlu0 %3868 }
 0x524   : > { %v9899_v63 = vpop.eup %7773  ;;  %v3745_v60 = vmax.f32 %v3679_v51, 0.0  ;;  %v4216_v15 = vmax.f32 %v4214_v40, %v4215_v14  ;;  %v4187_v26 = vrot.slane %v4186_v31, 1  ;;  %v4170_v3 = vmax.f32 %v4168_v57, %v4169_v53 }
 0x525   : > { %v4235_v39 = vmax.f32 %v4233_v48, %v4234_v37  ;;  %v9906_v1 = vpop.eup %7775  ;;  %v9909_v33 = vadd.f32 %v4753_v62, %v4752_v50  ;;  %v3743_v22 = vmax.f32 %v3671_v55, 0.0  ;;  %v9912_v54 = vadd.f32 %v9480_v28, %v3878_v20 }
 0x526   : > { %v4794_v16 = vsel %vm4076_vm5, %v9899_v63, 0.0  ;;  %7781 = vpow2.f32 %v4621_v45  ;;  %v4544_v12 = vsub.f32 %v9861_v17, %v4216_v15  ;;  %v4188_v35 = vmax.f32 %v4186_v31, %v4187_v26 }
 0x527   : > { %v4613_v40 = vmul.f32 1.442695, %v4537_v2  ;;  %v4236_v48 = vrot.slane %v4235_v39, 1  ;;  %v9920_v50 = vadd.f32 %v4776_v23, %v9863_v30  ;;  %v3815_v20 = vmul.f32 %v9748_v4, %v3745_v60  ;;  %v3887_v60 = vpop.xlane.xlu1 %3886  ;;  %v3896_v47 = vpop.xlane.xlu0 %3895 }
 0x528   : > { %v4540_v55 = vsub.f32 %v9866_v59, %v4188_v35  ;;  %v4171_v53 = vrot.slane %v4170_v3, 2  ;;  %v9924_v62 = vpop.eup %7777  ;;  %v4795_v45 = vrot.slane %v4794_v16, 4  ;;  %v4627_v17 = vmul.f32 1.442695, %v4544_v12 }
 0x529   : > { %11505 = vst [vmem:[#allocation45_spill] sm:$0xff] %v9924_v62  ;;  %v4237_v14 = vmax.f32 %v4235_v39, %v4236_v48  ;;  %v4217_v31 = vsel %vm4076_vm5, %v9912_v54, -inf  ;;  %v4755_v37 = vrot.slane %v9909_v33, 2  ;;  %v4780_v2 = vsel %vm4076_vm5, %v9906_v1, 0.0 }
 0x52a   : > { %v3813_v30 = vmul.f32 %v9748_v4, %v3743_v22  ;;  %v4172_v23 = vmax.f32 %v4170_v3, %v4171_v53  ;;  %7783 = vpow2.f32 %v4613_v40  ;;  %v4218_v15 = vrot.slane %v4217_v31, 4 }
 0x52b   : > { %v4547_v59 = vsub.f32 %v9877_v58, %v4237_v14  ;;  %v9934_v26 = vadd.f32 %v9480_v28, %v3869_v10  ;;  %v4843_v12 = vsel %vm4076_vm5, %v9924_v62, 0.0  ;;  %v4619_v35 = vmul.f32 1.442695, %v4540_v55 }
 0x52c   : > { %v9936_v39 = vpop.eup %7779  ;;  %v4173_v48 = vrot.slane %v4172_v23, 1  ;;  %v4005_v51 = vsel %vm1360_vm3, %v3815_v20, 0.0  ;;  %v4796_v4 = vadd.f32 %v4795_v45, %v4794_v16  ;;  %7785 = vpow2.f32 %v4627_v17  ;;  %v3881_v17 = vpop.xlane.xlu1 %3880 }
 0x52d   : > { %v4219_v3 = vmax.f32 %v4217_v31, %v4218_v15  ;;  %v4196_v58 = vsel %vm4076_vm5, %v9934_v26, -inf  ;;  %4006 = vadd.xlane.f32.xlu0 %v4005_v51  ;;  %v4781_v22 = vrot.slane %v4780_v2, 4  ;;  %v4633_v10 = vmul.f32 1.442695, %v4547_v59 }
 0x52e   : > { %v4197_v40 = vrot.slane %v4196_v58, 4  ;;  %v9944_v53 = vadd.f32 %v9480_v28, %v3887_v60  ;;  %v4844_v14 = vrot.slane %v4843_v12, 4  ;;  %v4815_v55 = vsel %vm4076_vm5, %v9936_v39, 0.0 }
 0x52f   : > { %v4220_v43 = vrot.slane %v4219_v3, 2  ;;  %v9949_v20 = vadd.f32 %v9480_v28, %v3896_v47  ;;  %7787 = vpow2.f32 %v4619_v35  ;;  %v4174_v16 = vmax.f32 %v4172_v23, %v4173_v48 }
 0x530   : > { %v4198_v45 = vmax.f32 %v4196_v58, %v4197_v40  ;;  %v4238_v51 = vsel %vm4076_vm5, %v9944_v53, -inf  ;;  %v3999_v15 = vsel %vm1360_vm3, %v3813_v30, 0.0  ;;  %v4782_v57 = vadd.f32 %v4781_v22, %v4780_v2 }
 0x531   : > { %v4221_v31 = vmax.f32 %v4219_v3, %v4220_v43  ;;  %v4239_v59 = vrot.slane %v4238_v51, 4  ;;  %v4259_v60 = vsel %vm4076_vm5, %v9949_v20, -inf  ;;  %7789 = vpow2.f32 %v4633_v10  ;;  %4000 = vadd.xlane.f32.xlu0 %v3999_v15  ;;  %v3899_v15 = vpop.xlane.xlu0 %3898 }
 0x532   : > { %v4199_v46 = vrot.slane %v4198_v45, 2  ;;  %v4260_v27 = vrot.slane %v4259_v60, 4  ;;  %v4816_v23 = vrot.slane %v4815_v55, 4  ;;  %v9959_v58 = vadd.f32 %v9480_v28, %v3881_v17 }
 0x533   : > { %v9956_v47 = vpop.eup %7781  ;;  %v4222_v35 = vrot.slane %v4221_v31, 1  ;;  %v4240_v48 = vmax.f32 %v4238_v51, %v4239_v59  ;;  %v9962_v43 = vadd.f32 %v4755_v37, %v9909_v33  ;;  %v4797_v3 = vrot.slane %v4796_v4, 2 }
 0x534   : > { %11506 = vst [vmem:[#allocation46_spill] sm:$0xff] %v9956_v47  ;;  %v4845_v40 = vadd.f32 %v4844_v14, %v4843_v12  ;;  %v4200_v21 = vmax.f32 %v4198_v45, %v4199_v46  ;;  %v4538_v2 = vsub.f32 %v9882_v7, %v4174_v16  ;;  %v4261_v10 = vmax.f32 %v4259_v60, %v4260_v27 }
 0x535   : > { %v4223_v30 = vmax.f32 %v4221_v31, %v4222_v35  ;;  %v4241_v22 = vrot.slane %v4240_v48, 2  ;;  %v4783_v5 = vrot.slane %v4782_v57, 2  ;;  %v4829_v18 = vsel %vm4076_vm5, %v9956_v47, 0.0 }
 0x536   : > { %v4201_v51 = vrot.slane %v4200_v21, 1  ;;  %v4224_v17 = vsel %vm4076_vm5, %v9959_v58, -inf  ;;  %v4817_v59 = vadd.f32 %v4816_v23, %v4815_v55  ;;  %v4262_v12 = vrot.slane %v4261_v10, 2 }
 0x537   : > { %v4545_v33 = vsub.f32 %v9912_v54, %v4223_v30  ;;  %v4242_v37 = vmax.f32 %v4240_v48, %v4241_v22  ;;  %v9970_v46 = vpop.eup %7783  ;;  %v9973_v14 = vadd.f32 %v4797_v3, %v4796_v4  ;;  %v4225_v27 = vrot.slane %v4224_v17, 4 }
 0x538   : > { %11507 = vst [vmem:[#allocation47_spill] sm:$0xff] %v9970_v46  ;;  %v9976_v16 = vadd.f32 %v9480_v28, %v3899_v15  ;;  %v4846_v45 = vrot.slane %v4845_v40, 2  ;;  %v4830_v31 = vrot.slane %v4829_v18, 4  ;;  %v4615_v60 = vmul.f32 1.442695, %v4538_v2 }
 0x539   : > { %v4243_v35 = vrot.slane %v4242_v37, 1  ;;  %v9978_v29 = vpop.eup %7785  ;;  %v4629_v55 = vmul.f32 1.442695, %v4545_v33  ;;  %v4202_v54 = vmax.f32 %v4200_v21, %v4201_v51  ;;  %v4263_v23 = vmax.f32 %v4261_v10, %v4262_v12  ;;  %v3893_v21 = vpop.xlane.xlu0 %3892 }
 0x53a   : > { %11508 = vst [vmem:[#allocation48_spill] sm:$0xff] %v9978_v29  ;;  %v4226_v48 = vmax.f32 %v4224_v17, %v4225_v27  ;;  %v9981_v22 = vadd.f32 %v4783_v5, %v4782_v57  ;;  %v4818_v4 = vrot.slane %v4817_v59, 2  ;;  %v4801_v3 = vsel %vm4076_vm5, %v9970_v46, 0.0  ;;  %v3890_v57 = vpop.xlane.xlu1 %3889 }
 0x53b   : > { %v4244_v28 = vmax.f32 %v4242_v37, %v4243_v35  ;;  %v4264_v15 = vrot.slane %v4263_v23, 1  ;;  %v4266_v2 = vsel %vm4076_vm5, %v9976_v16, -inf  ;;  %v9990_v10 = vadd.f32 %v4846_v45, %v4845_v40 }
 0x53c   : > { %v4227_v7 = vrot.slane %v4226_v48, 2  ;;  %v9987_v61 = vpop.eup %7787  ;;  %v4850_v5 = vsel %vm4076_vm5, %v9978_v29, 0.0  ;;  %7791 = vpow2.f32 %v4615_v60  ;;  %v4831_v51 = vadd.f32 %v4830_v31, %v4829_v18  ;;  %v10004_v18 = vld [vmem:[%s11342_s3 + $0x6] ss:$0 sm:$0xff] }
 0x53d   : > { %11509 = vst [vmem:[#allocation49_spill] sm:$0xff] %v9987_v61  ;;  %11510 = vst [vmem:[#allocation50_spill] sm:$0xff] %v9990_v10  ;;  %v4802_v17 = vrot.slane %v4801_v3, 4  ;;  %7793 = vpow2.f32 %v4629_v55  ;;  %v4542_v33 = vsub.f32 %v9934_v26, %v4202_v54  ;;  %v4548_v12 = vsub.f32 %v9944_v53, %v4244_v28 }
 0x53e   : > { %v9995_v37 = vpop.eup %7789  ;;  %v4265_v27 = vmax.f32 %v4263_v23, %v4264_v15  ;;  %v4228_v35 = vmax.f32 %v4226_v48, %v4227_v7  ;;  %v4267_v30 = vrot.slane %v4266_v2, 4  ;;  %v9999_v45 = vadd.f32 %v4818_v4, %v4817_v59 }
 0x53f   : > { %11511 = vst [vmem:[#allocation51_spill] sm:$0xff] %v9995_v37  ;;  %v4851_v8 = vrot.slane %v4850_v5, 4  ;;  %v10007_v26 = vadd.f32 %v10004_v18, %v3890_v57  ;;  %v4822_v53 = vsel %vm4076_vm5, %v9987_v61, 0.0  ;;  %v4832_v55 = vrot.slane %v4831_v51, 2  ;;  %v3920_v57 = vpop.xlane.xlu1 %3919 }
 0x540   : > { %v4229_v7 = vrot.slane %v4228_v35, 1  ;;  %v4268_v60 = vmax.f32 %v4266_v2, %v4267_v30  ;;  %v10012_v54 = vadd.f32 %v4802_v17, %v4801_v3  ;;  %v4871_v59 = vsel %vm4076_vm5, %v9995_v37, 0.0 }
 0x541   : > { %v4623_v23 = vmul.f32 1.442695, %v4542_v33  ;;  %v4635_v48 = vmul.f32 1.442695, %v4548_v12  ;;  %v4551_v4 = vsub.f32 %v9949_v20, %v4265_v27  ;;  %v10017_v40 = vadd.f32 %v4851_v8, %v4850_v5  ;;  %v3908_v12 = vpop.xlane.xlu0 %3907 }
 0x542   : > { %v4230_v28 = vmax.f32 %v4228_v35, %v4229_v7  ;;  %v4269_v15 = vrot.slane %v4268_v60, 2  ;;  %v4823_v31 = vrot.slane %v4822_v53, 4  ;;  %v4245_v47 = vsel %vm4076_vm5, %v10007_v26, -inf }
 0x543   : > { %v10022_v30 = vadd.f32 %v10004_v18, %v3893_v21  ;;  %v4872_v3 = vrot.slane %v4871_v59, 4  ;;  %v4246_v33 = vrot.slane %v4245_v47, 4  ;;  %7795 = vpow2.f32 %v4623_v23 }
 0x544   : > { %v4546_v2 = vsub.f32 %v9959_v58, %v4230_v28  ;;  %v4270_v17 = vmax.f32 %v4268_v60, %v4269_v15  ;;  %v11512_v8 = vrot.slane %v9810_v41, 1  ;;  %v10031_v27 = vadd.f32 %v10004_v18, %v3920_v57 }
 0x545   : > { %v4252_v20 = vsel %vm4076_vm5, %v10022_v30, -inf  ;;  %7797 = vpow2.f32 %v4635_v48  ;;  %v4641_v21 = vmul.f32 1.442695, %v4551_v4  ;;  %v4247_v7 = vmax.f32 %v4245_v47, %v4246_v33  ;;  %v3902_v46 = vpop.xlane.xlu0 %3901 }
 0x546   : > { %v4737_v5 = vadd.f32 %v11512_v8, %v9810_v41  ;;  %v4271_v35 = vrot.slane %v4270_v17, 1  ;;  %v4253_v37 = vrot.slane %v4252_v20, 4  ;;  %v4315_v58 = vsel %vm4076_vm5, %v10031_v27, -inf }
 0x547   : > { %v10036_v60 = vadd.f32 %v10004_v18, %v3908_v12  ;;  %v10038_v23 = vadd.f32 %v4832_v55, %v4831_v51  ;;  %v4824_v28 = vadd.f32 %v4823_v31, %v4822_v53  ;;  %v4631_v15 = vmul.f32 1.442695, %v4546_v2 }
 0x548   : > { %7799 = vrcp.f32 %v4737_v5  ;;  %v4272_v41 = vmax.f32 %v4270_v17, %v4271_v35  ;;  %v4804_v48 = vrot.slane %v10012_v54, 2  ;;  %v4248_v4 = vrot.slane %v4247_v7, 2 }
 0x549   : > { %11513 = vst [vmem:[#allocation52_spill] sm:$0xff] %v10038_v23  ;;  %v10040_v8 = vpop.eup %7791  ;;  %v4254_v57 = vmax.f32 %v4252_v20, %v4253_v37  ;;  %v4316_v47 = vrot.slane %v4315_v58, 4  ;;  %v4873_v5 = vadd.f32 %v4872_v3, %v4871_v59  ;;  %7801 = vpow2.f32 %v4641_v21 }
 0x54a   : > { %11514 = vst [vmem:[#allocation53_spill] sm:$0xff] %v10040_v8  ;;  %v10043_v33 = vpop.eup %7793  ;;  %v4287_v12 = vsel %vm4076_vm5, %v10036_v60, -inf  ;;  %v11516_v51 = vrot.slane %v9819_v9, 1  ;;  %v4853_v53 = vrot.slane %v10017_v40, 2  ;;  %v4552_v55 = vsub.f32 %v9976_v16, %v4272_v41 }
 0x54b   : > { %11515 = vst [vmem:[#allocation54_spill] sm:$0xff] %v10043_v33  ;;  %v4249_v2 = vmax.f32 %v4247_v7, %v4248_v4  ;;  %v4255_v17 = vrot.slane %v4254_v57, 2  ;;  %v4825_v35 = vrot.slane %v4824_v28, 2  ;;  %7803 = vpow2.f32 %v4631_v15  ;;  %v3914_v15 = vpop.xlane.xlu1 %3913 }
 0x54c   : > { %v4723_v31 = vadd.f32 %v11516_v51, %v9819_v9  ;;  %v4317_v37 = vmax.f32 %v4315_v58, %v4316_v47  ;;  %v4288_v20 = vrot.slane %v4287_v12, 4  ;;  %v4808_v59 = vsel %vm4076_vm5, %v10040_v8, 0.0 }
 0x54d   : > { %v4250_v3 = vrot.slane %v4249_v2, 1  ;;  %v4256_v21 = vmax.f32 %v4254_v57, %v4255_v17  ;;  %v4874_v29 = vrot.slane %v4873_v5, 2  ;;  %v4857_v9 = vsel %vm4076_vm5, %v10043_v33, 0.0 }
 0x54e   : > { %7805 = vrcp.f32 %v4723_v31  ;;  %v4318_v51 = vrot.slane %v4317_v37, 2  ;;  %v4289_v61 = vmax.f32 %v4287_v12, %v4288_v20  ;;  %v4643_v7 = vmul.f32 1.442695, %v4552_v55 }
 0x54f   : > { %v4251_v41 = vmax.f32 %v4249_v2, %v4250_v3  ;;  %v4257_v4 = vrot.slane %v4256_v21, 1  ;;  %v10058_v58 = vadd.f32 %v4804_v48, %v10012_v54  ;;  %v4809_v47 = vrot.slane %v4808_v59, 4 }
 0x550   : > { %v4319_v8 = vmax.f32 %v4317_v37, %v4318_v51  ;;  %v4290_v62 = vrot.slane %v4289_v61, 2  ;;  %v4858_v31 = vrot.slane %v4857_v9, 4  ;;  %v10062_v12 = vpop.eup %7795  ;;  %v10065_v55 = vadd.f32 %v4853_v53, %v10017_v40 }
 0x551   : > { %v4549_v17 = vsub.f32 %v10007_v26, %v4251_v41  ;;  %v4258_v33 = vmax.f32 %v4256_v21, %v4257_v4  ;;  %11517 = vst [vmem:[#allocation55_spill] sm:$0xff] %v10062_v12  ;;  %v10067_v2 = vadd.f32 %v4825_v35, %v4824_v28  ;;  %v10069_v20 = vadd.f32 %v4874_v29, %v4873_v5 }
 0x552   : > { %11518 = vst [vmem:[#allocation56_spill] sm:$0xff] %v10065_v55  ;;  %v4320_v54 = vrot.slane %v4319_v8, 1  ;;  %v10071_v48 = vpop.eup %7797  ;;  %7807 = vpow2.f32 %v4643_v7  ;;  %v4291_v3 = vmax.f32 %v4289_v61, %v4290_v62  ;;  %v10075_v26 = vadd.f32 %v10004_v18, %v3914_v15  ;;  %v3911_v15 = vpop.xlane.xlu0 %3910 }
 0x553   : > { %11519 = vst [vmem:[#allocation57_spill] sm:$0xff] %v10067_v2  ;;  %11520 = vst [vmem:[#allocation58_spill] sm:$0xff] %v10069_v20  ;;  %v4550_v37 = vsub.f32 %v10022_v30, %v4258_v33  ;;  %v10078_v41 = vadd.f32 %v4809_v47, %v4808_v59  ;;  %v4637_v40 = vmul.f32 1.442695, %v4549_v17  ;;  %v10080_v53 = vadd.f32 %v4858_v31, %v4857_v9  ;;  %v3923_v30 = vpop.xlane.xlu1 %3922 }
 0x554   : > { %11521 = vst [vmem:[#allocation59_spill] sm:$0xff] %v10071_v48  ;;  %v4321_v28 = vmax.f32 %v4319_v8, %v4320_v54  ;;  %v4836_v29 = vsel %vm4076_vm5, %v10062_v12, 0.0  ;;  %v4292_v35 = vrot.slane %v4291_v3, 1  ;;  %v4878_v33 = vsel %vm4076_vm5, %v10071_v48, 0.0 }
 0x555   : > { %v7800_v21 = vpop.eup %7799  ;;  %v4639_v59 = vmul.f32 1.442695, %v4550_v37  ;;  %v4837_v31 = vrot.slane %v4836_v29, 4  ;;  %7809 = vpow2.f32 %v4637_v40  ;;  %v10100_v57 = vadd.f32 %v10004_v18, %v3902_v46 }
 0x556   : > { %v5231_v5 = vmul.f32 %v7800_v21, %v9705_v42  ;;  %v10089_v7 = vpop.eup %7801  ;;  %v4559_v9 = vsub.f32 %v10031_v27, %v4321_v28  ;;  %v4293_v4 = vmax.f32 %v4291_v3, %v4292_v35  ;;  %v4301_v42 = vsel %vm4076_vm5, %v10075_v26, -inf }
 0x557   : > { %11522 = vst [vmem:[#allocation60_spill] sm:$0xff] %v10089_v7  ;;  %v4302_v17 = vrot.slane %v4301_v42, 4  ;;  %v4879_v21 = vrot.slane %v4878_v33, 4  ;;  %v10103_v27 = vadd.f32 %v10004_v18, %v3923_v30  ;;  %v4899_v28 = vsel %vm4076_vm5, %v10089_v7, 0.0  ;;  %v3932_v62 = vpop.xlane.xlu1 %3931 }
 0x558   : > { %5305 = vperm.xlu1 %7734, %v5231_v5   ;;  %v10096_v54 = vpop.eup %7803  ;;  %7811 = vpow2.f32 %v4639_v59  ;;  %v10108_v40 = vadd.f32 %v10004_v18, %v3911_v15  ;;  %v4657_v35 = vmul.f32 1.442695, %v4559_v9  ;;  %v4555_v8 = vsub.f32 %v10036_v60, %v4293_v4  ;;  %v3905_v60 = vpop.xlane.xlu0 %3904 }
 0x559   : > { %11523 = vst [vmem:[#allocation61_spill] sm:$0xff] %v10096_v54  ;;  %v4303_v5 = vmax.f32 %v4301_v42, %v4302_v17  ;;  %v4273_v46 = vsel %vm4076_vm5, %v10100_v57, -inf  ;;  %v4838_v30 = vadd.f32 %v4837_v31, %v4836_v29  ;;  %v4322_v37 = vsel %vm4076_vm5, %v10103_v27, -inf }
 0x55a   : > { %v4274_v16 = vrot.slane %v4273_v46, 4  ;;  %v4880_v59 = vadd.f32 %v4879_v21, %v4878_v33  ;;  %v4900_v42 = vrot.slane %v4899_v28, 4  ;;  %v4864_v15 = vsel %vm4076_vm5, %v10096_v54, 0.0 }
 0x55b   : > { %v7806_v3 = vpop.eup %7805  ;;  %v4304_v51 = vrot.slane %v4303_v5, 2  ;;  %v4323_v9 = vrot.slane %v4322_v37, 4  ;;  %v4294_v17 = vsel %vm4076_vm5, %v10108_v40, -inf  ;;  %v10121_v29 = vadd.f32 %v10004_v18, %v3932_v62 }
 0x55c   : > { %v5229_v61 = vmul.f32 %v7806_v3, %v9717_v36  ;;  %v4275_v36 = vmax.f32 %v4273_v46, %v4274_v16  ;;  %7813 = vpow2.f32 %v4657_v35  ;;  %v4649_v31 = vmul.f32 1.442695, %v4555_v8 }
 0x55d   : > { %v4305_v4 = vmax.f32 %v4303_v5, %v4304_v51  ;;  %v4324_v3 = vmax.f32 %v4322_v37, %v4323_v9  ;;  %v4295_v47 = vrot.slane %v4294_v17, 4  ;;  %v10128_v51 = vadd.f32 %v10004_v18, %v3905_v60 }
 0x55e   : > { %5295 = vperm.xlu1 %7734, %v5229_v61   ;;  %v4276_v7 = vrot.slane %v4275_v36, 2  ;;  %v4343_v61 = vsel %vm4076_vm5, %v10121_v29, -inf  ;;  %v4901_v16 = vadd.f32 %v4900_v42, %v4899_v28  ;;  %v4839_v62 = vrot.slane %v4838_v30, 2 }
 0x55f   : > { %v10123_v33 = vpop.eup %7807  ;;  %v4306_v21 = vrot.slane %v4305_v4, 1  ;;  %v4325_v5 = vrot.slane %v4324_v3, 2  ;;  %v4296_v46 = vmax.f32 %v4294_v17, %v4295_v47  ;;  %v4344_v54 = vrot.slane %v4343_v61, 4 }
 0x560   : > { %11524 = vst [vmem:[#allocation62_spill] sm:$0xff] %v10123_v33  ;;  %v4865_v48 = vrot.slane %v4864_v15, 4  ;;  %v4277_v8 = vmax.f32 %v4275_v36, %v4276_v7  ;;  %v4881_v37 = vrot.slane %v4880_v59, 2  ;;  %v4906_v9 = vsel %vm4076_vm5, %v10123_v33, 0.0 }
 0x561   : > { %v4307_v35 = vmax.f32 %v4305_v4, %v4306_v21  ;;  %v4326_v12 = vmax.f32 %v4324_v3, %v4325_v5  ;;  %v4297_v11 = vrot.slane %v4296_v46, 2  ;;  %7815 = vpow2.f32 %v4649_v31 }
 0x562   : > { %v4278_v20 = vrot.slane %v4277_v8, 1  ;;  %v4280_v28 = vsel %vm4076_vm5, %v10128_v51, -inf  ;;  %v10135_v42 = vpop.eup %7809  ;;  %v4902_v47 = vrot.slane %v4901_v16, 2  ;;  %v4345_v4 = vmax.f32 %v4343_v61, %v4344_v54 }
 0x563   : > { %v4557_v23 = vsub.f32 %v10075_v26, %v4307_v35  ;;  %11525 = vst [vmem:[#allocation63_spill] sm:$0xff] %v10135_v42  ;;  %v4327_v60 = vrot.slane %v4326_v12, 1  ;;  %v4298_v17 = vmax.f32 %v4296_v46, %v4297_v11  ;;  %v4866_v7 = vadd.f32 %v4865_v48, %v4864_v15 }
 0x564   : > { %v4907_v36 = vrot.slane %v4906_v9, 4  ;;  %v4279_v55 = vmax.f32 %v4277_v8, %v4278_v20  ;;  %v11527_v31 = vrot.slane %v10078_v41, 2  ;;  %v4281_v35 = vrot.slane %v4280_v28, 4 }
 0x565   : > { %v4653_v21 = vmul.f32 1.442695, %v4557_v23  ;;  %v10137_v33 = vpop.eup %7811  ;;  %v4328_v3 = vmax.f32 %v4326_v12, %v4327_v60  ;;  %v4299_v5 = vrot.slane %v4298_v17, 1  ;;  %v11528_v2 = vrot.slane %v10080_v53, 2 }
 0x566   : > { %11526 = vst [vmem:[#allocation64_spill] sm:$0xff] %v10137_v33  ;;  %v10142_v26 = vadd.f32 %v11527_v31, %v10078_v41  ;;  %v10149_v11 = vadd.f32 %v4839_v62, %v4838_v30  ;;  %v4885_v23 = vsel %vm4076_vm5, %v10135_v42, 0.0  ;;  %v10153_v20 = vadd.f32 %v4881_v37, %v4880_v59  ;;  %v3926_v37 = vpop.xlane.xlu1 %3925 }
 0x567   : > { %v10147_v10 = vadd.f32 %v11528_v2, %v10080_v53  ;;  %7817 = vpow2.f32 %v4653_v21  ;;  %v4553_v48 = vsub.f32 %v10100_v57, %v4279_v55  ;;  %v4560_v41 = vsub.f32 %v10103_v27, %v4328_v3 }
 0x568   : > { %v4346_v12 = vrot.slane %v4345_v4, 2  ;;  %v10157_v54 = vadd.f32 %v4902_v47, %v4901_v16  ;;  %v4867_v15 = vrot.slane %v4866_v7, 2  ;;  %v10159_v61 = vadd.f32 %v4907_v36, %v4906_v9 }
 0x569   : > { %v4282_v2 = vmax.f32 %v4280_v28, %v4281_v35  ;;  %v4886_v53 = vrot.slane %v4885_v23, 4  ;;  %v4892_v30 = vsel %vm4076_vm5, %v10137_v33, 0.0  ;;  %v4300_v46 = vmax.f32 %v4298_v17, %v4299_v5  ;;  %v10166_v8 = vpop.eup %7813  ;;  %v3917_v17 = vpop.xlane.xlu0 %3916 }
 0x56a   : > { %v11529_v59 = vrot.slane %v9821_v44, 1  ;;  %11530 = vst [vmem:[#allocation65_spill] sm:$0xff] %v10166_v8  ;;  %v4645_v16 = vmul.f32 1.442695, %v4553_v48  ;;  %v4659_v28 = vmul.f32 1.442695, %v4560_v41  ;;  %v4347_v47 = vmax.f32 %v4345_v4, %v4346_v12 }
 0x56b   : > { %v4283_v60 = vrot.slane %v4282_v2, 2  ;;  %v10173_v21 = vadd.f32 %v4867_v15, %v4866_v7  ;;  %v4893_v31 = vrot.slane %v4892_v30, 4  ;;  %v10176_v3 = vadd.f32 %v4886_v53, %v4885_v23 }
 0x56c   : > { %v4744_v62 = vadd.f32 %v11529_v59, %v9821_v44  ;;  %v4909_v44 = vrot.slane %v10159_v61, 2  ;;  %v4556_v5 = vsub.f32 %v10108_v40, %v4300_v46  ;;  %v4955_v48 = vsel %vm4076_vm5, %v10166_v8, 0.0  ;;  %v3935_v59 = vpop.xlane.xlu1 %3934 }
 0x56d   : > { %v4284_v35 = vmax.f32 %v4282_v2, %v4283_v60  ;;  %v11531_v4 = vrot.slane %v9902_v52, 1  ;;  %v10185_v7 = vadd.f32 %v10004_v18, %v3926_v37  ;;  %v4348_v23 = vrot.slane %v4347_v47, 1  ;;  %v3944_v60 = vpop.xlane.xlu0 %3943 }
 0x56e   : > { %7819 = vrcp.f32 %v4744_v62  ;;  %v10187_v12 = vpop.eup %7815  ;;  %v10190_v40 = vadd.f32 %v10004_v18, %v3917_v17  ;;  %v4894_v2 = vadd.f32 %v4893_v31, %v4892_v30  ;;  %v11533_v46 = vrot.slane %v9825_v38, 1 }
 0x56f   : > { %7821 = vpow2.f32 %v4645_v16  ;;  %v4793_v41 = vadd.f32 %v11531_v4, %v9902_v52  ;;  %11532 = vst [vmem:[#allocation66_spill] sm:$0xff] %v10187_v12  ;;  %v4285_v15 = vrot.slane %v4284_v35, 1  ;;  %v4329_v53 = vsel %vm4076_vm5, %v10185_v7, -inf }
 0x570   : > { %7823 = vpow2.f32 %v4659_v28  ;;  %v4730_v52 = vadd.f32 %v11533_v46, %v9825_v38  ;;  %v4956_v62 = vrot.slane %v4955_v48, 4  ;;  %v4651_v16 = vmul.f32 1.442695, %v4556_v5 }
 0x571   : > { %7825 = vrcp.f32 %v4793_v41  ;;  %v4330_v37 = vrot.slane %v4329_v53, 4  ;;  %v4308_v28 = vsel %vm4076_vm5, %v10190_v40, -inf  ;;  %v4927_v17 = vsel %vm4076_vm5, %v10187_v12, 0.0 }
 0x572   : > { %v4309_v30 = vrot.slane %v4308_v28, 4  ;;  %7827 = vrcp.f32 %v4730_v52  ;;  %v11534_v31 = vrot.slane %v9920_v50, 1  ;;  %v4349_v38 = vmax.f32 %v4347_v47, %v4348_v23 }
 0x573   : > { %v4286_v46 = vmax.f32 %v4284_v35, %v4285_v15  ;;  %v4331_v36 = vmax.f32 %v4329_v53, %v4330_v37  ;;  %v10207_v5 = vadd.f32 %v10004_v18, %v3935_v59  ;;  %v10212_v55 = vadd.f32 %v10004_v18, %v3944_v60 }
 0x574   : > { %v4779_v4 = vadd.f32 %v11534_v31, %v9920_v50  ;;  %v10204_v41 = vpop.eup %7817  ;;  %v4310_v27 = vmax.f32 %v4308_v28, %v4309_v30  ;;  %v4928_v52 = vrot.slane %v4927_v17, 4  ;;  %v4888_v47 = vrot.slane %v10176_v3, 2 }
 0x575   : > { %11535 = vst [vmem:[#allocation67_spill] sm:$0xff] %v10204_v41  ;;  %v4941_v9 = vsel %vm4076_vm5, %v10204_v41, 0.0  ;;  %v4332_v57 = vrot.slane %v4331_v36, 2  ;;  %v4350_v50 = vsel %vm4076_vm5, %v10207_v5, -inf  ;;  %v11536_v15 = vrot.slane %v9849_v24, 1 }
 0x576   : > { %7829 = vrcp.f32 %v4779_v4  ;;  %v4311_v35 = vrot.slane %v4310_v27, 2  ;;  %v4351_v23 = vrot.slane %v4350_v50, 4  ;;  %v4942_v59 = vrot.slane %v4941_v9, 4 }
 0x577   : > { %7831 = vpow2.f32 %v4651_v16  ;;  %v4765_v53 = vadd.f32 %v11536_v15, %v9849_v24  ;;  %v4563_v37 = vsub.f32 %v10121_v29, %v4349_v38  ;;  %v4554_v28 = vsub.f32 %v10128_v51, %v4286_v46 }
 0x578   : > { %v4333_v60 = vmax.f32 %v4331_v36, %v4332_v57  ;;  %v4312_v30 = vmax.f32 %v4310_v27, %v4311_v35  ;;  %v4352_v16 = vmax.f32 %v4350_v50, %v4351_v23  ;;  %v4371_v31 = vsel %vm4076_vm5, %v10212_v55, -inf }
 0x579   : > { %7833 = vrcp.f32 %v4765_v53  ;;  %v4895_v4 = vrot.slane %v4894_v2, 2  ;;  %v4957_v12 = vadd.f32 %v4956_v62, %v4955_v48  ;;  %v4929_v33 = vadd.f32 %v4928_v52, %v4927_v17 }
 0x57a   : > { %v4334_v41 = vrot.slane %v4333_v60, 1  ;;  %v4869_v42 = vrot.slane %v10173_v21, 1  ;;  %v10226_v24 = vadd.f32 %v4909_v44, %v10159_v61  ;;  %v4313_v29 = vrot.slane %v4312_v30, 1 }
 0x57b   : > { %v7820_v8 = vpop.eup %7819  ;;  %v4353_v38 = vrot.slane %v4352_v16, 2  ;;  %v4665_v57 = vmul.f32 1.442695, %v4563_v37  ;;  %v4372_v46 = vrot.slane %v4371_v31, 4  ;;  %v10234_v48 = vadd.f32 %v4888_v47, %v10176_v3 }
 0x57c   : > { %v10228_v51 = vpop.eup %7821  ;;  %v5232_v27 = vmul.f32 %v7820_v8, %v9741_v6  ;;  %v4335_v36 = vmax.f32 %v4333_v60, %v4334_v41  ;;  %v4943_v62 = vadd.f32 %v4942_v59, %v4941_v9  ;;  %v4647_v17 = vmul.f32 1.442695, %v4554_v28  ;;  %v3947_v60 = vpop.xlane.xlu0 %3946 }
 0x57d   : > { %v10231_v50 = vpop.eup %7823  ;;  %v4314_v52 = vmax.f32 %v4312_v30, %v4313_v29  ;;  %v10236_v61 = vadd.f32 %v4895_v4, %v4894_v2  ;;  %v4958_v44 = vrot.slane %v4957_v12, 2  ;;  %v4930_v23 = vrot.slane %v4929_v33, 2 }
 0x57e   : > { %v7826_v35 = vpop.eup %7825  ;;  %5310 = vperm.xlu0 %7735, %v5232_v27   ;;  %v4561_v15 = vsub.f32 %v10185_v7, %v4335_v36  ;;  %v4913_v6 = vsel %vm4076_vm5, %v10228_v51, 0.0  ;;  %v4354_v3 = vmax.f32 %v4352_v16, %v4353_v38  ;;  %v4962_v9 = vsel %vm4076_vm5, %v10231_v50, 0.0 }
 0x57f   : > { %v5239_v8 = vmul.f32 %v7826_v35, %v9808_v32  ;;  %v4558_v41 = vsub.f32 %v10190_v40, %v4314_v52  ;;  %v7828_v47 = vpop.eup %7827  ;;  %7835 = vpow2.f32 %v4665_v57  ;;  %v4373_v53 = vmax.f32 %v4371_v31, %v4372_v46  ;;  %v3929_v32 = vpop.xlane.xlu1 %3928 }
 0x580   : > { %v4661_v2 = vmul.f32 1.442695, %v4561_v15  ;;  %v4944_v59 = vrot.slane %v4943_v62, 2  ;;  %7837 = vpow2.f32 %v4647_v17  ;;  %v5230_v7 = vmul.f32 %v7828_v47, %v9743_v0  ;;  %v3941_v47 = vpop.xlane.xlu0 %3940 }
 0x581   : > { %5345 = vperm.xlu1 %7734, %v5239_v8   ;;  %v11537_v37 = vrot.slane %v9973_v14, 1  ;;  %v10249_v30 = vadd.f32 %v4958_v44, %v4957_v12  ;;  %v4914_v16 = vrot.slane %v4913_v6, 4  ;;  %v4655_v4 = vmul.f32 1.442695, %v4558_v41 }
 0x582   : > { %7839 = vpow2.f32 %v4661_v2  ;;  %v4963_v38 = vrot.slane %v4962_v9, 4  ;;  %5300 = vperm.xlu0 %7735, %v5230_v7   ;;  %v4355_v57 = vrot.slane %v4354_v3, 1  ;;  %v10257_v36 = vadd.f32 %v4930_v23, %v4929_v33 }
 0x583   : > { %v4800_v28 = vadd.f32 %v11537_v37, %v9973_v14  ;;  %v7830_v40 = vpop.eup %7829  ;;  %v4374_v12 = vrot.slane %v4373_v53, 2  ;;  %v10259_v46 = vadd.f32 %v4944_v59, %v4943_v62  ;;  %v10262_v17 = vadd.f32 %v10004_v18, %v3929_v32  ;;  %v3938_v41 = vpop.xlane.xlu1 %3937 }
 0x584   : > { %v10251_v29 = vpop.eup %7831  ;;  %v5237_v0 = vmul.f32 %v7830_v40, %v9828_v56  ;;  %v10265_v52 = vadd.f32 %v10004_v18, %v3947_v60  ;;  %v4915_v44 = vadd.f32 %v4914_v16, %v4913_v6  ;;  %v10270_v33 = vadd.f32 %v4963_v38, %v4962_v9 }
 0x585   : > { %7841 = vrcp.f32 %v4800_v28  ;;  %v4934_v15 = vsel %vm4076_vm5, %v10251_v29, 0.0  ;;  %v4356_v62 = vmax.f32 %v4354_v3, %v4355_v57  ;;  %v4336_v8 = vsel %vm4076_vm5, %v10262_v17, -inf }
 0x586   : > { %5335 = vperm.xlu1 %7734, %v5237_v0   ;;  %v7834_v35 = vpop.eup %7833  ;;  %7843 = vpow2.f32 %v4655_v4  ;;  %v4375_v59 = vmax.f32 %v4373_v53, %v4374_v12  ;;  %v4337_v7 = vrot.slane %v4336_v8, 4  ;;  %v4378_v6 = vsel %vm4076_vm5, %v10265_v52, -inf }
 0x587   : > { %v5235_v23 = vmul.f32 %v7834_v35, %v9777_v13  ;;  %v4935_v28 = vrot.slane %v4934_v15, 4  ;;  %v4379_v9 = vrot.slane %v4378_v6, 4  ;;  %v11538_v13 = vrot.slane %v9893_v25, 1 }
 0x588   : > { %v4916_v32 = vrot.slane %v4915_v44, 2  ;;  %v4338_v60 = vmax.f32 %v4336_v8, %v4337_v7  ;;  %v11539_v40 = vrot.slane %v9981_v22, 1  ;;  %v10286_v53 = vadd.f32 %v10004_v18, %v3938_v41  ;;  %v3956_v7 = vpop.xlane.xlu0 %3955 }
 0x589   : > { %5325 = vperm.xlu0 %7735, %v5235_v23   ;;  %v4751_v3 = vadd.f32 %v11538_v13, %v9893_v25  ;;  %v4965_v4 = vrot.slane %v10270_v33, 2  ;;  %v4564_v38 = vsub.f32 %v10207_v5, %v4356_v62  ;;  %v4380_v0 = vmax.f32 %v4378_v6, %v4379_v9 }
 0x58a   : > { %v4786_v16 = vadd.f32 %v11539_v40, %v9981_v22  ;;  %v4376_v57 = vrot.slane %v4375_v59, 1  ;;  %v4339_v12 = vrot.slane %v4338_v60, 2  ;;  %v4357_v25 = vsel %vm4076_vm5, %v10286_v53, -inf }
 0x58b   : > { %7845 = vrcp.f32 %v4751_v3  ;;  %v10294_v23 = vadd.f32 %v4935_v28, %v4934_v15  ;;  %v4381_v22 = vrot.slane %v4380_v0, 2  ;;  %v4358_v8 = vrot.slane %v4357_v25, 4 }
 0x58c   : > { %7847 = vrcp.f32 %v4786_v16  ;;  %v10292_v35 = vpop.eup %7835  ;;  %v10297_v41 = vadd.f32 %v10004_v18, %v3941_v47  ;;  %v10301_v5 = vadd.f32 %v4916_v32, %v4915_v44  ;;  %v4340_v62 = vmax.f32 %v4338_v60, %v4339_v12 }
 0x58d   : > { %v10299_v13 = vpop.eup %7837  ;;  %v11540_v6 = vrot.slane %v9896_v34, 1  ;;  %v11541_v3 = vrot.slane %v9999_v45, 1  ;;  %v4667_v40 = vmul.f32 1.442695, %v4564_v38  ;;  %v4382_v16 = vmax.f32 %v4380_v0, %v4381_v22 }
 0x58e   : > { %v4359_v47 = vmax.f32 %v4357_v25, %v4358_v8  ;;  %v4364_v2 = vsel %vm4076_vm5, %v10297_v41, -inf  ;;  %v4377_v14 = vmax.f32 %v4375_v59, %v4376_v57  ;;  %v4341_v44 = vrot.slane %v4340_v62, 1 }
 0x58f   : > { %v4772_v9 = vadd.f32 %v11540_v6, %v9896_v34  ;;  %v4821_v15 = vadd.f32 %v11541_v3, %v9999_v45  ;;  %v10309_v28 = vpop.eup %7839  ;;  %v4365_v32 = vrot.slane %v4364_v2, 4  ;;  %v4983_v60 = vsel %vm4076_vm5, %v10292_v35, 0.0 }
 0x590   : > { %v4920_v34 = vsel %vm4076_vm5, %v10299_v13, 0.0  ;;  %v4383_v12 = vrot.slane %v4382_v16, 1  ;;  %v4360_v45 = vrot.slane %v4359_v47, 2  ;;  %v4969_v38 = vsel %vm4076_vm5, %v10309_v28, 0.0 }
 0x591   : > { %7849 = vrcp.f32 %v4772_v9  ;;  %v4342_v0 = vmax.f32 %v4340_v62, %v4341_v44  ;;  %v4366_v25 = vmax.f32 %v4364_v2, %v4365_v32  ;;  %v3950_v9 = vpop.xlane.xlu0 %3949  ;;  %v4984_v3 = vrot.slane %v4983_v60, 4 }
 0x592   : > { %v7842_v6 = vpop.eup %7841  ;;  %7851 = vrcp.f32 %v4821_v15  ;;  %v4384_v57 = vmax.f32 %v4382_v16, %v4383_v12  ;;  %v4361_v8 = vmax.f32 %v4359_v47, %v4360_v45  ;;  %v4567_v31 = vsub.f32 %v10212_v55, %v4377_v14 }
 0x593   : > { %v10319_v22 = vpop.eup %7843  ;;  %7853 = vpow2.f32 %v4667_v40  ;;  %v5240_v59 = vmul.f32 %v7842_v6, %v9899_v63  ;;  %v4367_v37 = vrot.slane %v4366_v25, 2  ;;  %v10324_v56 = vadd.f32 %v10004_v18, %v3956_v7 }
 0x594   : > { %v10327_v27 = vadd.f32 %v4965_v4, %v10270_v33  ;;  %v4921_v2 = vrot.slane %v4920_v34, 4  ;;  %v4970_v62 = vrot.slane %v4969_v38, 4  ;;  %v4362_v15 = vrot.slane %v4361_v8, 1 }
 0x595   : > { %5350 = vperm.xlu1 %7734, %v5240_v59   ;;  %v4937_v40 = vrot.slane %v10294_v23, 2  ;;  %v4948_v63 = vsel %vm4076_vm5, %v10319_v22, 0.0  ;;  %v4562_v16 = vsub.f32 %v10262_v17, %v4342_v0  ;;  %v4368_v47 = vmax.f32 %v4366_v25, %v4367_v37  ;;  %v3959_v25 = vpop.xlane.xlu0 %3958 }
 0x596   : > { %v4918_v55 = vrot.slane %v10301_v5, 1  ;;  %v4568_v14 = vsub.f32 %v10265_v52, %v4384_v57  ;;  %v4363_v7 = vmax.f32 %v4361_v8, %v4362_v15  ;;  %v11542_v33 = vrot.slane %v9962_v43, 1 }
 0x597   : > { %v10338_v32 = vadd.f32 %v4984_v3, %v4983_v60  ;;  %v4673_v12 = vmul.f32 1.442695, %v4567_v31  ;;  %v4369_v45 = vrot.slane %v4368_v47, 1  ;;  %v4399_v6 = vsel %vm4076_vm5, %v10324_v56, -inf }
 0x598   : > { %v4758_v4 = vadd.f32 %v11542_v33, %v9962_v43  ;;  %v7846_v44 = vpop.eup %7845  ;;  %v10342_v17 = vadd.f32 %v4921_v2, %v4920_v34  ;;  %v10344_v37 = vadd.f32 %v4970_v62, %v4969_v38  ;;  %v4949_v0 = vrot.slane %v4948_v63, 4 }
 0x599   : > { %v7848_v59 = vpop.eup %7847  ;;  %v5233_v52 = vmul.f32 %v7846_v44, %v9798_v49  ;;  %v4663_v57 = vmul.f32 1.442695, %v4562_v16  ;;  %v4565_v60 = vsub.f32 %v10286_v53, %v4363_v7  ;;  %v4370_v8 = vmax.f32 %v4368_v47, %v4369_v45  ;;  %v3953_v44 = vpop.xlane.xlu0 %3952 }
 0x59a   : > { %v5238_v43 = vmul.f32 %v7848_v59, %v9906_v1  ;;  %v4675_v31 = vmul.f32 1.442695, %v4568_v14  ;;  %v4400_v3 = vrot.slane %v4399_v6, 4  ;;  %7855 = vrcp.f32 %v4758_v4 }
 0x59b   : > { %5315 = vperm.xlu0 %7735, %v5233_v52   ;;  %v11543_v34 = vrot.slane %v10058_v58, 1  ;;  %v4986_v38 = vrot.slane %v10338_v32, 2  ;;  %7857 = vpow2.f32 %v4673_v12  ;;  %v4669_v49 = vmul.f32 1.442695, %v4565_v60 }
 0x59c   : > { %5340 = vperm.xlu1 %7734, %v5238_v43   ;;  %v10354_v62 = vadd.f32 %v10004_v18, %v3950_v9  ;;  %v4923_v53 = vrot.slane %v10342_v17, 2  ;;  %v4566_v15 = vsub.f32 %v10297_v41, %v4370_v8  ;;  %v4401_v16 = vmax.f32 %v4399_v6, %v4400_v3  ;;  %v11546_v6 = vld [vmem:[#allocation57_spill] sm:$0xff]  ;;  %v11548_v8 = vld [vmem:[#allocation56_spill] sm:$0xff] }
 0x59d   : > { %v4807_v2 = vadd.f32 %v11543_v34, %v10058_v58  ;;  %v4950_v47 = vadd.f32 %v4949_v0, %v4948_v63  ;;  %v4972_v33 = vrot.slane %v10344_v37, 2  ;;  %v11544_v63 = vld [vmem:[#allocation50_spill] sm:$0xff]  ;;  %v11547_v59 = vrot.slane %v11546_v6, 1 }
 0x59e   : > { %v7850_v1 = vpop.eup %7849  ;;  %v4385_v58 = vsel %vm4076_vm5, %v10354_v62, -inf  ;;  %v4402_v9 = vrot.slane %v4401_v16, 2  ;;  %v11545_v45 = vrot.slane %v11544_v63, 1  ;;  %v4671_v52 = vmul.f32 1.442695, %v4566_v15 }
 0x59f   : > { %7859 = vrcp.f32 %v4807_v2  ;;  %v5236_v14 = vmul.f32 %v7850_v1, %v9803_v19  ;;  %v7852_v7 = vpop.eup %7851  ;;  %v4386_v4 = vrot.slane %v4385_v58, 4  ;;  %v4828_v0 = vadd.f32 %v11547_v59, %v11546_v6 }
 0x5a0   : > { %7861 = vpow2.f32 %v4663_v57  ;;  %v10362_v12 = vpop.eup %7853  ;;  %v5243_v41 = vmul.f32 %v7852_v7, %v9936_v39  ;;  %v4849_v19 = vadd.f32 %v11545_v45, %v11544_v63  ;;  %v4403_v57 = vmax.f32 %v4401_v16, %v4402_v9 }
 0x5a1   : > { %7863 = vpow2.f32 %v4675_v31  ;;  %5330 = vperm.xlu0 %7735, %v5236_v14   ;;  %v4387_v43 = vmax.f32 %v4385_v58, %v4386_v4  ;;  %v10372_v60 = vadd.f32 %v10004_v18, %v3959_v25  ;;  %v11549_v31 = vrot.slane %v11548_v8, 1  ;;  %v11551_v14 = vld [vmem:[#allocation58_spill] sm:$0xff] }
 0x5a2   : > { %7865 = vpow2.f32 %v4669_v49  ;;  %5365 = vperm.xlu1 %7734, %v5243_v41   ;;  %v11550_v3 = vrot.slane %v10142_v26, 1  ;;  %v10381_v2 = vadd.f32 %v10004_v18, %v3953_v44  ;;  %v4990_v49 = vsel %vm4076_vm5, %v10362_v12, 0.0  ;;  %v11553_v41 = vld [vmem:[#allocation52_spill] sm:$0xff] }
 0x5a3   : > { %7867 = vrcp.f32 %v4849_v19  ;;  %v4856_v39 = vadd.f32 %v11549_v31, %v11548_v8  ;;  %v4404_v1 = vrot.slane %v4403_v57, 1  ;;  %v4388_v15 = vrot.slane %v4387_v43, 2 }
 0x5a4   : > { %v4814_v34 = vadd.f32 %v11550_v3, %v10142_v26  ;;  %7869 = vrcp.f32 %v4828_v0  ;;  %v4406_v25 = vsel %vm4076_vm5, %v10372_v60, -inf  ;;  %v4392_v16 = vsel %vm4076_vm5, %v10381_v2, -inf }
 0x5a5   : > { %7871 = vrcp.f32 %v4856_v39  ;;  %v11552_v58 = vrot.slane %v11551_v14, 1  ;;  %v4405_v18 = vmax.f32 %v4403_v57, %v4404_v1  ;;  %v4389_v7 = vmax.f32 %v4387_v43, %v4388_v15  ;;  %v11555_v39 = vld [vmem:[#allocation44_spill] sm:$0xff] }
 0x5a6   : > { %7873 = vpow2.f32 %v4671_v52  ;;  %v4407_v9 = vrot.slane %v4406_v25, 4  ;;  %v10395_v4 = vadd.f32 %v4937_v40, %v10294_v23  ;;  %v4393_v44 = vrot.slane %v4392_v16, 4 }
 0x5a7   : > { %v4877_v26 = vadd.f32 %v11552_v58, %v11551_v14  ;;  %7875 = vrcp.f32 %v4814_v34  ;;  %v11554_v63 = vrot.slane %v11553_v41, 1  ;;  %v10401_v19 = vadd.f32 %v4986_v38, %v10338_v32  ;;  %v7856_v52 = vpop.eup %7855 }
 0x5a8   : > { %v4951_v6 = vrot.slane %v4950_v47, 2  ;;  %v4571_v59 = vsub.f32 %v10324_v56, %v4405_v18  ;;  %v4390_v0 = vrot.slane %v4389_v7, 1  ;;  %v4991_v57 = vrot.slane %v4990_v49, 4  ;;  %v10404_v23 = vpop.eup %7857 }
 0x5a9   : > { %v4835_v45 = vadd.f32 %v11554_v63, %v11553_v41  ;;  %v4408_v43 = vmax.f32 %v4406_v25, %v4407_v9  ;;  %v4394_v8 = vmax.f32 %v4392_v16, %v4393_v44  ;;  %7877 = vrcp.f32 %v4877_v26 }
 0x5aa   : > { %v10407_v40 = vadd.f32 %v4923_v53, %v10342_v17  ;;  %v10410_v31 = vadd.f32 %v4972_v33, %v10344_v37  ;;  %v5234_v32 = vmul.f32 %v7856_v52, %v11555_v39  ;;  %v4391_v38 = vmax.f32 %v4389_v7, %v4390_v0  ;;  %v11556_v17 = vld [vmem:[#allocation47_spill] sm:$0xff]  ;;  %v11558_v39 = vld [vmem:[#allocation45_spill] sm:$0xff] }
 0x5ab   : > { %v4967_v56 = vrot.slane %v10327_v27, 1  ;;  %v4409_v34 = vrot.slane %v4408_v43, 2  ;;  %v4395_v1 = vrot.slane %v4394_v8, 2  ;;  %7879 = vrcp.f32 %v4835_v45 }
 0x5ac   : > { %v7860_v3 = vpop.eup %7859  ;;  %v10416_v25 = vadd.f32 %v4951_v6, %v4950_v47  ;;  %v4681_v16 = vmul.f32 1.442695, %v4571_v59  ;;  %5320 = vperm.xlu0 %7735, %v5234_v32   ;;  %v4569_v37 = vsub.f32 %v10354_v62, %v4391_v38  ;;  %v4939_v14 = vrot.slane %v10395_v4, 1 }
 0x5ad   : > { %v10414_v15 = vpop.eup %7861  ;;  %v5241_v53 = vmul.f32 %v7860_v3, %v11556_v17  ;;  %v4992_v58 = vadd.f32 %v4991_v57, %v4990_v49  ;;  %v4410_v26 = vmax.f32 %v4408_v43, %v4409_v34  ;;  %v4396_v18 = vmax.f32 %v4394_v8, %v4395_v1  ;;  %v11559_v17 = vld [vmem:[#allocation49_spill] sm:$0xff] }
 0x5ae   : > { %v10420_v33 = vpop.eup %7863  ;;  %v4988_v9 = vrot.slane %v10401_v19, 1  ;;  %v4974_v44 = vrot.slane %v10410_v31, 1  ;;  %v11557_v41 = vrot.slane %v10147_v10, 1  ;;  %v5011_v63 = vsel %vm4076_vm5, %v10404_v23, 0.0 }
 0x5af   : > { %v10423_v7 = vpop.eup %7865  ;;  %5355 = vperm.xlu1 %7734, %v5241_v53   ;;  %v4976_v49 = vsel %vm4076_vm5, %v10414_v15, 0.0  ;;  %v4411_v45 = vrot.slane %v4410_v26, 1  ;;  %v4397_v6 = vrot.slane %v4396_v18, 1  ;;  %v5018_v52 = vsel %vm4076_vm5, %v10420_v33, 0.0 }
 0x5b0   : > { %v4863_v62 = vadd.f32 %v11557_v41, %v10147_v10  ;;  %v7868_v59 = vpop.eup %7867  ;;  %7881 = vpow2.f32 %v4681_v16  ;;  %v4677_v57 = vmul.f32 1.442695, %v4569_v37  ;;  %v4993_v8 = vrot.slane %v4992_v58, 2  ;;  %v3968_v41 = vpop.xlane.xlu1 %3967 }
 0x5b1   : > { %v7870_v43 = vpop.eup %7869  ;;  %v5247_v10 = vmul.f32 %v7868_v59, %v11558_v39  ;;  %v4412_v32 = vmax.f32 %v4410_v26, %v4411_v45  ;;  %v4398_v38 = vmax.f32 %v4396_v18, %v4397_v6  ;;  %v5012_v34 = vrot.slane %v5011_v63, 4  ;;  %v11561_v45 = vld [vmem:[#allocation48_spill] sm:$0xff] }
 0x5b2   : > { %v7872_v3 = vpop.eup %7871  ;;  %v4977_v1 = vrot.slane %v4976_v49, 4  ;;  %v5244_v53 = vmul.f32 %v7870_v43, %v11559_v17  ;;  %7883 = vrcp.f32 %v4863_v62  ;;  %v5019_v0 = vrot.slane %v5018_v52, 4 }
 0x5b3   : > { %v10440_v47 = vpop.eup %7873  ;;  %5385 = vperm.xlu0 %7735, %v5247_v10   ;;  %v4572_v16 = vsub.f32 %v10372_v60, %v4412_v32  ;;  %v4570_v37 = vsub.f32 %v10381_v2, %v4398_v38  ;;  %v11560_v59 = vrot.slane %v10149_v11, 1  ;;  %7885 = vpow2.f32 %v4677_v57  ;;  %v11564_v32 = vld [vmem:[#allocation53_spill] sm:$0xff] }
 0x5b4   : > { %v7876_v18 = vpop.eup %7875  ;;  %5370 = vperm.xlu1 %7734, %v5244_v53   ;;  %v5248_v6 = vmul.f32 %v7872_v3, %v11561_v45  ;;  %v11562_v62 = vrot.slane %v10153_v20, 1  ;;  %v11563_v39 = vrot.slane %v10157_v54, 1  ;;  %v4997_v57 = vsel %vm4076_vm5, %v10423_v7, 0.0 }
 0x5b5   : > { %v4842_v26 = vadd.f32 %v11560_v59, %v10149_v11  ;;  %v4683_v60 = vmul.f32 1.442695, %v4572_v16  ;;  %v5242_v2 = vmul.f32 %v7876_v18, %v11564_v32  ;;  %v4679_v38 = vmul.f32 1.442695, %v4570_v37  ;;  %v11567_v59 = vld [vmem:[#allocation51_spill] sm:$0xff] }
 0x5b6   : > { %v4884_v43 = vadd.f32 %v11562_v62, %v10153_v20  ;;  %v4905_v10 = vadd.f32 %v11563_v39, %v10157_v54  ;;  %v7878_v17 = vpop.eup %7877  ;;  %v10455_v11 = vadd.f32 %v4993_v8, %v4992_v58  ;;  %v4870_v20 = vadd.f32 %v4869_v42, %v10173_v21 }
 0x5b7   : > { %7887 = vrcp.f32 %v4842_v26  ;;  %v10462_v3 = vadd.f32 %v5012_v34, %v5011_v63  ;;  %v5004_v54 = vsel %vm4076_vm5, %v10440_v47, 0.0  ;;  %5390 = vperm.xlu0 %7735, %v5248_v6   ;;  %v11565_v53 = vrot.slane %v10234_v48, 1  ;;  %v3962_v63 = vpop.xlane.xlu1 %3961 }
 0x5b8   : > { %7889 = vrcp.f32 %v4884_v43  ;;  %v7880_v8 = vpop.eup %7879  ;;  %v10469_v16 = vadd.f32 %v4977_v1, %v4976_v49  ;;  %v10471_v37 = vadd.f32 %v5019_v0, %v5018_v52  ;;  %5360 = vperm.xlu1 %7734, %v5242_v2   ;;  %v11566_v42 = vrot.slane %v10249_v30, 1  ;;  %v3965_v0 = vpop.xlane.xlu0 %3964  ;;  %v11568_v1 = vld [vmem:[#allocation46_spill] sm:$0xff] }
 0x5b9   : > { %7891 = vpow2.f32 %v4683_v60  ;;  %v4891_v58 = vadd.f32 %v11565_v53, %v10234_v48  ;;  %v4998_v34 = vrot.slane %v4997_v57, 4  ;;  %v5251_v26 = vmul.f32 %v7878_v17, %v11567_v59  ;;  %v10480_v48 = vld [vmem:[%s11342_s3 + $0x6] ss:$0 sm:$0xff] }
 0x5ba   : > { %7893 = vpow2.f32 %v4679_v38  ;;  %v4961_v21 = vadd.f32 %v11566_v42, %v10249_v30  ;;  %v10483_v49 = vadd.f32 %v10480_v48, %v3968_v41  ;;  %v5005_v52 = vrot.slane %v5004_v54, 4 }
 0x5bb   : > { %7895 = vrcp.f32 %v4905_v10  ;;  %v5245_v18 = vmul.f32 %v7880_v8, %v11568_v1  ;;  %v11569_v30 = vrot.slane %v10259_v46, 1  ;;  %5405 = vperm.xlu0 %7735, %v5251_v26   ;;  %v11570_v6 = vrot.slane %v10226_v24, 1  ;;  %v3971_v8 = vpop.xlane.xlu1 %3970  ;;  %v11572_v26 = vld [vmem:[#allocation54_spill] sm:$0xff] }
 0x5bc   : > { %7897 = vrcp.f32 %v4870_v20  ;;  %v4427_v43 = vsel %vm4076_vm5, %v10483_v49, -inf  ;;  %v10495_v41 = vadd.f32 %v10480_v48, %v3962_v63  ;;  %v5014_v39 = vrot.slane %v10462_v3, 2 }
 0x5bd   : > { %v4947_v45 = vadd.f32 %v11569_v30, %v10259_v46  ;;  %7899 = vrcp.f32 %v4891_v58  ;;  %v4912_v62 = vadd.f32 %v11570_v6, %v10226_v24  ;;  %5375 = vperm.xlu1 %7734, %v5245_v18   ;;  %v4428_v10 = vrot.slane %v4427_v43, 4  ;;  %v10501_v46 = vpop.eup %7881 }
 0x5be   : > { %7901 = vrcp.f32 %v4961_v21  ;;  %v10499_v60 = vadd.f32 %v10480_v48, %v3965_v0  ;;  %v4979_v32 = vrot.slane %v10469_v16, 2  ;;  %v5021_v24 = vrot.slane %v10471_v37, 2 }
 0x5bf   : > { %v11571_v2 = vrot.slane %v10236_v61, 1  ;;  %v4413_v17 = vsel %vm4076_vm5, %v10495_v41, -inf  ;;  %7903 = vrcp.f32 %v4947_v45  ;;  %v4429_v20 = vmax.f32 %v4427_v43, %v4428_v10  ;;  %v7884_v42 = vpop.eup %7883 }
 0x5c0   : > { %v4968_v53 = vadd.f32 %v4967_v56, %v10327_v27  ;;  %v4414_v58 = vrot.slane %v4413_v17, 4  ;;  %v4999_v21 = vadd.f32 %v4998_v34, %v4997_v57  ;;  %v5006_v63 = vadd.f32 %v5005_v52, %v5004_v54  ;;  %v10518_v30 = vpop.eup %7885 }
 0x5c1   : > { %v4898_v38 = vadd.f32 %v11571_v2, %v10236_v61  ;;  %7905 = vrcp.f32 %v4912_v62  ;;  %v4420_v59 = vsel %vm4076_vm5, %v10499_v60, -inf  ;;  %v5039_v61 = vsel %vm4076_vm5, %v10501_v46, 0.0  ;;  %v10529_v62 = vpop.xlane.xlu1 %3979  ;;  %v11574_v2 = vld [vmem:[#allocation55_spill] sm:$0xff] }
 0x5c2   : > { %v5249_v0 = vmul.f32 %v7884_v42, %v11572_v26  ;;  %v4430_v1 = vrot.slane %v4429_v20, 2  ;;  %v4415_v18 = vmax.f32 %v4413_v17, %v4414_v58  ;;  %v11573_v27 = vrot.slane %v10257_v36, 1 }
 0x5c3   : > { %7907 = vrcp.f32 %v4898_v38  ;;  %v4421_v57 = vrot.slane %v4420_v59, 4  ;;  %v4989_v54 = vadd.f32 %v4988_v9, %v10401_v19  ;;  %v10527_v6 = vadd.f32 %v10480_v48, %v3971_v8  ;;  %v11575_v9 = vld [vmem:[#allocation59_spill] sm:$0xff] }
 0x5c4   : > { %v4933_v56 = vadd.f32 %v11573_v27, %v10257_v36  ;;  %v7888_v34 = vpop.eup %7887  ;;  %5395 = vperm.xlu0 %7735, %v5249_v0   ;;  %v4431_v52 = vmax.f32 %v4429_v20, %v4430_v1  ;;  %7909 = vrcp.f32 %v4968_v53  ;;  %v4416_v45 = vrot.slane %v4415_v18, 2 }
 0x5c5   : > { %v7890_v43 = vpop.eup %7889  ;;  %v10532_v10 = vadd.f32 %v5014_v39, %v10462_v3  ;;  %v5000_v36 = vrot.slane %v4999_v21, 2  ;;  %v5246_v38 = vmul.f32 %v7888_v34, %v11574_v2  ;;  %v4422_v17 = vmax.f32 %v4420_v59, %v4421_v57  ;;  %v3974_v2 = vpop.xlane.xlu1 %3973 }
 0x5c6   : > { %v10535_v58 = vpop.eup %7891  ;;  %v5007_v19 = vrot.slane %v5006_v63, 2  ;;  %v5252_v20 = vmul.f32 %v7890_v43, %v11575_v9  ;;  %v4432_v53 = vrot.slane %v4431_v52, 1  ;;  %v4417_v42 = vmax.f32 %v4415_v18, %v4416_v45 }
 0x5c7   : > { %v10538_v26 = vpop.eup %7893  ;;  %v10541_v8 = vadd.f32 %v4979_v32, %v10469_v16  ;;  %v5040_v0 = vrot.slane %v5039_v61, 4  ;;  %5380 = vperm.xlu1 %7734, %v5246_v38   ;;  %7911 = vrcp.f32 %v4933_v56  ;;  %v4423_v3 = vrot.slane %v4422_v17, 2  ;;  %v11576_v16 = vld [vmem:[#allocation60_spill] sm:$0xff] }
 0x5c8   : > { %v7896_v39 = vpop.eup %7895  ;;  %v10544_v1 = vadd.f32 %v5021_v24, %v10471_v37  ;;  %5410 = vperm.xlu0 %7735, %v5252_v20   ;;  %v4433_v59 = vmax.f32 %v4431_v52, %v4432_v53  ;;  %7913 = vrcp.f32 %v4989_v54  ;;  %v4434_v27 = vsel %vm4076_vm5, %v10527_v6, -inf  ;;  %v11577_v54 = vld [vmem:[#allocation61_spill] sm:$0xff]  ;;  %v11578_v20 = vld [vmem:[#allocation63_spill] sm:$0xff] }
 0x5c9   : > { %v7898_v18 = vpop.eup %7897  ;;  %v5025_v57 = vsel %vm4076_vm5, %v10518_v30, 0.0  ;;  %v5255_v32 = vmul.f32 %v7896_v39, %v11576_v16  ;;  %v4418_v34 = vrot.slane %v4417_v42, 1  ;;  %v4919_v56 = vadd.f32 %v4918_v55, %v10301_v5 }
 0x5ca   : > { %v7900_v45 = vpop.eup %7899  ;;  %v10554_v37 = vadd.f32 %v5000_v36, %v4999_v21  ;;  %v10556_v24 = vadd.f32 %v5007_v19, %v5006_v63  ;;  %v5250_v52 = vmul.f32 %v7898_v18, %v11577_v54  ;;  %v4424_v43 = vmax.f32 %v4422_v17, %v4423_v3  ;;  %v11579_v63 = vld [vmem:[#allocation65_spill] sm:$0xff] }
 0x5cb   : > { %v7902_v38 = vpop.eup %7901  ;;  %v10559_v9 = vadd.f32 %v5040_v0, %v5039_v61  ;;  %5425 = vperm.xlu1 %7734, %v5255_v32   ;;  %v5253_v53 = vmul.f32 %v7900_v45, %v11578_v20  ;;  %v4575_v39 = vsub.f32 %v10483_v49, %v4433_v59  ;;  %v4435_v16 = vrot.slane %v4434_v27, 4 }
 0x5cc   : > { %v4995_v5 = vrot.slane %v10455_v11, 1  ;;  %v5026_v21 = vrot.slane %v5025_v57, 4  ;;  %5400 = vperm.xlu0 %7735, %v5250_v52   ;;  %v5263_v36 = vmul.f32 %v7902_v38, %v11579_v63  ;;  %v7904_v19 = vpop.eup %7903  ;;  %v4981_v17 = vrot.slane %v10541_v8, 1  ;;  %v11580_v52 = vld [vmem:[#allocation67_spill] sm:$0xff]  ;;  %v3983_v63 = vpop.xlane.xlu1 %3982 }
 0x5cd   : > { %v4419_v3 = vmax.f32 %v4417_v42, %v4418_v34  ;;  %7915 = vrcp.f32 %v4919_v56  ;;  %v4436_v61 = vmax.f32 %v4434_v27, %v4435_v16  ;;  %v10570_v49 = vsel %vm4076_vm5, %v10535_v58, 0.0  ;;  %v11581_v42 = vld [vmem:[#allocation62_spill] sm:$0xff] }
 0x5ce   : > { %v7906_v0 = vpop.eup %7905  ;;  %v10574_v59 = vsel %vm4076_vm5, %v10538_v26, 0.0  ;;  %v4425_v32 = vrot.slane %v4424_v43, 1  ;;  %v5002_v45 = vrot.slane %v10554_v37, 1  ;;  %v4689_v27 = vmul.f32 1.442695, %v4575_v39 }
 0x5cf   : > { %5415 = vperm.xlu1 %7734, %v5253_v53   ;;  %v10579_v56 = vadd.f32 %v5026_v21, %v5025_v57  ;;  %v5261_v38 = vmul.f32 %v7904_v19, %v11580_v52  ;;  %v4437_v20 = vrot.slane %v4436_v61, 2  ;;  %v4975_v16 = vadd.f32 %v4974_v44, %v10410_v31  ;;  %v11582_v31 = vld [vmem:[#allocation64_spill] sm:$0xff] }
 0x5d0   : > { %v7908_v34 = vpop.eup %7907  ;;  %5465 = vperm.xlu0 %7735, %v5263_v36   ;;  %v5047_v55 = vrot.slane %v10570_v49, 4  ;;  %v5033_v54 = vrot.slane %v10574_v59, 4  ;;  %v5256_v53 = vmul.f32 %v7906_v0, %v11581_v42  ;;  %v4573_v39 = vsub.f32 %v10495_v41, %v4419_v3 }
 0x5d1   : > { %v7910_v18 = vpop.eup %7909  ;;  %v10589_v57 = vmax.f32 %v4424_v43, %v4425_v32  ;;  %7917 = vrcp.f32 %v4975_v16  ;;  %v4940_v21 = vadd.f32 %v4939_v14, %v10395_v4  ;;  %v4996_v36 = vadd.f32 %v4995_v5, %v10455_v11 }
 0x5d2   : > { %v5254_v44 = vmul.f32 %v7908_v34, %v11582_v31  ;;  %7919 = vpow2.f32 %v4689_v27  ;;  %v11583_v19 = vrot.slane %v10407_v40, 1  ;;  %v10601_v41 = vadd.f32 %v10480_v48, %v10529_v62 }
 0x5d3   : > { %5430 = vperm.xlu1 %7734, %v5256_v53   ;;  %v5264_v3 = vmul.f32 %v7910_v18, %v10231_v50  ;;  %v4438_v0 = vmax.f32 %v4436_v61, %v4437_v20  ;;  %7921 = vrcp.f32 %v4940_v21  ;;  %v4982_v4 = vadd.f32 %v4981_v17, %v10541_v8  ;;  %v3977_v61 = vpop.xlane.xlu1 %3976  ;;  %v11585_v8 = vld [vmem:[#allocation66_spill] sm:$0xff] }
 0x5d4   : > { %v4926_v52 = vadd.f32 %v11583_v19, %v10407_v40  ;;  %v7912_v43 = vpop.eup %7911  ;;  %5455 = vperm.xlu0 %7735, %v5261_v38   ;;  %7923 = vrcp.f32 %v4996_v36  ;;  %v4455_v11 = vsel %vm4076_vm5, %v10601_v41, -inf  ;;  %v11584_v40 = vrot.slane %v10416_v25, 1 }
 0x5d5   : > { %v7914_v14 = vpop.eup %7913  ;;  %v10611_v62 = vadd.f32 %v10480_v48, %v3974_v2  ;;  %v4685_v32 = vmul.f32 1.442695, %v4573_v39  ;;  %v4456_v42 = vrot.slane %v4455_v11, 4  ;;  %v5003_v50 = vadd.f32 %v5002_v45, %v10554_v37 }
 0x5d6   : > { %v4954_v5 = vadd.f32 %v11584_v40, %v10416_v25  ;;  %7925 = vrcp.f32 %v4926_v52  ;;  %v5259_v17 = vmul.f32 %v7912_v43, %v11585_v8  ;;  %v10618_v27 = vadd.f32 %v10480_v48, %v3983_v63 }
 0x5d7   : > { %5420 = vperm.xlu1 %7734, %v5254_v44   ;;  %7927 = vrcp.f32 %v4982_v4  ;;  %v4441_v18 = vsel %vm4076_vm5, %v10611_v62, -inf  ;;  %v5267_v25 = vmul.f32 %v7914_v14, %v10292_v35  ;;  %v4439_v2 = vrot.slane %v4438_v0, 1 }
 0x5d8   : > { %5470 = vperm.xlu0 %7735, %v5264_v3   ;;  %v4457_v34 = vmax.f32 %v4455_v11, %v4456_v42  ;;  %v4442_v38 = vrot.slane %v4441_v18, 4  ;;  %7929 = vrcp.f32 %v4954_v5  ;;  %v11586_v37 = vrot.slane %v10532_v10, 1 }
 0x5d9   : > { %v4462_v20 = vsel %vm4076_vm5, %v10618_v27, -inf  ;;  %v10627_v16 = vadd.f32 %v10480_v48, %v3977_v61  ;;  %7931 = vrcp.f32 %v5003_v50  ;;  %v5048_v35 = vadd.f32 %v5047_v55, %v10570_v49 }
 0x5da   : > { %v5017_v45 = vadd.f32 %v11586_v37, %v10532_v10  ;;  %v7916_v53 = vpop.eup %7915  ;;  %v4458_v63 = vrot.slane %v4457_v34, 2  ;;  %v4443_v39 = vmax.f32 %v4441_v18, %v4442_v38  ;;  %v4463_v21 = vrot.slane %v4462_v20, 4 }
 0x5db   : > { %5445 = vperm.xlu1 %7734, %v5259_v17   ;;  %7933 = vpow2.f32 %v4685_v32  ;;  %v4574_v36 = vsub.f32 %v10499_v60, %v10589_v57  ;;  %v4448_v10 = vsel %vm4076_vm5, %v10627_v16, -inf  ;;  %v4440_v31 = vmax.f32 %v4438_v0, %v4439_v2  ;;  %v3992_v57 = vpop.xlane.xlu0 %3991 }
 0x5dc   : > { %5485 = vperm.xlu0 %7735, %v5267_v25   ;;  %v4459_v44 = vmax.f32 %v4457_v34, %v4458_v63  ;;  %v4444_v19 = vrot.slane %v4443_v39, 2  ;;  %v4464_v52 = vmax.f32 %v4462_v20, %v4463_v21  ;;  %v5028_v43 = vrot.slane %v10579_v56, 2 }
 0x5dd   : > { %v5257_v3 = vmul.f32 %v7916_v53, %v10228_v51  ;;  %v11587_v55 = vrot.slane %v10544_v1, 1  ;;  %v4449_v4 = vrot.slane %v4448_v10, 4  ;;  %7935 = vrcp.f32 %v5017_v45 }
 0x5de   : > { %v4460_v14 = vrot.slane %v4459_v44, 1  ;;  %v4445_v11 = vmax.f32 %v4443_v39, %v4444_v19  ;;  %v4465_v60 = vrot.slane %v4464_v52, 2  ;;  %v7918_v40 = vpop.eup %7917  ;;  %v5049_v5 = vrot.slane %v5048_v35, 2  ;;  %v7584_v39 = vpop.f32.mrf.mxu1 }
 0x5df   : > { %v5024_v49 = vadd.f32 %v11587_v55, %v10544_v1  ;;  %v5034_v0 = vadd.f32 %v5033_v54, %v10574_v59  ;;  %v4687_v32 = vmul.f32 1.442695, %v4574_v36  ;;  %5435 = vperm.xlu1 %7734, %v5257_v3   ;;  %v4450_v42 = vmax.f32 %v4448_v10, %v4449_v4  ;;  %v10642_v51 = vpop.eup %7919  ;;  %v3995_v36 = vpop.xlane.xlu0 %3994 }
 0x5e0   : > { %v4576_v50 = vsub.f32 %v10527_v6, %v4440_v31  ;;  %v5265_v1 = vmul.f32 %v7918_v40, %v10309_v28  ;;  %v4461_v61 = vmax.f32 %v4459_v44, %v4460_v14  ;;  %v4446_v8 = vrot.slane %v4445_v11, 1  ;;  %v7922_v17 = vpop.eup %7921  ;;  %v3986_v3 = vpop.xlane.xlu1 %3985 }
 0x5e1   : > { %v11588_v18 = vrot.slane %v10559_v9, 2  ;;  %v10650_v2 = vadd.f32 %v5028_v43, %v10579_v56  ;;  %v4466_v59 = vmax.f32 %v4464_v52, %v4465_v60  ;;  %v10653_v54 = vadd.f32 %v10480_v48, %v3992_v57  ;;  %v7924_v34 = vpop.eup %7923 }
 0x5e2   : > { %5475 = vperm.xlu0 %7735, %v5265_v1   ;;  %v5260_v6 = vmul.f32 %v7922_v17, %v10251_v29  ;;  %v4579_v28 = vsub.f32 %v10601_v41, %v4461_v61  ;;  %7937 = vrcp.f32 %v5024_v49  ;;  %v11589_v38 = vrot.slane %v10556_v24, 1 }
 0x5e3   : > { %v5043_v25 = vadd.f32 %v11588_v18, %v10559_v9  ;;  %v7926_v45 = vpop.eup %7925  ;;  %v10660_v9 = vadd.f32 %v5049_v5, %v5048_v35  ;;  %v5035_v56 = vrot.slane %v5034_v0, 2  ;;  %v5268_v20 = vmul.f32 %v7924_v34, %v10362_v12 }
 0x5e4   : > { %v5010_v37 = vadd.f32 %v11589_v38, %v10556_v24  ;;  %v4451_v53 = vrot.slane %v4450_v42, 2  ;;  %v7928_v63 = vpop.eup %7927  ;;  %v5067_v21 = vsel %vm4076_vm5, %v10642_v51, 0.0  ;;  %7939 = vpow2.f32 %v4687_v32  ;;  %5450 = vperm.xlu1 %7734, %v5260_v6   ;;  %v10668_v24 = vld [vmem:[%s11342_s3 + $0x3] ss:$0 sm:$0xff] }
 0x5e5   : > { %v4691_v29 = vmul.f32 1.442695, %v4576_v50  ;;  %v4447_v41 = vmax.f32 %v4445_v11, %v4446_v8  ;;  %v10671_v35 = vadd.f32 %v10668_v24, %v7584_v39  ;;  %v4697_v12 = vmul.f32 1.442695, %v4579_v28  ;;  %v7930_v44 = vpop.eup %7929  ;;  %v3989_v8 = vpop.xlane.xlu0 %3988 }
 0x5e6   : > { %v4467_v10 = vrot.slane %v4466_v59, 1  ;;  %v4483_v31 = vsel %vm4076_vm5, %v10653_v54, -inf  ;;  %v5044_v19 = vrot.slane %v5043_v25, 1  ;;  %5490 = vperm.xlu0 %7735, %v5268_v20   ;;  %v5258_v52 = vmul.f32 %v7926_v45, %v10299_v13  ;;  %v7932_v55 = vpop.eup %7931  ;;  %v10682_v13 = vpop.f32.mrf.mxu1 }
 0x5e7   : > { %v5266_v43 = vmul.f32 %v7928_v63, %v10414_v15  ;;  %7941 = vrcp.f32 %v5010_v37  ;;  %v5030_v49 = vrot.slane %v10650_v2, 1  ;;  %v5036_v4 = vadd.f32 %v5035_v56, %v5034_v0 }
 0x5e8   : > { %v5068_v14 = vrot.slane %v5067_v21, 4  ;;  %v4452_v11 = vmax.f32 %v4450_v42, %v4451_v53  ;;  %v10678_v60 = vpop.eup %7933  ;;  %v5051_v57 = vrot.slane %v10660_v9, 1  ;;  %7943 = vpow2.f32 %v4691_v29  ;;  %5440 = vperm.xlu1 %7734, %v5258_v52  }
 0x5e9   : > { %v4577_v40 = vsub.f32 %v10611_v62, %v4447_v41  ;;  %v4484_v5 = vrot.slane %v4483_v31, 4  ;;  %7945 = vpow2.f32 %v4697_v12  ;;  %v4468_v15 = vmax.f32 %v4466_v59, %v4467_v10  ;;  %v4004_v39 = vpop.xlane.xlu0 %4003 }
 0x5ea   : > { %v4453_v32 = vrot.slane %v4452_v11, 1  ;;  %v10685_v50 = vadd.f32 %v10480_v48, %v3986_v3  ;;  %5480 = vperm.xlu0 %7735, %v5266_v43   ;;  %v5262_v0 = vmul.f32 %v7930_v44, %v10319_v22  ;;  %v5269_v42 = vmul.f32 %v7932_v55, %v10423_v7  ;;  %v7936_v17 = vpop.eup %7935  ;;  %v7587_v22 = vpop.f32.mrf.mxu1 }
 0x5eb   : > { %v4485_v1 = vmax.f32 %v4483_v31, %v4484_v5  ;;  %v5045_v61 = vadd.f32 %v5044_v19, %v5043_v25  ;;  %v5037_v18 = vrot.slane %v5036_v4, 1  ;;  %v10689_v62 = vadd.f32 %v5068_v14, %v5067_v21 }
 0x5ec   : > { %v5053_v34 = vsel %vm4076_vm5, %v10678_v60, 0.0  ;;  %v4469_v59 = vsel %vm4076_vm5, %v10685_v50, -inf  ;;  %5460 = vperm.xlu1 %7734, %v5262_v0   ;;  %v4693_v6 = vmul.f32 1.442695, %v4577_v40  ;;  %v4580_v7 = vsub.f32 %v10618_v27, %v4468_v15  ;;  %v3068_v10 = vpop.f32.mrf.mxu1 }
 0x5ed   : > { %v4486_v28 = vrot.slane %v4485_v1, 2  ;;  %v4470_v38 = vrot.slane %v4469_v59, 4  ;;  %7947 = vrcp.f32 %v5045_v61  ;;  %v4454_v25 = vmax.f32 %v4452_v11, %v4453_v32 }
 0x5ee   : > { %v10697_v37 = vadd.f32 %v10480_v48, %v3995_v36  ;;  %v5031_v45 = vadd.f32 %v5030_v49, %v10650_v2  ;;  %5495 = vperm.xlu0 %7735, %v5269_v42   ;;  %v5271_v56 = vmul.f32 %v7936_v17, %v10404_v23  ;;  %v10702_v63 = vadd.f32 %v10480_v48, %v3989_v8 }
 0x5ef   : > { %v4487_v20 = vmax.f32 %v4485_v1, %v4486_v28  ;;  %v4471_v53 = vmax.f32 %v4469_v59, %v4470_v38  ;;  %v7938_v21 = vpop.eup %7937  ;;  %v5054_v29 = vrot.slane %v5053_v34, 4  ;;  %v5052_v41 = vadd.f32 %v5051_v57, %v10660_v9 }
 0x5f0   : > { %v4490_v27 = vsel %vm4076_vm5, %v10697_v37, -inf  ;;  %7949 = vrcp.f32 %v5031_v45  ;;  %5505 = vperm.xlu1 %7734, %v5271_v56   ;;  %v4699_v31 = vmul.f32 1.442695, %v4580_v7  ;;  %v4578_v44 = vsub.f32 %v10627_v16, %v4454_v25 }
 0x5f1   : > { %7951 = vpow2.f32 %v4693_v6  ;;  %v4488_v2 = vrot.slane %v4487_v20, 1  ;;  %v4472_v36 = vrot.slane %v4471_v53, 2  ;;  %v4491_v12 = vrot.slane %v4490_v27, 4  ;;  %v10707_v23 = vpop.eup %7939 }
 0x5f2   : > { %v4476_v19 = vsel %vm4076_vm5, %v10702_v63, -inf  ;;  %v10713_v52 = vadd.f32 %v10480_v48, %v4004_v39  ;;  %v5272_v43 = vmul.f32 %v7938_v21, %v10420_v33  ;;  %v5038_v55 = vadd.f32 %v5037_v18, %v5036_v4  ;;  %v7588_v33 = vpop.f32.mrf.mxu1  ;;  %v3998_v18 = vpop.xlane.xlu0 %3997 }
 0x5f3   : > { %v4473_v9 = vmax.f32 %v4471_v53, %v4472_v36  ;;  %v4492_v3 = vmax.f32 %v4490_v27, %v4491_v12  ;;  %v4489_v14 = vmax.f32 %v4487_v20, %v4488_v2  ;;  %v4477_v11 = vrot.slane %v4476_v19, 4 }
 0x5f4   : > { %v7942_v49 = vpop.eup %7941  ;;  %7953 = vrcp.f32 %v5052_v41  ;;  %v4511_v57 = vsel %vm4076_vm5, %v10713_v52, -inf  ;;  %v5055_v40 = vadd.f32 %v5054_v29, %v5053_v34  ;;  %v5060_v16 = vsel %vm4076_vm5, %v10707_v23, 0.0  ;;  %5510 = vperm.xlu1 %7734, %v5272_v43   ;;  %v5306_v29 = vpop.permute.xlu1 %5305 }
 0x5f5   : > { %v4474_v5 = vrot.slane %v4473_v9, 1  ;;  %v4493_v15 = vrot.slane %v4492_v3, 2  ;;  %v10720_v32 = vpop.eup %7943  ;;  %7955 = vpow2.f32 %v4699_v31  ;;  %v4695_v0 = vmul.f32 1.442695, %v4578_v44 }
 0x5f6   : > { %v4478_v4 = vmax.f32 %v4476_v19, %v4477_v11  ;;  %v4512_v42 = vrot.slane %v4511_v57, 4  ;;  %v10722_v1 = vpop.eup %7945  ;;  %v10726_v61 = vadd.f32 %v10668_v24, %v10682_v13  ;;  %v5270_v8 = vmul.f32 %v7942_v49, %v10440_v47  ;;  %v3071_v47 = vpop.f32.mrf.mxu1 }
 0x5f7   : > { %v4494_v17 = vmax.f32 %v4492_v3, %v4493_v15  ;;  %7957 = vrcp.f32 %v5038_v55  ;;  %v4583_v34 = vsub.f32 %v10653_v54, %v4489_v14  ;;  %v4475_v59 = vmax.f32 %v4473_v9, %v4474_v5  ;;  %v11594_v55 = vld [vmem:[#allocation2_spill] sm:$0xff] }
 0x5f8   : > { %v4479_v6 = vrot.slane %v4478_v4, 2  ;;  %v4513_v28 = vmax.f32 %v4511_v57, %v4512_v42  ;;  %v10731_v38 = vadd.f32 %v10668_v24, %v7587_v22  ;;  %v5070_v7 = vrot.slane %v10689_v62, 2  ;;  %5500 = vperm.xlu1 %7734, %v5270_v8   ;;  %v5296_v8 = vpop.permute.xlu1 %5295 }
 0x5f9   : > { %v5061_v25 = vrot.slane %v5060_v16, 4  ;;  %v4495_v45 = vrot.slane %v4494_v17, 1  ;;  %v10735_v56 = vadd.f32 %v10668_v24, %v3068_v10  ;;  %v5056_v20 = vrot.slane %v5055_v40, 2 }
 0x5fa   : > { %11590 = vst [vmem:[#allocation50_spill] sm:$0xff] %v10731_v38  ;;  %v7948_v13 = vpop.eup %7947  ;;  %7959 = vpow2.f32 %v4695_v0  ;;  %v4480_v53 = vmax.f32 %v4478_v4, %v4479_v6  ;;  %v5074_v54 = vsel %vm4076_vm5, %v10720_v32, 0.0  ;;  %v5095_v22 = vsel %vm4076_vm5, %v10722_v1, 0.0 }
 0x5fb   : > { %11591 = vst [vmem:[#allocation57_spill] sm:$0xff] %v10735_v56  ;;  %v5275_v39 = vmul.f32 %v7948_v13, %v10501_v46  ;;  %v4496_v21 = vmax.f32 %v4494_v17, %v4495_v45  ;;  %v4705_v27 = vmul.f32 1.442695, %v4583_v34  ;;  %v4581_v41 = vsub.f32 %v10685_v50, %v4475_v59  ;;  %v4007_v46 = vpop.xlane.xlu0 %4006  ;;  %v11605_v56 = vld [vmem:[#allocation15_spill] sm:$0xff] }
 0x5fc   : > { %v4481_v2 = vrot.slane %v4480_v53, 1  ;;  %v4514_v36 = vrot.slane %v4513_v28, 2  ;;  %v10744_v10 = vadd.f32 %v10668_v24, %v7588_v33  ;;  %v10747_v31 = vadd.f32 %v10668_v24, %v3071_v47 }
 0x5fd   : > { %v7950_v12 = vpop.eup %7949  ;;  %v5071_v44 = vadd.f32 %v5070_v7, %v10689_v62  ;;  %v10750_v19 = vadd.f32 %v5061_v25, %v5060_v16  ;;  %5525 = vperm.xlu1 %7734, %v5275_v39   ;;  %v10754_v9 = vadd.f32 %v5056_v20, %v5055_v40  ;;  %v5075_v50 = vrot.slane %v5074_v54, 4 }
 0x5fe   : > { %11592 = vst [vmem:[#allocation56_spill] sm:$0xff] %v10744_v10  ;;  %11593 = vst [vmem:[#allocation58_spill] sm:$0xff] %v10747_v31  ;;  %v10752_v43 = vpop.eup %7951  ;;  %v4482_v3 = vmax.f32 %v4480_v53, %v4481_v2  ;;  %v5615_v49 = vmul.f32 %v5306_v29, %v11594_v55  ;;  %v5096_v14 = vrot.slane %v5095_v22, 4  ;;  %v4584_v11 = vsub.f32 %v10697_v37, %v4496_v21  ;;  %v11595_v53 = vld [vmem:[#allocation3_spill] sm:$0xff] }
 0x5ff   : > { %v5273_v24 = vmul.f32 %v7950_v12, %v10518_v30  ;;  %v4515_v57 = vmax.f32 %v4513_v28, %v4514_v36  ;;  %7961 = vpow2.f32 %v4705_v27  ;;  %v4701_v62 = vmul.f32 1.442695, %v4581_v41  ;;  %v4001_v28 = vpop.xlane.xlu0 %4000 }
 0x600   : > { %v4582_v16 = vsub.f32 %v10702_v63, %v4482_v3  ;;  %v10761_v5 = vadd.f32 %v10480_v48, %v3998_v18  ;;  %v5072_v40 = vrot.slane %v5071_v44, 1  ;;  %v5063_v33 = vrot.slane %v10750_v19, 2 }
 0x601   : > { %v7954_v15 = vpop.eup %7953  ;;  %v5081_v0 = vsel %vm4076_vm5, %v10752_v43, 0.0  ;;  %5515 = vperm.xlu1 %7734, %v5273_v24   ;;  %v4516_v4 = vrot.slane %v4515_v57, 1  ;;  %v5058_v37 = vrot.slane %v10754_v9, 1  ;;  %v5076_v30 = vadd.f32 %v5075_v50, %v5074_v54 }
 0x602   : > { %v5691_v42 = vsel %vm1360_vm3, %v5615_v49, 0.0  ;;  %v4497_v63 = vsel %vm4076_vm5, %v10761_v5, -inf  ;;  %v10770_v17 = vpop.eup %7955  ;;  %v4707_v18 = vmul.f32 1.442695, %v4584_v11  ;;  %v5276_v34 = vmul.f32 %v7954_v15, %v10535_v58 }
 0x603   : > { %v4517_v59 = vmax.f32 %v4515_v57, %v4516_v4  ;;  %v4498_v6 = vrot.slane %v4497_v63, 4  ;;  %v5097_v25 = vadd.f32 %v5096_v14, %v5095_v22  ;;  %v5082_v45 = vrot.slane %v5081_v0, 4 }
 0x604   : > { %v7958_v7 = vpop.eup %7957  ;;  %7963 = vpow2.f32 %v4701_v62  ;;  %v4703_v13 = vmul.f32 1.442695, %v4582_v16  ;;  %v5613_v54 = vmul.f32 %v5296_v8, %v11595_v53  ;;  %v10776_v39 = vadd.f32 %v10480_v48, %v4007_v46  ;;  %v7747_v16 = vld [vmem:[%s11341_s2 + $0xc8] sm:$0xff]  }
 0x605   : > { %5530 = vperm.xlu1 %7734, %v5276_v34   ;;  %v4587_v47 = vsub.f32 %v10713_v52, %v4517_v59  ;;  %v4499_v20 = vmax.f32 %v4497_v63, %v4498_v6  ;;  %v5077_v21 = vrot.slane %v5076_v30, 2  ;;  %v5102_v58 = vsel %vm4076_vm5, %v10770_v17, 0.0  ;;  %7673 = vmatprep.subr.bf16.mxu1 %v7747_v16 }
 0x606   : > { %v5692_v29 = vrot.slane %v5691_v42, 4  ;;  %v10781_v27 = vadd.f32 %v10480_v48, %v4001_v28  ;;  %7965 = vpow2.f32 %v4707_v18  ;;  %v5274_v41 = vmul.f32 %v7958_v7, %v10538_v26  ;;  %v5311_v28 = vpop.permute.xlu0 %5310  ;;  %v5346_v7 = vpop.permute.xlu1 %5345  ;;  %7674 = vmatpush3.bf16.msra.mxu1 %v7747_v16 }
 0x607   : > { %v10783_v22 = vpop.eup %7959  ;;  %v4713_v52 = vmul.f32 1.442695, %v4587_v47  ;;  %v4500_v2 = vrot.slane %v4499_v20, 2  ;;  %v5098_v36 = vrot.slane %v5097_v25, 2  ;;  %v5083_v12 = vadd.f32 %v5082_v45, %v5081_v0 }
 0x608   : > { %7967 = vpow2.f32 %v4703_v13  ;;  %v4518_v46 = vsel %vm4076_vm5, %v10776_v39, -inf  ;;  %v5677_v3 = vsel %vm1360_vm3, %v5613_v54, 0.0  ;;  %v5073_v48 = vadd.f32 %v5072_v40, %v5071_v44 }
 0x609   : > { %5520 = vperm.xlu1 %7734, %v5274_v41   ;;  %v4501_v50 = vmax.f32 %v4499_v20, %v4500_v2  ;;  %v4519_v55 = vrot.slane %v4518_v46, 4  ;;  %v5103_v49 = vrot.slane %v5102_v58, 4  ;;  %v5088_v14 = vsel %vm4076_vm5, %v10783_v22, 0.0 }
 0x60a   : > { %v5693_v11 = vadd.f32 %v5692_v29, %v5691_v42  ;;  %v4504_v26 = vsel %vm4076_vm5, %v10781_v27, -inf  ;;  %7969 = vpow2.f32 %v4713_v52  ;;  %v5064_v15 = vadd.f32 %v5063_v33, %v10750_v19 }
 0x60b   : > { %v4502_v24 = vrot.slane %v4501_v50, 1  ;;  %v4520_v57 = vmax.f32 %v4518_v46, %v4519_v55  ;;  %v4505_v62 = vrot.slane %v4504_v26, 4  ;;  %v10797_v0 = vadd.f32 %v5077_v21, %v5076_v30 }
 0x60c   : > { %v5084_v44 = vrot.slane %v5083_v12, 2  ;;  %v5678_v40 = vrot.slane %v5677_v3, 4  ;;  %v10799_v4 = vpop.eup %7961  ;;  %7971 = vrcp.f32 %v5073_v48  ;;  %v10801_v18 = vadd.f32 %v5098_v36, %v5097_v25  ;;  %v5301_v48 = vpop.permute.xlu0 %5300 }
 0x60d   : > { %v4503_v42 = vmax.f32 %v4501_v50, %v4502_v24  ;;  %v4521_v63 = vrot.slane %v4520_v57, 2  ;;  %v4506_v8 = vmax.f32 %v4504_v26, %v4505_v62  ;;  %v5104_v34 = vadd.f32 %v5103_v49, %v5102_v58  ;;  %v5336_v49 = vpop.permute.xlu1 %5335 }
 0x60e   : > { %v5089_v59 = vrot.slane %v5088_v14, 4  ;;  %v5059_v6 = vadd.f32 %v5058_v37, %v10754_v9  ;;  %v5694_v19 = vrot.slane %v5693_v11, 2  ;;  %v5065_v13 = vrot.slane %v5064_v15, 1 }
 0x60f   : > { %v4585_v33 = vsub.f32 %v10761_v5, %v4503_v42  ;;  %v4522_v30 = vmax.f32 %v4520_v57, %v4521_v63  ;;  %v4507_v45 = vrot.slane %v4506_v8, 2  ;;  %v10805_v47 = vadd.f32 %v5084_v44, %v5083_v12 }
 0x610   : > { %v5123_v20 = vsel %vm4076_vm5, %v10799_v4, 0.0  ;;  %v5679_v25 = vadd.f32 %v5678_v40, %v5677_v3  ;;  %7973 = vrcp.f32 %v5059_v6  ;;  %v5079_v37 = vrot.slane %v10797_v0, 1  ;;  %v11596_v3 = vld [vmem:[#allocation4_spill] sm:$0xff]  ;;  %v11597_v40 = vld [vmem:[#allocation11_spill] sm:$0xff] }
 0x611   : > { %v10809_v53 = vpop.eup %7963  ;;  %v4709_v54 = vmul.f32 1.442695, %v4585_v33  ;;  %v4523_v21 = vrot.slane %v4522_v30, 1  ;;  %v4508_v9 = vmax.f32 %v4506_v8, %v4507_v45  ;;  %v5105_v5 = vrot.slane %v5104_v34, 2 }
 0x612   : > { %v10813_v29 = vadd.f32 %v5089_v59, %v5088_v14  ;;  %v5124_v41 = vrot.slane %v5123_v20, 4  ;;  %v5695_v52 = vadd.f32 %v5694_v19, %v5693_v11  ;;  %v5086_v46 = vrot.slane %v10805_v47, 1 }
 0x613   : > { %v4524_v2 = vmax.f32 %v4522_v30, %v4523_v21  ;;  %v4509_v36 = vrot.slane %v4508_v9, 1  ;;  %v10815_v12 = vpop.eup %7965  ;;  %7975 = vpow2.f32 %v4709_v54  ;;  %v5680_v50 = vrot.slane %v5679_v25, 2  ;;  %v5326_v54 = vpop.permute.xlu0 %5325 }
 0x614   : > { %v5616_v55 = vmul.f32 %v5311_v28, %v11596_v3  ;;  %v5109_v14 = vsel %vm4076_vm5, %v10809_v53, 0.0  ;;  %v5066_v57 = vadd.f32 %v5065_v13, %v5064_v15  ;;  %v10824_v62 = vadd.f32 %v5105_v5, %v5104_v34  ;;  %v5351_v21 = vpop.permute.xlu1 %5350  ;;  %v11598_v3 = vld [vmem:[#allocation5_spill] sm:$0xff] }
 0x615   : > { %v10819_v26 = vpop.eup %7967  ;;  %v4588_v24 = vsub.f32 %v10776_v39, %v4524_v2  ;;  %v4510_v11 = vmax.f32 %v4508_v9, %v4509_v36  ;;  %v5091_v16 = vrot.slane %v10813_v29, 2  ;;  %v5623_v42 = vmul.f32 %v5346_v7, %v11597_v40 }
 0x616   : > { %v5698_v44 = vsel %vm1360_vm3, %v5616_v55, 0.0  ;;  %v5125_v63 = vadd.f32 %v5124_v41, %v5123_v20  ;;  %v5696_v8 = vrot.slane %v5695_v52, 1  ;;  %v5110_v19 = vrot.slane %v5109_v14, 4 }
 0x617   : > { %v4715_v59 = vmul.f32 1.442695, %v4588_v24  ;;  %v4586_v6 = vsub.f32 %v10781_v27, %v4510_v11  ;;  %v10830_v28 = vpop.eup %7969  ;;  %v5681_v33 = vadd.f32 %v5680_v50, %v5679_v25  ;;  %v5699_v39 = vrot.slane %v5698_v44, 4  ;;  %v11599_v24 = vld [vmem:[#allocation10_spill] sm:$0xff] }
 0x618   : > { %7977 = vrcp.f32 %v5066_v57  ;;  %v5130_v15 = vsel %vm4076_vm5, %v10815_v12, 0.0  ;;  %v5116_v34 = vsel %vm4076_vm5, %v10819_v26, 0.0  ;;  %v5747_v7 = vsel %vm1360_vm3, %v5623_v42, 0.0 }
 0x619   : > { %v4711_v30 = vmul.f32 1.442695, %v4586_v6  ;;  %v7972_v45 = vpop.eup %7971  ;;  %7979 = vpow2.f32 %v4715_v59  ;;  %v5700_v13 = vadd.f32 %v5699_v39, %v5698_v44  ;;  %v5748_v20 = vrot.slane %v5747_v7, 4  ;;  %v11601_v39 = vld [vmem:[#allocation12_spill] sm:$0xff] }
 0x61a   : > { %v5080_v27 = vadd.f32 %v5079_v37, %v10797_v0  ;;  %v5151_v25 = vsel %vm4076_vm5, %v10830_v28, 0.0  ;;  %v10840_v9 = vadd.f32 %v5696_v8, %v5695_v52  ;;  %v5279_v5 = vmul.f32 %v7972_v45, %v10642_v51  ;;  %v11600_v37 = vld [vmem:[#allocation7_spill] sm:$0xff] }
 0x61b   : > { %7981 = vpow2.f32 %v4711_v30  ;;  %v5111_v41 = vadd.f32 %v5110_v19, %v5109_v14  ;;  %v5131_v2 = vrot.slane %v5130_v15, 4  ;;  %v5749_v36 = vadd.f32 %v5748_v20, %v5747_v7  ;;  %v5341_v30 = vpop.permute.xlu1 %5340 }
 0x61c   : > { %7983 = vrcp.f32 %v5080_v27  ;;  %v5117_v50 = vrot.slane %v5116_v34, 4  ;;  %5545 = vperm.xlu0 %7735, %v5279_v5   ;;  %v5614_v55 = vmul.f32 %v5301_v48, %v11598_v3  ;;  %v5621_v0 = vmul.f32 %v5336_v49, %v11599_v24 }
 0x61d   : > { %v5619_v11 = vmul.f32 %v5326_v54, %v11600_v37  ;;  %v7974_v57 = vpop.eup %7973  ;;  %v5126_v44 = vrot.slane %v5125_v63, 2  ;;  %v5152_v40 = vrot.slane %v5151_v25, 4  ;;  %v5682_v52 = vrot.slane %v5681_v33, 1 }
 0x61e   : > { %v5701_v42 = vrot.slane %v5700_v13, 2  ;;  %v5277_v8 = vmul.f32 %v7974_v57, %v10678_v60  ;;  %v5684_v51 = vsel %vm1360_vm3, %v5614_v55, 0.0  ;;  %v5733_v14 = vsel %vm1360_vm3, %v5621_v0, 0.0 }
 0x61f   : > { %v5719_v59 = vsel %vm1360_vm3, %v5619_v11, 0.0  ;;  %v5112_v6 = vrot.slane %v5111_v41, 2  ;;  %v5750_v19 = vrot.slane %v5749_v36, 2  ;;  %v5685_v48 = vrot.slane %v5684_v51, 4 }
 0x620   : > { %v5624_v49 = vmul.f32 %v5351_v21, %v11601_v39  ;;  %v10851_v7 = vpop.eup %7975  ;;  %v5132_v20 = vadd.f32 %v5131_v2, %v5130_v15  ;;  %v5118_v27 = vadd.f32 %v5117_v50, %v5116_v34  ;;  %5535 = vperm.xlu0 %7735, %v5277_v8   ;;  %v5734_v60 = vrot.slane %v5733_v14, 4 }
 0x621   : > { %v5153_v54 = vadd.f32 %v5152_v40, %v5151_v25  ;;  %v5683_v5 = vadd.f32 %v5682_v52, %v5681_v33  ;;  %v5686_v3 = vadd.f32 %v5685_v48, %v5684_v51  ;;  %v5720_v55 = vrot.slane %v5719_v59, 4  ;;  %v5316_v33 = vpop.permute.xlu0 %5315 }
 0x622   : > { %v10855_v24 = vadd.f32 %v5091_v16, %v10813_v29  ;;  %v10857_v0 = vadd.f32 %v5126_v44, %v5125_v63  ;;  %v6141_v21 = vpack.c.bf16 %v10840_v9, %v10840_v9  ;;  %v5702_v37 = vadd.f32 %v5701_v42, %v5700_v13  ;;  %v10867_v13 = vpop.permute.xlu1 %5365 }
 0x623   : > { %v10861_v11 = vadd.f32 %v5112_v6, %v5111_v41  ;;  %v5137_v15 = vsel %vm4076_vm5, %v10851_v7, 0.0  ;;  %v5751_v34 = vadd.f32 %v5750_v19, %v5749_v36  ;;  %v5754_v25 = vsel %vm1360_vm3, %v5624_v49, 0.0  ;;  %v7748_v41 = vld [vmem:[%s11341_s2 + $0xc0] sm:$0xff]  }
 0x624   : > { %v5133_v50 = vrot.slane %v5132_v20, 2  ;;  %v5119_v57 = vrot.slane %v5118_v27, 2  ;;  %v5687_v29 = vrot.slane %v5686_v3, 2  ;;  %v5735_v16 = vadd.f32 %v5734_v60, %v5733_v14  ;;  %7675 = vmatprep.subr.bf16.mxu1 %v7748_v41 }
 0x625   : > { %v7978_v2 = vpop.eup %7977  ;;  %v5154_v63 = vrot.slane %v5153_v54, 2  ;;  %v6139_v44 = vpack.c.bf16 %v5683_v5, %v5683_v5  ;;  %v5721_v9 = vadd.f32 %v5720_v55, %v5719_v59  ;;  %v5138_v42 = vrot.slane %v5137_v15, 4  ;;  %7676 = vmatpush3.bf16.msra.mxu1 %v7748_v41 }
 0x626   : > { %v5278_v40 = vmul.f32 %v7978_v2, %v10707_v23  ;;  %v10872_v36 = vpop.eup %7979  ;;  %v5703_v8 = vrot.slane %v5702_v37, 1  ;;  %v5755_v51 = vrot.slane %v5754_v25, 4  ;;  %v10879_v59 = vunpack.c.l.b16 %v6141_v21  ;;  %v5331_v21 = vpop.permute.xlu0 %5330 }
 0x627   : > { %v5752_v19 = vrot.slane %v5751_v34, 1  ;;  %v10881_v39 = vadd.f32 %v5133_v50, %v5132_v20  ;;  %v10883_v49 = vadd.f32 %v5119_v57, %v5118_v27  ;;  %v5688_v60 = vadd.f32 %v5687_v29, %v5686_v3  ;;  %v11603_v29 = vld [vmem:[#allocation13_spill] sm:$0xff] }
 0x628   : > { %v10875_v6 = vpop.eup %7981  ;;  %5540 = vperm.xlu1 %7734, %v5278_v40   ;;  %v5736_v5 = vrot.slane %v5735_v16, 2  ;;  %v10885_v55 = vadd.f32 %v5154_v63, %v5153_v54  ;;  %v10887_v2 = vunpack.c.l.b16 %v6139_v44  ;;  %v5722_v58 = vrot.slane %v5721_v9, 2  ;;  %v11602_v54 = vld [vmem:[#allocation6_spill] sm:$0xff] }
 0x629   : > { %v7984_v48 = vpop.eup %7983  ;;  %v10890_v23 = vadd.f32 %v5138_v42, %v5137_v15  ;;  %v5158_v40 = vsel %vm4076_vm5, %v10872_v36, 0.0  ;;  %v10894_v20 = vadd.f32 %v5703_v8, %v5702_v37  ;;  %v5756_v27 = vadd.f32 %v5755_v51, %v5754_v25 }
 0x62a   : > { %v5280_v45 = vmul.f32 %v7984_v48, %v10720_v32  ;;  %v5144_v3 = vsel %vm4076_vm5, %v10875_v6, 0.0  ;;  %v10898_v50 = vadd.f32 %v5752_v19, %v5751_v34  ;;  %v5617_v57 = vmul.f32 %v5316_v33, %v11602_v54  ;;  %v5356_v63 = vpop.permute.xlu1 %5355 }
 0x62b   : > { %v5622_v32 = vmul.f32 %v5341_v30, %v11603_v29  ;;  %v5689_v41 = vrot.slane %v5688_v60, 1  ;;  %v5737_v42 = vadd.f32 %v5736_v5, %v5735_v16  ;;  %v5159_v37 = vrot.slane %v5158_v40, 4  ;;  %v5321_v5 = vpop.permute.xlu0 %5320  ;;  %v11604_v29 = vld [vmem:[#allocation8_spill] sm:$0xff] }
 0x62c   : > { %5550 = vperm.xlu0 %7735, %v5280_v45   ;;  %v5723_v8 = vadd.f32 %v5722_v58, %v5721_v9  ;;  %v5705_v25 = vsel %vm1360_vm3, %v5617_v57, 0.0  ;;  %v5145_v45 = vrot.slane %v5144_v3, 4  ;;  %v6142_v33 = vpack.c.bf16 %v10894_v20, %v10894_v20 }
 0x62d   : > { %v5740_v51 = vsel %vm1360_vm3, %v5622_v32, 0.0  ;;  %v5757_v30 = vrot.slane %v5756_v27, 2  ;;  %v5140_v19 = vrot.slane %v10890_v23, 2  ;;  %v6149_v48 = vpack.c.bf16 %v10898_v50, %v10898_v50 }
 0x62e   : > { %v5706_v54 = vrot.slane %v5705_v25, 4  ;;  %v5741_v16 = vrot.slane %v5740_v51, 4  ;;  %v5690_v58 = vadd.f32 %v5689_v41, %v5688_v60  ;;  %v5738_v9 = vrot.slane %v5737_v42, 1 }
 0x62f   : > { %v5087_v57 = vadd.f32 %v5086_v46, %v10805_v47  ;;  %v5620_v32 = vmul.f32 %v5331_v21, %v11604_v29  ;;  %v5160_v34 = vadd.f32 %v5159_v37, %v5158_v40  ;;  %v5724_v44 = vrot.slane %v5723_v8, 1  ;;  %v5371_v14 = vpop.permute.xlu1 %5370  ;;  %v11606_v46 = vld [vmem:[#allocation9_spill] sm:$0xff]  ;;  %v11607_v40 = vld [vmem:[#allocation14_spill] sm:$0xff] }
 0x630   : > { %v5707_v20 = vadd.f32 %v5706_v54, %v5705_v25  ;;  %v5742_v15 = vadd.f32 %v5741_v16, %v5740_v51  ;;  %v5146_v52 = vadd.f32 %v5145_v45, %v5144_v3  ;;  %v5758_v31 = vadd.f32 %v5757_v30, %v5756_v27  ;;  %v5386_v54 = vpop.permute.xlu0 %5385 }
 0x631   : > { %7985 = vrcp.f32 %v5087_v57  ;;  %v5726_v50 = vsel %vm1360_vm3, %v5620_v32, 0.0  ;;  %v5627_v38 = vmul.f32 %v10867_v13, %v11605_v56  ;;  %v6140_v47 = vpack.c.bf16 %v5690_v58, %v5690_v58  ;;  %v11609_v32 = vld [vmem:[#allocation17_spill] sm:$0xff] }
 0x632   : > { %v5708_v10 = vrot.slane %v5707_v20, 2  ;;  %v5743_v60 = vrot.slane %v5742_v15, 2  ;;  %v5727_v41 = vrot.slane %v5726_v50, 4  ;;  %v5618_v21 = vmul.f32 %v5321_v5, %v11606_v46 }
 0x633   : > { %v5625_v37 = vmul.f32 %v5356_v63, %v11607_v40  ;;  %v11608_v25 = vrot.slane %v10855_v24, 1  ;;  %v5775_v30 = vsel %vm1360_vm3, %v5627_v38, 0.0  ;;  %v5759_v16 = vrot.slane %v5758_v31, 1  ;;  %v10926_v13 = vpop.permute.xlu1 %5360 }
 0x634   : > { %v5709_v27 = vadd.f32 %v5708_v10, %v5707_v20  ;;  %v5744_v51 = vadd.f32 %v5743_v60, %v5742_v15  ;;  %v5728_v45 = vadd.f32 %v5727_v41, %v5726_v50  ;;  %v5776_v57 = vrot.slane %v5775_v30, 4 }
 0x635   : > { %v5094_v3 = vadd.f32 %v11608_v25, %v10855_v24  ;;  %v5712_v56 = vsel %vm1360_vm3, %v5618_v21, 0.0  ;;  %v5161_v5 = vrot.slane %v5160_v34, 2  ;;  %v5739_v63 = vadd.f32 %v5738_v9, %v5737_v42 }
 0x636   : > { %v5725_v58 = vadd.f32 %v5724_v44, %v5723_v8  ;;  %v5761_v29 = vsel %vm1360_vm3, %v5625_v37, 0.0  ;;  %v5147_v24 = vrot.slane %v5146_v52, 2  ;;  %v5710_v10 = vrot.slane %v5709_v27, 1 }
 0x637   : > { %7987 = vrcp.f32 %v5094_v3  ;;  %v5745_v15 = vrot.slane %v5744_v51, 1  ;;  %v5631_v20 = vmul.f32 %v5386_v54, %v11609_v32  ;;  %v6275_v38 = vunpack.c.l.b16 %v6142_v33 }
 0x638   : > { %v6273_v50 = vunpack.c.l.b16 %v6140_v47  ;;  %v5729_v60 = vrot.slane %v5728_v45, 2  ;;  %v5713_v41 = vrot.slane %v5712_v56, 4  ;;  %v10931_v46 = vadd.f32 %v5140_v19, %v10890_v23  ;;  %v5391_v47 = vpop.permute.xlu0 %5390  ;;  %v10940_v32 = vpop.permute.xlu1 %5375  ;;  %v11610_v19 = vld [vmem:[#allocation16_spill] sm:$0xff] }
 0x639   : > { %v5760_v21 = vadd.f32 %v5759_v16, %v5758_v31  ;;  %v5777_v40 = vadd.f32 %v5776_v57, %v5775_v30  ;;  %v5762_v25 = vrot.slane %v5761_v29, 4  ;;  %v10933_v42 = vadd.f32 %v5161_v5, %v5160_v34 }
 0x63a   : > { %v10935_v44 = vunpack.c.l.b16 %v6149_v48  ;;  %v6147_v8 = vpack.c.bf16 %v5739_v63, %v5739_v63  ;;  %v6145_v9 = vpack.c.bf16 %v5725_v58, %v5725_v58  ;;  %v10937_v37 = vadd.f32 %v5147_v24, %v5146_v52 }
 0x63b   : > { %v5711_v3 = vadd.f32 %v5710_v10, %v5709_v27  ;;  %v5746_v54 = vadd.f32 %v5745_v15, %v5744_v51  ;;  %v5803_v33 = vsel %vm1360_vm3, %v5631_v20, 0.0  ;;  %v6337_v31 = vsel %vm6336_vm6, %v6273_v50, %v10887_v2 }
 0x63c   : > { %v5730_v23 = vadd.f32 %v5729_v60, %v5728_v45  ;;  %v5714_v34 = vadd.f32 %v5713_v41, %v5712_v56  ;;  %v5628_v48 = vmul.f32 %v5371_v14, %v11610_v19  ;;  %v5142_v30 = vrot.slane %v10931_v46, 1 }
 0x63d   : > { %v6150_v16 = vpack.c.bf16 %v5760_v21, %v5760_v21  ;;  %v5778_v52 = vrot.slane %v5777_v40, 2  ;;  %v5763_v57 = vadd.f32 %v5762_v25, %v5761_v29  ;;  %v5163_v51 = vrot.slane %v10933_v42, 1  ;;  %v5406_v21 = vpop.permute.xlu0 %5405 }
 0x63e   : > { %v7986_v27 = vpop.eup %7985  ;;  %v6280_v5 = vunpack.c.l.b16 %v6147_v8  ;;  %v10947_v63 = vunpack.c.l.b16 %v6145_v9  ;;  %v5804_v58 = vrot.slane %v5803_v33, 4  ;;  %v6339_v2 = vsel %vm6338_vm7, %v10879_v59, %v6337_v31 }
 0x63f   : > { %v6143_v24 = vpack.c.bf16 %v5711_v3, %v5711_v3  ;;  %v6148_v45 = vpack.c.bf16 %v5746_v54, %v5746_v54  ;;  %v5281_v56 = vmul.f32 %v7986_v27, %v10752_v43  ;;  %v5149_v14 = vrot.slane %v10937_v37, 1  ;;  %v11612_v3 = vld [vmem:[#allocation20_spill] sm:$0xff] }
 0x640   : > { %v5731_v10 = vrot.slane %v5730_v23, 1  ;;  %v5715_v15 = vrot.slane %v5714_v34, 2  ;;  %v5782_v29 = vsel %vm1360_vm3, %v5628_v48, 0.0  ;;  %v10954_v20 = vunpack.c.l.b16 %v6150_v16 }
 0x641   : > { %5555 = vperm.xlu0 %7735, %v5281_v56   ;;  %v10956_v50 = vadd.f32 %v5778_v52, %v5777_v40  ;;  %v5764_v60 = vrot.slane %v5763_v57, 2  ;;  %v11611_v41 = vrot.slane %v10857_v0, 1  ;;  %v6341_v43 = vsel %vm6340_vm8, %v6275_v38, %v6339_v2 }
 0x642   : > { %v5381_v25 = vpop.permute.xlu1 %5380  ;;  %v5805_v9 = vadd.f32 %v5804_v58, %v5803_v33  ;;  %v5632_v54 = vmul.f32 %v5391_v47, %v11612_v3  ;;  %v11613_v31 = vrot.slane %v10861_v11, 1  ;;  %v6276_v48 = vunpack.c.l.b16 %v6143_v24 }
 0x643   : > { %v5129_v59 = vadd.f32 %v11611_v41, %v10857_v0  ;;  %v6281_v40 = vunpack.c.l.b16 %v6148_v45  ;;  %v5783_v52 = vrot.slane %v5782_v29, 4  ;;  %v5732_v27 = vadd.f32 %v5731_v10, %v5730_v23 }
 0x644   : > { %v7988_v8 = vpop.eup %7987  ;;  %v5115_v19 = vadd.f32 %v11613_v31, %v10861_v11  ;;  %v5716_v56 = vadd.f32 %v5715_v15, %v5714_v34  ;;  %v5810_v0 = vsel %vm1360_vm3, %v5632_v54, 0.0  ;;  %v5780_v41 = vrot.slane %v10956_v50, 1  ;;  %v11614_v11 = vld [vmem:[#allocation18_spill] sm:$0xff]  ;;  %v11616_v34 = vld [vmem:[#allocation21_spill] sm:$0xff] }
 0x645   : > { %v5282_v16 = vmul.f32 %v7988_v8, %v10783_v22  ;;  %7989 = vrcp.f32 %v5129_v59  ;;  %v5765_v38 = vadd.f32 %v5764_v60, %v5763_v57  ;;  %v5811_v33 = vrot.slane %v5810_v0, 4  ;;  %v5396_v59 = vpop.permute.xlu0 %5395 }
 0x646   : > { %7991 = vrcp.f32 %v5115_v19  ;;  %v10969_v47 = vpop.permute.xlu1 %5425  ;;  %v5806_v58 = vrot.slane %v5805_v9, 2  ;;  %v5626_v2 = vmul.f32 %v10926_v13, %v11614_v11  ;;  %v11615_v22 = vrot.slane %v10881_v39, 1 }
 0x647   : > { %5560 = vperm.xlu0 %7735, %v5282_v16   ;;  %v5635_v24 = vmul.f32 %v5406_v21, %v11616_v34  ;;  %v10978_v45 = vsel %vm6342_vm9, %v6276_v48, %v6341_v43  ;;  %v5784_v10 = vadd.f32 %v5783_v52, %v5782_v29  ;;  %v5812_v57 = vadd.f32 %v5811_v33, %v5810_v0  ;;  %v11618_v29 = vld [vmem:[#allocation19_spill] sm:$0xff] }
 0x648   : > { %v5136_v23 = vadd.f32 %v11615_v22, %v10881_v39  ;;  %v11617_v15 = vrot.slane %v10801_v18, 1  ;;  %v6350_v8 = vsel %vm6336_vm6, %v6281_v40, %v6280_v5  ;;  %v5768_v13 = vsel %vm1360_vm3, %v5626_v2, 0.0  ;;  %v11620_v5 = vld [vmem:[#allocation23_spill] sm:$0xff] }
 0x649   : > { %v5831_v3 = vsel %vm1360_vm3, %v5635_v24, 0.0  ;;  %v6146_v39 = vpack.c.bf16 %v5732_v27, %v5732_v27  ;;  %v5766_v54 = vrot.slane %v5765_v38, 1  ;;  %v5769_v21 = vrot.slane %v5768_v13, 4 }
 0x64a   : > { %v5101_v60 = vadd.f32 %v11617_v15, %v10801_v18  ;;  %7993 = vrcp.f32 %v5136_v23  ;;  %v5832_v31 = vrot.slane %v5831_v3, 4  ;;  %v10986_v43 = vpop.permute.xlu1 %5415  ;;  %v5629_v19 = vmul.f32 %v10940_v32, %v11618_v29 }
 0x64b   : > { %v11619_v18 = vrot.slane %v10883_v49, 1  ;;  %v5633_v40 = vmul.f32 %v5396_v59, %v11620_v5  ;;  %v5785_v16 = vrot.slane %v5784_v10, 2  ;;  %v5813_v52 = vrot.slane %v5812_v57, 2  ;;  %v11622_v59 = vld [vmem:[#allocation22_spill] sm:$0xff] }
 0x64c   : > { %7995 = vrcp.f32 %v5101_v60  ;;  %v5770_v0 = vadd.f32 %v5769_v21, %v5768_v13  ;;  %v5833_v33 = vadd.f32 %v5832_v31, %v5831_v3  ;;  %v5789_v27 = vsel %vm1360_vm3, %v5629_v19, 0.0  ;;  %v5411_v3 = vpop.permute.xlu0 %5410 }
 0x64d   : > { %v5122_v48 = vadd.f32 %v11619_v18, %v10883_v49  ;;  %v5817_v11 = vsel %vm1360_vm3, %v5633_v40, 0.0  ;;  %v11621_v2 = vrot.slane %v10824_v62, 1  ;;  %v5717_v32 = vrot.slane %v5716_v56, 1 }
 0x64e   : > { %v5771_v23 = vrot.slane %v5770_v0, 2  ;;  %v5834_v34 = vrot.slane %v5833_v33, 2  ;;  %v5790_v24 = vrot.slane %v5789_v27, 4  ;;  %v10999_v49 = vpop.permute.xlu1 %5430  ;;  %v5767_v15 = vadd.f32 %v5766_v54, %v5765_v38  ;;  %v11623_v54 = vld [vmem:[#allocation24_spill] sm:$0xff] }
 0x64f   : > { %7997 = vrcp.f32 %v5122_v48  ;;  %v5108_v22 = vadd.f32 %v11621_v2, %v10824_v62  ;;  %v5807_v60 = vadd.f32 %v5806_v58, %v5805_v9  ;;  %v5630_v13 = vmul.f32 %v5381_v25, %v11622_v59 }
 0x650   : > { %v6351_v21 = vsel %vm6338_vm7, %v10935_v44, %v6350_v8  ;;  %v5786_v31 = vadd.f32 %v5785_v16, %v5784_v10  ;;  %v5814_v29 = vadd.f32 %v5813_v52, %v5812_v57  ;;  %v5818_v19 = vrot.slane %v5817_v11, 4 }
 0x651   : > { %7999 = vrcp.f32 %v5108_v22  ;;  %v11004_v18 = vunpack.c.l.b16 %v6146_v39  ;;  %v5781_v62 = vadd.f32 %v5780_v41, %v10956_v50  ;;  %v5772_v48 = vadd.f32 %v5771_v23, %v5770_v0 }
 0x652   : > { %v5796_v5 = vsel %vm1360_vm3, %v5630_v13, 0.0  ;;  %v7990_v40 = vpop.eup %7989  ;;  %v5718_v38 = vadd.f32 %v5717_v32, %v5716_v56  ;;  %v5835_v9 = vadd.f32 %v5834_v34, %v5833_v33  ;;  %v5791_v58 = vadd.f32 %v5790_v24, %v5789_v27  ;;  %v11009_v2 = vpop.permute.xlu1 %5420 }
 0x653   : > { %v5636_v25 = vmul.f32 %v5411_v3, %v11623_v54  ;;  %v7992_v22 = vpop.eup %7991  ;;  %v6151_v44 = vpack.c.bf16 %v5767_v15, %v5767_v15  ;;  %v5808_v10 = vrot.slane %v5807_v60, 1  ;;  %v5287_v57 = vmul.f32 %v7990_v40, %v10799_v4 }
 0x654   : > { %v5797_v8 = vrot.slane %v5796_v5, 4  ;;  %v5787_v39 = vrot.slane %v5786_v31, 1  ;;  %v5815_v16 = vrot.slane %v5814_v29, 1  ;;  %v5285_v50 = vmul.f32 %v7992_v22, %v10809_v53  ;;  %v11625_v22 = vld [vmem:[#allocation25_spill] sm:$0xff] }
 0x655   : > { %v5819_v41 = vadd.f32 %v5818_v19, %v5817_v11  ;;  %v6153_v52 = vpack.c.bf16 %v5781_v62, %v5781_v62  ;;  %v6352_v56 = vsel %vm6340_vm8, %v10954_v20, %v6351_v21  ;;  %5585 = vperm.xlu1 %7734, %v5287_v57   ;;  %v5773_v0 = vrot.slane %v5772_v48, 1 }
 0x656   : > { %v5798_v33 = vadd.f32 %v5797_v8, %v5796_v5  ;;  %5575 = vperm.xlu0 %7735, %v5285_v50   ;;  %v5836_v32 = vrot.slane %v5835_v9, 1  ;;  %v5792_v23 = vrot.slane %v5791_v58, 2  ;;  %v5838_v34 = vsel %vm1360_vm3, %v5636_v25, 0.0  ;;  %v11020_v13 = vpop.permute.xlu1 %5445  ;;  %v5401_v5 = vpop.permute.xlu0 %5400 }
 0x657   : > { %v7994_v27 = vpop.eup %7993  ;;  %v11624_v4 = vrot.slane %v10885_v55, 1  ;;  %v6144_v15 = vpack.c.bf16 %v5718_v38, %v5718_v38  ;;  %v5809_v53 = vadd.f32 %v5808_v10, %v5807_v60  ;;  %v6284_v3 = vunpack.c.l.b16 %v6151_v44 }
 0x658   : > { %v5288_v11 = vmul.f32 %v7994_v27, %v10815_v12  ;;  %v5799_v59 = vrot.slane %v5798_v33, 2  ;;  %v5788_v21 = vadd.f32 %v5787_v39, %v5786_v31  ;;  %v5816_v19 = vadd.f32 %v5815_v16, %v5814_v29 }
 0x659   : > { %v5157_v24 = vadd.f32 %v11624_v4, %v10885_v55  ;;  %v7996_v20 = vpop.eup %7995  ;;  %v5820_v62 = vrot.slane %v5819_v41, 2  ;;  %v5774_v40 = vadd.f32 %v5773_v0, %v5772_v48  ;;  %v5839_v25 = vrot.slane %v5838_v34, 4 }
 0x65a   : > { %5590 = vperm.xlu1 %7734, %v5288_v11   ;;  %v5283_v54 = vmul.f32 %v7996_v20, %v10722_v1  ;;  %v5639_v55 = vmul.f32 %v10969_v47, %v11625_v22  ;;  %v11025_v38 = vunpack.c.l.b16 %v6153_v52  ;;  %v5837_v12 = vadd.f32 %v5836_v32, %v5835_v9  ;;  %v5466_v16 = vpop.permute.xlu0 %5465  ;;  %v11035_v0 = vpop.permute.xlu1 %5435 }
 0x65b   : > { %v5793_v10 = vadd.f32 %v5792_v23, %v5791_v58  ;;  %8001 = vrcp.f32 %v5157_v24  ;;  %v11027_v57 = vunpack.c.l.b16 %v6144_v15  ;;  %v6157_v31 = vpack.c.bf16 %v5809_v53, %v5809_v53  ;;  %v11627_v23 = vld [vmem:[#allocation27_spill] sm:$0xff]  ;;  %v11628_v24 = vld [vmem:[#allocation28_spill] sm:$0xff] }
 0x65c   : > { %v7998_v60 = vpop.eup %7997  ;;  %5565 = vperm.xlu0 %7735, %v5283_v54   ;;  %v5800_v48 = vadd.f32 %v5799_v59, %v5798_v33  ;;  %v11031_v1 = vsel %vm6342_vm9, %v6284_v3, %v6352_v56  ;;  %v6154_v8 = vpack.c.bf16 %v5788_v21, %v5788_v21  ;;  %v6158_v39 = vpack.c.bf16 %v5816_v19, %v5816_v19  ;;  %v11626_v33 = vld [vmem:[#allocation26_spill] sm:$0xff] }
 0x65d   : > { %v5286_v29 = vmul.f32 %v7998_v60, %v10819_v26  ;;  %v5821_v47 = vadd.f32 %v5820_v62, %v5819_v41  ;;  %v6152_v50 = vpack.c.bf16 %v5774_v40, %v5774_v40  ;;  %v5840_v58 = vadd.f32 %v5839_v25, %v5838_v34  ;;  %v11629_v34 = vld [vmem:[#allocation34_spill] sm:$0xff] }
 0x65e   : > { %v8000_v44 = vpop.eup %7999  ;;  %v5859_v52 = vsel %vm1360_vm3, %v5639_v55, 0.0  ;;  %v6161_v27 = vpack.c.bf16 %v5837_v12, %v5837_v12  ;;  %v5794_v26 = vrot.slane %v5793_v10, 1  ;;  %v5634_v32 = vmul.f32 %v5401_v5, %v11626_v33  ;;  %v11630_v12 = vld [vmem:[#allocation29_spill] sm:$0xff] }
 0x65f   : > { %5580 = vperm.xlu1 %7734, %v5286_v29   ;;  %v5284_v9 = vmul.f32 %v8000_v44, %v10770_v17  ;;  %v5637_v56 = vmul.f32 %v10986_v43, %v11627_v23  ;;  %v5801_v4 = vrot.slane %v5800_v48, 1  ;;  %v5143_v41 = vadd.f32 %v5142_v30, %v10931_v46  ;;  %v11054_v25 = vpop.permute.xlu1 %5450  ;;  %v5456_v29 = vpop.permute.xlu0 %5455 }
 0x660   : > { %v5640_v17 = vmul.f32 %v10999_v49, %v11628_v24  ;;  %v5647_v15 = vmul.f32 %v5466_v16, %v11629_v34  ;;  %v5822_v53 = vrot.slane %v5821_v47, 1  ;;  %v5860_v11 = vrot.slane %v5859_v52, 4 }
 0x661   : > { %5570 = vperm.xlu0 %7735, %v5284_v9   ;;  %v5824_v59 = vsel %vm1360_vm3, %v5634_v32, 0.0  ;;  %v5845_v20 = vsel %vm1360_vm3, %v5637_v56, 0.0  ;;  %v5841_v3 = vrot.slane %v5840_v58, 2  ;;  %8003 = vrcp.f32 %v5143_v41 }
 0x662   : > { %v5825_v21 = vrot.slane %v5824_v59, 4  ;;  %v5846_v43 = vrot.slane %v5845_v20, 4  ;;  %v11048_v19 = vunpack.c.l.b16 %v6157_v31  ;;  %v11050_v62 = vunpack.c.l.b16 %v6154_v8 }
 0x663   : > { %v5795_v46 = vadd.f32 %v5794_v26, %v5793_v10  ;;  %v5866_v30 = vsel %vm1360_vm3, %v5640_v17, 0.0  ;;  %v5802_v49 = vadd.f32 %v5801_v4, %v5800_v48  ;;  %v5915_v54 = vsel %vm1360_vm3, %v5647_v15, 0.0  ;;  %v11068_v24 = vpop.permute.xlu1 %5440  ;;  %v5471_v15 = vpop.permute.xlu0 %5470 }
 0x664   : > { %v5826_v5 = vadd.f32 %v5825_v21, %v5824_v59  ;;  %v5847_v40 = vadd.f32 %v5846_v43, %v5845_v20  ;;  %v11056_v22 = vunpack.c.l.b16 %v6158_v39  ;;  %v6285_v55 = vunpack.c.l.b16 %v6152_v50 }
 0x665   : > { %v5861_v60 = vadd.f32 %v5860_v11, %v5859_v52  ;;  %v5638_v31 = vmul.f32 %v11009_v2, %v11630_v12  ;;  %v11060_v44 = vunpack.c.l.b16 %v6161_v27  ;;  %v5823_v10 = vadd.f32 %v5822_v53, %v5821_v47  ;;  %v11631_v2 = vld [vmem:[#allocation35_spill] sm:$0xff] }
 0x666   : > { %v5842_v8 = vadd.f32 %v5841_v3, %v5840_v58  ;;  %v5867_v16 = vrot.slane %v5866_v30, 4  ;;  %v5827_v48 = vrot.slane %v5826_v5, 2  ;;  %v5916_v9 = vrot.slane %v5915_v54, 4 }
 0x667   : > { %v5852_v26 = vsel %vm1360_vm3, %v5638_v31, 0.0  ;;  %v6155_v32 = vpack.c.bf16 %v5795_v46, %v5795_v46  ;;  %v6156_v39 = vpack.c.bf16 %v5802_v49, %v5802_v49  ;;  %v5848_v23 = vrot.slane %v5847_v40, 2 }
 0x668   : > { %v8002_v33 = vpop.eup %8001  ;;  %v5853_v50 = vrot.slane %v5852_v26, 4  ;;  %v5862_v52 = vrot.slane %v5861_v60, 2  ;;  %v5645_v4 = vmul.f32 %v5456_v29, %v11631_v2  ;;  %v5150_v47 = vadd.f32 %v5149_v14, %v10937_v37 }
 0x669   : > { %v5291_v56 = vmul.f32 %v8002_v33, %v10830_v28  ;;  %v6159_v58 = vpack.c.bf16 %v5823_v10, %v5823_v10  ;;  %v5868_v27 = vadd.f32 %v5867_v16, %v5866_v30  ;;  %v5828_v17 = vadd.f32 %v5827_v48, %v5826_v5  ;;  %v5486_v16 = vpop.permute.xlu0 %5485 }
 0x66a   : > { %v5854_v41 = vadd.f32 %v5853_v50, %v5852_v26  ;;  %v5917_v34 = vadd.f32 %v5916_v9, %v5915_v54  ;;  %8005 = vrcp.f32 %v5150_v47  ;;  %v6345_v28 = vsel %vm6344_vm10, %v11027_v57, %v10978_v45  ;;  %v11632_v26 = vld [vmem:[#allocation30_spill] sm:$0xff] }
 0x66b   : > { %5605 = vperm.xlu1 %7734, %v5291_v56   ;;  %v6289_v53 = vunpack.c.l.b16 %v6156_v39  ;;  %v5849_v11 = vadd.f32 %v5848_v23, %v5847_v40  ;;  %v5901_v37 = vsel %vm1360_vm3, %v5645_v4, 0.0  ;;  %v5843_v14 = vrot.slane %v5842_v8, 1  ;;  %v11634_v4 = vld [vmem:[#allocation31_spill] sm:$0xff] }
 0x66c   : > { %v5855_v59 = vrot.slane %v5854_v41, 2  ;;  %v5863_v20 = vadd.f32 %v5862_v52, %v5861_v60  ;;  %v6354_v3 = vsel %vm6344_vm10, %v6285_v55, %v11031_v1  ;;  %v6288_v21 = vunpack.c.l.b16 %v6155_v32  ;;  %v11082_v1 = vpop.permute.xlu1 %5460 }
 0x66d   : > { %v5869_v43 = vrot.slane %v5868_v27, 2  ;;  %v6347_v30 = vsel %vm6346_vm11, %v10947_v63, %v6345_v28  ;;  %v5829_v45 = vrot.slane %v5828_v17, 1  ;;  %v5918_v57 = vrot.slane %v5917_v34, 2 }
 0x66e   : > { %v5856_v46 = vadd.f32 %v5855_v59, %v5854_v41  ;;  %v8004_v49 = vpop.eup %8003  ;;  %v5902_v5 = vrot.slane %v5901_v37, 4  ;;  %v6355_v40 = vsel %vm6346_vm11, %v11025_v38, %v6354_v3  ;;  %v6292_v54 = vunpack.c.l.b16 %v6159_v58 }
 0x66f   : > { %v6357_v60 = vsel %vm6336_vm6, %v6289_v53, %v6288_v21  ;;  %v5850_v12 = vrot.slane %v5849_v11, 1  ;;  %v5289_v31 = vmul.f32 %v8004_v49, %v10851_v7  ;;  %v5864_v55 = vrot.slane %v5863_v20, 1 }
 0x670   : > { %v5857_v29 = vrot.slane %v5856_v46, 1  ;;  %v6349_v63 = vsel %vm6348_vm12, %v11004_v18, %v6347_v30  ;;  %v6356_v10 = vsel %vm6348_vm12, %v11050_v62, %v6355_v40  ;;  %v11088_v48 = vadd.f32 %v5843_v14, %v5842_v8  ;;  %v11633_v62 = vld [vmem:[#allocation36_spill] sm:$0xff] }
 0x671   : > { %5595 = vperm.xlu1 %7734, %v5289_v31   ;;  %v5870_v38 = vadd.f32 %v5869_v43, %v5868_v27  ;;  %v6399_v9 = vpack.c.b16 %v6356_v10, %v6349_v63  ;;  %v5643_v33 = vmul.f32 %v11020_v13, %v11632_v26  ;;  %v6358_v7 = vsel %vm6338_vm7, %v11048_v19, %v6357_v60  ;;  %v11635_v27 = vld [vmem:[#allocation32_spill] sm:$0xff]  ;;  %v11637_v10 = vld [vmem:[#allocation33_spill] sm:$0xff]  ;;  %v11638_v26 = vld [vmem:[#allocation39_spill] sm:$0xff] }
 0x672   : > { %v5830_v32 = vadd.f32 %v5829_v45, %v5828_v17  ;;  %v5919_v39 = vadd.f32 %v5918_v57, %v5917_v34  ;;  %v5903_v23 = vadd.f32 %v5902_v5, %v5901_v37  ;;  %v5851_v50 = vadd.f32 %v5850_v12, %v5849_v11  ;;  %v11108_v17 = vpop.permute.xlu1 %5505 }
 0x673   : > { %7677 = vmatprep.mubr.msk.bf16.mxu1 %vm1360_vm3, %v6399_v9  ;;  %v5887_v18 = vsel %vm1360_vm3, %v5643_v33, 0.0  ;;  %v5648_v8 = vmul.f32 %v5471_v15, %v11633_v62  ;;  %v5164_v52 = vadd.f32 %v5163_v51, %v10933_v42  ;;  %v11100_v56 = vadd.f32 %v5864_v55, %v5863_v20  ;;  %v5476_v15 = vpop.permute.xlu0 %5475  ;;  %v11636_v20 = vld [vmem:[#allocation38_spill] sm:$0xff] }
 0x674   : > { %v5858_v13 = vadd.f32 %v5857_v29, %v5856_v46  ;;  %v5888_v2 = vrot.slane %v5887_v18, 4  ;;  %v5641_v19 = vmul.f32 %v11035_v0, %v11634_v4  ;;  %v6359_v47 = vsel %vm6340_vm8, %v11056_v22, %v6358_v7 }
 0x675   : > { %v5871_v58 = vrot.slane %v5870_v38, 1  ;;  %8007 = vrcp.f32 %v5164_v52  ;;  %v5644_v41 = vmul.f32 %v11054_v25, %v11635_v27  ;;  %v5920_v34 = vrot.slane %v5919_v39, 1 }
 0x676   : > { %v5904_v28 = vrot.slane %v5903_v23, 2  ;;  %v5889_v42 = vadd.f32 %v5888_v2, %v5887_v18  ;;  %v5922_v51 = vsel %vm1360_vm3, %v5648_v8, 0.0  ;;  %v6160_v11 = vpack.c.bf16 %v5830_v32, %v5830_v32  ;;  %v11120_v55 = vpop.permute.xlu1 %5510 }
 0x677   : > { %v8006_v53 = vpop.eup %8005  ;;  %v6163_v59 = vpack.c.bf16 %v5851_v50, %v5851_v50  ;;  %v5873_v0 = vsel %vm1360_vm3, %v5641_v19, 0.0  ;;  %v5894_v22 = vsel %vm1360_vm3, %v5644_v41, 0.0  ;;  %v6162_v37 = vpack.c.bf16 %v11088_v48, %v11088_v48  ;;  %v5491_v48 = vpop.permute.xlu0 %5490 }
 0x678   : > { %v6164_v14 = vpack.c.bf16 %v5858_v13, %v5858_v13  ;;  %v5290_v25 = vmul.f32 %v8006_v53, %v10875_v6  ;;  %v5651_v3 = vmul.f32 %v5486_v16, %v11636_v20  ;;  %v6165_v21 = vpack.c.bf16 %v11100_v56, %v11100_v56 }
 0x679   : > { %v5872_v43 = vadd.f32 %v5871_v58, %v5870_v38  ;;  %v5923_v46 = vrot.slane %v5922_v51, 4  ;;  %v5874_v30 = vrot.slane %v5873_v0, 4  ;;  %v6360_v49 = vsel %vm6342_vm9, %v6292_v54, %v6359_v47 }
 0x67a   : > { %v5905_v45 = vadd.f32 %v5904_v28, %v5903_v23  ;;  %5600 = vperm.xlu1 %7734, %v5290_v25   ;;  %v5890_v57 = vrot.slane %v5889_v42, 2  ;;  %v5895_v5 = vrot.slane %v5894_v22, 4  ;;  %v6293_v40 = vunpack.c.l.b16 %v6160_v11  ;;  %v5501_v58 = vpop.permute.xlu1 %5500 }
 0x67b   : > { %v6296_v60 = vunpack.c.l.b16 %v6163_v59  ;;  %v5921_v12 = vadd.f32 %v5920_v34, %v5919_v39  ;;  %v5875_v31 = vadd.f32 %v5874_v30, %v5873_v0  ;;  %v6297_v6 = vunpack.c.l.b16 %v6164_v14 }
 0x67c   : > { %v5943_v29 = vsel %vm1360_vm3, %v5651_v3, 0.0  ;;  %v5896_v63 = vadd.f32 %v5895_v5, %v5894_v22  ;;  %v5642_v16 = vmul.f32 %v11068_v24, %v11637_v10  ;;  %v6166_v38 = vpack.c.bf16 %v5872_v43, %v5872_v43  ;;  %v11639_v3 = vld [vmem:[#allocation37_spill] sm:$0xff] }
 0x67d   : > { %v5924_v54 = vadd.f32 %v5923_v46, %v5922_v51  ;;  %v5876_v9 = vrot.slane %v5875_v31, 2  ;;  %v5649_v33 = vmul.f32 %v5476_v15, %v11638_v26  ;;  %v5906_v7 = vrot.slane %v5905_v45, 1  ;;  %v5481_v51 = vpop.permute.xlu0 %5480  ;;  %v11640_v5 = vld [vmem:[#allocation41_spill] sm:$0xff] }
 0x67e   : > { %v5891_v32 = vadd.f32 %v5890_v57, %v5889_v42  ;;  %v5897_v23 = vrot.slane %v5896_v63, 2  ;;  %v5880_v39 = vsel %vm1360_vm3, %v5642_v16, 0.0  ;;  %v6361_v50 = vsel %vm6344_vm10, %v6293_v40, %v6360_v49 }
 0x67f   : > { %v5877_v18 = vadd.f32 %v5876_v9, %v5875_v31  ;;  %v5944_v62 = vrot.slane %v5943_v29, 4  ;;  %v5881_v8 = vrot.slane %v5880_v39, 4  ;;  %v6295_v52 = vunpack.c.l.b16 %v6162_v37 }
 0x680   : > { %v6173_v56 = vpack.c.bf16 %v5921_v12, %v5921_v12  ;;  %v6364_v24 = vsel %vm6336_vm6, %v6297_v6, %v6296_v60  ;;  %v5898_v13 = vadd.f32 %v5897_v23, %v5896_v63  ;;  %v5925_v2 = vrot.slane %v5924_v54, 2  ;;  %v5526_v60 = vpop.permute.xlu1 %5525 }
 0x681   : > { %v5878_v4 = vrot.slane %v5877_v18, 1  ;;  %v5929_v19 = vsel %vm1360_vm3, %v5649_v33, 0.0  ;;  %v5882_v47 = vadd.f32 %v5881_v8, %v5880_v39  ;;  %v6298_v41 = vunpack.c.l.b16 %v6165_v21 }
 0x682   : > { %v8008_v27 = vpop.eup %8007  ;;  %v6362_v34 = vsel %vm6346_vm11, %v11060_v44, %v6361_v50  ;;  %v11132_v28 = vadd.f32 %v5906_v7, %v5905_v45  ;;  %v5892_v42 = vrot.slane %v5891_v32, 1  ;;  %v6299_v15 = vunpack.c.l.b16 %v6166_v38  ;;  %v11643_v50 = vld [vmem:[#allocation43_spill] sm:$0xff] }
 0x683   : > { %v5292_v53 = vmul.f32 %v8008_v27, %v10872_v36  ;;  %v5879_v11 = vadd.f32 %v5878_v4, %v5877_v18  ;;  %v5945_v59 = vadd.f32 %v5944_v62, %v5943_v29  ;;  %v6365_v0 = vsel %vm6338_vm7, %v6298_v41, %v6364_v24  ;;  %v11641_v29 = vld [vmem:[#allocation40_spill] sm:$0xff] }
 0x684   : > { %v5899_v22 = vrot.slane %v5898_v13, 1  ;;  %v5930_v37 = vrot.slane %v5929_v19, 4  ;;  %v5883_v14 = vrot.slane %v5882_v47, 2  ;;  %v11137_v25 = vsel %vm6348_vm12, %v6295_v52, %v6362_v34  ;;  %v5516_v4 = vpop.permute.xlu1 %5515 }
 0x685   : > { %v11139_v20 = vunpack.c.l.b16 %v6173_v56  ;;  %v11141_v44 = vadd.f32 %v5925_v2, %v5924_v54  ;;  %5610 = vperm.xlu1 %7734, %v5292_v53   ;;  %v5646_v21 = vmul.f32 %v11082_v1, %v11639_v3  ;;  %v6171_v36 = vpack.c.bf16 %v11132_v28, %v11132_v28  ;;  %v5496_v1 = vpop.permute.xlu0 %5495  ;;  %v11642_v54 = vld [vmem:[#allocation42_spill] sm:$0xff] }
 0x686   : > { %v5893_v43 = vadd.f32 %v5892_v42, %v5891_v32  ;;  %v6167_v46 = vpack.c.bf16 %v5879_v11, %v5879_v11  ;;  %v5884_v30 = vadd.f32 %v5883_v14, %v5882_v47  ;;  %v6366_v49 = vsel %vm6340_vm8, %v6299_v15, %v6365_v0 }
 0x687   : > { %v5946_v45 = vrot.slane %v5945_v59, 2  ;;  %v5908_v57 = vsel %vm1360_vm3, %v5646_v21, 0.0  ;;  %v5650_v40 = vmul.f32 %v5481_v51, %v11640_v5  ;;  %v5900_v12 = vadd.f32 %v5899_v22, %v5898_v13 }
 0x688   : > { %v5931_v31 = vadd.f32 %v5930_v37, %v5929_v19  ;;  %v5885_v6 = vrot.slane %v5884_v30, 1  ;;  %v5652_v63 = vmul.f32 %v5491_v48, %v11641_v29  ;;  %v5927_v10 = vrot.slane %v11141_v44, 1 }
 0x689   : > { %v5909_v16 = vrot.slane %v5908_v57, 4  ;;  %v5936_v38 = vsel %vm1360_vm3, %v5650_v40, 0.0  ;;  %v5655_v9 = vmul.f32 %v11108_v17, %v11642_v54  ;;  %v6169_v26 = vpack.c.bf16 %v5893_v43, %v5893_v43  ;;  %v11644_v40 = vld [vmem:[#allocation50_spill] sm:$0xff] }
 0x68a   : > { %v6300_v33 = vunpack.c.l.b16 %v6167_v46  ;;  %v5886_v7 = vadd.f32 %v5885_v6, %v5884_v30  ;;  %v5937_v32 = vrot.slane %v5936_v38, 4  ;;  %v5653_v18 = vmul.f32 %v5496_v1, %v11643_v50  ;;  %v11645_v1 = vld [vmem:[#allocation57_spill] sm:$0xff] }
 0x68b   : > { %v5910_v23 = vadd.f32 %v5909_v16, %v5908_v57  ;;  %v5971_v39 = vsel %vm1360_vm3, %v5655_v9, 0.0  ;;  %v5656_v48 = vmul.f32 %v11120_v55, %v10671_v35  ;;  %v6170_v62 = vpack.c.bf16 %v5900_v12, %v5900_v12 }
 0x68c   : > { %v6168_v8 = vpack.c.bf16 %v5886_v7, %v5886_v7  ;;  %v5950_v52 = vsel %vm1360_vm3, %v5652_v63, 0.0  ;;  %v5972_v56 = vrot.slane %v5971_v39, 4  ;;  %v5957_v17 = vsel %vm1360_vm3, %v5653_v18, 0.0 }
 0x68d   : > { %v5911_v24 = vrot.slane %v5910_v23, 2  ;;  %v5978_v13 = vsel %vm1360_vm3, %v5656_v48, 0.0  ;;  %v5654_v2 = vmul.f32 %v5501_v58, %v10726_v61  ;;  %v6302_v19 = vunpack.c.l.b16 %v6169_v26 }
 0x68e   : > { %v6367_v47 = vsel %vm6342_vm9, %v6300_v33, %v6366_v49  ;;  %v6301_v27 = vunpack.c.l.b16 %v6168_v8  ;;  %v5938_v41 = vadd.f32 %v5937_v32, %v5936_v38  ;;  %v5958_v35 = vrot.slane %v5957_v17, 4 }
 0x68f   : > { %v5912_v34 = vadd.f32 %v5911_v24, %v5910_v23  ;;  %v5979_v55 = vrot.slane %v5978_v13, 4  ;;  %v5964_v42 = vsel %vm1360_vm3, %v5654_v2, 0.0  ;;  %v5947_v51 = vadd.f32 %v5946_v45, %v5945_v59  ;;  %v5531_v59 = vpop.permute.xlu1 %5530 }
 0x690   : > { %v6303_v15 = vunpack.c.l.b16 %v6170_v62  ;;  %v6368_v53 = vsel %vm6344_vm10, %v6301_v27, %v6367_v47  ;;  %v5973_v11 = vadd.f32 %v5972_v56, %v5971_v39  ;;  %v5932_v0 = vrot.slane %v5931_v31, 2  ;;  %v11647_v47 = vld [vmem:[#allocation58_spill] sm:$0xff] }
 0x691   : > { %v6369_v22 = vsel %vm6346_vm11, %v6302_v19, %v6368_v53  ;;  %v5913_v61 = vrot.slane %v5912_v34, 1  ;;  %v5959_v58 = vadd.f32 %v5958_v35, %v5957_v17  ;;  %v5951_v14 = vrot.slane %v5950_v52, 4  ;;  %v11646_v17 = vld [vmem:[#allocation56_spill] sm:$0xff] }
 0x692   : > { %v6370_v37 = vsel %vm6348_vm12, %v6303_v15, %v6369_v22  ;;  %v5939_v3 = vrot.slane %v5938_v41, 2  ;;  %v5965_v21 = vrot.slane %v5964_v42, 4  ;;  %v5980_v49 = vadd.f32 %v5979_v55, %v5978_v13 }
 0x693   : > { %v6400_v43 = vpack.c.b16 %v6370_v37, %v11137_v25  ;;  %v5914_v46 = vadd.f32 %v5913_v61, %v5912_v34  ;;  %v5960_v30 = vrot.slane %v5959_v58, 2  ;;  %v5928_v45 = vadd.f32 %v5927_v10, %v11141_v44  ;;  %v5521_v48 = vpop.permute.xlu1 %5520 }
 0x694   : > { %v5974_v57 = vrot.slane %v5973_v11, 2  ;;  %v5966_v5 = vadd.f32 %v5965_v21, %v5964_v42  ;;  %v5659_v12 = vmul.f32 %v5526_v60, %v11644_v40  ;;  %v5948_v6 = vrot.slane %v5947_v51, 1 }
 0x695   : > { %v5933_v29 = vadd.f32 %v5932_v0, %v5931_v31  ;;  %v5961_v63 = vadd.f32 %v5960_v30, %v5959_v58  ;;  %v5657_v16 = vmul.f32 %v5516_v4, %v11645_v1  ;;  %7678 = vmatmul.mubr.msk.bf16.vlgmr.msra.gmra.mxu1 %vm1360_vm3, %v6400_v43  ;;  %v5952_v38 = vadd.f32 %v5951_v14, %v5950_v52 }
 0x696   : > { %v5940_v54 = vadd.f32 %v5939_v3, %v5938_v41  ;;  %v5967_v25 = vrot.slane %v5966_v5, 2  ;;  %v5999_v9 = vsel %vm1360_vm3, %v5659_v12, 0.0  ;;  %v6304_v44 = vunpack.c.l.b16 %v6171_v36 }
 0x697   : > { %v6172_v10 = vpack.c.bf16 %v5914_v46, %v5914_v46  ;;  %v5981_v26 = vrot.slane %v5980_v49, 2  ;;  %v6000_v33 = vrot.slane %v5999_v9, 4  ;;  %v6174_v60 = vpack.c.bf16 %v5928_v45, %v5928_v45 }
 0x698   : > { %v5975_v7 = vadd.f32 %v5974_v57, %v5973_v11  ;;  %v5968_v31 = vadd.f32 %v5967_v25, %v5966_v5  ;;  %v5985_v32 = vsel %vm1360_vm3, %v5657_v16, 0.0  ;;  %v11178_v23 = vadd.f32 %v5948_v6, %v5947_v51 }
 0x699   : > { %v5934_v39 = vrot.slane %v5933_v29, 1  ;;  %v5962_v50 = vrot.slane %v5961_v63, 1  ;;  %v6001_v18 = vadd.f32 %v6000_v33, %v5999_v9  ;;  %v5953_v62 = vrot.slane %v5952_v38, 2 }
 0x69a   : > { %v5941_v8 = vrot.slane %v5940_v54, 1  ;;  %v5969_v52 = vrot.slane %v5968_v31, 1  ;;  %v5986_v56 = vrot.slane %v5985_v32, 4  ;;  %v6305_v28 = vunpack.c.l.b16 %v6172_v10 }
 0x69b   : > { %v5982_v36 = vadd.f32 %v5981_v26, %v5980_v49  ;;  %v6002_v24 = vrot.slane %v6001_v18, 2  ;;  %v5660_v13 = vmul.f32 %v5531_v59, %v11646_v17  ;;  %v5976_v2 = vrot.slane %v5975_v7, 1 }
 0x69c   : > { %v5970_v4 = vadd.f32 %v5969_v52, %v5968_v31  ;;  %v5987_v19 = vadd.f32 %v5986_v56, %v5985_v32  ;;  %v5658_v27 = vmul.f32 %v5521_v48, %v11647_v47  ;;  %v5935_v41 = vadd.f32 %v5934_v39, %v5933_v29 }
 0x69d   : > { %v5963_v34 = vadd.f32 %v5962_v50, %v5961_v63  ;;  %v6003_v35 = vadd.f32 %v6002_v24, %v6001_v18  ;;  %v6006_v55 = vsel %vm1360_vm3, %v5660_v13, 0.0  ;;  %v5954_v42 = vadd.f32 %v5953_v62, %v5952_v38 }
 0x69e   : > { %v5988_v51 = vrot.slane %v5987_v19, 2  ;;  %v6007_v15 = vrot.slane %v6006_v55, 4  ;;  %v5992_v53 = vsel %vm1360_vm3, %v5658_v27, 0.0  ;;  %v6371_v11 = vsel %vm6336_vm6, %v6305_v28, %v6304_v44  ;;  %v7097_v27 = vld [vmem:[%s11341_s2 + $0xa0] sm:$0xf] }
 0x69f   : > { %v5983_v0 = vrot.slane %v5982_v36, 1  ;;  %v6180_v22 = vpack.c.bf16 %v5970_v4, %v5970_v4  ;;  %v5993_v61 = vrot.slane %v5992_v53, 4  ;;  %v5942_v58 = vadd.f32 %v5941_v8, %v5940_v54 }
 0x6a0   : > { %v5977_v37 = vadd.f32 %v5976_v2, %v5975_v7  ;;  %v5989_v14 = vadd.f32 %v5988_v51, %v5987_v19  ;;  %v6008_v3 = vadd.f32 %v6007_v15, %v6006_v55  ;;  %v6175_v21 = vpack.c.bf16 %v5935_v41, %v5935_v41 }
 0x6a1   : > { %v6179_v43 = vpack.c.bf16 %v5963_v34, %v5963_v34  ;;  %v6004_v46 = vrot.slane %v6003_v35, 1  ;;  %v5994_v30 = vadd.f32 %v5993_v61, %v5992_v53  ;;  %v5955_v49 = vrot.slane %v5954_v42, 1  ;;  %v7591_v61 = vpop.f32.mrf.mxu1 }
 0x6a2   : > { %v6372_v59 = vsel %vm6338_vm7, %v11139_v20, %v6371_v11  ;;  %v5990_v45 = vrot.slane %v5989_v14, 1  ;;  %v6009_v57 = vrot.slane %v6008_v3, 2  ;;  %v6307_v5 = vunpack.c.l.b16 %v6174_v60 }
 0x6a3   : > { %v5984_v40 = vadd.f32 %v5983_v0, %v5982_v36  ;;  %v6313_v12 = vunpack.c.l.b16 %v6180_v22  ;;  %v5995_v6 = vrot.slane %v5994_v30, 2  ;;  %v6176_v29 = vpack.c.bf16 %v5942_v58, %v5942_v58  ;;  %v3084_v58 = vpop.f32.mrf.mxu1 }
 0x6a4   : > { %v6181_v63 = vpack.c.bf16 %v5977_v37, %v5977_v37  ;;  %v5991_v1 = vadd.f32 %v5990_v45, %v5989_v14  ;;  %v6010_v16 = vadd.f32 %v6009_v57, %v6008_v3  ;;  %v6312_v38 = vunpack.c.l.b16 %v6179_v43  ;;  %v5546_v43 = vpop.permute.xlu0 %5545 }
 0x6a5   : > { %v6005_v54 = vadd.f32 %v6004_v46, %v6003_v35  ;;  %v5996_v25 = vadd.f32 %v5995_v6, %v5994_v30  ;;  %v6373_v9 = vsel %vm6340_vm8, %v6307_v5, %v6372_v59  ;;  %v6308_v44 = vunpack.c.l.b16 %v6175_v21  ;;  %v7592_v37 = vpop.f32.mrf.mxu1  ;;  %v5541_v59 = vpop.permute.xlu1 %5540 }
 0x6a6   : > { %v5956_v10 = vadd.f32 %v5955_v49, %v5954_v42  ;;  %v6183_v26 = vpack.c.bf16 %v5991_v1, %v5991_v1  ;;  %v6011_v33 = vrot.slane %v6010_v16, 1  ;;  %v6182_v20 = vpack.c.bf16 %v5984_v40, %v5984_v40 }
 0x6a7   : > { %v6378_v7 = vsel %vm6336_vm6, %v6313_v12, %v6312_v38  ;;  %v5997_v60 = vrot.slane %v5996_v25, 1  ;;  %v6177_v31 = vpack.c.bf16 %v11178_v23, %v11178_v23  ;;  %v6314_v32 = vunpack.c.l.b16 %v6181_v63  ;;  %v3087_v14 = vpop.f32.mrf.mxu1  ;;  %v11208_v63 = vld [vmem:[%s11342_s3 + $0x3] ss:$0 sm:$0xff] }
 0x6a8   : > { %v6012_v39 = vadd.f32 %v6011_v33, %v6010_v16  ;;  %v6374_v50 = vsel %vm6342_vm9, %v6308_v44, %v6373_v9  ;;  %v6309_v18 = vunpack.c.l.b16 %v6176_v29  ;;  %v6185_v48 = vpack.c.bf16 %v6005_v54, %v6005_v54  ;;  %v5536_v30 = vpop.permute.xlu0 %5535 }
 0x6a9   : > { %v5998_v62 = vadd.f32 %v5997_v60, %v5996_v25  ;;  %v6178_v8 = vpack.c.bf16 %v5956_v10, %v5956_v10  ;;  %v6379_v52 = vsel %vm6338_vm7, %v6314_v32, %v6378_v7  ;;  %v6316_v56 = vunpack.c.l.b16 %v6183_v26  ;;  %v7595_v3 = vpop.f32.mrf.mxu1 }
 0x6aa   : > { %v6315_v28 = vunpack.c.l.b16 %v6182_v20  ;;  %v6186_v36 = vpack.c.bf16 %v6012_v39, %v6012_v39  ;;  %v6375_v17 = vsel %vm6344_vm10, %v6309_v18, %v6374_v50  ;;  %v6310_v13 = vunpack.c.l.b16 %v6177_v31 }
 0x6ab   : > { %v6184_v24 = vpack.c.bf16 %v5998_v62, %v5998_v62  ;;  %v6318_v2 = vunpack.c.l.b16 %v6185_v48  ;;  %v6311_v41 = vunpack.c.l.b16 %v6178_v8  ;;  %v8026_v55 = vmov 65535   ;;  %v3100_v21 = vpop.f32.mrf.mxu1 }
 0x6ac   : > { %v6380_v23 = vsel %vm6340_vm8, %v6315_v28, %v6379_v52  ;;  %v6376_v47 = vsel %vm6346_vm11, %v6310_v13, %v6375_v17  ;;  %v6319_v34 = vunpack.c.l.b16 %v6186_v36  ;;  %v6507_v42 = vsel %vm6505_vm13, 4294967295, %v8026_v55  ;;  %v5551_v57 = vpop.permute.xlu0 %5550 }
 0x6ad   : > { %v6317_v4 = vunpack.c.l.b16 %v6184_v24  ;;  %v6381_v19 = vsel %vm6342_vm9, %v6316_v56, %v6380_v23  ;;  %v6508_v15 = vsel %vm6506_vm14, %v6507_v42, 0  ;;  %v6377_v53 = vsel %vm6348_vm12, %v6311_v41, %v6376_v47  ;;  %v7596_v46 = vpop.f32.mrf.mxu1 }
 0x6ae   : > { %v6510_v0 = vand.u32 %v7097_v27, %v6508_v15  ;;  %v3093_v1 = vadd.f32 %v11208_v63, %v7591_v61  ;;  %v3085_v25 = vadd.f32 %v11208_v63, %v3084_v58  ;;  %v3088_v10 = vadd.f32 %v11208_v63, %v3087_v14 }
 0x6af   : > { %v6382_v35 = vsel %vm6344_vm10, %v6317_v4, %v6381_v19  ;;  %v3103_v49 = vpop.f32.mrf.mxu1  ;;  %v3096_v62 = vadd.f32 %v11208_v63, %v7592_v37  ;;  %v3101_v28 = vadd.f32 %v11208_v63, %v3100_v21  ;;  %v3109_v41 = vadd.f32 %v11208_v63, %v7595_v3 }
 0x6b0   : > { %v6383_v51 = vsel %vm6346_vm11, %v6318_v2, %v6382_v35  ;;  %7685 = vmatprep.subr.bf16.mxu1 %v6510_v0  ;;  %v5663_v54 = vmul.f32 %v5546_v43, %v3093_v1  ;;  %v5661_v20 = vmul.f32 %v5536_v30, %v3085_v25  ;;  %v5662_v60 = vmul.f32 %v5541_v59, %v3088_v10 }
 0x6b1   : > { %v6384_v11 = vsel %vm6348_vm12, %v6319_v34, %v6383_v51  ;;  %7686 = vmatpush3.bf16.msra.mxu1 %v6510_v0  ;;  %v7599_v45 = vpop.f32.mrf.mxu1  ;;  %v5664_v23 = vmul.f32 %v5551_v57, %v3096_v62  ;;  %v3112_v34 = vadd.f32 %v11208_v63, %v7596_v46  ;;  %v3104_v35 = vadd.f32 %v11208_v63, %v3103_v49 }
 0x6b2   : > { %v6401_v22 = vpack.c.b16 %v6384_v11, %v6377_v53  ;;  %v6027_v33 = vsel %vm1360_vm3, %v5663_v54, 0.0  ;;  %v3125_v50 = vadd.f32 %v11208_v63, %v7599_v45  ;;  %v6013_v18 = vsel %vm1360_vm3, %v5661_v20, 0.0 }
 0x6b3   : > { %v3116_v40 = vpop.f32.mrf.mxu1  ;;  %v6028_v32 = vrot.slane %v6027_v33, 4  ;;  %v6020_v52 = vsel %vm1360_vm3, %v5662_v60, 0.0  ;;  %v6014_v2 = vrot.slane %v6013_v18, 4  ;;  %v6034_v58 = vsel %vm1360_vm3, %v5664_v23, 0.0 }
 0x6b4   : > { %7681 = vmatprep.mubr.msk.bf16.mxu1 %vm1360_vm3, %v6401_v22  ;;  %v3117_v7 = vadd.f32 %v11208_v63, %v3116_v40  ;;  %v6021_v19 = vrot.slane %v6020_v52, 4  ;;  %v6035_v40 = vrot.slane %v6034_v58, 4 }
 0x6b5   : > { %v7600_v6 = vpop.f32.mrf.mxu1  ;;  %v6029_v13 = vadd.f32 %v6028_v32, %v6027_v33  ;;  %v6015_v61 = vadd.f32 %v6014_v2, %v6013_v18 }
 0x6b6   : > { %v3128_v36 = vadd.f32 %v11208_v63, %v7600_v6  ;;  %v6022_v14 = vadd.f32 %v6021_v19, %v6020_v52  ;;  %v6036_v60 = vadd.f32 %v6035_v40, %v6034_v58 }
 0x6b7   : > { %v3119_v38 = vpop.f32.mrf.mxu1  ;;  %v6030_v22 = vrot.slane %v6029_v13, 2 }
 0x6b8   : > { %v3120_v26 = vadd.f32 %v11208_v63, %v3119_v38  ;;  %v6023_v33 = vrot.slane %v6022_v14, 2  ;;  %v6037_v23 = vrot.slane %v6036_v60, 2 }
 0x6b9   : > { %v7603_v8 = vpop.f32.mrf.mxu1 }
 0x6ba   : > { %v3141_v51 = vadd.f32 %v11208_v63, %v7603_v8 }
 0x6bb   : > { %v3132_v55 = vpop.f32.mrf.mxu1 }
 0x6bc   : > { %v5556_v12 = vpop.permute.xlu0 %5555  ;;  %v3133_v15 = vadd.f32 %v11208_v63, %v3132_v55 }
 0x6bd   : > { %v5665_v42 = vmul.f32 %v5556_v12, %v3101_v28  ;;  %v7604_v30 = vpop.f32.mrf.mxu1 }
 0x6bf   : > { %v6041_v49 = vsel %vm1360_vm3, %v5665_v42, 0.0  ;;  %v3135_v10 = vpop.f32.mrf.mxu1 }
 0x6c0   : > { %v6042_v54 = vrot.slane %v6041_v49, 4  ;;  %v3136_v8 = vadd.f32 %v11208_v63, %v3135_v10 }
 0x6c2   : > { %v5561_v16 = vpop.permute.xlu0 %5560  ;;  %v6043_v52 = vadd.f32 %v6042_v54, %v6041_v49 }
 0x6c3   : > { %v5666_v37 = vmul.f32 %v5561_v16, %v3104_v35 }
 0x6c4   : > { %v6044_v55 = vrot.slane %v6043_v52, 2 }
 0x6c5   : > { %v6048_v1 = vsel %vm1360_vm3, %v5666_v37, 0.0 }
 0x6d0   : > { %v5586_v5 = vpop.permute.xlu1 %5585 }
 0x6d1   : > { %v5576_v9 = vpop.permute.xlu0 %5575  ;;  %v5671_v24 = vmul.f32 %v5586_v5, %v3125_v50  ;;  %v11234_v5 = vadd.f32 %v11208_v63, %v7604_v30  ;;  %v6045_v30 = vadd.f32 %v6044_v55, %v6043_v52 }
 0x6d2   : > { %v5669_v39 = vmul.f32 %v5576_v9, %v3117_v7 }
 0x6d3   : > { %v6083_v53 = vsel %vm1360_vm3, %v5671_v24, 0.0  ;;  %v6024_v24 = vadd.f32 %v6023_v33, %v6022_v14  ;;  %v6046_v10 = vrot.slane %v6045_v30, 1 }
 0x6d4   : > { %v6069_v4 = vsel %vm1360_vm3, %v5669_v39, 0.0  ;;  %v6084_v59 = vrot.slane %v6083_v53, 4 }
 0x6d5   : > { %v5591_v29 = vpop.permute.xlu1 %5590  ;;  %v6070_v11 = vrot.slane %v6069_v4, 4 }
 0x6d6   : > { %v5672_v47 = vmul.f32 %v5591_v29, %v3128_v36  ;;  %v6016_v29 = vrot.slane %v6015_v61, 2  ;;  %v6085_v20 = vadd.f32 %v6084_v59, %v6083_v53 }
 0x6d7   : > { %v5566_v48 = vpop.permute.xlu0 %5565  ;;  %v6071_v12 = vadd.f32 %v6070_v11, %v6069_v4 }
 0x6d8   : > { %v6090_v3 = vsel %vm1360_vm3, %v5672_v47, 0.0  ;;  %v5667_v21 = vmul.f32 %v5566_v48, %v3109_v41  ;;  %v6017_v50 = vadd.f32 %v6016_v29, %v6015_v61  ;;  %v6038_v61 = vadd.f32 %v6037_v23, %v6036_v60 }
 0x6d9   : > { %v6091_v16 = vrot.slane %v6090_v3, 4  ;;  %v6072_v32 = vrot.slane %v6071_v12, 2 }
 0x6da   : > { %v5581_v44 = vpop.permute.xlu1 %5580  ;;  %v6055_v25 = vsel %vm1360_vm3, %v5667_v21, 0.0  ;;  %v6039_v29 = vrot.slane %v6038_v61, 1 }
 0x6db   : > { %v5670_v31 = vmul.f32 %v5581_v44, %v3120_v26  ;;  %v6031_v26 = vadd.f32 %v6030_v22, %v6029_v13  ;;  %v6092_v18 = vadd.f32 %v6091_v16, %v6090_v3  ;;  %v6056_v48 = vrot.slane %v6055_v25, 4 }
 0x6dc   : > { %v5571_v0 = vpop.permute.xlu0 %5570  ;;  %v6073_v19 = vadd.f32 %v6072_v32, %v6071_v12  ;;  %v6025_v22 = vrot.slane %v6024_v24, 1 }
 0x6dd   : > { %v6076_v56 = vsel %vm1360_vm3, %v5670_v31, 0.0  ;;  %v5668_v45 = vmul.f32 %v5571_v0, %v3112_v34  ;;  %v6049_v31 = vrot.slane %v6048_v1, 4  ;;  %v6032_v36 = vrot.slane %v6031_v26, 1 }
 0x6de   : > { %v6077_v27 = vrot.slane %v6076_v56, 4  ;;  %v6093_v41 = vrot.slane %v6092_v18, 2  ;;  %v6057_v34 = vadd.f32 %v6056_v48, %v6055_v25  ;;  %v6074_v37 = vrot.slane %v6073_v19, 1 }
 0x6df   : > { %v6062_v7 = vsel %vm1360_vm3, %v5668_v45, 0.0  ;;  %v6050_v4 = vadd.f32 %v6049_v31, %v6048_v1 }
 0x6e0   : > { %v6078_v43 = vadd.f32 %v6077_v27, %v6076_v56  ;;  %v6063_v28 = vrot.slane %v6062_v7, 4  ;;  %v6018_v27 = vrot.slane %v6017_v50, 1  ;;  %v6094_v14 = vadd.f32 %v6093_v41, %v6092_v18 }
 0x6e1   : > { %v6051_v58 = vrot.slane %v6050_v4, 2  ;;  %v6058_v3 = vrot.slane %v6057_v34, 2  ;;  %v6075_v16 = vadd.f32 %v6074_v37, %v6073_v19 }
 0x6e2   : > { %v6079_v9 = vrot.slane %v6078_v43, 2 }
 0x6e3   : > { %v6052_v1 = vadd.f32 %v6051_v58, %v6050_v4  ;;  %v6059_v54 = vadd.f32 %v6058_v3, %v6057_v34  ;;  %v6195_v48 = vpack.c.bf16 %v6075_v16, %v6075_v16 }
 0x6e4   : > { %v6080_v56 = vadd.f32 %v6079_v9, %v6078_v43 }
 0x6e5   : > { %v6053_v18 = vrot.slane %v6052_v1, 1 }
 0x6e6   : > { %v5606_v17 = vpop.permute.xlu1 %5605  ;;  %v6081_v42 = vrot.slane %v6080_v56, 1 }
 0x6e7   : > { %v5675_v6 = vmul.f32 %v5606_v17, %v3141_v51  ;;  %v6086_v17 = vrot.slane %v6085_v20, 2  ;;  %v6064_v51 = vadd.f32 %v6063_v28, %v6062_v7  ;;  %v6054_v19 = vadd.f32 %v6053_v18, %v6052_v1 }
 0x6e8   : > { %v6082_v49 = vadd.f32 %v6081_v42, %v6080_v56 }
 0x6e9   : > { %v6111_v39 = vsel %vm1360_vm3, %v5675_v6, 0.0  ;;  %v6087_v53 = vadd.f32 %v6086_v17, %v6085_v20  ;;  %v6065_v59 = vrot.slane %v6064_v51, 2  ;;  %v6026_v6 = vadd.f32 %v6025_v22, %v6024_v24 }
 0x6ea   : > { %v6112_v13 = vrot.slane %v6111_v39, 4  ;;  %v6192_v58 = vpack.c.bf16 %v6054_v19, %v6054_v19 }
 0x6eb   : > { %v6066_v33 = vadd.f32 %v6065_v59, %v6064_v51 }
 0x6ec   : > { %v5596_v46 = vpop.permute.xlu1 %5595  ;;  %v6113_v11 = vadd.f32 %v6112_v13, %v6111_v39  ;;  %v6188_v39 = vpack.c.bf16 %v6026_v6, %v6026_v6 }
 0x6ed   : > { %v5673_v57 = vmul.f32 %v5596_v46, %v3133_v15  ;;  %v11243_v15 = vadd.f32 %v6032_v36, %v6031_v26  ;;  %v6019_v46 = vadd.f32 %v6018_v27, %v6017_v50  ;;  %v6196_v26 = vpack.c.bf16 %v6082_v49, %v6082_v49 }
 0x6ee   : > { %v6114_v40 = vrot.slane %v6113_v11, 2  ;;  %v6040_v50 = vadd.f32 %v6039_v29, %v6038_v61  ;;  %v6067_v36 = vrot.slane %v6066_v33, 1  ;;  %v6321_v4 = vunpack.c.l.b16 %v6188_v39 }
 0x6ef   : > { %v6097_v38 = vsel %vm1360_vm3, %v5673_v57, 0.0  ;;  %v6189_v45 = vpack.c.bf16 %v11243_v15, %v11243_v15  ;;  %v6088_v57 = vrot.slane %v6087_v53, 1  ;;  %v6329_v28 = vunpack.c.l.b16 %v6196_v26  ;;  %v6125_v26 = vld [vmem:[%s11270_s8] sm:$0xff] }
 0x6f0   : > { %v6098_v44 = vrot.slane %v6097_v38, 4  ;;  %v6115_v60 = vadd.f32 %v6114_v40, %v6113_v11  ;;  %v6190_v41 = vpack.c.bf16 %v6040_v50, %v6040_v50  ;;  %v6068_v51 = vadd.f32 %v6067_v36, %v6066_v33  ;;  %v6126_v33 = vld [vmem:[%s11270_s8 + $0x8] sm:$0xff]  ;;  %v6131_v36 = vld [vmem:[%s11270_s8 + $0x30] sm:$0xff] }
 0x6f1   : > { %v6089_v7 = vadd.f32 %v6088_v57, %v6087_v53  ;;  %v6322_v22 = vunpack.c.l.b16 %v6189_v45  ;;  %v6325_v45 = vunpack.c.l.b16 %v6192_v58  ;;  %v6133_v50 = vpack.c.bf16 %v6126_v33, %v6125_v26 }
 0x6f2   : > { %v6099_v62 = vadd.f32 %v6098_v44, %v6097_v38  ;;  %v6095_v38 = vrot.slane %v6094_v14, 1  ;;  %v6187_v44 = vpack.c.bf16 %v6019_v46, %v6019_v46 }
 0x6f3   : > { %v6197_v23 = vpack.c.bf16 %v6089_v7, %v6089_v7 }
 0x6f4   : > { %v6100_v35 = vrot.slane %v6099_v62, 2  ;;  %v6320_v13 = vunpack.c.l.b16 %v6187_v44 }
 0x6f5   : > { %v5601_v2 = vpop.permute.xlu1 %5600  ;;  %v6330_v11 = vunpack.c.l.b16 %v6197_v23  ;;  %v7751_v23 = vld [vmem:[%s11341_s2 + $0x108] sm:$0xff]  }
 0x6f6   : > { %v5674_v47 = vmul.f32 %v5601_v2, %v3136_v8  ;;  %v6101_v21 = vadd.f32 %v6100_v35, %v6099_v62  ;;  %v6096_v62 = vadd.f32 %v6095_v38, %v6094_v14  ;;  %v6060_v8 = vrot.slane %v6059_v54, 1 }
 0x6f7   : > { %v6047_v2 = vadd.f32 %v6046_v10, %v6045_v30  ;;  %v6385_v61 = vsel %vm6336_vm6, %v6321_v4, %v6320_v13  ;;  %v6323_v14 = vunpack.c.l.b16 %v6190_v41  ;;  %v6194_v30 = vpack.c.bf16 %v6068_v51, %v6068_v51  ;;  %v7749_v13 = vld [vmem:[%s11341_s2 + $0xe8] sm:$0xff]  }
 0x6f8   : > { %v6104_v63 = vsel %vm1360_vm3, %v5674_v47, 0.0  ;;  %v6102_v25 = vrot.slane %v6101_v21, 1  ;;  %v6328_v47 = vunpack.c.l.b16 %v6195_v48  ;;  %v6198_v34 = vpack.c.bf16 %v6096_v62, %v6096_v62  ;;  %v6127_v48 = vld [vmem:[%s11270_s8 + $0x10] sm:$0xff]  ;;  %v6128_v62 = vld [vmem:[%s11270_s8 + $0x18] sm:$0xff]  ;;  %7695 = vmatprep.subr.bf16.mxu1 %v7749_v13 }
 0x6f9   : > { %v6105_v0 = vrot.slane %v6104_v63, 4  ;;  %v6061_v35 = vadd.f32 %v6060_v8, %v6059_v54  ;;  %v6191_v53 = vpack.c.bf16 %v6047_v2, %v6047_v2  ;;  %v6386_v57 = vsel %vm6338_vm7, %v6322_v22, %v6385_v61  ;;  %v6129_v8 = vld [vmem:[%s11270_s8 + $0x20] sm:$0xff] }
 0x6fa   : > { %v6103_v52 = vadd.f32 %v6102_v25, %v6101_v21  ;;  %v6392_v42 = vsel %vm6336_vm6, %v6329_v28, %v6328_v47  ;;  %v6331_v46 = vunpack.c.l.b16 %v6198_v34  ;;  %v6387_v38 = vsel %vm6340_vm8, %v6323_v14, %v6386_v57  ;;  %v7750_v2 = vld [vmem:[%s11341_s2 + $0xe0] sm:$0xff]  }
 0x6fb   : > { %v6106_v43 = vadd.f32 %v6105_v0, %v6104_v63  ;;  %v6193_v3 = vpack.c.bf16 %v6061_v35, %v6061_v35  ;;  %v6393_v21 = vsel %vm6338_vm7, %v6330_v11, %v6392_v42  ;;  %v6324_v40 = vunpack.c.l.b16 %v6191_v53  ;;  %v7112_v53 = vld [vmem:[%s11342_s3 + $0x7] ss:$0 sm:$0xff] }
 0x6fc   : > { %v6199_v55 = vpack.c.bf16 %v6103_v52, %v6103_v52  ;;  %v6394_v6 = vsel %vm6340_vm8, %v6331_v46, %v6393_v21  ;;  %v6327_v54 = vunpack.c.l.b16 %v6194_v30  ;;  %v6130_v52 = vld [vmem:[%s11270_s8 + $0x28] sm:$0xff] }
 0x6fd   : > { %v6107_v12 = vrot.slane %v6106_v43, 2  ;;  %v6326_v1 = vunpack.c.l.b16 %v6193_v3  ;;  %v6388_v44 = vsel %vm6342_vm9, %v6324_v40, %v6387_v38  ;;  %v6135_v28 = vpack.c.bf16 %v6130_v52, %v6129_v8 }
 0x6ff   : > { %v6108_v9 = vadd.f32 %v6107_v12, %v6106_v43  ;;  %v6332_v43 = vunpack.c.l.b16 %v6199_v55 }
 0x700   : > { %v5611_v20 = vpop.permute.xlu1 %5610 }
 0x701   : > { %v6109_v31 = vrot.slane %v6108_v9, 1  ;;  %v5676_v32 = vmul.f32 %v5611_v20, %v11234_v5  ;;  %v6116_v5 = vrot.slane %v6115_v60, 1  ;;  %v6395_v16 = vsel %vm6342_vm9, %v6332_v43, %v6394_v6 }
 0x702   : > { %v6389_v20 = vsel %vm6344_vm10, %v6325_v45, %v6388_v44 }
 0x703   : > { %v6118_v56 = vsel %vm1360_vm3, %v5676_v32, 0.0  ;;  %v6110_v24 = vadd.f32 %v6109_v31, %v6108_v9  ;;  %v6117_v0 = vadd.f32 %v6116_v5, %v6115_v60  ;;  %v6390_v60 = vsel %vm6346_vm11, %v6326_v1, %v6389_v20 }
 0x704   : > { %v6119_v17 = vrot.slane %v6118_v56, 4  ;;  %v6391_v32 = vsel %vm6348_vm12, %v6327_v54, %v6390_v60 }
 0x705   : > { %v6200_v63 = vpack.c.bf16 %v6110_v24, %v6110_v24  ;;  %v6201_v12 = vpack.c.bf16 %v6117_v0, %v6117_v0  ;;  %v6132_v24 = vld [vmem:[%s11270_s8 + $0x38] sm:$0xff] }
 0x706   : > { %v6120_v27 = vadd.f32 %v6119_v17, %v6118_v56  ;;  %v6134_v56 = vpack.c.bf16 %v6128_v62, %v6127_v48  ;;  %v6136_v17 = vpack.c.bf16 %v6132_v24, %v6131_v36 }
 0x707   : > { %v6333_v49 = vunpack.c.l.b16 %v6200_v63  ;;  %v6334_v10 = vunpack.c.l.b16 %v6201_v12 }
 0x708   : > { %v6121_v15 = vrot.slane %v6120_v27, 2 }
 0x709   : > { %v6396_v25 = vsel %vm6344_vm10, %v6333_v49, %v6395_v16 }
 0x70a   : > { %v6122_v37 = vadd.f32 %v6121_v15, %v6120_v27  ;;  %v6397_v31 = vsel %vm6346_vm11, %v6334_v10, %v6396_v25 }
 0x70c   : > { %v6123_v59 = vrot.slane %v6122_v37, 1 }
 0x70e   : > { %v6124_v29 = vadd.f32 %v6123_v59, %v6122_v37 }
 0x710   : > { %v6202_v9 = vpack.c.bf16 %v6124_v29, %v6124_v29 }
 0x712   : > { %v6335_v7 = vunpack.c.l.b16 %v6202_v9 }
 0x714   : > { %v6398_v39 = vsel %vm6348_vm12, %v6335_v7, %v6397_v31  ;;  %v7752_v7 = vld [vmem:[%s11341_s2 + $0x100] sm:$0xff]  }
 0x715   : > { %v6402_v18 = vpack.c.b16 %v6398_v39, %v6391_v32  ;;  %v7117_v32 = vld [vmem:[%s11342_s3 + $0x8] ss:$0 sm:$0xff] }
 0x717   : > { %7682 = vmatmul.mubr.msk.bf16.gmra.mxu1 %vm1360_vm3, %v6402_v18 }
 0x718   : > { %7687 = vmatprep.mubr.msk.bf16.mxu1 %vm6492_vm15, %v6133_v50 }
 0x71f   : > { %7688 = vmatmul.mubr.msk.bf16.vlgmr.msra.gmra.mxu1 %vm6492_vm15, %v6134_v56 }
 0x720   : > { %7691 = vmatprep.mubr.msk.bf16.mxu1 %vm6492_vm15, %v6135_v28  ;;  %7696 = vmatpush3.bf16.msra.mxu1 %v7749_v13 }
 0x721   : > { %7697 = vmatprep.subr.bf16.mxu1 %v7750_v2 }
 0x724   : > { %7698 = vmatpush3.bf16.msra.mxu1 %v7750_v2 }
 0x725   : > { %7707 = vmatprep.subr.bf16.mxu1 %v7751_v23 }
 0x727   : > { %7692 = vmatmul.mubr.msk.bf16.gmra.mxu1 %vm6492_vm15, %v6136_v17 }
 0x755   : > { %v7679_v5 = vpop.f32.mrf.mxu1 }
 0x757   : > { %v6461_v4 = vpop.f32.mrf.mxu1 }
 0x759   : > { %v7680_v19 = vpop.f32.mrf.mxu1 }
 0x75b   : > { %v6464_v47 = vpop.f32.mrf.mxu1 }
 0x7d7   : > { %v7683_v27 = vpop.f32.mrf.mxu1 }
 0x7d9   : > { %v6477_v41 = vpop.f32.mrf.mxu1 }
 0x7db   : > { %v7684_v34 = vpop.f32.mrf.mxu1 }
 0x7dd   : > { %v6480_v35 = vpop.f32.mrf.mxu1 }
 0x7df   : > { %v7689_v55 = vpop.f32.mrf.mxu1 }
 0x7e0   : > { %v6555_v63 = vadd.f32 %v7689_v55, %v7679_v5 }
 0x7e1   : > { %v6546_v42 = vpop.f32.mrf.mxu1 }
 0x7e2   : > { %v6547_v51 = vadd.f32 %v6546_v42, %v6461_v4  ;;  %v6584_v37 = vadd.f32 %v7112_v53, %v6555_v63  ;;  %v7128_v63 = vld [vmem:[%s11342_s3 + $0x9] ss:$0 sm:$0xff] }
 0x7e3   : > { %v7690_v15 = vpop.f32.mrf.mxu1 }
 0x7e4   : > { %v6558_v11 = vadd.f32 %v7690_v15, %v7680_v19  ;;  %v6582_v22 = vadd.f32 %v7112_v53, %v6547_v51  ;;  %v6592_v59 = vmax.f32 %v6584_v37, 0.0 }
 0x7e5   : > { %v6549_v0 = vpop.f32.mrf.mxu1 }
 0x7e6   : > { %v6585_v61 = vadd.f32 %v7112_v53, %v6558_v11  ;;  %v6550_v58 = vadd.f32 %v6549_v0, %v6464_v47  ;;  %v6590_v46 = vmax.f32 %v6582_v22, 0.0 }
 0x7e7   : > { %v7693_v14 = vpop.f32.mrf.mxu1 }
 0x7e8   : > { %v6583_v3 = vadd.f32 %v7112_v53, %v6550_v58  ;;  %v6593_v21 = vmax.f32 %v6585_v61, 0.0  ;;  %v6571_v57 = vadd.f32 %v7693_v14, %v7683_v27 }
 0x7e9   : > { %v6562_v43 = vpop.f32.mrf.mxu1 }
 0x7ea   : > { %v6591_v30 = vmax.f32 %v6583_v3, 0.0  ;;  %v6563_v49 = vadd.f32 %v6562_v43, %v6477_v41  ;;  %v6599_v6 = vpack.c.bf16 %v6593_v21, %v6592_v59  ;;  %v6588_v54 = vadd.f32 %v7112_v53, %v6571_v57 }
 0x7eb   : > { %v7694_v40 = vpop.f32.mrf.mxu1 }
 0x7ec   : > { %v6598_v12 = vpack.c.bf16 %v6591_v30, %v6590_v46  ;;  %v6574_v45 = vadd.f32 %v7694_v40, %v7684_v34  ;;  %v6586_v1 = vadd.f32 %v7112_v53, %v6563_v49  ;;  %v6596_v26 = vmax.f32 %v6588_v54, 0.0 }
 0x7ed   : > { %v6565_v29 = vpop.f32.mrf.mxu1 }
 0x7ee   : > { %v6589_v16 = vadd.f32 %v7112_v53, %v6574_v45  ;;  %v6566_v38 = vadd.f32 %v6565_v29, %v6480_v35  ;;  %7699 = vmatprep.mubr.msk.bf16.mxu1 %vm1360_vm3, %v6598_v12  ;;  %v6594_v44 = vmax.f32 %v6586_v1, 0.0 }
 0x7ef   : > { %7700 = vmatmul.mubr.msk.bf16.vlgmr.msra.gmra.mxu1 %vm1360_vm3, %v6599_v6 }
 0x7f0   : > { %v6587_v25 = vadd.f32 %v7112_v53, %v6566_v38  ;;  %7708 = vmatpush3.bf16.msra.mxu1 %v7751_v23  ;;  %v6597_v9 = vmax.f32 %v6589_v16, 0.0 }
 0x7f1   : > { %7709 = vmatprep.subr.bf16.mxu1 %v7752_v7 }
 0x7f2   : > { %v6595_v10 = vmax.f32 %v6587_v25, 0.0  ;;  %v6601_v20 = vpack.c.bf16 %v6597_v9, %v6596_v26 }
 0x7f4   : > { %v6600_v33 = vpack.c.bf16 %v6595_v10, %v6594_v44  ;;  %7710 = vmatpush3.bf16.msra.mxu1 %v7752_v7 }
 0x7f6   : > { %7703 = vmatprep.mubr.msk.bf16.mxu1 %vm1360_vm3, %v6600_v33 }
 0x7f7   : > { %7704 = vmatmul.mubr.msk.bf16.gmra.mxu1 %vm1360_vm3, %v6601_v20 }
 0x8af   : > { %v7701_v60 = vpop.f32.mrf.mxu1 }
 0x8b0   : > { %v6679_v48 = vadd.f32 %v7701_v60, %v7117_v32 }
 0x8b1   : > { %v6670_v31 = vpop.f32.mrf.mxu1 }
 0x8b2   : > { %v6671_v50 = vadd.f32 %v7117_v32, %v6670_v31  ;;  %v6703_v24 = vmax.f32 %v6679_v48, 0.0 }
 0x8b3   : > { %v7702_v39 = vpop.f32.mrf.mxu1 }
 0x8b4   : > { %v6682_v18 = vadd.f32 %v7702_v39, %v7117_v32  ;;  %v6701_v28 = vmax.f32 %v6671_v50, 0.0 }
 0x8b5   : > { %v6673_v62 = vpop.f32.mrf.mxu1 }
 0x8b6   : > { %v6674_v8 = vadd.f32 %v7117_v32, %v6673_v62  ;;  %v6704_v52 = vmax.f32 %v6682_v18, 0.0 }
 0x8b7   : > { %v7705_v56 = vpop.f32.mrf.mxu1 }
 0x8b8   : > { %v6702_v36 = vmax.f32 %v6674_v8, 0.0  ;;  %v6710_v2 = vpack.c.bf16 %v6704_v52, %v6703_v24  ;;  %v6695_v19 = vadd.f32 %v7705_v56, %v7117_v32 }
 0x8b9   : > { %v6686_v17 = vpop.f32.mrf.mxu1 }
 0x8ba   : > { %v6709_v13 = vpack.c.bf16 %v6702_v36, %v6701_v28  ;;  %v6687_v5 = vadd.f32 %v7117_v32, %v6686_v17  ;;  %v6707_v55 = vmax.f32 %v6695_v19, 0.0 }
 0x8bb   : > { %v7706_v23 = vpop.f32.mrf.mxu1 }
 0x8bc   : > { %v6698_v4 = vadd.f32 %v7706_v23, %v7117_v32  ;;  %7711 = vmatprep.mubr.msk.bf16.mxu1 %vm1360_vm3, %v6709_v13  ;;  %v6705_v34 = vmax.f32 %v6687_v5, 0.0 }
 0x8bd   : > { %v6689_v47 = vpop.f32.mrf.mxu1  ;;  %7712 = vmatmul.mubr.msk.bf16.vlgmr.msra.gmra.mxu1 %vm1360_vm3, %v6710_v2 }
 0x8be   : > { %v6690_v27 = vadd.f32 %v7117_v32, %v6689_v47  ;;  %v6708_v41 = vmax.f32 %v6698_v4, 0.0 }
 0x8c0   : > { %v6706_v35 = vmax.f32 %v6690_v27, 0.0  ;;  %v6712_v51 = vpack.c.bf16 %v6708_v41, %v6707_v55 }
 0x8c2   : > { %v6711_v42 = vpack.c.bf16 %v6706_v35, %v6705_v34 }
 0x8c4   : > { %7715 = vmatprep.mubr.msk.bf16.mxu1 %vm1360_vm3, %v6711_v42 }
 0x8c5   : > { %7716 = vmatmul.mubr.msk.bf16.gmra.mxu1 %vm1360_vm3, %v6712_v51 }
 0x97d   : > { %v7713_v15 = vpop.f32.mrf.mxu1 }
 0x97e   : > { %v6790_v53 = vadd.f32 %v7713_v15, %v7128_v63 }
 0x97f   : > { %v6781_v11 = vpop.f32.mrf.mxu1 }
 0x980   : > { %6814 = vst.msk [vmem:[%s221_s27 + $0x10] sm:$0xff] %vm6492_vm15, %v6790_v53  ;;  %v6782_v0 = vadd.f32 %v7128_v63, %v6781_v11 }
 0x981   : > { %v7714_v22 = vpop.f32.mrf.mxu1 }
 0x982   : > { %6812 = vst.msk [vmem:[%s221_s27] sm:$0xff] %vm6492_vm15, %v6782_v0  ;;  %v6793_v61 = vadd.f32 %v7714_v22, %v7128_v63 }
 0x983   : > { %v6784_v58 = vpop.f32.mrf.mxu1 }
 0x984   : > { %6815 = vst.msk [vmem:[%s221_s27 + $0x18] sm:$0xff] %vm6492_vm15, %v6793_v61  ;;  %v6785_v37 = vadd.f32 %v7128_v63, %v6784_v58 }
 0x985   : > { %v7717_v14 = vpop.f32.mrf.mxu1 }
 0x986   : > { %6813 = vst.msk [vmem:[%s221_s27 + $0x8] sm:$0xff] %vm6492_vm15, %v6785_v37  ;;  %v6806_v3 = vadd.f32 %v7717_v14, %v7128_v63 }
 0x987   : > { %v6797_v21 = vpop.f32.mrf.mxu1 }
 0x988   : > { %6818 = vst.msk [vmem:[%s221_s27 + $0x30] sm:$0xff] %vm6492_vm15, %v6806_v3  ;;  %v6798_v43 = vadd.f32 %v7128_v63, %v6797_v21 }
 0x989   : > { %v7718_v46 = vpop.f32.mrf.mxu1 }
 0x98a   : > { %6816 = vst.msk [vmem:[%s221_s27 + $0x20] sm:$0xff] %vm6492_vm15, %v6798_v43  ;;  %v6809_v30 = vadd.f32 %v7718_v46, %v7128_v63 }
 0x98b   : > { %v6800_v49 = vpop.f32.mrf.mxu1 }
 0x98c   : > { %6819 = vst.msk [vmem:[%s221_s27 + $0x38] sm:$0xff] %vm6492_vm15, %v6809_v30  ;;  %v6801_v59 = vadd.f32 %v7128_v63, %v6800_v49 }
 0x98e   : > { %6817 = vst.msk [vmem:[%s221_s27 + $0x28] sm:$0xff] %vm6492_vm15, %v6801_v59 }
 0x98f PF: > { %s14_s15 = sadd.s32 1, %s8022_s15  }
 0x990   : > { %p11_p5 = scmp.ge.s32.totalorder %s14_s15, 4  }
 0x992   :  { %13 = sbr.rel (!%p11_p5) target bundleno = 1 (0x1), region = 77 }

</bundles_post_ra>
